<compile_context>
chip_gen: v5e
topology: v5e:2x2
jax: 0.10.0
libtpu: 0.0.40
codegen_flags: <defaults>
</compile_context>

<pallas_src>
import jax
import jax.numpy as jnp
from jax.experimental import pallas as pl
from jax.experimental.pallas import tpu as pltpu

MODES1 = 4
MODES2 = 4
WIDTH = 32
# NOTE: the original module hardcodes fc1: width->40000 and fc2: 40000->1000.
# Shrunk here to keep this self-contained test small; structure is identical.
FC1_OUT = 256
FC2_OUT = 128


# ---------------------------------------------------------------------------
# In-kernel exact-form GELU (torch default = erf form).
# erf via Abramowitz & Stegun 7.1.26 (|err| <= ~1.5e-7).  The divide is routed
# to the EUP via pl.reciprocal(approx=True) so the VALU slots stay free for the
# polynomial — the pointwise layers are VALU-bound at width=32 otherwise.
# ---------------------------------------------------------------------------
def _erf(x):
    a1, a2, a3 = 0.254829592, -0.284496736, 1.421413741
    a4, a5, p = -1.453152027, 1.061405429, 0.3275911
    s = jnp.where(x < 0.0, -1.0, 1.0)
    ax = jnp.abs(x)
    t = pl.reciprocal(1.0 + p * ax, approx=True)
    poly = ((((a5 * t + a4) * t + a3) * t + a2) * t + a1) * t
    return s * (1.0 - poly * jnp.exp(-ax * ax))


def _gelu(x):
    return 0.5 * x * (1.0 + _erf(x * 0.7071067811865476))


def _pick_tile_m(n):
    # Biggest row tile that still gives >= 2 grid steps (keeps both v7x TCs
    # busy; a no-op on v5e/v6e).  Large tiles amortize the ~0.35us/step grid
    # overhead and the masked stores of the 32-lane-wide outputs.
    for t in (512, 256, 128, 64, 32, 16, 8):
        if n % t == 0 and n // t >= 2:
            return t
    return n


# ---------------------------------------------------------------------------
# Kernel 1: fc0 (Linear 2 -> width).  K=2 would waste 126/128 of the MXU
# contraction depth, so compute it on the VPU as two broadcast multiplies.
# ---------------------------------------------------------------------------
def _fc0_kernel(x_ref, w_ref, b_ref, o_ref):
    x = x_ref[...]                       # (tile_m, K)  with K == 2
    w = w_ref[...]                       # (K, C)
    y = b_ref[...] + x[:, 0:1] * w[0:1, :]
    for j in range(1, x_ref.shape[1]):   # unrolled, K is tiny & static
        y = y + x[:, j:j + 1] * w[j:j + 1, :]
    o_ref[...] = y.astype(o_ref.dtype)


def fc0_pallas(x, w, b, *, tile_m):
    n, k = x.shape
    _, c = w.shape
    assert n % tile_m == 0  # TODO(synk): cdiv grid + row masking for general N
    return pl.pallas_call(
        _fc0_kernel,
        out_shape=jax.ShapeDtypeStruct((n, c), x.dtype),
        grid_spec=pltpu.PrefetchScalarGridSpec(
            num_scalar_prefetch=0,
            grid=(n // tile_m,),
            in_specs=[
                pl.BlockSpec((tile_m, k), lambda i: (i, 0)),
                pl.BlockSpec((k, c), lambda i: (0, 0)),
                pl.BlockSpec((1, c), lambda i: (0, 0)),
            ],
            out_specs=pl.BlockSpec((tile_m, c), lambda i: (i, 0)),
        ),
        compiler_params=pltpu.CompilerParams(dimension_semantics=("parallel",)),
    )(x, w, b.reshape(1, c))


# ---------------------------------------------------------------------------
# Kernel 2: one Fourier-layer pointwise path:
#   out = gelu( spectral_branch + x @ W_1x1 + b )
# (the 1x1 Conv2d over channels is exactly a per-pixel matmul in NHWC)
# ---------------------------------------------------------------------------
def _fourier_layer_kernel(x_ref, spec_ref, w_ref, b_ref, o_ref):
    y = jnp.dot(x_ref[...], w_ref[...], preferred_element_type=jnp.float32)
    y = y + b_ref[...] + spec_ref[...]
    o_ref[...] = _gelu(y).astype(o_ref.dtype)


def fourier_layer_pallas(x, spec, w, b, *, tile_m):
    n, c = x.shape
    assert spec.shape == (n, c) and w.shape == (c, c) and n % tile_m == 0
    return pl.pallas_call(
        _fourier_layer_kernel,
        out_shape=jax.ShapeDtypeStruct((n, c), x.dtype),
        grid_spec=pltpu.PrefetchScalarGridSpec(
            num_scalar_prefetch=0,
            grid=(n // tile_m,),
            in_specs=[
                pl.BlockSpec((tile_m, c), lambda i: (i, 0)),
                pl.BlockSpec((tile_m, c), lambda i: (i, 0)),
                pl.BlockSpec((c, c), lambda i: (0, 0)),
                pl.BlockSpec((1, c), lambda i: (0, 0)),
            ],
            out_specs=pl.BlockSpec((tile_m, c), lambda i: (i, 0)),
        ),
        compiler_params=pltpu.CompilerParams(dimension_semantics=("parallel",)),
    )(x, spec, w, b.reshape(1, c))


# ---------------------------------------------------------------------------
# Kernel 3: complex per-mode channel mixing of SpectralConv2d.
# All P = 2*modes1*modes2 modes are processed in a single pallas_call with
# grid=(2,) (16 modes per step; both halves fit VMEM trivially), removing the
# previous 32-step grid and its per-mode 4KB DMAs.  The complex product uses
# the 3-matmul Karatsuba-style form (wr+wi precomputed in the wrapper):
#   t1 = ar@wr, t2 = ai@wi, t3 = (ar+ai)@(wr+wi)
#   out_r = t1 - t2 ; out_i = t3 - t1 - t2
# ---------------------------------------------------------------------------
def _complex_mix_kernel(ar_ref, ai_ref, wr_ref, wi_ref, wri_ref,
                        or_ref, oi_ref):
    for m in range(ar_ref.shape[0]):     # unrolled over modes within the block
        ar = ar_ref[m]                   # (B, Cin)
        ai = ai_ref[m]
        t1 = jnp.dot(ar, wr_ref[m], preferred_element_type=jnp.float32)
        t2 = jnp.dot(ai, wi_ref[m], preferred_element_type=jnp.float32)
        t3 = jnp.dot(ar + ai, wri_ref[m], preferred_element_type=jnp.float32)
        or_ref[m] = (t1 - t2).astype(or_ref.dtype)
        oi_ref[m] = (t3 - t1 - t2).astype(oi_ref.dtype)


def complex_mix_pallas(ar, ai, wr, wi, wri, *, grid_steps=2):
    p, b, cin = ar.shape
    _, _, cout = wr.shape
    assert p % grid_steps == 0
    bp = p // grid_steps
    a_spec = pl.BlockSpec((bp, b, cin), lambda i: (i, 0, 0))
    w_spec = pl.BlockSpec((bp, cin, cout), lambda i: (i, 0, 0))
    o_spec = pl.BlockSpec((bp, b, cout), lambda i: (i, 0, 0))
    return pl.pallas_call(
        _complex_mix_kernel,
        out_shape=(jax.ShapeDtypeStruct((p, b, cout), ar.dtype),
                   jax.ShapeDtypeStruct((p, b, cout), ar.dtype)),
        grid_spec=pltpu.PrefetchScalarGridSpec(
            num_scalar_prefetch=0,
            grid=(grid_steps,),
            in_specs=[a_spec, a_spec, w_spec, w_spec, w_spec],
            out_specs=(o_spec, o_spec),
        ),
        compiler_params=pltpu.CompilerParams(dimension_semantics=("parallel",)),
    )(ar, ai, wr, wi, wri)


# ---------------------------------------------------------------------------
# Kernel 4: fused head  fc1 + GELU + fc2.  The (tile_m, FC1_OUT) intermediate
# lives in a VMEM scratch, never touching HBM.
# TODO(synk): at the real module sizes (fc1: width->40000, fc2: 40000->1000)
# the untiled weights do not fit VMEM (esp. v7x's 64 MiB); that regime needs an
# N/K-tiled grid with an f32 accumulator instead of this fused form.
# ---------------------------------------------------------------------------
def _head_kernel(x_ref, w1_ref, b1_ref, w2_ref, b2_ref, o_ref, h_ref):
    h = jnp.dot(x_ref[...], w1_ref[...], preferred_element_type=jnp.float32)
    h_ref[...] = _gelu(h + b1_ref[...])
    y = jnp.dot(h_ref[...], w2_ref[...], preferred_element_type=jnp.float32)
    o_ref[...] = (y + b2_ref[...]).astype(o_ref.dtype)


def head_pallas(x, w1, b1, w2, b2, *, tile_m):
    n, c = x.shape
    c1 = w1.shape[1]
    c2 = w2.shape[1]
    assert w1.shape[0] == c and w2.shape[0] == c1 and n % tile_m == 0
    return pl.pallas_call(
        _head_kernel,
        out_shape=jax.ShapeDtypeStruct((n, c2), x.dtype),
        grid_spec=pltpu.PrefetchScalarGridSpec(
            num_scalar_prefetch=0,
            grid=(n // tile_m,),
            in_specs=[
                pl.BlockSpec((tile_m, c), lambda i: (i, 0)),
                pl.BlockSpec((c, c1), lambda i: (0, 0)),
                pl.BlockSpec((1, c1), lambda i: (0, 0)),
                pl.BlockSpec((c1, c2), lambda i: (0, 0)),
                pl.BlockSpec((1, c2), lambda i: (0, 0)),
            ],
            out_specs=pl.BlockSpec((tile_m, c2), lambda i: (i, 0)),
            scratch_shapes=[pltpu.VMEM((tile_m, c1), jnp.float32)],
        ),
        compiler_params=pltpu.CompilerParams(dimension_semantics=("parallel",)),
    )(x, w1, b1.reshape(1, c1), w2, b2.reshape(1, c2))


# ---------------------------------------------------------------------------
# SpectralConv2d_fast forward, NHWC throughout (FFT over axes (1,2) matches
# torch.fft.rfft2 over (H,W) exactly; no full-tensor transposes needed).
# ---------------------------------------------------------------------------
def spectral_conv2d_nhwc(v_nhwc, w1, w2, modes1, modes2):
    b, h, w, c = v_nhwc.shape
    x_ft = jnp.fft.rfft2(v_nhwc, axes=(1, 2))        # (B, H, W//2+1, C) c64

    a1 = x_ft[:, :modes1, :modes2, :]                 # low modes
    a2 = x_ft[:, -modes1:, :modes2, :]                # high (negative) modes

    def a_to_pbc(a):   # (B, m1, m2, C) -> (m1*m2, B, C)   (tiny arrays)
        return jnp.transpose(a, (1, 2, 0, 3)).reshape(modes1 * modes2, b, c)

    def w_to_pio(wt):  # (Cin, Cout, m1, m2) -> (m1*m2, Cin, Cout)
        return jnp.transpose(wt, (2, 3, 0, 1)).reshape(modes1 * modes2, c, c)

    ar = jnp.concatenate([a_to_pbc(a1.real), a_to_pbc(a2.real)], axis=0)
    ai = jnp.concatenate([a_to_pbc(a1.imag), a_to_pbc(a2.imag)], axis=0)
    # weights stored as trailing-dim (real, imag), matching torch.view_as_real
    wr = jnp.concatenate([w_to_pio(w1[..., 0]), w_to_pio(w2[..., 0])], axis=0)
    wi = jnp.concatenate([w_to_pio(w1[..., 1]), w_to_pio(w2[..., 1])], axis=0)
    wri = wr + wi                                     # for 3-matmul product

    out_r, out_i = complex_mix_pallas(ar, ai, wr, wi, wri)

    def from_pbc(o):   # (m1*m2, B, C) -> (B, m1, m2, C)
        return jnp.transpose(o.reshape(modes1, modes2, b, c), (2, 0, 1, 3))

    pm = modes1 * modes2
    o1 = from_pbc(out_r[:pm]) + 1j * from_pbc(out_i[:pm])
    o2 = from_pbc(out_r[pm:]) + 1j * from_pbc(out_i[pm:])

    out_ft = jnp.zeros((b, h, w // 2 + 1, c), dtype=jnp.complex64)
    out_ft = out_ft.at[:, :modes1, :modes2, :].set(o1)
    out_ft = out_ft.at[:, -modes1:, :modes2, :].set(o2)
    return jnp.fft.irfft2(out_ft, s=(h, w), axes=(1, 2))   # (B, H, W, C) f32


# ---------------------------------------------------------------------------
# FNO2d forward.
# ---------------------------------------------------------------------------
def fno2d_forward(x, params):
    b, h, w_sz, two = x.shape
    c = params["fc0_w"].shape[1]
    n = b * h * w_sz
    tile_m = _pick_tile_m(n)

    # fc0 (Linear 2 -> width), applied on the channel dim (VPU Pallas kernel).
    v = fc0_pallas(x.reshape(n, two), params["fc0_w"], params["fc0_b"],
                   tile_m=tile_m)

    # four Fourier layers: spectral conv + 1x1 conv + bias + GELU (fused).
    for i in range(4):
        spec = spectral_conv2d_nhwc(v.reshape(b, h, w_sz, c),
                                    params[f"conv{i}_w1"],
                                    params[f"conv{i}_w2"],
                                    MODES1, MODES2)
        v = fourier_layer_pallas(v, spec.reshape(n, c),
                                 params[f"w{i}_w"], params[f"w{i}_b"],
                                 tile_m=tile_m)

    # fc1 + GELU + fc2 fused in one kernel (bn*/fc01 are unused in forward).
    out = head_pallas(v, params["fc1_w"], params["fc1_b"],
                      params["fc2_w"], params["fc2_b"], tile_m=tile_m)
    return out.reshape(b, h, w_sz, -1)


# ---------------------------------------------------------------------------
# Deterministic parameter init (shapes mirror the PyTorch __init__; linear /
# 1x1-conv weights are stored pre-transposed as (in, out) for x @ W).
# ---------------------------------------------------------------------------
def init_params(key):
    keys = iter(jax.random.split(key, 40))
    c = WIDTH

    def uni(shape, scale):
        return scale * jax.random.uniform(next(keys), shape, dtype=jnp.float32)

    def nrm(shape, scale):
        return scale * jax.random.normal(next(keys), shape, dtype=jnp.float32)

    p = {}
    p["fc0_w"] = nrm((2, c), 0.5)
    p["fc0_b"] = nrm((c,), 0.1)
    spec_scale = 1.0 / (c * c)
    for i in range(4):
        p[f"conv{i}_w1"] = uni((c, c, MODES1, MODES2, 2), spec_scale)
        p[f"conv{i}_w2"] = uni((c, c, MODES1, MODES2, 2), spec_scale)
        p[f"w{i}_w"] = nrm((c, c), 1.0 / (c ** 0.5))        # 1x1 conv, (Cin, Cout)
        p[f"w{i}_b"] = nrm((c,), 0.1)
    p["fc1_w"] = nrm((c, FC1_OUT), 1.0 / (c ** 0.5))
    p["fc1_b"] = nrm((FC1_OUT,), 0.1)
    p["fc2_w"] = nrm((FC1_OUT, FC2_OUT), 1.0 / (FC1_OUT ** 0.5))
    p["fc2_b"] = nrm((FC2_OUT,), 0.1)
    return p


if __name__ == "__main__":
    key = jax.random.PRNGKey(0)
    pkey, xkey = jax.random.split(key)
    params = init_params(pkey)
    x = jax.random.normal(xkey, (2, 16, 16, 2), dtype=jnp.float32)

    out = jax.jit(fno2d_forward)(x, params)
    out = jax.block_until_ready(out)
    assert out.shape == (2, 16, 16, FC2_OUT), out.shape
    assert out.dtype == jnp.float32
    print("KERNEL_OK")
</pallas_src>

<mosaic_0001>
module attributes {stable_mosaic.version = 11 : i64} {
  func.func @_fc0_kernel(%arg0: i32, %arg1: memref<256x2xf32, #tpu.memory_space<vmem>>, %arg2: memref<2x32xf32, #tpu.memory_space<vmem>>, %arg3: memref<1x32xf32, #tpu.memory_space<vmem>>, %arg4: memref<256x32xf32, #tpu.memory_space<vmem>>) attributes {dimension_semantics = [#tpu.dimension_semantics<parallel>], iteration_bounds = array<i64: 2>, scalar_prefetch = 0 : i64, scratch_operands = 0 : i64, tpu.core_type = #tpu.core_type<tc>, window_params = [{transform_indices = @transform_0, window_bounds = array<i64: 256, 2>}, {pipeline_mode = #tpu.pipeline_mode<synchronous>, transform_indices = @transform_1, window_bounds = array<i64: 2, 32>}, {pipeline_mode = #tpu.pipeline_mode<synchronous>, transform_indices = @transform_2, window_bounds = array<i64: 1, 32>}, {transform_indices = @transform_3, window_bounds = array<i64: 256, 32>}]} {
    %c0 = arith.constant 0 : index
    %c0_0 = arith.constant 0 : index
    %0 = vector.load %arg1[%c0, %c0_0] : memref<256x2xf32, #tpu.memory_space<vmem>>, vector<256x2xf32>
    %c0_1 = arith.constant 0 : index
    %c0_2 = arith.constant 0 : index
    %1 = vector.load %arg2[%c0_1, %c0_2] : memref<2x32xf32, #tpu.memory_space<vmem>>, vector<2x32xf32>
    %c0_3 = arith.constant 0 : index
    %c0_4 = arith.constant 0 : index
    %2 = vector.load %arg3[%c0_3, %c0_4] : memref<1x32xf32, #tpu.memory_space<vmem>>, vector<1x32xf32>
    %3 = vector.extract_strided_slice %0 {offsets = [0, 0], sizes = [256, 1], strides = [1, 1]} : vector<256x2xf32> to vector<256x1xf32>
    %4 = vector.extract_strided_slice %1 {offsets = [0, 0], sizes = [1, 32], strides = [1, 1]} : vector<2x32xf32> to vector<1x32xf32>
    %5 = vector.broadcast %3 : vector<256x1xf32> to vector<256x32xf32>
    %6 = vector.broadcast %4 : vector<1x32xf32> to vector<256x32xf32>
    %7 = arith.mulf %5, %6 : vector<256x32xf32>
    %8 = vector.broadcast %2 : vector<1x32xf32> to vector<256x32xf32>
    %9 = arith.addf %8, %7 : vector<256x32xf32>
    %10 = vector.extract_strided_slice %0 {offsets = [0, 1], sizes = [256, 1], strides = [1, 1]} : vector<256x2xf32> to vector<256x1xf32>
    %11 = vector.extract_strided_slice %1 {offsets = [1, 0], sizes = [1, 32], strides = [1, 1]} : vector<2x32xf32> to vector<1x32xf32>
    %12 = vector.broadcast %10 : vector<256x1xf32> to vector<256x32xf32>
    %13 = vector.broadcast %11 : vector<1x32xf32> to vector<256x32xf32>
    %14 = arith.mulf %12, %13 : vector<256x32xf32>
    %15 = arith.addf %9, %14 : vector<256x32xf32>
    %c0_5 = arith.constant 0 : index
    %c0_6 = arith.constant 0 : index
    %16 = vector.load %arg4[%c0_5, %c0_6] : memref<256x32xf32, #tpu.memory_space<vmem>>, vector<256x32xf32>
    tpu.vector_store %arg4[%c0_5, %c0_6], %15 {strides = array<i32>} : memref<256x32xf32, #tpu.memory_space<vmem>>, vector<256x32xf32>,
    return
  }
  func.func @transform_0(%arg0: i32) -> (i32, i32) {
    %c0_i32 = arith.constant 0 : i32
    %c0_i32_0 = arith.constant 0 : i32
    return %arg0, %c0_i32 : i32, i32
  }
  func.func @transform_1(%arg0: i32) -> (i32, i32) {
    %c0_i32 = arith.constant 0 : i32
    %c0_i32_0 = arith.constant 0 : i32
    %c0_i32_1 = arith.constant 0 : i32
    return %c0_i32, %c0_i32_0 : i32, i32
  }
  func.func @transform_2(%arg0: i32) -> (i32, i32) {
    %c0_i32 = arith.constant 0 : i32
    %c0_i32_0 = arith.constant 0 : i32
    %c0_i32_1 = arith.constant 0 : i32
    return %c0_i32, %c0_i32_0 : i32, i32
  }
  func.func @transform_3(%arg0: i32) -> (i32, i32) {
    %c0_i32 = arith.constant 0 : i32
    %c0_i32_0 = arith.constant 0 : i32
    return %arg0, %c0_i32 : i32, i32
  }
}

module attributes {stable_mosaic.version = 11 : i64} {
  func.func @_complex_mix_kernel(%arg0: i32, %arg1: memref<16x2x32xf32, #tpu.memory_space<vmem>>, %arg2: memref<16x2x32xf32, #tpu.memory_space<vmem>>, %arg3: memref<16x32x32xf32, #tpu.memory_space<vmem>>, %arg4: memref<16x32x32xf32, #tpu.memory_space<vmem>>, %arg5: memref<16x32x32xf32, #tpu.memory_space<vmem>>, %arg6: memref<16x2x32xf32, #tpu.memory_space<vmem>>, %arg7: memref<16x2x32xf32, #tpu.memory_space<vmem>>) attributes {dimension_semantics = [#tpu.dimension_semantics<parallel>], iteration_bounds = array<i64: 2>, scalar_prefetch = 0 : i64, scratch_operands = 0 : i64, tpu.core_type = #tpu.core_type<tc>, window_params = [{transform_indices = @transform_0, window_bounds = array<i64: 16, 2, 32>}, {transform_indices = @transform_1, window_bounds = array<i64: 16, 2, 32>}, {transform_indices = @transform_2, window_bounds = array<i64: 16, 32, 32>}, {transform_indices = @transform_3, window_bounds = array<i64: 16, 32, 32>}, {transform_indices = @transform_4, window_bounds = array<i64: 16, 32, 32>}, {transform_indices = @transform_5, window_bounds = array<i64: 16, 2, 32>}, {transform_indices = @transform_6, window_bounds = array<i64: 16, 2, 32>}]} {
    %c0 = arith.constant 0 : index
    %c0_0 = arith.constant 0 : index
    %c0_1 = arith.constant 0 : index
    %0 = vector.load %arg1[%c0, %c0_0, %c0_1] : memref<16x2x32xf32, #tpu.memory_space<vmem>>, vector<1x2x32xf32>
    %1 = vector.shape_cast %0 : vector<1x2x32xf32> to vector<2x32xf32>
    %c0_2 = arith.constant 0 : index
    %c0_3 = arith.constant 0 : index
    %c0_4 = arith.constant 0 : index
    %2 = vector.load %arg2[%c0_2, %c0_3, %c0_4] : memref<16x2x32xf32, #tpu.memory_space<vmem>>, vector<1x2x32xf32>
    %3 = vector.shape_cast %2 : vector<1x2x32xf32> to vector<2x32xf32>
    %c0_5 = arith.constant 0 : index
    %c0_6 = arith.constant 0 : index
    %c0_7 = arith.constant 0 : index
    %4 = vector.load %arg3[%c0_5, %c0_6, %c0_7] : memref<16x32x32xf32, #tpu.memory_space<vmem>>, vector<1x32x32xf32>
    %5 = vector.shape_cast %4 : vector<1x32x32xf32> to vector<32x32xf32>
    %cst = arith.constant dense<0.000000e+00> : vector<2x32xf32>
    %6 = tpu.matmul %1, %5, %cst {dimension_numbers = #tpu.dot_dimension_numbers<[1], [0], [0], [1], [0, 0, 1, 1], [], []>} : vector<2x32xf32>, vector<32x32xf32>, vector<2x32xf32> -> vector<2x32xf32>
    %c0_8 = arith.constant 0 : index
    %c0_9 = arith.constant 0 : index
    %c0_10 = arith.constant 0 : index
    %7 = vector.load %arg4[%c0_8, %c0_9, %c0_10] : memref<16x32x32xf32, #tpu.memory_space<vmem>>, vector<1x32x32xf32>
    %8 = vector.shape_cast %7 : vector<1x32x32xf32> to vector<32x32xf32>
    %cst_11 = arith.constant dense<0.000000e+00> : vector<2x32xf32>
    %9 = tpu.matmul %3, %8, %cst_11 {dimension_numbers = #tpu.dot_dimension_numbers<[1], [0], [0], [1], [0, 0, 1, 1], [], []>} : vector<2x32xf32>, vector<32x32xf32>, vector<2x32xf32> -> vector<2x32xf32>
    %10 = arith.addf %1, %3 : vector<2x32xf32>
    %c0_12 = arith.constant 0 : index
    %c0_13 = arith.constant 0 : index
    %c0_14 = arith.constant 0 : index
    %11 = vector.load %arg5[%c0_12, %c0_13, %c0_14] : memref<16x32x32xf32, #tpu.memory_space<vmem>>, vector<1x32x32xf32>
    %12 = vector.shape_cast %11 : vector<1x32x32xf32> to vector<32x32xf32>
    %cst_15 = arith.constant dense<0.000000e+00> : vector<2x32xf32>
    %13 = tpu.matmul %10, %12, %cst_15 {dimension_numbers = #tpu.dot_dimension_numbers<[1], [0], [0], [1], [0, 0, 1, 1], [], []>} : vector<2x32xf32>, vector<32x32xf32>, vector<2x32xf32> -> vector<2x32xf32>
    %14 = arith.subf %6, %9 : vector<2x32xf32>
    %c0_16 = arith.constant 0 : index
    %c0_17 = arith.constant 0 : index
    %c0_18 = arith.constant 0 : index
    %15 = vector.load %arg6[%c0_16, %c0_17, %c0_18] : memref<16x2x32xf32, #tpu.memory_space<vmem>>, vector<1x2x32xf32>
    %16 = vector.shape_cast %15 : vector<1x2x32xf32> to vector<2x32xf32>
    %17 = vector.shape_cast %14 : vector<2x32xf32> to vector<1x2x32xf32>
    tpu.vector_store %arg6[%c0_16, %c0_17, %c0_18], %17 {strides = array<i32>} : memref<16x2x32xf32, #tpu.memory_space<vmem>>, vector<1x2x32xf32>,
    %18 = arith.subf %13, %6 : vector<2x32xf32>
    %19 = arith.subf %18, %9 : vector<2x32xf32>
    %c0_19 = arith.constant 0 : index
    %c0_20 = arith.constant 0 : index
    %c0_21 = arith.constant 0 : index
    %20 = vector.load %arg7[%c0_19, %c0_20, %c0_21] : memref<16x2x32xf32, #tpu.memory_space<vmem>>, vector<1x2x32xf32>
    %21 = vector.shape_cast %20 : vector<1x2x32xf32> to vector<2x32xf32>
    %22 = vector.shape_cast %19 : vector<2x32xf32> to vector<1x2x32xf32>
    tpu.vector_store %arg7[%c0_19, %c0_20, %c0_21], %22 {strides = array<i32>} : memref<16x2x32xf32, #tpu.memory_space<vmem>>, vector<1x2x32xf32>,
    %c1 = arith.constant 1 : index
    %c0_22 = arith.constant 0 : index
    %c0_23 = arith.constant 0 : index
    %23 = vector.load %arg1[%c1, %c0_22, %c0_23] : memref<16x2x32xf32, #tpu.memory_space<vmem>>, vector<1x2x32xf32>
    %24 = vector.shape_cast %23 : vector<1x2x32xf32> to vector<2x32xf32>
    %c1_24 = arith.constant 1 : index
    %c0_25 = arith.constant 0 : index
    %c0_26 = arith.constant 0 : index
    %25 = vector.load %arg2[%c1_24, %c0_25, %c0_26] : memref<16x2x32xf32, #tpu.memory_space<vmem>>, vector<1x2x32xf32>
    %26 = vector.shape_cast %25 : vector<1x2x32xf32> to vector<2x32xf32>
    %c1_27 = arith.constant 1 : index
    %c0_28 = arith.constant 0 : index
    %c0_29 = arith.constant 0 : index
    %27 = vector.load %arg3[%c1_27, %c0_28, %c0_29] : memref<16x32x32xf32, #tpu.memory_space<vmem>>, vector<1x32x32xf32>
    %28 = vector.shape_cast %27 : vector<1x32x32xf32> to vector<32x32xf32>
    %cst_30 = arith.constant dense<0.000000e+00> : vector<2x32xf32>
    %29 = tpu.matmul %24, %28, %cst_30 {dimension_numbers = #tpu.dot_dimension_numbers<[1], [0], [0], [1], [0, 0, 1, 1], [], []>} : vector<2x32xf32>, vector<32x32xf32>, vector<2x32xf32> -> vector<2x32xf32>
    %c1_31 = arith.constant 1 : index
    %c0_32 = arith.constant 0 : index
    %c0_33 = arith.constant 0 : index
    %30 = vector.load %arg4[%c1_31, %c0_32, %c0_33] : memref<16x32x32xf32, #tpu.memory_space<vmem>>, vector<1x32x32xf32>
    %31 = vector.shape_cast %30 : vector<1x32x32xf32> to vector<32x32xf32>
    %cst_34 = arith.constant dense<0.000000e+00> : vector<2x32xf32>
    %32 = tpu.matmul %26, %31, %cst_34 {dimension_numbers = #tpu.dot_dimension_numbers<[1], [0], [0], [1], [0, 0, 1, 1], [], []>} : vector<2x32xf32>, vector<32x32xf32>, vector<2x32xf32> -> vector<2x32xf32>
    %33 = arith.addf %24, %26 : vector<2x32xf32>
    %c1_35 = arith.constant 1 : index
    %c0_36 = arith.constant 0 : index
    %c0_37 = arith.constant 0 : index
    %34 = vector.load %arg5[%c1_35, %c0_36, %c0_37] : memref<16x32x32xf32, #tpu.memory_space<vmem>>, vector<1x32x32xf32>
    %35 = vector.shape_cast %34 : vector<1x32x32xf32> to vector<32x32xf32>
    %cst_38 = arith.constant dense<0.000000e+00> : vector<2x32xf32>
    %36 = tpu.matmul %33, %35, %cst_38 {dimension_numbers = #tpu.dot_dimension_numbers<[1], [0], [0], [1], [0, 0, 1, 1], [], []>} : vector<2x32xf32>, vector<32x32xf32>, vector<2x32xf32> -> vector<2x32xf32>
    %37 = arith.subf %29, %32 : vector<2x32xf32>
    %c1_39 = arith.constant 1 : index
    %c0_40 = arith.constant 0 : index
    %c0_41 = arith.constant 0 : index
    %38 = vector.load %arg6[%c1_39, %c0_40, %c0_41] : memref<16x2x32xf32, #tpu.memory_space<vmem>>, vector<1x2x32xf32>
    %39 = vector.shape_cast %38 : vector<1x2x32xf32> to vector<2x32xf32>
    %40 = vector.shape_cast %37 : vector<2x32xf32> to vector<1x2x32xf32>
    tpu.vector_store %arg6[%c1_39, %c0_40, %c0_41], %40 {strides = array<i32>} : memref<16x2x32xf32, #tpu.memory_space<vmem>>, vector<1x2x32xf32>,
    %41 = arith.subf %36, %29 : vector<2x32xf32>
    %42 = arith.subf %41, %32 : vector<2x32xf32>
    %c1_42 = arith.constant 1 : index
    %c0_43 = arith.constant 0 : index
    %c0_44 = arith.constant 0 : index
    %43 = vector.load %arg7[%c1_42, %c0_43, %c0_44] : memref<16x2x32xf32, #tpu.memory_space<vmem>>, vector<1x2x32xf32>
    %44 = vector.shape_cast %43 : vector<1x2x32xf32> to vector<2x32xf32>
    %45 = vector.shape_cast %42 : vector<2x32xf32> to vector<1x2x32xf32>
    tpu.vector_store %arg7[%c1_42, %c0_43, %c0_44], %45 {strides = array<i32>} : memref<16x2x32xf32, #tpu.memory_space<vmem>>, vector<1x2x32xf32>,
    %c2 = arith.constant 2 : index
    %c0_45 = arith.constant 0 : index
    %c0_46 = arith.constant 0 : index
    %46 = vector.load %arg1[%c2, %c0_45, %c0_46] : memref<16x2x32xf32, #tpu.memory_space<vmem>>, vector<1x2x32xf32>
    %47 = vector.shape_cast %46 : vector<1x2x32xf32> to vector<2x32xf32>
    %c2_47 = arith.constant 2 : index
    %c0_48 = arith.constant 0 : index
    %c0_49 = arith.constant 0 : index
    %48 = vector.load %arg2[%c2_47, %c0_48, %c0_49] : memref<16x2x32xf32, #tpu.memory_space<vmem>>, vector<1x2x32xf32>
    %49 = vector.shape_cast %48 : vector<1x2x32xf32> to vector<2x32xf32>
    %c2_50 = arith.constant 2 : index
    %c0_51 = arith.constant 0 : index
    %c0_52 = arith.constant 0 : index
    %50 = vector.load %arg3[%c2_50, %c0_51, %c0_52] : memref<16x32x32xf32, #tpu.memory_space<vmem>>, vector<1x32x32xf32>
    %51 = vector.shape_cast %50 : vector<1x32x32xf32> to vector<32x32xf32>
    %cst_53 = arith.constant dense<0.000000e+00> : vector<2x32xf32>
    %52 = tpu.matmul %47, %51, %cst_53 {dimension_numbers = #tpu.dot_dimension_numbers<[1], [0], [0], [1], [0, 0, 1, 1], [], []>} : vector<2x32xf32>, vector<32x32xf32>, vector<2x32xf32> -> vector<2x32xf32>
    %c2_54 = arith.constant 2 : index
    %c0_55 = arith.constant 0 : index
    %c0_56 = arith.constant 0 : index
    %53 = vector.load %arg4[%c2_54, %c0_55, %c0_56] : memref<16x32x32xf32, #tpu.memory_space<vmem>>, vector<1x32x32xf32>
    %54 = vector.shape_cast %53 : vector<1x32x32xf32> to vector<32x32xf32>
    %cst_57 = arith.constant dense<0.000000e+00> : vector<2x32xf32>
    %55 = tpu.matmul %49, %54, %cst_57 {dimension_numbers = #tpu.dot_dimension_numbers<[1], [0], [0], [1], [0, 0, 1, 1], [], []>} : vector<2x32xf32>, vector<32x32xf32>, vector<2x32xf32> -> vector<2x32xf32>
    %56 = arith.addf %47, %49 : vector<2x32xf32>
    %c2_58 = arith.constant 2 : index
    %c0_59 = arith.constant 0 : index
    %c0_60 = arith.constant 0 : index
    %57 = vector.load %arg5[%c2_58, %c0_59, %c0_60] : memref<16x32x32xf32, #tpu.memory_space<vmem>>, vector<1x32x32xf32>
    %58 = vector.shape_cast %57 : vector<1x32x32xf32> to vector<32x32xf32>
    %cst_61 = arith.constant dense<0.000000e+00> : vector<2x32xf32>
    %59 = tpu.matmul %56, %58, %cst_61 {dimension_numbers = #tpu.dot_dimension_numbers<[1], [0], [0], [1], [0, 0, 1, 1], [], []>} : vector<2x32xf32>, vector<32x32xf32>, vector<2x32xf32> -> vector<2x32xf32>
    %60 = arith.subf %52, %55 : vector<2x32xf32>
    %c2_62 = arith.constant 2 : index
    %c0_63 = arith.constant 0 : index
    %c0_64 = arith.constant 0 : index
    %61 = vector.load %arg6[%c2_62, %c0_63, %c0_64] : memref<16x2x32xf32, #tpu.memory_space<vmem>>, vector<1x2x32xf32>
    %62 = vector.shape_cast %61 : vector<1x2x32xf32> to vector<2x32xf32>
    %63 = vector.shape_cast %60 : vector<2x32xf32> to vector<1x2x32xf32>
    tpu.vector_store %arg6[%c2_62, %c0_63, %c0_64], %63 {strides = array<i32>} : memref<16x2x32xf32, #tpu.memory_space<vmem>>, vector<1x2x32xf32>,
    %64 = arith.subf %59, %52 : vector<2x32xf32>
    %65 = arith.subf %64, %55 : vector<2x32xf32>
    %c2_65 = arith.constant 2 : index
    %c0_66 = arith.constant 0 : index
    %c0_67 = arith.constant 0 : index
    %66 = vector.load %arg7[%c2_65, %c0_66, %c0_67] : memref<16x2x32xf32, #tpu.memory_space<vmem>>, vector<1x2x32xf32>
    %67 = vector.shape_cast %66 : vector<1x2x32xf32> to vector<2x32xf32>
    %68 = vector.shape_cast %65 : vector<2x32xf32> to vector<1x2x32xf32>
    tpu.vector_store %arg7[%c2_65, %c0_66, %c0_67], %68 {strides = array<i32>} : memref<16x2x32xf32, #tpu.memory_space<vmem>>, vector<1x2x32xf32>,
    %c3 = arith.constant 3 : index
    %c0_68 = arith.constant 0 : index
    %c0_69 = arith.constant 0 : index
    %69 = vector.load %arg1[%c3, %c0_68, %c0_69] : memref<16x2x32xf32, #tpu.memory_space<vmem>>, vector<1x2x32xf32>
    %70 = vector.shape_cast %69 : vector<1x2x32xf32> to vector<2x32xf32>
    %c3_70 = arith.constant 3 : index
    %c0_71 = arith.constant 0 : index
    %c0_72 = arith.constant 0 : index
    %71 = vector.load %arg2[%c3_70, %c0_71, %c0_72] : memref<16x2x32xf32, #tpu.memory_space<vmem>>, vector<1x2x32xf32>
    %72 = vector.shape_cast %71 : vector<1x2x32xf32> to vector<2x32xf32>
    %c3_73 = arith.constant 3 : index
    %c0_74 = arith.constant 0 : index
    %c0_75 = arith.constant 0 : index
    %73 = vector.load %arg3[%c3_73, %c0_74, %c0_75] : memref<16x32x32xf32, #tpu.memory_space<vmem>>, vector<1x32x32xf32>
    %74 = vector.shape_cast %73 : vector<1x32x32xf32> to vector<32x32xf32>
    %cst_76 = arith.constant dense<0.000000e+00> : vector<2x32xf32>
    %75 = tpu.matmul %70, %74, %cst_76 {dimension_numbers = #tpu.dot_dimension_numbers<[1], [0], [0], [1], [0, 0, 1, 1], [], []>} : vector<2x32xf32>, vector<32x32xf32>, vector<2x32xf32> -> vector<2x32xf32>
    %c3_77 = arith.constant 3 : index
    %c0_78 = arith.constant 0 : index
    %c0_79 = arith.constant 0 : index
    %76 = vector.load %arg4[%c3_77, %c0_78, %c0_79] : memref<16x32x32xf32, #tpu.memory_space<vmem>>, vector<1x32x32xf32>
    %77 = vector.shape_cast %76 : vector<1x32x32xf32> to vector<32x32xf32>
    %cst_80 = arith.constant dense<0.000000e+00> : vector<2x32xf32>
    %78 = tpu.matmul %72, %77, %cst_80 {dimension_numbers = #tpu.dot_dimension_numbers<[1], [0], [0], [1], [0, 0, 1, 1], [], []>} : vector<2x32xf32>, vector<32x32xf32>, vector<2x32xf32> -> vector<2x32xf32>
    %79 = arith.addf %70, %72 : vector<2x32xf32>
    %c3_81 = arith.constant 3 : index
    %c0_82 = arith.constant 0 : index
    %c0_83 = arith.constant 0 : index
    %80 = vector.load %arg5[%c3_81, %c0_82, %c0_83] : memref<16x32x32xf32, #tpu.memory_space<vmem>>, vector<1x32x32xf32>
    %81 = vector.shape_cast %80 : vector<1x32x32xf32> to vector<32x32xf32>
    %cst_84 = arith.constant dense<0.000000e+00> : vector<2x32xf32>
    %82 = tpu.matmul %79, %81, %cst_84 {dimension_numbers = #tpu.dot_dimension_numbers<[1], [0], [0], [1], [0, 0, 1, 1], [], []>} : vector<2x32xf32>, vector<32x32xf32>, vector<2x32xf32> -> vector<2x32xf32>
    %83 = arith.subf %75, %78 : vector<2x32xf32>
    %c3_85 = arith.constant 3 : index
    %c0_86 = arith.constant 0 : index
    %c0_87 = arith.constant 0 : index
    %84 = vector.load %arg6[%c3_85, %c0_86, %c0_87] : memref<16x2x32xf32, #tpu.memory_space<vmem>>, vector<1x2x32xf32>
    %85 = vector.shape_cast %84 : vector<1x2x32xf32> to vector<2x32xf32>
    %86 = vector.shape_cast %83 : vector<2x32xf32> to vector<1x2x32xf32>
    tpu.vector_store %arg6[%c3_85, %c0_86, %c0_87], %86 {strides = array<i32>} : memref<16x2x32xf32, #tpu.memory_space<vmem>>, vector<1x2x32xf32>,
    %87 = arith.subf %82, %75 : vector<2x32xf32>
    %88 = arith.subf %87, %78 : vector<2x32xf32>
    %c3_88 = arith.constant 3 : index
    %c0_89 = arith.constant 0 : index
    %c0_90 = arith.constant 0 : index
    %89 = vector.load %arg7[%c3_88, %c0_89, %c0_90] : memref<16x2x32xf32, #tpu.memory_space<vmem>>, vector<1x2x32xf32>
    %90 = vector.shape_cast %89 : vector<1x2x32xf32> to vector<2x32xf32>
    %91 = vector.shape_cast %88 : vector<2x32xf32> to vector<1x2x32xf32>
    tpu.vector_store %arg7[%c3_88, %c0_89, %c0_90], %91 {strides = array<i32>} : memref<16x2x32xf32, #tpu.memory_space<vmem>>, vector<1x2x32xf32>,
    %c4 = arith.constant 4 : index
    %c0_91 = arith.constant 0 : index
    %c0_92 = arith.constant 0 : index
    %92 = vector.load %arg1[%c4, %c0_91, %c0_92] : memref<16x2x32xf32, #tpu.memory_space<vmem>>, vector<1x2x32xf32>
    %93 = vector.shape_cast %92 : vector<1x2x32xf32> to vector<2x32xf32>
    %c4_93 = arith.constant 4 : index
    %c0_94 = arith.constant 0 : index
    %c0_95 = arith.constant 0 : index
    %94 = vector.load %arg2[%c4_93, %c0_94, %c0_95] : memref<16x2x32xf32, #tpu.memory_space<vmem>>, vector<1x2x32xf32>
    %95 = vector.shape_cast %94 : vector<1x2x32xf32> to vector<2x32xf32>
    %c4_96 = arith.constant 4 : index
    %c0_97 = arith.constant 0 : index
    %c0_98 = arith.constant 0 : index
    %96 = vector.load %arg3[%c4_96, %c0_97, %c0_98] : memref<16x32x32xf32, #tpu.memory_space<vmem>>, vector<1x32x32xf32>
    %97 = vector.shape_cast %96 : vector<1x32x32xf32> to vector<32x32xf32>
    %cst_99 = arith.constant dense<0.000000e+00> : vector<2x32xf32>
    %98 = tpu.matmul %93, %97, %cst_99 {dimension_numbers = #tpu.dot_dimension_numbers<[1], [0], [0], [1], [0, 0, 1, 1], [], []>} : vector<2x32xf32>, vector<32x32xf32>, vector<2x32xf32> -> vector<2x32xf32>
    %c4_100 = arith.constant 4 : index
    %c0_101 = arith.constant 0 : index
    %c0_102 = arith.constant 0 : index
    %99 = vector.load %arg4[%c4_100, %c0_101, %c0_102] : memref<16x32x32xf32, #tpu.memory_space<vmem>>, vector<1x32x32xf32>
    %100 = vector.shape_cast %99 : vector<1x32x32xf32> to vector<32x32xf32>
    %cst_103 = arith.constant dense<0.000000e+00> : vector<2x32xf32>
    %101 = tpu.matmul %95, %100, %cst_103 {dimension_numbers = #tpu.dot_dimension_numbers<[1], [0], [0], [1], [0, 0, 1, 1], [], []>} : vector<2x32xf32>, vector<32x32xf32>, vector<2x32xf32> -> vector<2x32xf32>
    %102 = arith.addf %93, %95 : vector<2x32xf32>
    %c4_104 = arith.constant 4 : index
    %c0_105 = arith.constant 0 : index
    %c0_106 = arith.constant 0 : index
    %103 = vector.load %arg5[%c4_104, %c0_105, %c0_106] : memref<16x32x32xf32, #tpu.memory_space<vmem>>, vector<1x32x32xf32>
    %104 = vector.shape_cast %103 : vector<1x32x32xf32> to vector<32x32xf32>
    %cst_107 = arith.constant dense<0.000000e+00> : vector<2x32xf32>
    %105 = tpu.matmul %102, %104, %cst_107 {dimension_numbers = #tpu.dot_dimension_numbers<[1], [0], [0], [1], [0, 0, 1, 1], [], []>} : vector<2x32xf32>, vector<32x32xf32>, vector<2x32xf32> -> vector<2x32xf32>
    %106 = arith.subf %98, %101 : vector<2x32xf32>
    %c4_108 = arith.constant 4 : index
    %c0_109 = arith.constant 0 : index
    %c0_110 = arith.constant 0 : index
    %107 = vector.load %arg6[%c4_108, %c0_109, %c0_110] : memref<16x2x32xf32, #tpu.memory_space<vmem>>, vector<1x2x32xf32>
    %108 = vector.shape_cast %107 : vector<1x2x32xf32> to vector<2x32xf32>
    %109 = vector.shape_cast %106 : vector<2x32xf32> to vector<1x2x32xf32>
    tpu.vector_store %arg6[%c4_108, %c0_109, %c0_110], %109 {strides = array<i32>} : memref<16x2x32xf32, #tpu.memory_space<vmem>>, vector<1x2x32xf32>,
    %110 = arith.subf %105, %98 : vector<2x32xf32>
    %111 = arith.subf %110, %101 : vector<2x32xf32>
    %c4_111 = arith.constant 4 : index
    %c0_112 = arith.constant 0 : index
    %c0_113 = arith.constant 0 : index
    %112 = vector.load %arg7[%c4_111, %c0_112, %c0_113] : memref<16x2x32xf32, #tpu.memory_space<vmem>>, vector<1x2x32xf32>
    %113 = vector.shape_cast %112 : vector<1x2x32xf32> to vector<2x32xf32>
    %114 = vector.shape_cast %111 : vector<2x32xf32> to vector<1x2x32xf32>
    tpu.vector_store %arg7[%c4_111, %c0_112, %c0_113], %114 {strides = array<i32>} : memref<16x2x32xf32, #tpu.memory_space<vmem>>, vector<1x2x32xf32>,
    %c5 = arith.constant 5 : index
    %c0_114 = arith.constant 0 : index
    %c0_115 = arith.constant 0 : index
    %115 = vector.load %arg1[%c5, %c0_114, %c0_115] : memref<16x2x32xf32, #tpu.memory_space<vmem>>, vector<1x2x32xf32>
    %116 = vector.shape_cast %115 : vector<1x2x32xf32> to vector<2x32xf32>
    %c5_116 = arith.constant 5 : index
    %c0_117 = arith.constant 0 : index
    %c0_118 = arith.constant 0 : index
    %117 = vector.load %arg2[%c5_116, %c0_117, %c0_118] : memref<16x2x32xf32, #tpu.memory_space<vmem>>, vector<1x2x32xf32>
    %118 = vector.shape_cast %117 : vector<1x2x32xf32> to vector<2x32xf32>
    %c5_119 = arith.constant 5 : index
    %c0_120 = arith.constant 0 : index
    %c0_121 = arith.constant 0 : index
    %119 = vector.load %arg3[%c5_119, %c0_120, %c0_121] : memref<16x32x32xf32, #tpu.memory_space<vmem>>, vector<1x32x32xf32>
    %120 = vector.shape_cast %119 : vector<1x32x32xf32> to vector<32x32xf32>
    %cst_122 = arith.constant dense<0.000000e+00> : vector<2x32xf32>
    %121 = tpu.matmul %116, %120, %cst_122 {dimension_numbers = #tpu.dot_dimension_numbers<[1], [0], [0], [1], [0, 0, 1, 1], [], []>} : vector<2x32xf32>, vector<32x32xf32>, vector<2x32xf32> -> vector<2x32xf32>
    %c5_123 = arith.constant 5 : index
    %c0_124 = arith.constant 0 : index
    %c0_125 = arith.constant 0 : index
    %122 = vector.load %arg4[%c5_123, %c0_124, %c0_125] : memref<16x32x32xf32, #tpu.memory_space<vmem>>, vector<1x32x32xf32>
    %123 = vector.shape_cast %122 : vector<1x32x32xf32> to vector<32x32xf32>
    %cst_126 = arith.constant dense<0.000000e+00> : vector<2x32xf32>
    %124 = tpu.matmul %118, %123, %cst_126 {dimension_numbers = #tpu.dot_dimension_numbers<[1], [0], [0], [1], [0, 0, 1, 1], [], []>} : vector<2x32xf32>, vector<32x32xf32>, vector<2x32xf32> -> vector<2x32xf32>
    %125 = arith.addf %116, %118 : vector<2x32xf32>
    %c5_127 = arith.constant 5 : index
    %c0_128 = arith.constant 0 : index
    %c0_129 = arith.constant 0 : index
    %126 = vector.load %arg5[%c5_127, %c0_128, %c0_129] : memref<16x32x32xf32, #tpu.memory_space<vmem>>, vector<1x32x32xf32>
    %127 = vector.shape_cast %126 : vector<1x32x32xf32> to vector<32x32xf32>
    %cst_130 = arith.constant dense<0.000000e+00> : vector<2x32xf32>
    %128 = tpu.matmul %125, %127, %cst_130 {dimension_numbers = #tpu.dot_dimension_numbers<[1], [0], [0], [1], [0, 0, 1, 1], [], []>} : vector<2x32xf32>, vector<32x32xf32>, vector<2x32xf32> -> vector<2x32xf32>
    %129 = arith.subf %121, %124 : vector<2x32xf32>
    %c5_131 = arith.constant 5 : index
    %c0_132 = arith.constant 0 : index
    %c0_133 = arith.constant 0 : index
    %130 = vector.load %arg6[%c5_131, %c0_132, %c0_133] : memref<16x2x32xf32, #tpu.memory_space<vmem>>, vector<1x2x32xf32>
    %131 = vector.shape_cast %130 : vector<1x2x32xf32> to vector<2x32xf32>
    %132 = vector.shape_cast %129 : vector<2x32xf32> to vector<1x2x32xf32>
    tpu.vector_store %arg6[%c5_131, %c0_132, %c0_133], %132 {strides = array<i32>} : memref<16x2x32xf32, #tpu.memory_space<vmem>>, vector<1x2x32xf32>,
    %133 = arith.subf %128, %121 : vector<2x32xf32>
    %134 = arith.subf %133, %124 : vector<2x32xf32>
    %c5_134 = arith.constant 5 : index
    %c0_135 = arith.constant 0 : index
    %c0_136 = arith.constant 0 : index
    %135 = vector.load %arg7[%c5_134, %c0_135, %c0_136] : memref<16x2x32xf32, #tpu.memory_space<vmem>>, vector<1x2x32xf32>
    %136 = vector.shape_cast %135 : vector<1x2x32xf32> to vector<2x32xf32>
    %137 = vector.shape_cast %134 : vector<2x32xf32> to vector<1x2x32xf32>
    tpu.vector_store %arg7[%c5_134, %c0_135, %c0_136], %137 {strides = array<i32>} : memref<16x2x32xf32, #tpu.memory_space<vmem>>, vector<1x2x32xf32>,
    %c6 = arith.constant 6 : index
    %c0_137 = arith.constant 0 : index
    %c0_138 = arith.constant 0 : index
    %138 = vector.load %arg1[%c6, %c0_137, %c0_138] : memref<16x2x32xf32, #tpu.memory_space<vmem>>, vector<1x2x32xf32>
    %139 = vector.shape_cast %138 : vector<1x2x32xf32> to vector<2x32xf32>
    %c6_139 = arith.constant 6 : index
    %c0_140 = arith.constant 0 : index
    %c0_141 = arith.constant 0 : index
    %140 = vector.load %arg2[%c6_139, %c0_140, %c0_141] : memref<16x2x32xf32, #tpu.memory_space<vmem>>, vector<1x2x32xf32>
    %141 = vector.shape_cast %140 : vector<1x2x32xf32> to vector<2x32xf32>
    %c6_142 = arith.constant 6 : index
    %c0_143 = arith.constant 0 : index
    %c0_144 = arith.constant 0 : index
    %142 = vector.load %arg3[%c6_142, %c0_143, %c0_144] : memref<16x32x32xf32, #tpu.memory_space<vmem>>, vector<1x32x32xf32>
    %143 = vector.shape_cast %142 : vector<1x32x32xf32> to vector<32x32xf32>
    %cst_145 = arith.constant dense<0.000000e+00> : vector<2x32xf32>
    %144 = tpu.matmul %139, %143, %cst_145 {dimension_numbers = #tpu.dot_dimension_numbers<[1], [0], [0], [1], [0, 0, 1, 1], [], []>} : vector<2x32xf32>, vector<32x32xf32>, vector<2x32xf32> -> vector<2x32xf32>
    %c6_146 = arith.constant 6 : index
    %c0_147 = arith.constant 0 : index
    %c0_148 = arith.constant 0 : index
    %145 = vector.load %arg4[%c6_146, %c0_147, %c0_148] : memref<16x32x32xf32, #tpu.memory_space<vmem>>, vector<1x32x32xf32>
    %146 = vector.shape_cast %145 : vector<1x32x32xf32> to vector<32x32xf32>
    %cst_149 = arith.constant dense<0.000000e+00> : vector<2x32xf32>
    %147 = tpu.matmul %141, %146, %cst_149 {dimension_numbers = #tpu.dot_dimension_numbers<[1], [0], [0], [1], [0, 0, 1, 1], [], []>} : vector<2x32xf32>, vector<32x32xf32>, vector<2x32xf32> -> vector<2x32xf32>
    %148 = arith.addf %139, %141 : vector<2x32xf32>
    %c6_150 = arith.constant 6 : index
    %c0_151 = arith.constant 0 : index
    %c0_152 = arith.constant 0 : index
    %149 = vector.load %arg5[%c6_150, %c0_151, %c0_152] : memref<16x32x32xf32, #tpu.memory_space<vmem>>, vector<1x32x32xf32>
    %150 = vector.shape_cast %149 : vector<1x32x32xf32> to vector<32x32xf32>
    %cst_153 = arith.constant dense<0.000000e+00> : vector<2x32xf32>
    %151 = tpu.matmul %148, %150, %cst_153 {dimension_numbers = #tpu.dot_dimension_numbers<[1], [0], [0], [1], [0, 0, 1, 1], [], []>} : vector<2x32xf32>, vector<32x32xf32>, vector<2x32xf32> -> vector<2x32xf32>
    %152 = arith.subf %144, %147 : vector<2x32xf32>
    %c6_154 = arith.constant 6 : index
    %c0_155 = arith.constant 0 : index
    %c0_156 = arith.constant 0 : index
    %153 = vector.load %arg6[%c6_154, %c0_155, %c0_156] : memref<16x2x32xf32, #tpu.memory_space<vmem>>, vector<1x2x32xf32>
    %154 = vector.shape_cast %153 : vector<1x2x32xf32> to vector<2x32xf32>
    %155 = vector.shape_cast %152 : vector<2x32xf32> to vector<1x2x32xf32>
    tpu.vector_store %arg6[%c6_154, %c0_155, %c0_156], %155 {strides = array<i32>} : memref<16x2x32xf32, #tpu.memory_space<vmem>>, vector<1x2x32xf32>,
    %156 = arith.subf %151, %144 : vector<2x32xf32>
    %157 = arith.subf %156, %147 : vector<2x32xf32>
    %c6_157 = arith.constant 6 : index
    %c0_158 = arith.constant 0 : index
    %c0_159 = arith.constant 0 : index
    %158 = vector.load %arg7[%c6_157, %c0_158, %c0_159] : memref<16x2x32xf32, #tpu.memory_space<vmem>>, vector<1x2x32xf32>
    %159 = vector.shape_cast %158 : vector<1x2x32xf32> to vector<2x32xf32>
    %160 = vector.shape_cast %157 : vector<2x32xf32> to vector<1x2x32xf32>
    tpu.vector_store %arg7[%c6_157, %c0_158, %c0_159], %160 {strides = array<i32>} : memref<16x2x32xf32, #tpu.memory_space<vmem>>, vector<1x2x32xf32>,
    %c7 = arith.constant 7 : index
    %c0_160 = arith.constant 0 : index
    %c0_161 = arith.constant 0 : index
    %161 = vector.load %arg1[%c7, %c0_160, %c0_161] : memref<16x2x32xf32, #tpu.memory_space<vmem>>, vector<1x2x32xf32>
    %162 = vector.shape_cast %161 : vector<1x2x32xf32> to vector<2x32xf32>
    %c7_162 = arith.constant 7 : index
    %c0_163 = arith.constant 0 : index
    %c0_164 = arith.constant 0 : index
    %163 = vector.load %arg2[%c7_162, %c0_163, %c0_164] : memref<16x2x32xf32, #tpu.memory_space<vmem>>, vector<1x2x32xf32>
    %164 = vector.shape_cast %163 : vector<1x2x32xf32> to vector<2x32xf32>
    %c7_165 = arith.constant 7 : index
    %c0_166 = arith.constant 0 : index
    %c0_167 = arith.constant 0 : index
    %165 = vector.load %arg3[%c7_165, %c0_166, %c0_167] : memref<16x32x32xf32, #tpu.memory_space<vmem>>, vector<1x32x32xf32>
    %166 = vector.shape_cast %165 : vector<1x32x32xf32> to vector<32x32xf32>
    %cst_168 = arith.constant dense<0.000000e+00> : vector<2x32xf32>
    %167 = tpu.matmul %162, %166, %cst_168 {dimension_numbers = #tpu.dot_dimension_numbers<[1], [0], [0], [1], [0, 0, 1, 1], [], []>} : vector<2x32xf32>, vector<32x32xf32>, vector<2x32xf32> -> vector<2x32xf32>
    %c7_169 = arith.constant 7 : index
    %c0_170 = arith.constant 0 : index
    %c0_171 = arith.constant 0 : index
    %168 = vector.load %arg4[%c7_169, %c0_170, %c0_171] : memref<16x32x32xf32, #tpu.memory_space<vmem>>, vector<1x32x32xf32>
    %169 = vector.shape_cast %168 : vector<1x32x32xf32> to vector<32x32xf32>
    %cst_172 = arith.constant dense<0.000000e+00> : vector<2x32xf32>
    %170 = tpu.matmul %164, %169, %cst_172 {dimension_numbers = #tpu.dot_dimension_numbers<[1], [0], [0], [1], [0, 0, 1, 1], [], []>} : vector<2x32xf32>, vector<32x32xf32>, vector<2x32xf32> -> vector<2x32xf32>
    %171 = arith.addf %162, %164 : vector<2x32xf32>
    %c7_173 = arith.constant 7 : index
    %c0_174 = arith.constant 0 : index
    %c0_175 = arith.constant 0 : index
    %172 = vector.load %arg5[%c7_173, %c0_174, %c0_175] : memref<16x32x32xf32, #tpu.memory_space<vmem>>, vector<1x32x32xf32>
    %173 = vector.shape_cast %172 : vector<1x32x32xf32> to vector<32x32xf32>
    %cst_176 = arith.constant dense<0.000000e+00> : vector<2x32xf32>
    %174 = tpu.matmul %171, %173, %cst_176 {dimension_numbers = #tpu.dot_dimension_numbers<[1], [0], [0], [1], [0, 0, 1, 1], [], []>} : vector<2x32xf32>, vector<32x32xf32>, vector<2x32xf32> -> vector<2x32xf32>
    %175 = arith.subf %167, %170 : vector<2x32xf32>
    %c7_177 = arith.constant 7 : index
    %c0_178 = arith.constant 0 : index
    %c0_179 = arith.constant 0 : index
    %176 = vector.load %arg6[%c7_177, %c0_178, %c0_179] : memref<16x2x32xf32, #tpu.memory_space<vmem>>, vector<1x2x32xf32>
    %177 = vector.shape_cast %176 : vector<1x2x32xf32> to vector<2x32xf32>
    %178 = vector.shape_cast %175 : vector<2x32xf32> to vector<1x2x32xf32>
    tpu.vector_store %arg6[%c7_177, %c0_178, %c0_179], %178 {strides = array<i32>} : memref<16x2x32xf32, #tpu.memory_space<vmem>>, vector<1x2x32xf32>,
    %179 = arith.subf %174, %167 : vector<2x32xf32>
    %180 = arith.subf %179, %170 : vector<2x32xf32>
    %c7_180 = arith.constant 7 : index
    %c0_181 = arith.constant 0 : index
    %c0_182 = arith.constant 0 : index
    %181 = vector.load %arg7[%c7_180, %c0_181, %c0_182] : memref<16x2x32xf32, #tpu.memory_space<vmem>>, vector<1x2x32xf32>
    %182 = vector.shape_cast %181 : vector<1x2x32xf32> to vector<2x32xf32>
    %183 = vector.shape_cast %180 : vector<2x32xf32> to vector<1x2x32xf32>
    tpu.vector_store %arg7[%c7_180, %c0_181, %c0_182], %183 {strides = array<i32>} : memref<16x2x32xf32, #tpu.memory_space<vmem>>, vector<1x2x32xf32>,
    %c8 = arith.constant 8 : index
    %c0_183 = arith.constant 0 : index
    %c0_184 = arith.constant 0 : index
    %184 = vector.load %arg1[%c8, %c0_183, %c0_184] : memref<16x2x32xf32, #tpu.memory_space<vmem>>, vector<1x2x32xf32>
    %185 = vector.shape_cast %184 : vector<1x2x32xf32> to vector<2x32xf32>
    %c8_185 = arith.constant 8 : index
    %c0_186 = arith.constant 0 : index
    %c0_187 = arith.constant 0 : index
    %186 = vector.load %arg2[%c8_185, %c0_186, %c0_187] : memref<16x2x32xf32, #tpu.memory_space<vmem>>, vector<1x2x32xf32>
    %187 = vector.shape_cast %186 : vector<1x2x32xf32> to vector<2x32xf32>
    %c8_188 = arith.constant 8 : index
    %c0_189 = arith.constant 0 : index
    %c0_190 = arith.constant 0 : index
    %188 = vector.load %arg3[%c8_188, %c0_189, %c0_190] : memref<16x32x32xf32, #tpu.memory_space<vmem>>, vector<1x32x32xf32>
    %189 = vector.shape_cast %188 : vector<1x32x32xf32> to vector<32x32xf32>
    %cst_191 = arith.constant dense<0.000000e+00> : vector<2x32xf32>
    %190 = tpu.matmul %185, %189, %cst_191 {dimension_numbers = #tpu.dot_dimension_numbers<[1], [0], [0], [1], [0, 0, 1, 1], [], []>} : vector<2x32xf32>, vector<32x32xf32>, vector<2x32xf32> -> vector<2x32xf32>
    %c8_192 = arith.constant 8 : index
    %c0_193 = arith.constant 0 : index
    %c0_194 = arith.constant 0 : index
    %191 = vector.load %arg4[%c8_192, %c0_193, %c0_194] : memref<16x32x32xf32, #tpu.memory_space<vmem>>, vector<1x32x32xf32>
    %192 = vector.shape_cast %191 : vector<1x32x32xf32> to vector<32x32xf32>
    %cst_195 = arith.constant dense<0.000000e+00> : vector<2x32xf32>
    %193 = tpu.matmul %187, %192, %cst_195 {dimension_numbers = #tpu.dot_dimension_numbers<[1], [0], [0], [1], [0, 0, 1, 1], [], []>} : vector<2x32xf32>, vector<32x32xf32>, vector<2x32xf32> -> vector<2x32xf32>
    %194 = arith.addf %185, %187 : vector<2x32xf32>
    %c8_196 = arith.constant 8 : index
    %c0_197 = arith.constant 0 : index
    %c0_198 = arith.constant 0 : index
    %195 = vector.load %arg5[%c8_196, %c0_197, %c0_198] : memref<16x32x32xf32, #tpu.memory_space<vmem>>, vector<1x32x32xf32>
    %196 = vector.shape_cast %195 : vector<1x32x32xf32> to vector<32x32xf32>
    %cst_199 = arith.constant dense<0.000000e+00> : vector<2x32xf32>
    %197 = tpu.matmul %194, %196, %cst_199 {dimension_numbers = #tpu.dot_dimension_numbers<[1], [0], [0], [1], [0, 0, 1, 1], [], []>} : vector<2x32xf32>, vector<32x32xf32>, vector<2x32xf32> -> vector<2x32xf32>
    %198 = arith.subf %190, %193 : vector<2x32xf32>
    %c8_200 = arith.constant 8 : index
    %c0_201 = arith.constant 0 : index
    %c0_202 = arith.constant 0 : index
    %199 = vector.load %arg6[%c8_200, %c0_201, %c0_202] : memref<16x2x32xf32, #tpu.memory_space<vmem>>, vector<1x2x32xf32>
    %200 = vector.shape_cast %199 : vector<1x2x32xf32> to vector<2x32xf32>
    %201 = vector.shape_cast %198 : vector<2x32xf32> to vector<1x2x32xf32>
    tpu.vector_store %arg6[%c8_200, %c0_201, %c0_202], %201 {strides = array<i32>} : memref<16x2x32xf32, #tpu.memory_space<vmem>>, vector<1x2x32xf32>,
    %202 = arith.subf %197, %190 : vector<2x32xf32>
    %203 = arith.subf %202, %193 : vector<2x32xf32>
    %c8_203 = arith.constant 8 : index
    %c0_204 = arith.constant 0 : index
    %c0_205 = arith.constant 0 : index
    %204 = vector.load %arg7[%c8_203, %c0_204, %c0_205] : memref<16x2x32xf32, #tpu.memory_space<vmem>>, vector<1x2x32xf32>
    %205 = vector.shape_cast %204 : vector<1x2x32xf32> to vector<2x32xf32>
    %206 = vector.shape_cast %203 : vector<2x32xf32> to vector<1x2x32xf32>
    tpu.vector_store %arg7[%c8_203, %c0_204, %c0_205], %206 {strides = array<i32>} : memref<16x2x32xf32, #tpu.memory_space<vmem>>, vector<1x2x32xf32>,
    %c9 = arith.constant 9 : index
    %c0_206 = arith.constant 0 : index
    %c0_207 = arith.constant 0 : index
    %207 = vector.load %arg1[%c9, %c0_206, %c0_207] : memref<16x2x32xf32, #tpu.memory_space<vmem>>, vector<1x2x32xf32>
    %208 = vector.shape_cast %207 : vector<1x2x32xf32> to vector<2x32xf32>
    %c9_208 = arith.constant 9 : index
    %c0_209 = arith.constant 0 : index
    %c0_210 = arith.constant 0 : index
    %209 = vector.load %arg2[%c9_208, %c0_209, %c0_210] : memref<16x2x32xf32, #tpu.memory_space<vmem>>, vector<1x2x32xf32>
    %210 = vector.shape_cast %209 : vector<1x2x32xf32> to vector<2x32xf32>
    %c9_211 = arith.constant 9 : index
    %c0_212 = arith.constant 0 : index
    %c0_213 = arith.constant 0 : index
    %211 = vector.load %arg3[%c9_211, %c0_212, %c0_213] : memref<16x32x32xf32, #tpu.memory_space<vmem>>, vector<1x32x32xf32>
    %212 = vector.shape_cast %211 : vector<1x32x32xf32> to vector<32x32xf32>
    %cst_214 = arith.constant dense<0.000000e+00> : vector<2x32xf32>
    %213 = tpu.matmul %208, %212, %cst_214 {dimension_numbers = #tpu.dot_dimension_numbers<[1], [0], [0], [1], [0, 0, 1, 1], [], []>} : vector<2x32xf32>, vector<32x32xf32>, vector<2x32xf32> -> vector<2x32xf32>
    %c9_215 = arith.constant 9 : index
    %c0_216 = arith.constant 0 : index
    %c0_217 = arith.constant 0 : index
    %214 = vector.load %arg4[%c9_215, %c0_216, %c0_217] : memref<16x32x32xf32, #tpu.memory_space<vmem>>, vector<1x32x32xf32>
    %215 = vector.shape_cast %214 : vector<1x32x32xf32> to vector<32x32xf32>
    %cst_218 = arith.constant dense<0.000000e+00> : vector<2x32xf32>
    %216 = tpu.matmul %210, %215, %cst_218 {dimension_numbers = #tpu.dot_dimension_numbers<[1], [0], [0], [1], [0, 0, 1, 1], [], []>} : vector<2x32xf32>, vector<32x32xf32>, vector<2x32xf32> -> vector<2x32xf32>
    %217 = arith.addf %208, %210 : vector<2x32xf32>
    %c9_219 = arith.constant 9 : index
    %c0_220 = arith.constant 0 : index
    %c0_221 = arith.constant 0 : index
    %218 = vector.load %arg5[%c9_219, %c0_220, %c0_221] : memref<16x32x32xf32, #tpu.memory_space<vmem>>, vector<1x32x32xf32>
    %219 = vector.shape_cast %218 : vector<1x32x32xf32> to vector<32x32xf32>
    %cst_222 = arith.constant dense<0.000000e+00> : vector<2x32xf32>
    %220 = tpu.matmul %217, %219, %cst_222 {dimension_numbers = #tpu.dot_dimension_numbers<[1], [0], [0], [1], [0, 0, 1, 1], [], []>} : vector<2x32xf32>, vector<32x32xf32>, vector<2x32xf32> -> vector<2x32xf32>
    %221 = arith.subf %213, %216 : vector<2x32xf32>
    %c9_223 = arith.constant 9 : index
    %c0_224 = arith.constant 0 : index
    %c0_225 = arith.constant 0 : index
    %222 = vector.load %arg6[%c9_223, %c0_224, %c0_225] : memref<16x2x32xf32, #tpu.memory_space<vmem>>, vector<1x2x32xf32>
    %223 = vector.shape_cast %222 : vector<1x2x32xf32> to vector<2x32xf32>
    %224 = vector.shape_cast %221 : vector<2x32xf32> to vector<1x2x32xf32>
    tpu.vector_store %arg6[%c9_223, %c0_224, %c0_225], %224 {strides = array<i32>} : memref<16x2x32xf32, #tpu.memory_space<vmem>>, vector<1x2x32xf32>,
    %225 = arith.subf %220, %213 : vector<2x32xf32>
    %226 = arith.subf %225, %216 : vector<2x32xf32>
    %c9_226 = arith.constant 9 : index
    %c0_227 = arith.constant 0 : index
    %c0_228 = arith.constant 0 : index
    %227 = vector.load %arg7[%c9_226, %c0_227, %c0_228] : memref<16x2x32xf32, #tpu.memory_space<vmem>>, vector<1x2x32xf32>
    %228 = vector.shape_cast %227 : vector<1x2x32xf32> to vector<2x32xf32>
    %229 = vector.shape_cast %226 : vector<2x32xf32> to vector<1x2x32xf32>
    tpu.vector_store %arg7[%c9_226, %c0_227, %c0_228], %229 {strides = array<i32>} : memref<16x2x32xf32, #tpu.memory_space<vmem>>, vector<1x2x32xf32>,
    %c10 = arith.constant 10 : index
    %c0_229 = arith.constant 0 : index
    %c0_230 = arith.constant 0 : index
    %230 = vector.load %arg1[%c10, %c0_229, %c0_230] : memref<16x2x32xf32, #tpu.memory_space<vmem>>, vector<1x2x32xf32>
    %231 = vector.shape_cast %230 : vector<1x2x32xf32> to vector<2x32xf32>
    %c10_231 = arith.constant 10 : index
    %c0_232 = arith.constant 0 : index
    %c0_233 = arith.constant 0 : index
    %232 = vector.load %arg2[%c10_231, %c0_232, %c0_233] : memref<16x2x32xf32, #tpu.memory_space<vmem>>, vector<1x2x32xf32>
    %233 = vector.shape_cast %232 : vector<1x2x32xf32> to vector<2x32xf32>
    %c10_234 = arith.constant 10 : index
    %c0_235 = arith.constant 0 : index
    %c0_236 = arith.constant 0 : index
    %234 = vector.load %arg3[%c10_234, %c0_235, %c0_236] : memref<16x32x32xf32, #tpu.memory_space<vmem>>, vector<1x32x32xf32>
    %235 = vector.shape_cast %234 : vector<1x32x32xf32> to vector<32x32xf32>
    %cst_237 = arith.constant dense<0.000000e+00> : vector<2x32xf32>
    %236 = tpu.matmul %231, %235, %cst_237 {dimension_numbers = #tpu.dot_dimension_numbers<[1], [0], [0], [1], [0, 0, 1, 1], [], []>} : vector<2x32xf32>, vector<32x32xf32>, vector<2x32xf32> -> vector<2x32xf32>
    %c10_238 = arith.constant 10 : index
    %c0_239 = arith.constant 0 : index
    %c0_240 = arith.constant 0 : index
    %237 = vector.load %arg4[%c10_238, %c0_239, %c0_240] : memref<16x32x32xf32, #tpu.memory_space<vmem>>, vector<1x32x32xf32>
    %238 = vector.shape_cast %237 : vector<1x32x32xf32> to vector<32x32xf32>
    %cst_241 = arith.constant dense<0.000000e+00> : vector<2x32xf32>
    %239 = tpu.matmul %233, %238, %cst_241 {dimension_numbers = #tpu.dot_dimension_numbers<[1], [0], [0], [1], [0, 0, 1, 1], [], []>} : vector<2x32xf32>, vector<32x32xf32>, vector<2x32xf32> -> vector<2x32xf32>
    %240 = arith.addf %231, %233 : vector<2x32xf32>
    %c10_242 = arith.constant 10 : index
    %c0_243 = arith.constant 0 : index
    %c0_244 = arith.constant 0 : index
    %241 = vector.load %arg5[%c10_242, %c0_243, %c0_244] : memref<16x32x32xf32, #tpu.memory_space<vmem>>, vector<1x32x32xf32>
    %242 = vector.shape_cast %241 : vector<1x32x32xf32> to vector<32x32xf32>
    %cst_245 = arith.constant dense<0.000000e+00> : vector<2x32xf32>
    %243 = tpu.matmul %240, %242, %cst_245 {dimension_numbers = #tpu.dot_dimension_numbers<[1], [0], [0], [1], [0, 0, 1, 1], [], []>} : vector<2x32xf32>, vector<32x32xf32>, vector<2x32xf32> -> vector<2x32xf32>
    %244 = arith.subf %236, %239 : vector<2x32xf32>
    %c10_246 = arith.constant 10 : index
    %c0_247 = arith.constant 0 : index
    %c0_248 = arith.constant 0 : index
    %245 = vector.load %arg6[%c10_246, %c0_247, %c0_248] : memref<16x2x32xf32, #tpu.memory_space<vmem>>, vector<1x2x32xf32>
    %246 = vector.shape_cast %245 : vector<1x2x32xf32> to vector<2x32xf32>
    %247 = vector.shape_cast %244 : vector<2x32xf32> to vector<1x2x32xf32>
    tpu.vector_store %arg6[%c10_246, %c0_247, %c0_248], %247 {strides = array<i32>} : memref<16x2x32xf32, #tpu.memory_space<vmem>>, vector<1x2x32xf32>,
    %248 = arith.subf %243, %236 : vector<2x32xf32>
    %249 = arith.subf %248, %239 : vector<2x32xf32>
    %c10_249 = arith.constant 10 : index
    %c0_250 = arith.constant 0 : index
    %c0_251 = arith.constant 0 : index
    %250 = vector.load %arg7[%c10_249, %c0_250, %c0_251] : memref<16x2x32xf32, #tpu.memory_space<vmem>>, vector<1x2x32xf32>
    %251 = vector.shape_cast %250 : vector<1x2x32xf32> to vector<2x32xf32>
    %252 = vector.shape_cast %249 : vector<2x32xf32> to vector<1x2x32xf32>
    tpu.vector_store %arg7[%c10_249, %c0_250, %c0_251], %252 {strides = array<i32>} : memref<16x2x32xf32, #tpu.memory_space<vmem>>, vector<1x2x32xf32>,
    %c11 = arith.constant 11 : index
    %c0_252 = arith.constant 0 : index
    %c0_253 = arith.constant 0 : index
    %253 = vector.load %arg1[%c11, %c0_252, %c0_253] : memref<16x2x32xf32, #tpu.memory_space<vmem>>, vector<1x2x32xf32>
    %254 = vector.shape_cast %253 : vector<1x2x32xf32> to vector<2x32xf32>
    %c11_254 = arith.constant 11 : index
    %c0_255 = arith.constant 0 : index
    %c0_256 = arith.constant 0 : index
    %255 = vector.load %arg2[%c11_254, %c0_255, %c0_256] : memref<16x2x32xf32, #tpu.memory_space<vmem>>, vector<1x2x32xf32>
    %256 = vector.shape_cast %255 : vector<1x2x32xf32> to vector<2x32xf32>
    %c11_257 = arith.constant 11 : index
    %c0_258 = arith.constant 0 : index
    %c0_259 = arith.constant 0 : index
    %257 = vector.load %arg3[%c11_257, %c0_258, %c0_259] : memref<16x32x32xf32, #tpu.memory_space<vmem>>, vector<1x32x32xf32>
    %258 = vector.shape_cast %257 : vector<1x32x32xf32> to vector<32x32xf32>
    %cst_260 = arith.constant dense<0.000000e+00> : vector<2x32xf32>
    %259 = tpu.matmul %254, %258, %cst_260 {dimension_numbers = #tpu.dot_dimension_numbers<[1], [0], [0], [1], [0, 0, 1, 1], [], []>} : vector<2x32xf32>, vector<32x32xf32>, vector<2x32xf32> -> vector<2x32xf32>
    %c11_261 = arith.constant 11 : index
    %c0_262 = arith.constant 0 : index
    %c0_263 = arith.constant 0 : index
    %260 = vector.load %arg4[%c11_261, %c0_262, %c0_263] : memref<16x32x32xf32, #tpu.memory_space<vmem>>, vector<1x32x32xf32>
    %261 = vector.shape_cast %260 : vector<1x32x32xf32> to vector<32x32xf32>
    %cst_264 = arith.constant dense<0.000000e+00> : vector<2x32xf32>
    %262 = tpu.matmul %256, %261, %cst_264 {dimension_numbers = #tpu.dot_dimension_numbers<[1], [0], [0], [1], [0, 0, 1, 1], [], []>} : vector<2x32xf32>, vector<32x32xf32>, vector<2x32xf32> -> vector<2x32xf32>
    %263 = arith.addf %254, %256 : vector<2x32xf32>
    %c11_265 = arith.constant 11 : index
    %c0_266 = arith.constant 0 : index
    %c0_267 = arith.constant 0 : index
    %264 = vector.load %arg5[%c11_265, %c0_266, %c0_267] : memref<16x32x32xf32, #tpu.memory_space<vmem>>, vector<1x32x32xf32>
    %265 = vector.shape_cast %264 : vector<1x32x32xf32> to vector<32x32xf32>
    %cst_268 = arith.constant dense<0.000000e+00> : vector<2x32xf32>
    %266 = tpu.matmul %263, %265, %cst_268 {dimension_numbers = #tpu.dot_dimension_numbers<[1], [0], [0], [1], [0, 0, 1, 1], [], []>} : vector<2x32xf32>, vector<32x32xf32>, vector<2x32xf32> -> vector<2x32xf32>
    %267 = arith.subf %259, %262 : vector<2x32xf32>
    %c11_269 = arith.constant 11 : index
    %c0_270 = arith.constant 0 : index
    %c0_271 = arith.constant 0 : index
    %268 = vector.load %arg6[%c11_269, %c0_270, %c0_271] : memref<16x2x32xf32, #tpu.memory_space<vmem>>, vector<1x2x32xf32>
    %269 = vector.shape_cast %268 : vector<1x2x32xf32> to vector<2x32xf32>
    %270 = vector.shape_cast %267 : vector<2x32xf32> to vector<1x2x32xf32>
    tpu.vector_store %arg6[%c11_269, %c0_270, %c0_271], %270 {strides = array<i32>} : memref<16x2x32xf32, #tpu.memory_space<vmem>>, vector<1x2x32xf32>,
    %271 = arith.subf %266, %259 : vector<2x32xf32>
    %272 = arith.subf %271, %262 : vector<2x32xf32>
    %c11_272 = arith.constant 11 : index
    %c0_273 = arith.constant 0 : index
    %c0_274 = arith.constant 0 : index
    %273 = vector.load %arg7[%c11_272, %c0_273, %c0_274] : memref<16x2x32xf32, #tpu.memory_space<vmem>>, vector<1x2x32xf32>
    %274 = vector.shape_cast %273 : vector<1x2x32xf32> to vector<2x32xf32>
    %275 = vector.shape_cast %272 : vector<2x32xf32> to vector<1x2x32xf32>
    tpu.vector_store %arg7[%c11_272, %c0_273, %c0_274], %275 {strides = array<i32>} : memref<16x2x32xf32, #tpu.memory_space<vmem>>, vector<1x2x32xf32>,
    %c12 = arith.constant 12 : index
    %c0_275 = arith.constant 0 : index
    %c0_276 = arith.constant 0 : index
    %276 = vector.load %arg1[%c12, %c0_275, %c0_276] : memref<16x2x32xf32, #tpu.memory_space<vmem>>, vector<1x2x32xf32>
    %277 = vector.shape_cast %276 : vector<1x2x32xf32> to vector<2x32xf32>
    %c12_277 = arith.constant 12 : index
    %c0_278 = arith.constant 0 : index
    %c0_279 = arith.constant 0 : index
    %278 = vector.load %arg2[%c12_277, %c0_278, %c0_279] : memref<16x2x32xf32, #tpu.memory_space<vmem>>, vector<1x2x32xf32>
    %279 = vector.shape_cast %278 : vector<1x2x32xf32> to vector<2x32xf32>
    %c12_280 = arith.constant 12 : index
    %c0_281 = arith.constant 0 : index
    %c0_282 = arith.constant 0 : index
    %280 = vector.load %arg3[%c12_280, %c0_281, %c0_282] : memref<16x32x32xf32, #tpu.memory_space<vmem>>, vector<1x32x32xf32>
    %281 = vector.shape_cast %280 : vector<1x32x32xf32> to vector<32x32xf32>
    %cst_283 = arith.constant dense<0.000000e+00> : vector<2x32xf32>
    %282 = tpu.matmul %277, %281, %cst_283 {dimension_numbers = #tpu.dot_dimension_numbers<[1], [0], [0], [1], [0, 0, 1, 1], [], []>} : vector<2x32xf32>, vector<32x32xf32>, vector<2x32xf32> -> vector<2x32xf32>
    %c12_284 = arith.constant 12 : index
    %c0_285 = arith.constant 0 : index
    %c0_286 = arith.constant 0 : index
    %283 = vector.load %arg4[%c12_284, %c0_285, %c0_286] : memref<16x32x32xf32, #tpu.memory_space<vmem>>, vector<1x32x32xf32>
    %284 = vector.shape_cast %283 : vector<1x32x32xf32> to vector<32x32xf32>
    %cst_287 = arith.constant dense<0.000000e+00> : vector<2x32xf32>
    %285 = tpu.matmul %279, %284, %cst_287 {dimension_numbers = #tpu.dot_dimension_numbers<[1], [0], [0], [1], [0, 0, 1, 1], [], []>} : vector<2x32xf32>, vector<32x32xf32>, vector<2x32xf32> -> vector<2x32xf32>
    %286 = arith.addf %277, %279 : vector<2x32xf32>
    %c12_288 = arith.constant 12 : index
    %c0_289 = arith.constant 0 : index
    %c0_290 = arith.constant 0 : index
    %287 = vector.load %arg5[%c12_288, %c0_289, %c0_290] : memref<16x32x32xf32, #tpu.memory_space<vmem>>, vector<1x32x32xf32>
    %288 = vector.shape_cast %287 : vector<1x32x32xf32> to vector<32x32xf32>
    %cst_291 = arith.constant dense<0.000000e+00> : vector<2x32xf32>
    %289 = tpu.matmul %286, %288, %cst_291 {dimension_numbers = #tpu.dot_dimension_numbers<[1], [0], [0], [1], [0, 0, 1, 1], [], []>} : vector<2x32xf32>, vector<32x32xf32>, vector<2x32xf32> -> vector<2x32xf32>
    %290 = arith.subf %282, %285 : vector<2x32xf32>
    %c12_292 = arith.constant 12 : index
    %c0_293 = arith.constant 0 : index
    %c0_294 = arith.constant 0 : index
    %291 = vector.load %arg6[%c12_292, %c0_293, %c0_294] : memref<16x2x32xf32, #tpu.memory_space<vmem>>, vector<1x2x32xf32>
    %292 = vector.shape_cast %291 : vector<1x2x32xf32> to vector<2x32xf32>
    %293 = vector.shape_cast %290 : vector<2x32xf32> to vector<1x2x32xf32>
    tpu.vector_store %arg6[%c12_292, %c0_293, %c0_294], %293 {strides = array<i32>} : memref<16x2x32xf32, #tpu.memory_space<vmem>>, vector<1x2x32xf32>,
    %294 = arith.subf %289, %282 : vector<2x32xf32>
    %295 = arith.subf %294, %285 : vector<2x32xf32>
    %c12_295 = arith.constant 12 : index
    %c0_296 = arith.constant 0 : index
    %c0_297 = arith.constant 0 : index
    %296 = vector.load %arg7[%c12_295, %c0_296, %c0_297] : memref<16x2x32xf32, #tpu.memory_space<vmem>>, vector<1x2x32xf32>
    %297 = vector.shape_cast %296 : vector<1x2x32xf32> to vector<2x32xf32>
    %298 = vector.shape_cast %295 : vector<2x32xf32> to vector<1x2x32xf32>
    tpu.vector_store %arg7[%c12_295, %c0_296, %c0_297], %298 {strides = array<i32>} : memref<16x2x32xf32, #tpu.memory_space<vmem>>, vector<1x2x32xf32>,
    %c13 = arith.constant 13 : index
    %c0_298 = arith.constant 0 : index
    %c0_299 = arith.constant 0 : index
    %299 = vector.load %arg1[%c13, %c0_298, %c0_299] : memref<16x2x32xf32, #tpu.memory_space<vmem>>, vector<1x2x32xf32>
    %300 = vector.shape_cast %299 : vector<1x2x32xf32> to vector<2x32xf32>
    %c13_300 = arith.constant 13 : index
    %c0_301 = arith.constant 0 : index
    %c0_302 = arith.constant 0 : index
    %301 = vector.load %arg2[%c13_300, %c0_301, %c0_302] : memref<16x2x32xf32, #tpu.memory_space<vmem>>, vector<1x2x32xf32>
    %302 = vector.shape_cast %301 : vector<1x2x32xf32> to vector<2x32xf32>
    %c13_303 = arith.constant 13 : index
    %c0_304 = arith.constant 0 : index
    %c0_305 = arith.constant 0 : index
    %303 = vector.load %arg3[%c13_303, %c0_304, %c0_305] : memref<16x32x32xf32, #tpu.memory_space<vmem>>, vector<1x32x32xf32>
    %304 = vector.shape_cast %303 : vector<1x32x32xf32> to vector<32x32xf32>
    %cst_306 = arith.constant dense<0.000000e+00> : vector<2x32xf32>
    %305 = tpu.matmul %300, %304, %cst_306 {dimension_numbers = #tpu.dot_dimension_numbers<[1], [0], [0], [1], [0, 0, 1, 1], [], []>} : vector<2x32xf32>, vector<32x32xf32>, vector<2x32xf32> -> vector<2x32xf32>
    %c13_307 = arith.constant 13 : index
    %c0_308 = arith.constant 0 : index
    %c0_309 = arith.constant 0 : index
    %306 = vector.load %arg4[%c13_307, %c0_308, %c0_309] : memref<16x32x32xf32, #tpu.memory_space<vmem>>, vector<1x32x32xf32>
    %307 = vector.shape_cast %306 : vector<1x32x32xf32> to vector<32x32xf32>
    %cst_310 = arith.constant dense<0.000000e+00> : vector<2x32xf32>
    %308 = tpu.matmul %302, %307, %cst_310 {dimension_numbers = #tpu.dot_dimension_numbers<[1], [0], [0], [1], [0, 0, 1, 1], [], []>} : vector<2x32xf32>, vector<32x32xf32>, vector<2x32xf32> -> vector<2x32xf32>
    %309 = arith.addf %300, %302 : vector<2x32xf32>
    %c13_311 = arith.constant 13 : index
    %c0_312 = arith.constant 0 : index
    %c0_313 = arith.constant 0 : index
    %310 = vector.load %arg5[%c13_311, %c0_312, %c0_313] : memref<16x32x32xf32, #tpu.memory_space<vmem>>, vector<1x32x32xf32>
    %311 = vector.shape_cast %310 : vector<1x32x32xf32> to vector<32x32xf32>
    %cst_314 = arith.constant dense<0.000000e+00> : vector<2x32xf32>
    %312 = tpu.matmul %309, %311, %cst_314 {dimension_numbers = #tpu.dot_dimension_numbers<[1], [0], [0], [1], [0, 0, 1, 1], [], []>} : vector<2x32xf32>, vector<32x32xf32>, vector<2x32xf32> -> vector<2x32xf32>
    %313 = arith.subf %305, %308 : vector<2x32xf32>
    %c13_315 = arith.constant 13 : index
    %c0_316 = arith.constant 0 : index
    %c0_317 = arith.constant 0 : index
    %314 = vector.load %arg6[%c13_315, %c0_316, %c0_317] : memref<16x2x32xf32, #tpu.memory_space<vmem>>, vector<1x2x32xf32>
    %315 = vector.shape_cast %314 : vector<1x2x32xf32> to vector<2x32xf32>
    %316 = vector.shape_cast %313 : vector<2x32xf32> to vector<1x2x32xf32>
    tpu.vector_store %arg6[%c13_315, %c0_316, %c0_317], %316 {strides = array<i32>} : memref<16x2x32xf32, #tpu.memory_space<vmem>>, vector<1x2x32xf32>,
    %317 = arith.subf %312, %305 : vector<2x32xf32>
    %318 = arith.subf %317, %308 : vector<2x32xf32>
    %c13_318 = arith.constant 13 : index
    %c0_319 = arith.constant 0 : index
    %c0_320 = arith.constant 0 : index
    %319 = vector.load %arg7[%c13_318, %c0_319, %c0_320] : memref<16x2x32xf32, #tpu.memory_space<vmem>>, vector<1x2x32xf32>
    %320 = vector.shape_cast %319 : vector<1x2x32xf32> to vector<2x32xf32>
    %321 = vector.shape_cast %318 : vector<2x32xf32> to vector<1x2x32xf32>
    tpu.vector_store %arg7[%c13_318, %c0_319, %c0_320], %321 {strides = array<i32>} : memref<16x2x32xf32, #tpu.memory_space<vmem>>, vector<1x2x32xf32>,
    %c14 = arith.constant 14 : index
    %c0_321 = arith.constant 0 : index
    %c0_322 = arith.constant 0 : index
    %322 = vector.load %arg1[%c14, %c0_321, %c0_322] : memref<16x2x32xf32, #tpu.memory_space<vmem>>, vector<1x2x32xf32>
    %323 = vector.shape_cast %322 : vector<1x2x32xf32> to vector<2x32xf32>
    %c14_323 = arith.constant 14 : index
    %c0_324 = arith.constant 0 : index
    %c0_325 = arith.constant 0 : index
    %324 = vector.load %arg2[%c14_323, %c0_324, %c0_325] : memref<16x2x32xf32, #tpu.memory_space<vmem>>, vector<1x2x32xf32>
    %325 = vector.shape_cast %324 : vector<1x2x32xf32> to vector<2x32xf32>
    %c14_326 = arith.constant 14 : index
    %c0_327 = arith.constant 0 : index
    %c0_328 = arith.constant 0 : index
    %326 = vector.load %arg3[%c14_326, %c0_327, %c0_328] : memref<16x32x32xf32, #tpu.memory_space<vmem>>, vector<1x32x32xf32>
    %327 = vector.shape_cast %326 : vector<1x32x32xf32> to vector<32x32xf32>
    %cst_329 = arith.constant dense<0.000000e+00> : vector<2x32xf32>
    %328 = tpu.matmul %323, %327, %cst_329 {dimension_numbers = #tpu.dot_dimension_numbers<[1], [0], [0], [1], [0, 0, 1, 1], [], []>} : vector<2x32xf32>, vector<32x32xf32>, vector<2x32xf32> -> vector<2x32xf32>
    %c14_330 = arith.constant 14 : index
    %c0_331 = arith.constant 0 : index
    %c0_332 = arith.constant 0 : index
    %329 = vector.load %arg4[%c14_330, %c0_331, %c0_332] : memref<16x32x32xf32, #tpu.memory_space<vmem>>, vector<1x32x32xf32>
    %330 = vector.shape_cast %329 : vector<1x32x32xf32> to vector<32x32xf32>
    %cst_333 = arith.constant dense<0.000000e+00> : vector<2x32xf32>
    %331 = tpu.matmul %325, %330, %cst_333 {dimension_numbers = #tpu.dot_dimension_numbers<[1], [0], [0], [1], [0, 0, 1, 1], [], []>} : vector<2x32xf32>, vector<32x32xf32>, vector<2x32xf32> -> vector<2x32xf32>
    %332 = arith.addf %323, %325 : vector<2x32xf32>
    %c14_334 = arith.constant 14 : index
    %c0_335 = arith.constant 0 : index
    %c0_336 = arith.constant 0 : index
    %333 = vector.load %arg5[%c14_334, %c0_335, %c0_336] : memref<16x32x32xf32, #tpu.memory_space<vmem>>, vector<1x32x32xf32>
    %334 = vector.shape_cast %333 : vector<1x32x32xf32> to vector<32x32xf32>
    %cst_337 = arith.constant dense<0.000000e+00> : vector<2x32xf32>
    %335 = tpu.matmul %332, %334, %cst_337 {dimension_numbers = #tpu.dot_dimension_numbers<[1], [0], [0], [1], [0, 0, 1, 1], [], []>} : vector<2x32xf32>, vector<32x32xf32>, vector<2x32xf32> -> vector<2x32xf32>
    %336 = arith.subf %328, %331 : vector<2x32xf32>
    %c14_338 = arith.constant 14 : index
    %c0_339 = arith.constant 0 : index
    %c0_340 = arith.constant 0 : index
    %337 = vector.load %arg6[%c14_338, %c0_339, %c0_340] : memref<16x2x32xf32, #tpu.memory_space<vmem>>, vector<1x2x32xf32>
    %338 = vector.shape_cast %337 : vector<1x2x32xf32> to vector<2x32xf32>
    %339 = vector.shape_cast %336 : vector<2x32xf32> to vector<1x2x32xf32>
    tpu.vector_store %arg6[%c14_338, %c0_339, %c0_340], %339 {strides = array<i32>} : memref<16x2x32xf32, #tpu.memory_space<vmem>>, vector<1x2x32xf32>,
    %340 = arith.subf %335, %328 : vector<2x32xf32>
    %341 = arith.subf %340, %331 : vector<2x32xf32>
    %c14_341 = arith.constant 14 : index
    %c0_342 = arith.constant 0 : index
    %c0_343 = arith.constant 0 : index
    %342 = vector.load %arg7[%c14_341, %c0_342, %c0_343] : memref<16x2x32xf32, #tpu.memory_space<vmem>>, vector<1x2x32xf32>
    %343 = vector.shape_cast %342 : vector<1x2x32xf32> to vector<2x32xf32>
    %344 = vector.shape_cast %341 : vector<2x32xf32> to vector<1x2x32xf32>
    tpu.vector_store %arg7[%c14_341, %c0_342, %c0_343], %344 {strides = array<i32>} : memref<16x2x32xf32, #tpu.memory_space<vmem>>, vector<1x2x32xf32>,
    %c15 = arith.constant 15 : index
    %c0_344 = arith.constant 0 : index
    %c0_345 = arith.constant 0 : index
    %345 = vector.load %arg1[%c15, %c0_344, %c0_345] : memref<16x2x32xf32, #tpu.memory_space<vmem>>, vector<1x2x32xf32>
    %346 = vector.shape_cast %345 : vector<1x2x32xf32> to vector<2x32xf32>
    %c15_346 = arith.constant 15 : index
    %c0_347 = arith.constant 0 : index
    %c0_348 = arith.constant 0 : index
    %347 = vector.load %arg2[%c15_346, %c0_347, %c0_348] : memref<16x2x32xf32, #tpu.memory_space<vmem>>, vector<1x2x32xf32>
    %348 = vector.shape_cast %347 : vector<1x2x32xf32> to vector<2x32xf32>
    %c15_349 = arith.constant 15 : index
    %c0_350 = arith.constant 0 : index
    %c0_351 = arith.constant 0 : index
    %349 = vector.load %arg3[%c15_349, %c0_350, %c0_351] : memref<16x32x32xf32, #tpu.memory_space<vmem>>, vector<1x32x32xf32>
    %350 = vector.shape_cast %349 : vector<1x32x32xf32> to vector<32x32xf32>
    %cst_352 = arith.constant dense<0.000000e+00> : vector<2x32xf32>
    %351 = tpu.matmul %346, %350, %cst_352 {dimension_numbers = #tpu.dot_dimension_numbers<[1], [0], [0], [1], [0, 0, 1, 1], [], []>} : vector<2x32xf32>, vector<32x32xf32>, vector<2x32xf32> -> vector<2x32xf32>
    %c15_353 = arith.constant 15 : index
    %c0_354 = arith.constant 0 : index
    %c0_355 = arith.constant 0 : index
    %352 = vector.load %arg4[%c15_353, %c0_354, %c0_355] : memref<16x32x32xf32, #tpu.memory_space<vmem>>, vector<1x32x32xf32>
    %353 = vector.shape_cast %352 : vector<1x32x32xf32> to vector<32x32xf32>
    %cst_356 = arith.constant dense<0.000000e+00> : vector<2x32xf32>
    %354 = tpu.matmul %348, %353, %cst_356 {dimension_numbers = #tpu.dot_dimension_numbers<[1], [0], [0], [1], [0, 0, 1, 1], [], []>} : vector<2x32xf32>, vector<32x32xf32>, vector<2x32xf32> -> vector<2x32xf32>
    %355 = arith.addf %346, %348 : vector<2x32xf32>
    %c15_357 = arith.constant 15 : index
    %c0_358 = arith.constant 0 : index
    %c0_359 = arith.constant 0 : index
    %356 = vector.load %arg5[%c15_357, %c0_358, %c0_359] : memref<16x32x32xf32, #tpu.memory_space<vmem>>, vector<1x32x32xf32>
    %357 = vector.shape_cast %356 : vector<1x32x32xf32> to vector<32x32xf32>
    %cst_360 = arith.constant dense<0.000000e+00> : vector<2x32xf32>
    %358 = tpu.matmul %355, %357, %cst_360 {dimension_numbers = #tpu.dot_dimension_numbers<[1], [0], [0], [1], [0, 0, 1, 1], [], []>} : vector<2x32xf32>, vector<32x32xf32>, vector<2x32xf32> -> vector<2x32xf32>
    %359 = arith.subf %351, %354 : vector<2x32xf32>
    %c15_361 = arith.constant 15 : index
    %c0_362 = arith.constant 0 : index
    %c0_363 = arith.constant 0 : index
    %360 = vector.load %arg6[%c15_361, %c0_362, %c0_363] : memref<16x2x32xf32, #tpu.memory_space<vmem>>, vector<1x2x32xf32>
    %361 = vector.shape_cast %360 : vector<1x2x32xf32> to vector<2x32xf32>
    %362 = vector.shape_cast %359 : vector<2x32xf32> to vector<1x2x32xf32>
    tpu.vector_store %arg6[%c15_361, %c0_362, %c0_363], %362 {strides = array<i32>} : memref<16x2x32xf32, #tpu.memory_space<vmem>>, vector<1x2x32xf32>,
    %363 = arith.subf %358, %351 : vector<2x32xf32>
    %364 = arith.subf %363, %354 : vector<2x32xf32>
    %c15_364 = arith.constant 15 : index
    %c0_365 = arith.constant 0 : index
    %c0_366 = arith.constant 0 : index
    %365 = vector.load %arg7[%c15_364, %c0_365, %c0_366] : memref<16x2x32xf32, #tpu.memory_space<vmem>>, vector<1x2x32xf32>
    %366 = vector.shape_cast %365 : vector<1x2x32xf32> to vector<2x32xf32>
    %367 = vector.shape_cast %364 : vector<2x32xf32> to vector<1x2x32xf32>
    tpu.vector_store %arg7[%c15_364, %c0_365, %c0_366], %367 {strides = array<i32>} : memref<16x2x32xf32, #tpu.memory_space<vmem>>, vector<1x2x32xf32>,
    return
  }
  func.func @transform_0(%arg0: i32) -> (i32, i32, i32) {
    %c0_i32 = arith.constant 0 : i32
    %c0_i32_0 = arith.constant 0 : i32
    %c0_i32_1 = arith.constant 0 : i32
    return %arg0, %c0_i32, %c0_i32_0 : i32, i32, i32
  }
  func.func @transform_1(%arg0: i32) -> (i32, i32, i32) {
    %c0_i32 = arith.constant 0 : i32
    %c0_i32_0 = arith.constant 0 : i32
    %c0_i32_1 = arith.constant 0 : i32
    return %arg0, %c0_i32, %c0_i32_0 : i32, i32, i32
  }
  func.func @transform_2(%arg0: i32) -> (i32, i32, i32) {
    %c0_i32 = arith.constant 0 : i32
    %c0_i32_0 = arith.constant 0 : i32
    %c0_i32_1 = arith.constant 0 : i32
    return %arg0, %c0_i32, %c0_i32_0 : i32, i32, i32
  }
  func.func @transform_3(%arg0: i32) -> (i32, i32, i32) {
    %c0_i32 = arith.constant 0 : i32
    %c0_i32_0 = arith.constant 0 : i32
    %c0_i32_1 = arith.constant 0 : i32
    return %arg0, %c0_i32, %c0_i32_0 : i32, i32, i32
  }
  func.func @transform_4(%arg0: i32) -> (i32, i32, i32) {
    %c0_i32 = arith.constant 0 : i32
    %c0_i32_0 = arith.constant 0 : i32
    %c0_i32_1 = arith.constant 0 : i32
    return %arg0, %c0_i32, %c0_i32_0 : i32, i32, i32
  }
  func.func @transform_5(%arg0: i32) -> (i32, i32, i32) {
    %c0_i32 = arith.constant 0 : i32
    %c0_i32_0 = arith.constant 0 : i32
    %c0_i32_1 = arith.constant 0 : i32
    return %arg0, %c0_i32, %c0_i32_0 : i32, i32, i32
  }
  func.func @transform_6(%arg0: i32) -> (i32, i32, i32) {
    %c0_i32 = arith.constant 0 : i32
    %c0_i32_0 = arith.constant 0 : i32
    %c0_i32_1 = arith.constant 0 : i32
    return %arg0, %c0_i32, %c0_i32_0 : i32, i32, i32
  }
}

module attributes {stable_mosaic.version = 11 : i64} {
  func.func @_fourier_layer_kernel(%arg0: i32, %arg1: memref<256x32xf32, #tpu.memory_space<vmem>>, %arg2: memref<256x32xf32, #tpu.memory_space<vmem>>, %arg3: memref<32x32xf32, #tpu.memory_space<vmem>>, %arg4: memref<1x32xf32, #tpu.memory_space<vmem>>, %arg5: memref<256x32xf32, #tpu.memory_space<vmem>>) attributes {dimension_semantics = [#tpu.dimension_semantics<parallel>], iteration_bounds = array<i64: 2>, scalar_prefetch = 0 : i64, scratch_operands = 0 : i64, tpu.core_type = #tpu.core_type<tc>, window_params = [{transform_indices = @transform_0, window_bounds = array<i64: 256, 32>}, {transform_indices = @transform_1, window_bounds = array<i64: 256, 32>}, {pipeline_mode = #tpu.pipeline_mode<synchronous>, transform_indices = @transform_2, window_bounds = array<i64: 32, 32>}, {pipeline_mode = #tpu.pipeline_mode<synchronous>, transform_indices = @transform_3, window_bounds = array<i64: 1, 32>}, {transform_indices = @transform_4, window_bounds = array<i64: 256, 32>}]} {
    %c0 = arith.constant 0 : index
    %c0_0 = arith.constant 0 : index
    %0 = vector.load %arg1[%c0, %c0_0] : memref<256x32xf32, #tpu.memory_space<vmem>>, vector<256x32xf32>
    %c0_1 = arith.constant 0 : index
    %c0_2 = arith.constant 0 : index
    %1 = vector.load %arg3[%c0_1, %c0_2] : memref<32x32xf32, #tpu.memory_space<vmem>>, vector<32x32xf32>
    %cst = arith.constant dense<0.000000e+00> : vector<256x32xf32>
    %2 = tpu.matmul %0, %1, %cst {dimension_numbers = #tpu.dot_dimension_numbers<[1], [0], [0], [1], [0, 0, 1, 1], [], []>} : vector<256x32xf32>, vector<32x32xf32>, vector<256x32xf32> -> vector<256x32xf32>
    %c0_3 = arith.constant 0 : index
    %c0_4 = arith.constant 0 : index
    %3 = vector.load %arg4[%c0_3, %c0_4] : memref<1x32xf32, #tpu.memory_space<vmem>>, vector<1x32xf32>
    %4 = vector.broadcast %3 : vector<1x32xf32> to vector<256x32xf32>
    %5 = arith.addf %2, %4 : vector<256x32xf32>
    %c0_5 = arith.constant 0 : index
    %c0_6 = arith.constant 0 : index
    %6 = vector.load %arg2[%c0_5, %c0_6] : memref<256x32xf32, #tpu.memory_space<vmem>>, vector<256x32xf32>
    %7 = arith.addf %5, %6 : vector<256x32xf32>
    %cst_7 = arith.constant 5.000000e-01 : f32
    %8 = vector.broadcast %cst_7 : f32 to vector<256x32xf32>
    %9 = arith.mulf %8, %7 : vector<256x32xf32>
    %cst_8 = arith.constant 0.707106769 : f32
    %10 = vector.broadcast %cst_8 : f32 to vector<256x32xf32>
    %11 = arith.mulf %7, %10 : vector<256x32xf32>
    %cst_9 = arith.constant 0.000000e+00 : f32
    %12 = vector.broadcast %cst_9 : f32 to vector<256x32xf32>
    %13 = arith.cmpf olt, %11, %12 : vector<256x32xf32>
    %cst_10 = arith.constant -1.000000e+00 : f32
    %cst_11 = arith.constant 1.000000e+00 : f32
    %14 = vector.broadcast %cst_10 : f32 to vector<256x32xf32>
    %15 = vector.broadcast %cst_11 : f32 to vector<256x32xf32>
    %16 = arith.select %13, %14, %15 : vector<256x32xi1>, vector<256x32xf32>
    %17 = math.absf %11 : vector<256x32xf32>
    %cst_12 = arith.constant 0.327591091 : f32
    %18 = vector.broadcast %cst_12 : f32 to vector<256x32xf32>
    %19 = arith.mulf %18, %17 : vector<256x32xf32>
    %cst_13 = arith.constant 1.000000e+00 : f32
    %20 = vector.broadcast %cst_13 : f32 to vector<256x32xf32>
    %21 = arith.addf %20, %19 : vector<256x32xf32>
    %22 = tpu.reciprocal %21 {approx = true} : vector<256x32xf32> -> vector<256x32xf32>
    %cst_14 = arith.constant 1.06140542 : f32
    %23 = vector.broadcast %cst_14 : f32 to vector<256x32xf32>
    %24 = arith.mulf %23, %22 : vector<256x32xf32>
    %cst_15 = arith.constant -1.45315206 : f32
    %25 = vector.broadcast %cst_15 : f32 to vector<256x32xf32>
    %26 = arith.addf %24, %25 : vector<256x32xf32>
    %27 = arith.mulf %26, %22 : vector<256x32xf32>
    %cst_16 = arith.constant 1.42141378 : f32
    %28 = vector.broadcast %cst_16 : f32 to vector<256x32xf32>
    %29 = arith.addf %27, %28 : vector<256x32xf32>
    %30 = arith.mulf %29, %22 : vector<256x32xf32>
    %cst_17 = arith.constant -0.284496725 : f32
    %31 = vector.broadcast %cst_17 : f32 to vector<256x32xf32>
    %32 = arith.addf %30, %31 : vector<256x32xf32>
    %33 = arith.mulf %32, %22 : vector<256x32xf32>
    %cst_18 = arith.constant 0.254829586 : f32
    %34 = vector.broadcast %cst_18 : f32 to vector<256x32xf32>
    %35 = arith.addf %33, %34 : vector<256x32xf32>
    %36 = arith.mulf %35, %22 : vector<256x32xf32>
    %cst_19 = arith.constant 0.000000e+00 : f32
    %37 = vector.broadcast %cst_19 : f32 to vector<256x32xf32>
    %38 = arith.subf %37, %17 : vector<256x32xf32>
    %39 = arith.mulf %38, %17 : vector<256x32xf32>
    %40 = math.exp %39 : vector<256x32xf32>
    %41 = arith.mulf %36, %40 : vector<256x32xf32>
    %cst_20 = arith.constant 1.000000e+00 : f32
    %42 = vector.broadcast %cst_20 : f32 to vector<256x32xf32>
    %43 = arith.subf %42, %41 : vector<256x32xf32>
    %44 = arith.mulf %16, %43 : vector<256x32xf32>
    %cst_21 = arith.constant 1.000000e+00 : f32
    %45 = vector.broadcast %cst_21 : f32 to vector<256x32xf32>
    %46 = arith.addf %45, %44 : vector<256x32xf32>
    %47 = arith.mulf %9, %46 : vector<256x32xf32>
    %c0_22 = arith.constant 0 : index
    %c0_23 = arith.constant 0 : index
    %48 = vector.load %arg5[%c0_22, %c0_23] : memref<256x32xf32, #tpu.memory_space<vmem>>, vector<256x32xf32>
    tpu.vector_store %arg5[%c0_22, %c0_23], %47 {strides = array<i32>} : memref<256x32xf32, #tpu.memory_space<vmem>>, vector<256x32xf32>,
    return
  }
  func.func @transform_0(%arg0: i32) -> (i32, i32) {
    %c0_i32 = arith.constant 0 : i32
    %c0_i32_0 = arith.constant 0 : i32
    return %arg0, %c0_i32 : i32, i32
  }
  func.func @transform_1(%arg0: i32) -> (i32, i32) {
    %c0_i32 = arith.constant 0 : i32
    %c0_i32_0 = arith.constant 0 : i32
    return %arg0, %c0_i32 : i32, i32
  }
  func.func @transform_2(%arg0: i32) -> (i32, i32) {
    %c0_i32 = arith.constant 0 : i32
    %c0_i32_0 = arith.constant 0 : i32
    %c0_i32_1 = arith.constant 0 : i32
    return %c0_i32, %c0_i32_0 : i32, i32
  }
  func.func @transform_3(%arg0: i32) -> (i32, i32) {
    %c0_i32 = arith.constant 0 : i32
    %c0_i32_0 = arith.constant 0 : i32
    %c0_i32_1 = arith.constant 0 : i32
    return %c0_i32, %c0_i32_0 : i32, i32
  }
  func.func @transform_4(%arg0: i32) -> (i32, i32) {
    %c0_i32 = arith.constant 0 : i32
    %c0_i32_0 = arith.constant 0 : i32
    return %arg0, %c0_i32 : i32, i32
  }
}

module attributes {stable_mosaic.version = 11 : i64} {
  func.func @_head_kernel(%arg0: i32, %arg1: memref<256x32xf32, #tpu.memory_space<vmem>>, %arg2: memref<32x256xf32, #tpu.memory_space<vmem>>, %arg3: memref<1x256xf32, #tpu.memory_space<vmem>>, %arg4: memref<256x128xf32, #tpu.memory_space<vmem>>, %arg5: memref<1x128xf32, #tpu.memory_space<vmem>>, %arg6: memref<256x128xf32, #tpu.memory_space<vmem>>, %arg7: memref<256x256xf32, #tpu.memory_space<vmem>>) attributes {dimension_semantics = [#tpu.dimension_semantics<parallel>], iteration_bounds = array<i64: 2>, scalar_prefetch = 0 : i64, scratch_operands = 1 : i64, tpu.core_type = #tpu.core_type<tc>, window_params = [{transform_indices = @transform_0, window_bounds = array<i64: 256, 32>}, {pipeline_mode = #tpu.pipeline_mode<synchronous>, transform_indices = @transform_1, window_bounds = array<i64: 32, 256>}, {pipeline_mode = #tpu.pipeline_mode<synchronous>, transform_indices = @transform_2, window_bounds = array<i64: 1, 256>}, {pipeline_mode = #tpu.pipeline_mode<synchronous>, transform_indices = @transform_3, window_bounds = array<i64: 256, 128>}, {pipeline_mode = #tpu.pipeline_mode<synchronous>, transform_indices = @transform_4, window_bounds = array<i64: 1, 128>}, {transform_indices = @transform_5, window_bounds = array<i64: 256, 128>}]} {
    %c0 = arith.constant 0 : index
    %c0_0 = arith.constant 0 : index
    %0 = vector.load %arg1[%c0, %c0_0] : memref<256x32xf32, #tpu.memory_space<vmem>>, vector<256x32xf32>
    %c0_1 = arith.constant 0 : index
    %c0_2 = arith.constant 0 : index
    %1 = vector.load %arg2[%c0_1, %c0_2] : memref<32x256xf32, #tpu.memory_space<vmem>>, vector<32x256xf32>
    %cst = arith.constant dense<0.000000e+00> : vector<256x256xf32>
    %2 = tpu.matmul %0, %1, %cst {dimension_numbers = #tpu.dot_dimension_numbers<[1], [0], [0], [1], [0, 0, 1, 1], [], []>} : vector<256x32xf32>, vector<32x256xf32>, vector<256x256xf32> -> vector<256x256xf32>
    %c0_3 = arith.constant 0 : index
    %c0_4 = arith.constant 0 : index
    %3 = vector.load %arg3[%c0_3, %c0_4] : memref<1x256xf32, #tpu.memory_space<vmem>>, vector<1x256xf32>
    %4 = vector.broadcast %3 : vector<1x256xf32> to vector<256x256xf32>
    %5 = arith.addf %2, %4 : vector<256x256xf32>
    %cst_5 = arith.constant 5.000000e-01 : f32
    %6 = vector.broadcast %cst_5 : f32 to vector<256x256xf32>
    %7 = arith.mulf %6, %5 : vector<256x256xf32>
    %cst_6 = arith.constant 0.707106769 : f32
    %8 = vector.broadcast %cst_6 : f32 to vector<256x256xf32>
    %9 = arith.mulf %5, %8 : vector<256x256xf32>
    %cst_7 = arith.constant 0.000000e+00 : f32
    %10 = vector.broadcast %cst_7 : f32 to vector<256x256xf32>
    %11 = arith.cmpf olt, %9, %10 : vector<256x256xf32>
    %cst_8 = arith.constant -1.000000e+00 : f32
    %cst_9 = arith.constant 1.000000e+00 : f32
    %12 = vector.broadcast %cst_8 : f32 to vector<256x256xf32>
    %13 = vector.broadcast %cst_9 : f32 to vector<256x256xf32>
    %14 = arith.select %11, %12, %13 : vector<256x256xi1>, vector<256x256xf32>
    %15 = math.absf %9 : vector<256x256xf32>
    %cst_10 = arith.constant 0.327591091 : f32
    %16 = vector.broadcast %cst_10 : f32 to vector<256x256xf32>
    %17 = arith.mulf %16, %15 : vector<256x256xf32>
    %cst_11 = arith.constant 1.000000e+00 : f32
    %18 = vector.broadcast %cst_11 : f32 to vector<256x256xf32>
    %19 = arith.addf %18, %17 : vector<256x256xf32>
    %20 = tpu.reciprocal %19 {approx = true} : vector<256x256xf32> -> vector<256x256xf32>
    %cst_12 = arith.constant 1.06140542 : f32
    %21 = vector.broadcast %cst_12 : f32 to vector<256x256xf32>
    %22 = arith.mulf %21, %20 : vector<256x256xf32>
    %cst_13 = arith.constant -1.45315206 : f32
    %23 = vector.broadcast %cst_13 : f32 to vector<256x256xf32>
    %24 = arith.addf %22, %23 : vector<256x256xf32>
    %25 = arith.mulf %24, %20 : vector<256x256xf32>
    %cst_14 = arith.constant 1.42141378 : f32
    %26 = vector.broadcast %cst_14 : f32 to vector<256x256xf32>
    %27 = arith.addf %25, %26 : vector<256x256xf32>
    %28 = arith.mulf %27, %20 : vector<256x256xf32>
    %cst_15 = arith.constant -0.284496725 : f32
    %29 = vector.broadcast %cst_15 : f32 to vector<256x256xf32>
    %30 = arith.addf %28, %29 : vector<256x256xf32>
    %31 = arith.mulf %30, %20 : vector<256x256xf32>
    %cst_16 = arith.constant 0.254829586 : f32
    %32 = vector.broadcast %cst_16 : f32 to vector<256x256xf32>
    %33 = arith.addf %31, %32 : vector<256x256xf32>
    %34 = arith.mulf %33, %20 : vector<256x256xf32>
    %cst_17 = arith.constant 0.000000e+00 : f32
    %35 = vector.broadcast %cst_17 : f32 to vector<256x256xf32>
    %36 = arith.subf %35, %15 : vector<256x256xf32>
    %37 = arith.mulf %36, %15 : vector<256x256xf32>
    %38 = math.exp %37 : vector<256x256xf32>
    %39 = arith.mulf %34, %38 : vector<256x256xf32>
    %cst_18 = arith.constant 1.000000e+00 : f32
    %40 = vector.broadcast %cst_18 : f32 to vector<256x256xf32>
    %41 = arith.subf %40, %39 : vector<256x256xf32>
    %42 = arith.mulf %14, %41 : vector<256x256xf32>
    %cst_19 = arith.constant 1.000000e+00 : f32
    %43 = vector.broadcast %cst_19 : f32 to vector<256x256xf32>
    %44 = arith.addf %43, %42 : vector<256x256xf32>
    %45 = arith.mulf %7, %44 : vector<256x256xf32>
    %c0_20 = arith.constant 0 : index
    %c0_21 = arith.constant 0 : index
    %46 = vector.load %arg7[%c0_20, %c0_21] : memref<256x256xf32, #tpu.memory_space<vmem>>, vector<256x256xf32>
    tpu.vector_store %arg7[%c0_20, %c0_21], %45 {strides = array<i32>} : memref<256x256xf32, #tpu.memory_space<vmem>>, vector<256x256xf32>,
    %c0_22 = arith.constant 0 : index
    %c0_23 = arith.constant 0 : index
    %47 = vector.load %arg7[%c0_22, %c0_23] : memref<256x256xf32, #tpu.memory_space<vmem>>, vector<256x256xf32>
    %c0_24 = arith.constant 0 : index
    %c0_25 = arith.constant 0 : index
    %48 = vector.load %arg4[%c0_24, %c0_25] : memref<256x128xf32, #tpu.memory_space<vmem>>, vector<256x128xf32>
    %cst_26 = arith.constant dense<0.000000e+00> : vector<256x128xf32>
    %49 = tpu.matmul %47, %48, %cst_26 {dimension_numbers = #tpu.dot_dimension_numbers<[1], [0], [0], [1], [0, 0, 1, 1], [], []>} : vector<256x256xf32>, vector<256x128xf32>, vector<256x128xf32> -> vector<256x128xf32>
    %c0_27 = arith.constant 0 : index
    %c0_28 = arith.constant 0 : index
    %50 = vector.load %arg5[%c0_27, %c0_28] : memref<1x128xf32, #tpu.memory_space<vmem>>, vector<1x128xf32>
    %51 = vector.broadcast %50 : vector<1x128xf32> to vector<256x128xf32>
    %52 = arith.addf %49, %51 : vector<256x128xf32>
    %c0_29 = arith.constant 0 : index
    %c0_30 = arith.constant 0 : index
    %53 = vector.load %arg6[%c0_29, %c0_30] : memref<256x128xf32, #tpu.memory_space<vmem>>, vector<256x128xf32>
    tpu.vector_store %arg6[%c0_29, %c0_30], %52 {strides = array<i32>} : memref<256x128xf32, #tpu.memory_space<vmem>>, vector<256x128xf32>,
    return
  }
  func.func @transform_0(%arg0: i32) -> (i32, i32) {
    %c0_i32 = arith.constant 0 : i32
    %c0_i32_0 = arith.constant 0 : i32
    return %arg0, %c0_i32 : i32, i32
  }
  func.func @transform_1(%arg0: i32) -> (i32, i32) {
    %c0_i32 = arith.constant 0 : i32
    %c0_i32_0 = arith.constant 0 : i32
    %c0_i32_1 = arith.constant 0 : i32
    return %c0_i32, %c0_i32_0 : i32, i32
  }
  func.func @transform_2(%arg0: i32) -> (i32, i32) {
    %c0_i32 = arith.constant 0 : i32
    %c0_i32_0 = arith.constant 0 : i32
    %c0_i32_1 = arith.constant 0 : i32
    return %c0_i32, %c0_i32_0 : i32, i32
  }
  func.func @transform_3(%arg0: i32) -> (i32, i32) {
    %c0_i32 = arith.constant 0 : i32
    %c0_i32_0 = arith.constant 0 : i32
    %c0_i32_1 = arith.constant 0 : i32
    return %c0_i32, %c0_i32_0 : i32, i32
  }
  func.func @transform_4(%arg0: i32) -> (i32, i32) {
    %c0_i32 = arith.constant 0 : i32
    %c0_i32_0 = arith.constant 0 : i32
    %c0_i32_1 = arith.constant 0 : i32
    return %c0_i32, %c0_i32_0 : i32, i32
  }
  func.func @transform_5(%arg0: i32) -> (i32, i32) {
    %c0_i32 = arith.constant 0 : i32
    %c0_i32_0 = arith.constant 0 : i32
    return %arg0, %c0_i32 : i32, i32
  }
}

</mosaic_0001>

<bundles_post_ra>
// kernel: fno2d_forward.10
= control target key start
LH: loop header
LB: loop body
LE: loop exit
PB: predicated region body
PF: predicated region fallthrough
CT: control target
= control target key end

     0   :  { %s776_s12 = smov 0   ;;  %s1154_s0 = inlined_call_operand.vmem [shape: f32[512,2], index: 0, kind: input, shape index: {}]   ;;  %s1155_s1 = inlined_call_operand.vmem [shape: f32[2,32], index: 1, kind: input, shape index: {}]   ;;  %s1156_s2 = inlined_call_operand.vmem [shape: f32[1,32], index: 2, kind: input, shape index: {}]   ;;  %s1157_s3 = inlined_call_operand.vmem [shape: f32[512,32], index: 3, kind: output, shape index: {}]  }
   0x1 LB: > { %s718_s13 = sadd.s32 4294967295, %s752_s12   ;;  %p722_p0 = scmp.ge.s32.totalorder %s752_s12, 1  ;;  %s752_s12 = sphi %s776_s12, %s13_s12  }
   0x2   : > { %p138_p1 = scmp.lt.s32.totalorder %s752_s12, 3 }
   0x4   : > { %p139_p2 = pnand %p722_p0, %p138_p1 }
   0x5   : > { %s723_s14 = sshll.u32 (!%p139_p2), %s718_s13, 5 }
   0x6   : > { %142 = sbr.rel (%p139_p2) target bundleno = 304 (0x130), region = 32  ;;  %p163_p3 = scmp.lt.s32.totalorder (!%p139_p2), %s723_s14, 63 }
   0xb   : > { %v754_v0 = vmov 0   ;;  %s1159_s14 = smov (!%p163_p3, %s723_s14), 63  ;;  %v755_v33 = vmov 1   ;;  %v206_v57 = vld [vmem:[%s1155_s1] sm:$0x3]  ;;  %vm629_vm0 = vcmask 261120  }
   0xc   : > { %741 = vset.pattern.permute.xlu2 %v754_v0  ;;  %740 = vset.pattern.permute.xlu1 %v754_v0  ;;  %s724_s15 = sshll.u32 %s1159_s14, 3  ;;  %v928_v59 = vperm.slane %v206_v57, 0  ;;  %v931_v61 = vperm.slane %v206_v57, 1  ;;  %v937_v62 = vld [vmem:[%s1156_s2] ss:$0 sm:$0xff] }
   0xd   : > { %739 = vset.pattern.permute.xlu0 %v754_v0  ;;  %s792_s18 = scalar_lea.vmem %s1154_s0, %s724_s15  ;;  %s950_s25 = scalar_lea.vmem %s1157_s3, %s724_s15 }
   0xe   : > { %v795_v1 = vld [vmem:[%s792_s18 + $0x20] sm:$0xff]  ;;  %v798_v2 = vld [vmem:[%s792_s18 + $0x10] sm:$0xff]  ;;  %v807_v4 = vld [vmem:[%s792_s18 + $0x28] sm:$0xff] }
   0xf   : > { %v801_v3 = vld [vmem:[%s792_s18] sm:$0xff]  ;;  %230 = vperm.xlu2 %741, %v795_v1   ;;  %220 = vperm.xlu1 %740, %v798_v2   ;;  %v177_v5 = vld [vmem:[%s792_s18 + $0x18] sm:$0xff]  ;;  %v175_v6 = vld [vmem:[%s792_s18 + $0x8] sm:$0xff] }
  0x10   : > { %210 = vperm.xlu0 %739, %v801_v3   ;;  %v813_v7 = vld [vmem:[%s792_s18 + $0x40] sm:$0xff]  ;;  %v816_v8 = vld [vmem:[%s792_s18 + $0x38] sm:$0xff]  ;;  %v180_v9 = vld [vmem:[%s792_s18 + $0x30] sm:$0xff] }
  0x11   : > { %v822_v10 = vld [vmem:[%s792_s18 + $0x58] sm:$0xff]  ;;  %v184_v11 = vld [vmem:[%s792_s18 + $0x50] sm:$0xff]  ;;  %v183_v12 = vld [vmem:[%s792_s18 + $0x48] sm:$0xff] }
  0x12   : > { %v828_v13 = vld [vmem:[%s792_s18 + $0x70] sm:$0xff]  ;;  %v187_v14 = vld [vmem:[%s792_s18 + $0x68] sm:$0xff]  ;;  %v186_v15 = vld [vmem:[%s792_s18 + $0x60] sm:$0xff] }
  0x13   : > { %v834_v16 = vld [vmem:[%s792_s18 + $0x88] sm:$0xff]  ;;  %v190_v17 = vld [vmem:[%s792_s18 + $0x80] sm:$0xff]  ;;  %v189_v18 = vld [vmem:[%s792_s18 + $0x78] sm:$0xff] }
  0x14   : > { %v840_v19 = vld [vmem:[%s792_s18 + $0xa0] sm:$0xff]  ;;  %v193_v20 = vld [vmem:[%s792_s18 + $0x98] sm:$0xff]  ;;  %v192_v21 = vld [vmem:[%s792_s18 + $0x90] sm:$0xff] }
  0x15   : > { %v846_v22 = vld [vmem:[%s792_s18 + $0xb8] sm:$0xff]  ;;  %v196_v23 = vld [vmem:[%s792_s18 + $0xb0] sm:$0xff]  ;;  %v195_v24 = vld [vmem:[%s792_s18 + $0xa8] sm:$0xff] }
  0x16   : > { %v852_v25 = vld [vmem:[%s792_s18 + $0xd0] sm:$0xff]  ;;  %v199_v26 = vld [vmem:[%s792_s18 + $0xc8] sm:$0xff]  ;;  %v198_v27 = vld [vmem:[%s792_s18 + $0xc0] sm:$0xff] }
  0x17   : > { %235 = vperm.xlu2 %741, %v807_v4   ;;  %225 = vperm.xlu1 %740, %v177_v5   ;;  %v858_v28 = vld [vmem:[%s792_s18 + $0xe8] sm:$0xff]  ;;  %v202_v29 = vld [vmem:[%s792_s18 + $0xe0] sm:$0xff]  ;;  %v201_v30 = vld [vmem:[%s792_s18 + $0xd8] sm:$0xff] }
  0x18   : > { %215 = vperm.xlu0 %739, %v175_v6   ;;  %v864_v31 = vld [vmem:[%s792_s18 + $0xf8] sm:$0xff]  ;;  %v204_v32 = vld [vmem:[%s792_s18 + $0xf0] sm:$0xff] }
  0x1f   : > { %250 = vperm.xlu2 %741, %v813_v7   ;;  %245 = vperm.xlu1 %740, %v816_v8  }
  0x20   : > { %240 = vperm.xlu0 %739, %v180_v9  }
  0x27   : > { %265 = vperm.xlu2 %741, %v822_v10   ;;  %260 = vperm.xlu1 %740, %v184_v11  }
  0x28   : > { %255 = vperm.xlu0 %739, %v183_v12  }
  0x2f   : > { %280 = vperm.xlu2 %741, %v828_v13   ;;  %275 = vperm.xlu1 %740, %v187_v14  }
  0x30   : > { %270 = vperm.xlu0 %739, %v186_v15  }
  0x37   : > { %295 = vperm.xlu2 %741, %v834_v16   ;;  %290 = vperm.xlu1 %740, %v190_v17  }
  0x38   : > { %285 = vperm.xlu0 %739, %v189_v18  }
  0x3f   : > { %310 = vperm.xlu2 %741, %v840_v19   ;;  %305 = vperm.xlu1 %740, %v193_v20  }
  0x40   : > { %300 = vperm.xlu0 %739, %v192_v21  }
  0x47   : > { %325 = vperm.xlu2 %741, %v846_v22   ;;  %320 = vperm.xlu1 %740, %v196_v23  }
  0x48   : > { %315 = vperm.xlu0 %739, %v195_v24  }
  0x4f   : > { %340 = vperm.xlu2 %741, %v852_v25   ;;  %335 = vperm.xlu1 %740, %v199_v26  }
  0x50   : > { %330 = vperm.xlu0 %739, %v198_v27  }
  0x57   : > { %355 = vperm.xlu2 %741, %v858_v28   ;;  %350 = vperm.xlu1 %740, %v202_v29  }
  0x58   : > { %345 = vperm.xlu0 %739, %v201_v30  }
  0x5f   : > { %742 = vset.pattern.permute.xlu2 %v755_v33  ;;  %365 = vperm.xlu1 %740, %v864_v31  }
  0x60   : > { %360 = vperm.xlu0 %739, %v204_v32   ;;  %437 = vperm.xlu2 %742, %v801_v3  }
  0x67   : > { %744 = vset.pattern.permute.xlu1 %v755_v33 }
  0x68   : > { %743 = vset.pattern.permute.xlu0 %v755_v33  ;;  %445 = vperm.xlu1 %744, %v798_v2  }
  0x69   : > { %449 = vperm.xlu2 %742, %v177_v5   ;;  %441 = vperm.xlu0 %743, %v175_v6   ;;  %v870_v34 = vpop.permute.xlu2 %230 }
  0x6a   : > { %v373_v57 = vmul.f32 %v928_v59, %v870_v34 }
  0x70   : > { %453 = vperm.xlu1 %744, %v795_v1  }
  0x71   : > { %457 = vperm.xlu2 %742, %v807_v4   ;;  %461 = vperm.xlu0 %743, %v180_v9   ;;  %v874_v35 = vpop.permute.xlu2 %235 }
  0x78   : > { %465 = vperm.xlu1 %744, %v816_v8  }
  0x79   : > { %469 = vperm.xlu2 %742, %v813_v7   ;;  %473 = vperm.xlu0 %743, %v183_v12   ;;  %v878_v36 = vpop.permute.xlu2 %250  ;;  %v374_v12 = vmul.f32 %v928_v59, %v874_v35 }
  0x80   : > { %477 = vperm.xlu1 %744, %v184_v11  }
  0x81   : > { %481 = vperm.xlu2 %742, %v822_v10   ;;  %485 = vperm.xlu0 %743, %v186_v15   ;;  %v881_v37 = vpop.permute.xlu2 %265  ;;  %v883_v38 = vpop.permute.xlu1 %220 }
  0x82   : > { %v211_v39 = vpop.permute.xlu0 %210 }
  0x83   : > { %v369_v60 = vmul.f32 %v928_v59, %v211_v39 }
  0x85   : > { %v404_v2 = vadd.f32 %v937_v62, %v369_v60 }
  0x88   : > { %489 = vperm.xlu1 %744, %v187_v14  }
  0x89   : > { %493 = vperm.xlu2 %742, %v828_v13   ;;  %497 = vperm.xlu0 %743, %v189_v18   ;;  %v886_v40 = vpop.permute.xlu2 %280  ;;  %v226_v41 = vpop.permute.xlu1 %225 }
  0x8a   : > { %v888_v42 = vpop.permute.xlu0 %215  ;;  %v372_v5 = vmul.f32 %v928_v59, %v226_v41  ;;  %v383_v60 = vmul.f32 %v928_v59, %v886_v40 }
  0x8c   : > { %v407_v9 = vadd.f32 %v937_v62, %v372_v5 }
  0x90   : > { %501 = vperm.xlu1 %744, %v190_v17  }
  0x91   : > { %505 = vperm.xlu2 %742, %v834_v16   ;;  %509 = vperm.xlu0 %743, %v192_v21   ;;  %v891_v43 = vpop.permute.xlu2 %295  ;;  %v893_v44 = vpop.permute.xlu1 %245  ;;  %v409_v16 = vadd.f32 %v937_v62, %v374_v12 }
  0x92   : > { %v895_v45 = vpop.permute.xlu0 %240 }
  0x98   : > { %513 = vperm.xlu1 %744, %v193_v20  }
  0x99   : > { %517 = vperm.xlu2 %742, %v840_v19   ;;  %521 = vperm.xlu0 %743, %v195_v24   ;;  %v898_v46 = vpop.permute.xlu2 %310  ;;  %v900_v47 = vpop.permute.xlu1 %260  ;;  %v377_v19 = vmul.f32 %v928_v59, %v878_v36 }
  0x9a   : > { %v902_v48 = vpop.permute.xlu0 %255 }
  0xa0   : > { %525 = vperm.xlu1 %744, %v196_v23   ;;  %v412_v23 = vadd.f32 %v937_v62, %v377_v19 }
  0xa1   : > { %529 = vperm.xlu2 %742, %v846_v22   ;;  %533 = vperm.xlu0 %743, %v198_v27   ;;  %v905_v49 = vpop.permute.xlu2 %325  ;;  %v907_v50 = vpop.permute.xlu1 %275  ;;  %v380_v27 = vmul.f32 %v928_v59, %v881_v37 }
  0xa2   : > { %v909_v51 = vpop.permute.xlu0 %270 }
  0xa3   : > { %v415_v35 = vadd.f32 %v937_v62, %v380_v27 }
  0xa8   : > { %537 = vperm.xlu1 %744, %v199_v26   ;;  %v371_v26 = vmul.f32 %v928_v59, %v883_v38 }
  0xa9   : > { %541 = vperm.xlu2 %742, %v852_v25   ;;  %545 = vperm.xlu0 %743, %v201_v30   ;;  %v912_v52 = vpop.permute.xlu2 %340  ;;  %v914_v53 = vpop.permute.xlu1 %290 }
  0xaa   : > { %v916_v54 = vpop.permute.xlu0 %285  ;;  %v406_v30 = vadd.f32 %v937_v62, %v371_v26 }
  0xb0   : > { %549 = vperm.xlu1 %744, %v202_v29  }
  0xb1   : > { %553 = vperm.xlu2 %742, %v858_v28   ;;  %557 = vperm.xlu0 %743, %v204_v32   ;;  %v919_v55 = vpop.permute.xlu2 %355  ;;  %v921_v56 = vpop.permute.xlu1 %305  ;;  %v370_v28 = vmul.f32 %v928_v59, %v888_v42 }
  0xb2   : > { %v926_v58 = vpop.permute.xlu0 %300 }
  0xb3   : > { %v405_v36 = vadd.f32 %v937_v62, %v370_v28 }
  0xb8   : > { %561 = vperm.xlu1 %744, %v864_v31  }
  0xb9   : > { %v939_v63 = vpop.permute.xlu1 %320 }
  0xba   : > { %v941_v0 = vpop.permute.xlu0 %315  ;;  %v438_v1 = vpop.permute.xlu2 %437 }
  0xbb   : > { %v565_v3 = vmul.f32 %v931_v61, %v438_v1  ;;  %v375_v1 = vmul.f32 %v928_v59, %v895_v45 }
  0xbd   : > { %v597_v4 = vadd.f32 %v565_v3, %v404_v2  ;;  %v408_v3 = vadd.f32 %v937_v62, %v373_v57  ;;  %v410_v40 = vadd.f32 %v937_v62, %v375_v1  ;;  %v382_v57 = vmul.f32 %v928_v59, %v907_v50 }
  0xbe   : > { %v384_v1 = vmul.f32 %v928_v59, %v916_v54 }
  0xbf   : > { %630 = vst.msk [vmem:[%s950_s25] sm:$0xff] %vm629_vm0, %v597_v4 }
  0xc1   : > { %v955_v6 = vpop.permute.xlu1 %335 }
  0xc2   : > { %v957_v7 = vpop.permute.xlu0 %330 }
  0xc3   : > { %v450_v8 = vpop.permute.xlu2 %449 }
  0xc4   : > { %v568_v10 = vmul.f32 %v931_v61, %v450_v8  ;;  %v418_v8 = vadd.f32 %v937_v62, %v383_v60  ;;  %v392_v60 = vmul.f32 %v928_v59, %v905_v49  ;;  %v419_v49 = vadd.f32 %v937_v62, %v384_v1 }
  0xc6   : > { %v600_v11 = vadd.f32 %v568_v10, %v407_v9 }
  0xc8   : > { %633 = vst.msk [vmem:[%s950_s25 + $0x18] sm:$0xff] %vm629_vm0, %v600_v11 }
  0xc9   : > { %v965_v13 = vpop.permute.xlu1 %350 }
  0xca   : > { %v967_v14 = vpop.permute.xlu0 %345 }
  0xcb   : > { %v458_v15 = vpop.permute.xlu2 %457 }
  0xcc   : > { %v570_v17 = vmul.f32 %v931_v61, %v458_v15  ;;  %v376_v15 = vmul.f32 %v928_v59, %v893_v44 }
  0xce   : > { %v602_v18 = vadd.f32 %v570_v17, %v409_v16  ;;  %v386_v16 = vmul.f32 %v928_v59, %v891_v43  ;;  %v378_v17 = vmul.f32 %v928_v59, %v902_v48  ;;  %v411_v19 = vadd.f32 %v937_v62, %v376_v15 }
  0xd0   : > { %635 = vst.msk [vmem:[%s950_s25 + $0x28] sm:$0xff] %vm629_vm0, %v602_v18  ;;  %v413_v43 = vadd.f32 %v937_v62, %v378_v17 }
  0xd1   : > { %v975_v20 = vpop.permute.xlu1 %365 }
  0xd2   : > { %v977_v21 = vpop.permute.xlu0 %360 }
  0xd3   : > { %v470_v22 = vpop.permute.xlu2 %469 }
  0xd4   : > { %v573_v24 = vmul.f32 %v931_v61, %v470_v22 }
  0xd6   : > { %v605_v25 = vadd.f32 %v573_v24, %v412_v23  ;;  %v421_v24 = vadd.f32 %v937_v62, %v386_v16 }
  0xd8   : > { %638 = vst.msk [vmem:[%s950_s25 + $0x40] sm:$0xff] %vm629_vm0, %v605_v25 }
  0xda   : > { %v446_v29 = vpop.permute.xlu1 %445 }
  0xdb   : > { %v567_v31 = vmul.f32 %v931_v61, %v446_v29  ;;  %v482_v32 = vpop.permute.xlu2 %481  ;;  %v442_v33 = vpop.permute.xlu0 %441  ;;  %v379_v29 = vmul.f32 %v928_v59, %v900_v47 }
  0xdc   : > { %v576_v37 = vmul.f32 %v931_v61, %v482_v32  ;;  %v566_v38 = vmul.f32 %v931_v61, %v442_v33 }
  0xdd   : > { %v599_v39 = vadd.f32 %v567_v31, %v406_v30  ;;  %v389_v30 = vmul.f32 %v928_v59, %v898_v46  ;;  %v381_v31 = vmul.f32 %v928_v59, %v909_v51  ;;  %v414_v33 = vadd.f32 %v937_v62, %v379_v29 }
  0xde   : > { %v608_v41 = vadd.f32 %v576_v37, %v415_v35  ;;  %v598_v42 = vadd.f32 %v566_v38, %v405_v36 }
  0xdf   : > { %632 = vst.msk [vmem:[%s950_s25 + $0x10] sm:$0xff] %vm629_vm0, %v599_v39  ;;  %v424_v37 = vadd.f32 %v937_v62, %v389_v30  ;;  %v416_v46 = vadd.f32 %v937_v62, %v381_v31 }
  0xe0   : > { %641 = vst.msk [vmem:[%s950_s25 + $0x58] sm:$0xff] %vm629_vm0, %v608_v41 }
  0xe1   : > { %631 = vst.msk [vmem:[%s950_s25 + $0x8] sm:$0xff] %vm629_vm0, %v598_v42 }
  0xe2   : > { %v454_v2 = vpop.permute.xlu1 %453 }
  0xe3   : > { %v569_v34 = vmul.f32 %v931_v61, %v454_v2  ;;  %v494_v4 = vpop.permute.xlu2 %493  ;;  %v462_v5 = vpop.permute.xlu0 %461 }
  0xe4   : > { %v579_v45 = vmul.f32 %v931_v61, %v494_v4  ;;  %v571_v9 = vmul.f32 %v931_v61, %v462_v5  ;;  %v427_v5 = vadd.f32 %v937_v62, %v392_v60 }
  0xe5   : > { %v601_v10 = vadd.f32 %v569_v34, %v408_v3  ;;  %v417_v3 = vadd.f32 %v937_v62, %v382_v57  ;;  %v396_v57 = vmul.f32 %v928_v59, %v967_v14  ;;  %v399_v14 = vmul.f32 %v928_v59, %v977_v21 }
  0xe6   : > { %v611_v11 = vadd.f32 %v579_v45, %v418_v8  ;;  %v603_v12 = vadd.f32 %v571_v9, %v410_v40 }
  0xe7   : > { %634 = vst.msk [vmem:[%s950_s25 + $0x20] sm:$0xff] %vm629_vm0, %v601_v10  ;;  %v385_v10 = vmul.f32 %v928_v59, %v914_v53 }
  0xe8   : > { %644 = vst.msk [vmem:[%s950_s25 + $0x70] sm:$0xff] %vm629_vm0, %v611_v11  ;;  %v395_v11 = vmul.f32 %v928_v59, %v912_v52 }
  0xe9   : > { %636 = vst.msk [vmem:[%s950_s25 + $0x30] sm:$0xff] %vm629_vm0, %v603_v12  ;;  %v387_v12 = vmul.f32 %v928_v59, %v926_v58  ;;  %v420_v16 = vadd.f32 %v937_v62, %v385_v10 }
  0xea   : > { %v466_v18 = vpop.permute.xlu1 %465 }
  0xeb   : > { %v572_v44 = vmul.f32 %v931_v61, %v466_v18  ;;  %v506_v22 = vpop.permute.xlu2 %505  ;;  %v474_v23 = vpop.permute.xlu0 %473  ;;  %v422_v52 = vadd.f32 %v937_v62, %v387_v12 }
  0xec   : > { %v582_v48 = vmul.f32 %v931_v61, %v506_v22  ;;  %v574_v25 = vmul.f32 %v931_v61, %v474_v23 }
  0xed   : > { %v604_v26 = vadd.f32 %v572_v44, %v411_v19  ;;  %v430_v19 = vadd.f32 %v937_v62, %v395_v11  ;;  %v400_v11 = vmul.f32 %v928_v59, %v975_v20 }
  0xee   : > { %v614_v27 = vadd.f32 %v582_v48, %v421_v24  ;;  %v606_v28 = vadd.f32 %v574_v25, %v413_v43  ;;  %v388_v43 = vmul.f32 %v928_v59, %v921_v56  ;;  %v398_v48 = vmul.f32 %v928_v59, %v919_v55 }
  0xef   : > { %637 = vst.msk [vmem:[%s950_s25 + $0x38] sm:$0xff] %vm629_vm0, %v604_v26  ;;  %v390_v25 = vmul.f32 %v928_v59, %v941_v0  ;;  %v435_v12 = vadd.f32 %v937_v62, %v400_v11 }
  0xf0   : > { %647 = vst.msk [vmem:[%s950_s25 + $0x88] sm:$0xff] %vm629_vm0, %v614_v27  ;;  %v423_v27 = vadd.f32 %v937_v62, %v388_v43  ;;  %v433_v30 = vadd.f32 %v937_v62, %v398_v48 }
  0xf1   : > { %639 = vst.msk [vmem:[%s950_s25 + $0x48] sm:$0xff] %vm629_vm0, %v606_v28  ;;  %v425_v55 = vadd.f32 %v937_v62, %v390_v25 }
  0xf2   : > { %v478_v32 = vpop.permute.xlu1 %477 }
  0xf3   : > { %v575_v47 = vmul.f32 %v931_v61, %v478_v32  ;;  %v518_v35 = vpop.permute.xlu2 %517  ;;  %v486_v36 = vpop.permute.xlu0 %485 }
  0xf4   : > { %v585_v51 = vmul.f32 %v931_v61, %v518_v35  ;;  %v577_v38 = vmul.f32 %v931_v61, %v486_v36  ;;  %v391_v35 = vmul.f32 %v928_v59, %v939_v63  ;;  %v393_v36 = vmul.f32 %v928_v59, %v957_v7 }
  0xf5   : > { %v607_v39 = vadd.f32 %v575_v47, %v414_v33  ;;  %v394_v7 = vmul.f32 %v928_v59, %v955_v6 }
  0xf6   : > { %v617_v41 = vadd.f32 %v585_v51, %v424_v37  ;;  %v609_v42 = vadd.f32 %v577_v38, %v416_v46  ;;  %v426_v46 = vadd.f32 %v937_v62, %v391_v35 }
  0xf7   : > { %640 = vst.msk [vmem:[%s950_s25 + $0x50] sm:$0xff] %vm629_vm0, %v607_v39  ;;  %v428_v39 = vadd.f32 %v937_v62, %v393_v36  ;;  %v429_v1 = vadd.f32 %v937_v62, %v394_v7 }
  0xf8   : > { %650 = vst.msk [vmem:[%s950_s25 + $0xa0] sm:$0xff] %vm629_vm0, %v617_v41 }
  0xf9   : > { %642 = vst.msk [vmem:[%s950_s25 + $0x60] sm:$0xff] %vm629_vm0, %v609_v42 }
  0xfa   : > { %v490_v2 = vpop.permute.xlu1 %489 }
  0xfb   : > { %v578_v50 = vmul.f32 %v931_v61, %v490_v2  ;;  %v530_v34 = vpop.permute.xlu2 %529  ;;  %v498_v4 = vpop.permute.xlu0 %497 }
  0xfc   : > { %v588_v54 = vmul.f32 %v931_v61, %v530_v34  ;;  %v580_v8 = vmul.f32 %v931_v61, %v498_v4 }
  0xfd   : > { %v610_v40 = vadd.f32 %v578_v50, %v417_v3  ;;  %v431_v50 = vadd.f32 %v937_v62, %v396_v57 }
  0xfe   : > { %v620_v45 = vadd.f32 %v588_v54, %v427_v5  ;;  %v612_v9 = vadd.f32 %v580_v8, %v419_v49  ;;  %v397_v5 = vmul.f32 %v928_v59, %v965_v13 }
  0xff   : > { %643 = vst.msk [vmem:[%s950_s25 + $0x68] sm:$0xff] %vm629_vm0, %v610_v40 }
 0x100   : > { %653 = vst.msk [vmem:[%s950_s25 + $0xb8] sm:$0xff] %vm629_vm0, %v620_v45  ;;  %v432_v54 = vadd.f32 %v937_v62, %v397_v5  ;;  %v434_v45 = vadd.f32 %v937_v62, %v399_v14 }
 0x101   : > { %645 = vst.msk [vmem:[%s950_s25 + $0x78] sm:$0xff] %vm629_vm0, %v612_v9 }
 0x102   : > { %v502_v15 = vpop.permute.xlu1 %501 }
 0x103   : > { %v581_v53 = vmul.f32 %v931_v61, %v502_v15  ;;  %v542_v17 = vpop.permute.xlu2 %541  ;;  %v510_v18 = vpop.permute.xlu0 %509 }
 0x104   : > { %v591_v58 = vmul.f32 %v931_v61, %v542_v17  ;;  %v583_v44 = vmul.f32 %v931_v61, %v510_v18 }
 0x105   : > { %v613_v22 = vadd.f32 %v581_v53, %v420_v16 }
 0x106   : > { %v623_v23 = vadd.f32 %v591_v58, %v430_v19  ;;  %v615_v24 = vadd.f32 %v583_v44, %v422_v52 }
 0x107   : > { %646 = vst.msk [vmem:[%s950_s25 + $0x80] sm:$0xff] %vm629_vm0, %v613_v22 }
 0x108   : > { %656 = vst.msk [vmem:[%s950_s25 + $0xd0] sm:$0xff] %vm629_vm0, %v623_v23 }
 0x109   : > { %648 = vst.msk [vmem:[%s950_s25 + $0x90] sm:$0xff] %vm629_vm0, %v615_v24 }
 0x10a   : > { %v514_v26 = vpop.permute.xlu1 %513 }
 0x10b   : > { %v584_v56 = vmul.f32 %v931_v61, %v514_v26  ;;  %v554_v28 = vpop.permute.xlu2 %553  ;;  %v522_v29 = vpop.permute.xlu0 %521 }
 0x10c   : > { %v594_v0 = vmul.f32 %v931_v61, %v554_v28  ;;  %v586_v31 = vmul.f32 %v931_v61, %v522_v29 }
 0x10d   : > { %v616_v32 = vadd.f32 %v584_v56, %v423_v27 }
 0x10e   : > { %v626_v33 = vadd.f32 %v594_v0, %v433_v30  ;;  %v618_v47 = vadd.f32 %v586_v31, %v425_v55 }
 0x10f   : > { %649 = vst.msk [vmem:[%s950_s25 + $0x98] sm:$0xff] %vm629_vm0, %v616_v32 }
 0x110   : > { %659 = vst.msk [vmem:[%s950_s25 + $0xe8] sm:$0xff] %vm629_vm0, %v626_v33 }
 0x111   : > { %651 = vst.msk [vmem:[%s950_s25 + $0xa8] sm:$0xff] %vm629_vm0, %v618_v47 }
 0x112   : > { %v526_v37 = vpop.permute.xlu1 %525 }
 0x113   : > { %v587_v51 = vmul.f32 %v931_v61, %v526_v37  ;;  %v534_v38 = vpop.permute.xlu0 %533 }
 0x114   : > { %v589_v63 = vmul.f32 %v931_v61, %v534_v38 }
 0x115   : > { %v619_v41 = vadd.f32 %v587_v51, %v426_v46 }
 0x116   : > { %v621_v42 = vadd.f32 %v589_v63, %v428_v39 }
 0x117   : > { %652 = vst.msk [vmem:[%s950_s25 + $0xb0] sm:$0xff] %vm629_vm0, %v619_v41 }
 0x118   : > { %654 = vst.msk [vmem:[%s950_s25 + $0xc0] sm:$0xff] %vm629_vm0, %v621_v42 }
 0x11a   : > { %v538_v60 = vpop.permute.xlu1 %537 }
 0x11b   : > { %v590_v2 = vmul.f32 %v931_v61, %v538_v60  ;;  %v546_v3 = vpop.permute.xlu0 %545 }
 0x11c   : > { %v592_v34 = vmul.f32 %v931_v61, %v546_v3 }
 0x11d   : > { %v622_v4 = vadd.f32 %v590_v2, %v429_v1 }
 0x11e   : > { %v624_v6 = vadd.f32 %v592_v34, %v431_v50 }
 0x11f   : > { %655 = vst.msk [vmem:[%s950_s25 + $0xc8] sm:$0xff] %vm629_vm0, %v622_v4 }
 0x120   : > { %657 = vst.msk [vmem:[%s950_s25 + $0xd8] sm:$0xff] %vm629_vm0, %v624_v6 }
 0x122   : > { %v550_v49 = vpop.permute.xlu1 %549 }
 0x123   : > { %v593_v8 = vmul.f32 %v931_v61, %v550_v49  ;;  %v558_v40 = vpop.permute.xlu0 %557 }
 0x124   : > { %v595_v9 = vmul.f32 %v931_v61, %v558_v40 }
 0x125   : > { %v625_v10 = vadd.f32 %v593_v8, %v432_v54 }
 0x126   : > { %v627_v13 = vadd.f32 %v595_v9, %v434_v45 }
 0x127   : > { %658 = vst.msk [vmem:[%s950_s25 + $0xe0] sm:$0xff] %vm629_vm0, %v625_v10 }
 0x128   : > { %660 = vst.msk [vmem:[%s950_s25 + $0xf0] sm:$0xff] %vm629_vm0, %v627_v13 }
 0x12a   : > { %v562_v21 = vpop.permute.xlu1 %561 }
 0x12b   : > { %v596_v15 = vmul.f32 %v931_v61, %v562_v21 }
 0x12d   : > { %v628_v16 = vadd.f32 %v596_v15, %v435_v12 }
 0x12f   : > { %661 = vst.msk [vmem:[%s950_s25 + $0xf8] sm:$0xff] %vm629_vm0, %v628_v16 }
 0x130 PF: > { %s13_s12 = sadd.s32 1, %s752_s12  }
 0x131   : > { %p10_p4 = scmp.ge.s32.totalorder %s13_s12, 4  }
 0x133   :  { %12 = sbr.rel (!%p10_p4) target bundleno = 1 (0x1), region = 62 }

// kernel: reverse.8
= control target key start
LH: loop header
LB: loop body
LE: loop exit
PB: predicated region body
PF: predicated region fallthrough
CT: control target
= control target key end

     0   :  { %s344_s0 = inlined_call_operand.vmem [shape: f32[2,32,16,7], index: 0, kind: input, shape index: {}]   ;;  %s345_s1 = inlined_call_operand.vmem [shape: f32[2,32,16,7], index: 1, kind: output, shape index: {}]  }
   0x1   :  { %v112_v0 = vld [vmem:[%s344_s0 + $0x60] sm:$0xff]  ;;  %v113_v1 = vld [vmem:[%s344_s0 + $0xd0] sm:$0xff]  ;;  %v138_v14 = vld [vmem:[%s344_s0 + $0x68] sm:$0xff] }
   0x2   :  { %v115_v2 = vld [vmem:[%s344_s0 + $0x50] sm:$0xff]  ;;  %4 = vst [vmem:[%s345_s1] sm:$0xff] %v112_v0  ;;  %v117_v3 = vld [vmem:[%s344_s0 + $0xc0] sm:$0xff]  ;;  %v140_v15 = vld [vmem:[%s344_s0 + $0xd8] sm:$0xff] }
   0x3   :  { %114 = vst [vmem:[%s345_s1 + $0x70] sm:$0xff] %v113_v1  ;;  %v119_v4 = vld [vmem:[%s344_s0 + $0x40] sm:$0xff]  ;;  %v121_v5 = vld [vmem:[%s344_s0 + $0xb0] sm:$0xff]  ;;  %v142_v16 = vld [vmem:[%s344_s0 + $0x58] sm:$0xff] }
   0x4   :  { %116 = vst [vmem:[%s345_s1 + $0x10] sm:$0xff] %v115_v2  ;;  %v123_v6 = vld [vmem:[%s344_s0 + $0x30] sm:$0xff]  ;;  %v125_v7 = vld [vmem:[%s344_s0 + $0xa0] sm:$0xff]  ;;  %v144_v17 = vld [vmem:[%s344_s0 + $0xc8] sm:$0xff] }
   0x5   :  { %118 = vst [vmem:[%s345_s1 + $0x80] sm:$0xff] %v117_v3  ;;  %v127_v8 = vld [vmem:[%s344_s0 + $0x20] sm:$0xff]  ;;  %v129_v9 = vld [vmem:[%s344_s0 + $0x90] sm:$0xff]  ;;  %v146_v18 = vld [vmem:[%s344_s0 + $0x48] sm:$0xff] }
   0x6   :  { %120 = vst [vmem:[%s345_s1 + $0x20] sm:$0xff] %v119_v4  ;;  %v131_v10 = vld [vmem:[%s344_s0 + $0x10] sm:$0xff]  ;;  %v133_v11 = vld [vmem:[%s344_s0 + $0x80] sm:$0xff]  ;;  %v148_v19 = vld [vmem:[%s344_s0 + $0xb8] sm:$0xff] }
   0x7   :  { %122 = vst [vmem:[%s345_s1 + $0x90] sm:$0xff] %v121_v5  ;;  %v49_v12 = vld [vmem:[%s344_s0] sm:$0xff]  ;;  %v136_v13 = vld [vmem:[%s344_s0 + $0x70] sm:$0xff]  ;;  %v150_v20 = vld [vmem:[%s344_s0 + $0x38] sm:$0xff] }
   0x8   :  { %124 = vst [vmem:[%s345_s1 + $0x30] sm:$0xff] %v123_v6  ;;  %v152_v21 = vld [vmem:[%s344_s0 + $0xa8] sm:$0xff]  ;;  %v156_v23 = vld [vmem:[%s344_s0 + $0x98] sm:$0xff] }
   0x9   :  { %126 = vst [vmem:[%s345_s1 + $0xa0] sm:$0xff] %v125_v7  ;;  %v154_v22 = vld [vmem:[%s344_s0 + $0x28] sm:$0xff]  ;;  %v158_v24 = vld [vmem:[%s344_s0 + $0x18] sm:$0xff] }
   0xa   :  { %128 = vst [vmem:[%s345_s1 + $0x40] sm:$0xff] %v127_v8  ;;  %v160_v25 = vld [vmem:[%s344_s0 + $0x88] sm:$0xff]  ;;  %v164_v27 = vld [vmem:[%s344_s0 + $0x78] sm:$0xff] }
   0xb   :  { %130 = vst [vmem:[%s345_s1 + $0xb0] sm:$0xff] %v129_v9  ;;  %v162_v26 = vld [vmem:[%s344_s0 + $0x8] sm:$0xff] }
   0xc   :  { %132 = vst [vmem:[%s345_s1 + $0x50] sm:$0xff] %v131_v10 }
   0xd   :  { %134 = vst [vmem:[%s345_s1 + $0xc0] sm:$0xff] %v133_v11 }
   0xe   :  { %135 = vst [vmem:[%s345_s1 + $0x60] sm:$0xff] %v49_v12 }
   0xf   :  { %137 = vst [vmem:[%s345_s1 + $0xd0] sm:$0xff] %v136_v13 }
  0x10   :  { %139 = vst [vmem:[%s345_s1 + $0x8] sm:$0xff] %v138_v14 }
  0x11   :  { %141 = vst [vmem:[%s345_s1 + $0x78] sm:$0xff] %v140_v15 }
  0x12   :  { %143 = vst [vmem:[%s345_s1 + $0x18] sm:$0xff] %v142_v16 }
  0x13   :  { %145 = vst [vmem:[%s345_s1 + $0x88] sm:$0xff] %v144_v17 }
  0x14   :  { %147 = vst [vmem:[%s345_s1 + $0x28] sm:$0xff] %v146_v18 }
  0x15   :  { %149 = vst [vmem:[%s345_s1 + $0x98] sm:$0xff] %v148_v19 }
  0x16   :  { %151 = vst [vmem:[%s345_s1 + $0x38] sm:$0xff] %v150_v20 }
  0x17   :  { %153 = vst [vmem:[%s345_s1 + $0xa8] sm:$0xff] %v152_v21 }
  0x18   :  { %155 = vst [vmem:[%s345_s1 + $0x48] sm:$0xff] %v154_v22 }
  0x19   :  { %157 = vst [vmem:[%s345_s1 + $0xb8] sm:$0xff] %v156_v23 }
  0x1a   :  { %159 = vst [vmem:[%s345_s1 + $0x58] sm:$0xff] %v158_v24 }
  0x1b   :  { %161 = vst [vmem:[%s345_s1 + $0xc8] sm:$0xff] %v160_v25 }
  0x1c   :  { %163 = vst [vmem:[%s345_s1 + $0x68] sm:$0xff] %v162_v26 }
  0x1d   :  { %165 = vst [vmem:[%s345_s1 + $0xd8] sm:$0xff] %v164_v27 }

// kernel: fno2d_forward.11
= control target key start
LH: loop header
LB: loop body
LE: loop exit
PB: predicated region body
PF: predicated region fallthrough
CT: control target
= control target key end

     0   :  { %s2401_s21 = smov 0   ;;  %s2789_s0 = inlined_call_operand.vmem [shape: f32[32,2,32], index: 0, kind: input, shape index: {}]   ;;  %s2790_s1 = inlined_call_operand.vmem [shape: f32[32,2,32], index: 1, kind: input, shape index: {}]   ;;  %s2791_s2 = inlined_call_operand.vmem [shape: f32[32,32,32], index: 2, kind: input, shape index: {}]   ;;  %s2792_s3 = inlined_call_operand.vmem [shape: f32[32,32,32], index: 3, kind: input, shape index: {}]   ;;  %s2793_s4 = inlined_call_operand.vmem [shape: f32[32,32,32], index: 4, kind: input, shape index: {}]   ;;  %s2794_s5 = inlined_call_operand.vmem [shape: f32[32,2,32], index: 5, kind: output, shape index: {0}]   ;;  %s2795_s6 = inlined_call_operand.vmem [shape: f32[32,2,32], index: 6, kind: output, shape index: {1}]  }
   0x1 LB: > { %s2035_s22 = sadd.s32 4294967295, %s2364_s21   ;;  %p2039_p0 = scmp.ge.s32.totalorder %s2364_s21, 1  ;;  %s2364_s21 = sphi %s2401_s21, %s17_s21  }
   0x2   : > { %p263_p1 = scmp.lt.s32.totalorder %s2364_s21, 3 }
   0x4   : > { %p264_p2 = pnand %p2039_p0, %p263_p1 }
   0x5   : > { %s2040_s23 = sshll.u32 (!%p264_p2), %s2035_s22, 4 }
   0x6   : > { %267 = sbr.rel (%p264_p2) target bundleno = 271 (0x10f), region = 40  ;;  %p322_p3 = scmp.lt.s32.totalorder (!%p264_p2), %s2040_s23, 31 }
   0xb   : > { %s2797_s23 = smov (!%p322_p3, %s2040_s23), 31  ;;  %vm372_vm0 = vcmask 261120   ;;  %vm452_vm1 = vcmask 254976  }
   0xc   : > { %s2347_s24 = sshll.u32 %s2797_s23, 5  ;;  %s2409_s25 = sshll.u32 %s2797_s23, 1 }
   0xd   : > { %s2414_s28 = scalar_lea.vmem %s2791_s2, %s2347_s24  ;;  %s2419_s7 = scalar_lea.vmem %s2792_s3, %s2347_s24 }
   0xe   : > { %v371_v0 = vld [vmem:[%s2414_s28 + $0x18] sm:$0xff]  ;;  %s2426_s10 = scalar_lea.vmem %s2793_s4, %s2347_s24  ;;  %v370_v4 = vld [vmem:[%s2414_s28 + $0x10] sm:$0xff]  ;;  %v369_v8 = vld [vmem:[%s2414_s28 + $0x8] sm:$0xff]  ;;  %s2439_s13 = scalar_lea.vmem %s2789_s0, %s2409_s25 }
   0xf   : > { %v399_v1 = vld [vmem:[%s2419_s7 + $0x18] sm:$0xff]  ;;  %388 = vmatpush.msra.mxu0 %v371_v0  ;;  %v398_v5 = vld [vmem:[%s2419_s7 + $0x10] sm:$0xff]  ;;  %s2445_s16 = scalar_lea.vmem %s2790_s1, %s2409_s25  ;;  %v397_v9 = vld [vmem:[%s2419_s7 + $0x8] sm:$0xff]  ;;  %s2714_s19 = scalar_lea.vmem %s2794_s5, %s2409_s25 }
  0x10   : > { %v2065_v2 = vld [vmem:[%s2414_s28 + $0x38] sm:$0xff]  ;;  %415 = vmatpush.msra.mxu1 %v399_v1  ;;  %v426_v6 = vld [vmem:[%s2426_s10 + $0x10] sm:$0xff]  ;;  %v425_v10 = vld [vmem:[%s2426_s10 + $0x8] sm:$0xff]  ;;  %s2722_s23 = scalar_lea.vmem %s2795_s6, %s2409_s25 }
  0x11   : > { %v427_v3 = vld [vmem:[%s2426_s10 + $0x18] sm:$0xff]  ;;  %481 = vmatpush.msra.mxu3 %v2065_v2  ;;  %v2064_v7 = vld [vmem:[%s2414_s28 + $0x30] sm:$0xff]  ;;  %389 = vmatpush.msra.mxu0 %v370_v4  ;;  %v2063_v11 = vld [vmem:[%s2414_s28 + $0x28] sm:$0xff] }
  0x12   : > { %443 = vmatpush.msra.mxu2 %v427_v3  ;;  %416 = vmatpush.msra.mxu1 %v398_v5  ;;  %v368_v12 = vld [vmem:[%s2414_s28] sm:$0xff]  ;;  %v2089_v20 = vld [vmem:[%s2419_s7 + $0x58] sm:$0xff]  ;;  %v2088_v24 = vld [vmem:[%s2419_s7 + $0x50] sm:$0xff] }
  0x13   : > { %482 = vmatpush.msra.mxu3 %v2064_v7  ;;  %v396_v13 = vld [vmem:[%s2419_s7] sm:$0xff]  ;;  %390 = vmatpush.msra.mxu0 %v369_v8  ;;  %v2070_v21 = vld [vmem:[%s2419_s7 + $0x38] sm:$0xff]  ;;  %v2069_v25 = vld [vmem:[%s2419_s7 + $0x30] sm:$0xff] }
  0x14   : > { %444 = vmatpush.msra.mxu2 %v426_v6  ;;  %v424_v14 = vld [vmem:[%s2426_s10] sm:$0xff]  ;;  %417 = vmatpush.msra.mxu1 %v397_v9  ;;  %v2075_v22 = vld [vmem:[%s2426_s10 + $0x38] sm:$0xff]  ;;  %v2074_v26 = vld [vmem:[%s2426_s10 + $0x30] sm:$0xff] }
  0x15   : > { %v2062_v15 = vld [vmem:[%s2414_s28 + $0x20] sm:$0xff]  ;;  %483 = vmatpush.msra.mxu3 %v2063_v11  ;;  %391 = vmatpush.msra.mxu0 %v368_v12  ;;  %v2084_v23 = vld [vmem:[%s2414_s28 + $0x58] sm:$0xff]  ;;  %v2083_v27 = vld [vmem:[%s2414_s28 + $0x50] sm:$0xff] }
  0x16   : > { %v366_v16 = vld [vmem:[%s2439_s13] sm:$0x3]  ;;  %445 = vmatpush.msra.mxu2 %v425_v10  ;;  %418 = vmatpush.msra.mxu1 %v396_v13  ;;  %v2060_v19 = vld [vmem:[%s2439_s13 + $0x2] sm:$0x3]  ;;  %v2087_v29 = vld [vmem:[%s2419_s7 + $0x48] sm:$0xff] }
  0x17   : > { %v367_v17 = vld [vmem:[%s2445_s16] sm:$0x3]  ;;  %484 = vmatpush.msra.mxu3 %v2062_v15  ;;  %2057 = vmatmul.msk.f32.vlgmr.msra.gmra.mxu0 %vm372_vm0, %v366_v16  ;;  %v2061_v28 = vld [vmem:[%s2445_s16 + $0x2] sm:$0x3]  ;;  %v2068_v30 = vld [vmem:[%s2419_s7 + $0x28] sm:$0xff] }
  0x18   : > { %v423_v18 = vadd.f32 %v367_v17, %v366_v16  ;;  %446 = vmatpush.msra.mxu2 %v424_v14  ;;  %2058 = vmatmul.msk.f32.vlgmr.msra.gmra.mxu1 %vm372_vm0, %v367_v17  ;;  %v2073_v31 = vld [vmem:[%s2426_s10 + $0x28] sm:$0xff]  ;;  %v2086_v33 = vld [vmem:[%s2419_s7 + $0x40] sm:$0xff]  ;;  %v517_v35 = vadd.f32 %v2061_v28, %v2060_v19  ;;  %v2113_v40 = vld [vmem:[%s2426_s10 + $0x78] sm:$0xff] }
  0x19   : > { %2066 = vmatmul.msk.f32.vlgmr.msra.gmra.mxu3 %vm372_vm0, %v2060_v19  ;;  %509 = vmatpush.msrb.mxu0 %v2070_v21  ;;  %v2082_v32 = vld [vmem:[%s2414_s28 + $0x48] sm:$0xff]  ;;  %v2067_v34 = vld [vmem:[%s2419_s7 + $0x20] sm:$0xff]  ;;  %v2094_v41 = vld [vmem:[%s2426_s10 + $0x58] sm:$0xff] }
  0x1a   : > { %2059 = vmatmul.msk.f32.vlgmr.msra.gmra.mxu2 %vm372_vm0, %v423_v18  ;;  %605 = vmatpush.msrb.mxu3 %v2089_v20  ;;  %v2072_v36 = vld [vmem:[%s2426_s10 + $0x20] sm:$0xff]  ;;  %v2103_v42 = vld [vmem:[%s2414_s28 + $0x78] sm:$0xff]  ;;  %v2112_v44 = vld [vmem:[%s2426_s10 + $0x70] sm:$0xff] }
  0x1b   : > { %538 = vmatpush.msrb.mxu1 %v2075_v22  ;;  %577 = vmatpush.msrb.mxu2 %v2084_v23  ;;  %v2081_v37 = vld [vmem:[%s2414_s28 + $0x40] sm:$0xff]  ;;  %v2108_v43 = vld [vmem:[%s2419_s7 + $0x78] sm:$0xff]  ;;  %v2093_v45 = vld [vmem:[%s2426_s10 + $0x50] sm:$0xff] }
  0x1c   : > { %606 = vmatpush.msrb.mxu3 %v2088_v24  ;;  %510 = vmatpush.msrb.mxu0 %v2069_v25  ;;  %v2079_v38 = vld [vmem:[%s2439_s13 + $0x4] sm:$0x3]  ;;  %v2102_v46 = vld [vmem:[%s2414_s28 + $0x70] sm:$0xff]  ;;  %v2111_v48 = vld [vmem:[%s2426_s10 + $0x68] sm:$0xff] }
  0x1d   : > { %539 = vmatpush.msrb.mxu1 %v2074_v26  ;;  %578 = vmatpush.msrb.mxu2 %v2083_v27  ;;  %v2080_v39 = vld [vmem:[%s2445_s16 + $0x4] sm:$0x3]  ;;  %v2107_v47 = vld [vmem:[%s2419_s7 + $0x70] sm:$0xff]  ;;  %v2092_v49 = vld [vmem:[%s2426_s10 + $0x48] sm:$0xff] }
  0x1e   : > { %607 = vmatpush.msrb.mxu3 %v2087_v29  ;;  %511 = vmatpush.msrb.mxu0 %v2068_v30  ;;  %v2101_v50 = vld [vmem:[%s2414_s28 + $0x68] sm:$0xff]  ;;  %v2098_v52 = vld [vmem:[%s2439_s13 + $0x6] sm:$0x3]  ;;  %v613_v56 = vadd.f32 %v2080_v39, %v2079_v38  ;;  %v2141_v60 = vld [vmem:[%s2414_s28 + $0xb8] sm:$0xff] }
  0x1f   : > { %540 = vmatpush.msrb.mxu1 %v2073_v31  ;;  %579 = vmatpush.msrb.mxu2 %v2082_v32  ;;  %v2106_v51 = vld [vmem:[%s2419_s7 + $0x68] sm:$0xff]  ;;  %v2099_v53 = vld [vmem:[%s2445_s16 + $0x6] sm:$0x3]  ;;  %v2122_v61 = vld [vmem:[%s2414_s28 + $0x98] sm:$0xff] }
  0x20   : > { %608 = vmatpush.msrb.mxu3 %v2086_v33  ;;  %512 = vmatpush.msrb.mxu0 %v2067_v34  ;;  %v2110_v54 = vld [vmem:[%s2426_s10 + $0x60] sm:$0xff]  ;;  %v709_v59 = vadd.f32 %v2099_v53, %v2098_v52  ;;  %v2127_v62 = vld [vmem:[%s2419_s7 + $0x98] sm:$0xff]  ;;  %v2140_v0 = vld [vmem:[%s2414_s28 + $0xb0] sm:$0xff] }
  0x21   : > { %541 = vmatpush.msrb.mxu1 %v2072_v36  ;;  %580 = vmatpush.msrb.mxu2 %v2081_v37  ;;  %v2091_v55 = vld [vmem:[%s2426_s10 + $0x40] sm:$0xff]  ;;  %v2132_v63 = vld [vmem:[%s2426_s10 + $0x98] sm:$0xff]  ;;  %v2121_v1 = vld [vmem:[%s2414_s28 + $0x90] sm:$0xff] }
  0x22   : > { %2071 = vmatmul.msk.f32.vlgmr.msrb.gmra.mxu0 %vm372_vm0, %v2061_v28  ;;  %2076 = vmatmul.msk.f32.vlgmr.msrb.gmra.mxu1 %vm372_vm0, %v517_v35  ;;  %v2100_v57 = vld [vmem:[%s2414_s28 + $0x60] sm:$0xff]  ;;  %v2126_v2 = vld [vmem:[%s2419_s7 + $0x90] sm:$0xff]  ;;  %v2139_v4 = vld [vmem:[%s2414_s28 + $0xa8] sm:$0xff] }
  0x23   : > { %2085 = vmatmul.msk.f32.vlgmr.msrb.gmra.mxu2 %vm372_vm0, %v2079_v38  ;;  %2090 = vmatmul.msk.f32.vlgmr.msrb.gmra.mxu3 %vm372_vm0, %v2080_v39  ;;  %v2105_v58 = vld [vmem:[%s2419_s7 + $0x60] sm:$0xff]  ;;  %v2131_v3 = vld [vmem:[%s2426_s10 + $0x90] sm:$0xff]  ;;  %v2120_v5 = vld [vmem:[%s2414_s28 + $0x88] sm:$0xff] }
  0x24   : > { %730 = vmatpush.msra.mxu3 %v2113_v40  ;;  %634 = vmatpush.msra.mxu0 %v2094_v41  ;;  %v2125_v6 = vld [vmem:[%s2419_s7 + $0x88] sm:$0xff]  ;;  %v2138_v10 = vld [vmem:[%s2414_s28 + $0xa0] sm:$0xff]  ;;  %v2165_v16 = vld [vmem:[%s2419_s7 + $0xd8] sm:$0xff] }
  0x25   : > { %673 = vmatpush.msra.mxu1 %v2103_v42  ;;  %701 = vmatpush.msra.mxu2 %v2108_v43  ;;  %v2130_v7 = vld [vmem:[%s2426_s10 + $0x88] sm:$0xff]  ;;  %v2119_v11 = vld [vmem:[%s2414_s28 + $0x80] sm:$0xff]  ;;  %v2146_v17 = vld [vmem:[%s2419_s7 + $0xb8] sm:$0xff] }
  0x26   : > { %731 = vmatpush.msra.mxu3 %v2112_v44  ;;  %635 = vmatpush.msra.mxu0 %v2093_v45  ;;  %v2117_v8 = vld [vmem:[%s2439_s13 + $0x8] sm:$0x3]  ;;  %v2124_v12 = vld [vmem:[%s2419_s7 + $0x80] sm:$0xff]  ;;  %v2136_v15 = vld [vmem:[%s2439_s13 + $0xa] sm:$0x3] }
  0x27   : > { %674 = vmatpush.msra.mxu1 %v2102_v46  ;;  %702 = vmatpush.msra.mxu2 %v2107_v47  ;;  %v2118_v9 = vld [vmem:[%s2445_s16 + $0x8] sm:$0x3]  ;;  %v2129_v13 = vld [vmem:[%s2426_s10 + $0x80] sm:$0xff]  ;;  %v2151_v18 = vld [vmem:[%s2426_s10 + $0xb8] sm:$0xff] }
  0x28   : > { %732 = vmatpush.msra.mxu3 %v2111_v48  ;;  %636 = vmatpush.msra.mxu0 %v2092_v49  ;;  %v805_v14 = vadd.f32 %v2118_v9, %v2117_v8  ;;  %v2160_v19 = vld [vmem:[%s2414_s28 + $0xd8] sm:$0xff]  ;;  %v2164_v20 = vld [vmem:[%s2419_s7 + $0xd0] sm:$0xff]  ;;  %v2163_v24 = vld [vmem:[%s2419_s7 + $0xc8] sm:$0xff] }
  0x29   : > { %675 = vmatpush.msra.mxu1 %v2101_v50  ;;  %703 = vmatpush.msra.mxu2 %v2106_v51  ;;  %v2145_v21 = vld [vmem:[%s2419_s7 + $0xb0] sm:$0xff]  ;;  %v2144_v25 = vld [vmem:[%s2419_s7 + $0xa8] sm:$0xff]  ;;  %v2162_v29 = vld [vmem:[%s2419_s7 + $0xc0] sm:$0xff] }
  0x2a   : > { %733 = vmatpush.msra.mxu3 %v2110_v54  ;;  %637 = vmatpush.msra.mxu0 %v2091_v55  ;;  %v2150_v22 = vld [vmem:[%s2426_s10 + $0xb0] sm:$0xff]  ;;  %v2137_v26 = vld [vmem:[%s2445_s16 + $0xa] sm:$0x3]  ;;  %v2143_v30 = vld [vmem:[%s2419_s7 + $0xa0] sm:$0xff] }
  0x2b   : > { %676 = vmatpush.msra.mxu1 %v2100_v57  ;;  %704 = vmatpush.msra.mxu2 %v2105_v58  ;;  %v2159_v23 = vld [vmem:[%s2414_s28 + $0xd0] sm:$0xff]  ;;  %v2149_v27 = vld [vmem:[%s2426_s10 + $0xa8] sm:$0xff]  ;;  %v2148_v31 = vld [vmem:[%s2426_s10 + $0xa0] sm:$0xff]  ;;  %v901_v33 = vadd.f32 %v2137_v26, %v2136_v15 }
  0x2c   : > { %2095 = vmatmul.msk.f32.vlgmr.msra.gmra.mxu0 %vm372_vm0, %v613_v56  ;;  %2104 = vmatmul.msk.f32.vlgmr.msra.gmra.mxu1 %vm372_vm0, %v2098_v52  ;;  %v2158_v28 = vld [vmem:[%s2414_s28 + $0xc8] sm:$0xff]  ;;  %v2157_v32 = vld [vmem:[%s2414_s28 + $0xc0] sm:$0xff]  ;;  %v2189_v36 = vld [vmem:[%s2426_s10 + $0xf8] sm:$0xff] }
  0x2d   : > { %2109 = vmatmul.msk.f32.vlgmr.msra.gmra.mxu2 %vm372_vm0, %v2099_v53  ;;  %2114 = vmatmul.msk.f32.vlgmr.msra.gmra.mxu3 %vm372_vm0, %v709_v59  ;;  %v2155_v34 = vld [vmem:[%s2439_s13 + $0xc] sm:$0x3]  ;;  %v2170_v37 = vld [vmem:[%s2426_s10 + $0xd8] sm:$0xff]  ;;  %v2188_v40 = vld [vmem:[%s2426_s10 + $0xf0] sm:$0xff] }
  0x2e   : > { %865 = vmatpush.msrb.mxu3 %v2141_v60  ;;  %769 = vmatpush.msrb.mxu0 %v2122_v61  ;;  %v2156_v35 = vld [vmem:[%s2445_s16 + $0xc] sm:$0x3]  ;;  %v2179_v38 = vld [vmem:[%s2414_s28 + $0xf8] sm:$0xff]  ;;  %v2169_v41 = vld [vmem:[%s2426_s10 + $0xd0] sm:$0xff] }
  0x2f   : > { %797 = vmatpush.msrb.mxu1 %v2127_v62  ;;  %826 = vmatpush.msrb.mxu2 %v2132_v63  ;;  %v2184_v39 = vld [vmem:[%s2419_s7 + $0xf8] sm:$0xff]  ;;  %v2178_v42 = vld [vmem:[%s2414_s28 + $0xf0] sm:$0xff]  ;;  %v2187_v44 = vld [vmem:[%s2426_s10 + $0xe8] sm:$0xff]  ;;  %v997_v52 = vadd.f32 %v2156_v35, %v2155_v34 }
  0x30   : > { %866 = vmatpush.msrb.mxu3 %v2140_v0  ;;  %770 = vmatpush.msrb.mxu0 %v2121_v1  ;;  %v2183_v43 = vld [vmem:[%s2419_s7 + $0xf0] sm:$0xff]  ;;  %v2168_v45 = vld [vmem:[%s2426_s10 + $0xc8] sm:$0xff]  ;;  %v2186_v50 = vld [vmem:[%s2426_s10 + $0xe0] sm:$0xff] }
  0x31   : > { %798 = vmatpush.msrb.mxu1 %v2126_v2  ;;  %827 = vmatpush.msrb.mxu2 %v2131_v3  ;;  %v2177_v46 = vld [vmem:[%s2414_s28 + $0xe8] sm:$0xff]  ;;  %v2167_v51 = vld [vmem:[%s2426_s10 + $0xc0] sm:$0xff]  ;;  %v2217_v56 = vld [vmem:[%s2414_s28 + $0x138] sm:$0xff] }
  0x32   : > { %867 = vmatpush.msrb.mxu3 %v2139_v4  ;;  %771 = vmatpush.msrb.mxu0 %v2120_v5  ;;  %v2182_v47 = vld [vmem:[%s2419_s7 + $0xe8] sm:$0xff]  ;;  %v2176_v53 = vld [vmem:[%s2414_s28 + $0xe0] sm:$0xff]  ;;  %v2198_v57 = vld [vmem:[%s2414_s28 + $0x118] sm:$0xff] }
  0x33   : > { %799 = vmatpush.msrb.mxu1 %v2125_v6  ;;  %828 = vmatpush.msrb.mxu2 %v2130_v7  ;;  %v2174_v48 = vld [vmem:[%s2439_s13 + $0xe] sm:$0x3]  ;;  %v2181_v54 = vld [vmem:[%s2419_s7 + $0xe0] sm:$0xff]  ;;  %v2203_v58 = vld [vmem:[%s2419_s7 + $0x118] sm:$0xff] }
  0x34   : > { %868 = vmatpush.msrb.mxu3 %v2138_v10  ;;  %772 = vmatpush.msrb.mxu0 %v2119_v11  ;;  %v2175_v49 = vld [vmem:[%s2445_s16 + $0xe] sm:$0x3]  ;;  %v2208_v59 = vld [vmem:[%s2426_s10 + $0x118] sm:$0xff]  ;;  %v2216_v60 = vld [vmem:[%s2414_s28 + $0x130] sm:$0xff] }
  0x35   : > { %800 = vmatpush.msrb.mxu1 %v2124_v12  ;;  %829 = vmatpush.msrb.mxu2 %v2129_v13  ;;  %v1093_v55 = vadd.f32 %v2175_v49, %v2174_v48  ;;  %v2197_v61 = vld [vmem:[%s2414_s28 + $0x110] sm:$0xff]  ;;  %v2215_v0 = vld [vmem:[%s2414_s28 + $0x128] sm:$0xff]  ;;  %v2214_v6 = vld [vmem:[%s2414_s28 + $0x120] sm:$0xff] }
  0x36   : > { %2123 = vmatmul.msk.f32.vlgmr.msrb.gmra.mxu0 %vm372_vm0, %v2117_v8  ;;  %2128 = vmatmul.msk.f32.vlgmr.msrb.gmra.mxu1 %vm372_vm0, %v2118_v9  ;;  %v2202_v62 = vld [vmem:[%s2419_s7 + $0x110] sm:$0xff]  ;;  %v2196_v1 = vld [vmem:[%s2414_s28 + $0x108] sm:$0xff]  ;;  %v2195_v7 = vld [vmem:[%s2414_s28 + $0x100] sm:$0xff] }
  0x37   : > { %2133 = vmatmul.msk.f32.vlgmr.msrb.gmra.mxu2 %vm372_vm0, %v805_v14  ;;  %2142 = vmatmul.msk.f32.vlgmr.msrb.gmra.mxu3 %vm372_vm0, %v2136_v15  ;;  %v2207_v63 = vld [vmem:[%s2426_s10 + $0x110] sm:$0xff]  ;;  %v2201_v2 = vld [vmem:[%s2419_s7 + $0x108] sm:$0xff]  ;;  %v2200_v8 = vld [vmem:[%s2419_s7 + $0x100] sm:$0xff] }
  0x38   : > { %989 = vmatpush.msra.mxu3 %v2165_v16  ;;  %893 = vmatpush.msra.mxu0 %v2146_v17  ;;  %v2206_v3 = vld [vmem:[%s2426_s10 + $0x108] sm:$0xff]  ;;  %v2193_v4 = vld [vmem:[%s2439_s13 + $0x10] sm:$0x3]  ;;  %v2205_v9 = vld [vmem:[%s2426_s10 + $0x100] sm:$0xff] }
  0x39   : > { %922 = vmatpush.msra.mxu1 %v2151_v18  ;;  %961 = vmatpush.msra.mxu2 %v2160_v19  ;;  %v2194_v5 = vld [vmem:[%s2445_s16 + $0x10] sm:$0x3]  ;;  %v2212_v11 = vld [vmem:[%s2439_s13 + $0x12] sm:$0x3]  ;;  %v2241_v12 = vld [vmem:[%s2419_s7 + $0x158] sm:$0xff] }
  0x3a   : > { %990 = vmatpush.msra.mxu3 %v2164_v20  ;;  %894 = vmatpush.msra.mxu0 %v2145_v21  ;;  %v1189_v10 = vadd.f32 %v2194_v5, %v2193_v4  ;;  %v2222_v13 = vld [vmem:[%s2419_s7 + $0x138] sm:$0xff]  ;;  %v2240_v16 = vld [vmem:[%s2419_s7 + $0x150] sm:$0xff]  ;;  %v2239_v20 = vld [vmem:[%s2419_s7 + $0x148] sm:$0xff] }
  0x3b   : > { %923 = vmatpush.msra.mxu1 %v2150_v22  ;;  %962 = vmatpush.msra.mxu2 %v2159_v23  ;;  %v2227_v14 = vld [vmem:[%s2426_s10 + $0x138] sm:$0xff]  ;;  %v2221_v17 = vld [vmem:[%s2419_s7 + $0x130] sm:$0xff]  ;;  %v2220_v21 = vld [vmem:[%s2419_s7 + $0x128] sm:$0xff] }
  0x3c   : > { %991 = vmatpush.msra.mxu3 %v2163_v24  ;;  %895 = vmatpush.msra.mxu0 %v2144_v25  ;;  %v2236_v15 = vld [vmem:[%s2414_s28 + $0x158] sm:$0xff]  ;;  %v2226_v18 = vld [vmem:[%s2426_s10 + $0x130] sm:$0xff]  ;;  %v2225_v23 = vld [vmem:[%s2426_s10 + $0x128] sm:$0xff] }
  0x3d   : > { %924 = vmatpush.msra.mxu1 %v2149_v27  ;;  %963 = vmatpush.msra.mxu2 %v2158_v28  ;;  %v2235_v19 = vld [vmem:[%s2414_s28 + $0x150] sm:$0xff]  ;;  %v2234_v24 = vld [vmem:[%s2414_s28 + $0x148] sm:$0xff]  ;;  %v2238_v25 = vld [vmem:[%s2419_s7 + $0x140] sm:$0xff] }
  0x3e   : > { %992 = vmatpush.msra.mxu3 %v2162_v29  ;;  %896 = vmatpush.msra.mxu0 %v2143_v30  ;;  %v2213_v22 = vld [vmem:[%s2445_s16 + $0x12] sm:$0x3]  ;;  %v2224_v27 = vld [vmem:[%s2426_s10 + $0x120] sm:$0xff]  ;;  %v2231_v30 = vld [vmem:[%s2439_s13 + $0x14] sm:$0x3] }
  0x3f   : > { %925 = vmatpush.msra.mxu1 %v2148_v31  ;;  %964 = vmatpush.msra.mxu2 %v2157_v32  ;;  %v2233_v28 = vld [vmem:[%s2414_s28 + $0x140] sm:$0xff]  ;;  %v1285_v29 = vadd.f32 %v2213_v22, %v2212_v11  ;;  %v2232_v31 = vld [vmem:[%s2445_s16 + $0x14] sm:$0x3]  ;;  %v2265_v32 = vld [vmem:[%s2426_s10 + $0x178] sm:$0xff] }
  0x40   : > { %2147 = vmatmul.msk.f32.vlgmr.msra.gmra.mxu0 %vm372_vm0, %v2137_v26  ;;  %2152 = vmatmul.msk.f32.vlgmr.msra.gmra.mxu1 %vm372_vm0, %v901_v33  ;;  %v2219_v26 = vld [vmem:[%s2419_s7 + $0x120] sm:$0xff]  ;;  %v2246_v33 = vld [vmem:[%s2426_s10 + $0x158] sm:$0xff] }
  0x41   : > { %2161 = vmatmul.msk.f32.vlgmr.msra.gmra.mxu2 %vm372_vm0, %v2155_v34  ;;  %2166 = vmatmul.msk.f32.vlgmr.msra.gmra.mxu3 %vm372_vm0, %v2156_v35  ;;  %v2255_v34 = vld [vmem:[%s2414_s28 + $0x178] sm:$0xff] }
  0x42   : > { %1114 = vmatpush.msrb.mxu3 %v2189_v36  ;;  %1018 = vmatpush.msrb.mxu0 %v2170_v37  ;;  %v2260_v35 = vld [vmem:[%s2419_s7 + $0x178] sm:$0xff]  ;;  %v2264_v36 = vld [vmem:[%s2426_s10 + $0x170] sm:$0xff] }
  0x43   : > { %1057 = vmatpush.msrb.mxu1 %v2179_v38  ;;  %1085 = vmatpush.msrb.mxu2 %v2184_v39  ;;  %v2245_v37 = vld [vmem:[%s2426_s10 + $0x150] sm:$0xff] }
  0x44   : > { %1115 = vmatpush.msrb.mxu3 %v2188_v40  ;;  %1019 = vmatpush.msrb.mxu0 %v2169_v41  ;;  %v2254_v38 = vld [vmem:[%s2414_s28 + $0x170] sm:$0xff]  ;;  %v2263_v40 = vld [vmem:[%s2426_s10 + $0x168] sm:$0xff] }
  0x45   : > { %1058 = vmatpush.msrb.mxu1 %v2178_v42  ;;  %1086 = vmatpush.msrb.mxu2 %v2183_v43  ;;  %v2259_v39 = vld [vmem:[%s2419_s7 + $0x170] sm:$0xff]  ;;  %v2244_v41 = vld [vmem:[%s2426_s10 + $0x148] sm:$0xff] }
  0x46   : > { %1116 = vmatpush.msrb.mxu3 %v2187_v44  ;;  %1020 = vmatpush.msrb.mxu0 %v2168_v45  ;;  %v2253_v42 = vld [vmem:[%s2414_s28 + $0x168] sm:$0xff]  ;;  %v2250_v44 = vld [vmem:[%s2439_s13 + $0x16] sm:$0x3] }
  0x47   : > { %1059 = vmatpush.msrb.mxu1 %v2177_v46  ;;  %1087 = vmatpush.msrb.mxu2 %v2182_v47  ;;  %v2258_v43 = vld [vmem:[%s2419_s7 + $0x168] sm:$0xff]  ;;  %v2251_v45 = vld [vmem:[%s2445_s16 + $0x16] sm:$0x3]  ;;  %v2262_v46 = vld [vmem:[%s2426_s10 + $0x160] sm:$0xff] }
  0x48   : > { %1117 = vmatpush.msrb.mxu3 %v2186_v50  ;;  %1021 = vmatpush.msrb.mxu0 %v2167_v51  ;;  %v2243_v47 = vld [vmem:[%s2426_s10 + $0x140] sm:$0xff]  ;;  %v1477_v51 = vadd.f32 %v2251_v45, %v2250_v44 }
  0x49   : > { %1060 = vmatpush.msrb.mxu1 %v2176_v53  ;;  %1088 = vmatpush.msrb.mxu2 %v2181_v54  ;;  %v2257_v50 = vld [vmem:[%s2419_s7 + $0x160] sm:$0xff]  ;;  %v2274_v53 = vld [vmem:[%s2414_s28 + $0x198] sm:$0xff] }
  0x4a   : > { %2171 = vmatmul.msk.f32.vlgmr.msrb.gmra.mxu0 %vm372_vm0, %v997_v52  ;;  %2180 = vmatmul.msk.f32.vlgmr.msrb.gmra.mxu1 %vm372_vm0, %v2174_v48  ;;  %v1381_v48 = vadd.f32 %v2232_v31, %v2231_v30  ;;  %v2293_v52 = vld [vmem:[%s2414_s28 + $0x1b8] sm:$0xff] }
  0x4b   : > { %2185 = vmatmul.msk.f32.vlgmr.msrb.gmra.mxu2 %vm372_vm0, %v2175_v49  ;;  %2190 = vmatmul.msk.f32.vlgmr.msrb.gmra.mxu3 %vm372_vm0, %v1093_v55  ;;  %v2252_v49 = vld [vmem:[%s2414_s28 + $0x160] sm:$0xff]  ;;  %v2279_v54 = vld [vmem:[%s2419_s7 + $0x198] sm:$0xff] }
  0x4c   : > { %1249 = vmatpush.msra.mxu3 %v2217_v56  ;;  %1153 = vmatpush.msra.mxu0 %v2198_v57  ;;  %v2284_v55 = vld [vmem:[%s2426_s10 + $0x198] sm:$0xff]  ;;  %v2292_v56 = vld [vmem:[%s2414_s28 + $0x1b0] sm:$0xff] }
  0x4d   : > { %1181 = vmatpush.msra.mxu1 %v2203_v58  ;;  %1210 = vmatpush.msra.mxu2 %v2208_v59  ;;  %v2273_v57 = vld [vmem:[%s2414_s28 + $0x190] sm:$0xff] }
  0x4e   : > { %1250 = vmatpush.msra.mxu3 %v2216_v60  ;;  %1154 = vmatpush.msra.mxu0 %v2197_v61  ;;  %v2278_v58 = vld [vmem:[%s2419_s7 + $0x190] sm:$0xff]  ;;  %v2291_v60 = vld [vmem:[%s2414_s28 + $0x1a8] sm:$0xff] }
  0x4f   : > { %1182 = vmatpush.msra.mxu1 %v2202_v62  ;;  %1211 = vmatpush.msra.mxu2 %v2207_v63  ;;  %v2283_v59 = vld [vmem:[%s2426_s10 + $0x190] sm:$0xff]  ;;  %v2272_v61 = vld [vmem:[%s2414_s28 + $0x188] sm:$0xff] }
  0x50   : > { %1251 = vmatpush.msra.mxu3 %v2215_v0  ;;  %1155 = vmatpush.msra.mxu0 %v2196_v1  ;;  %v2277_v62 = vld [vmem:[%s2419_s7 + $0x188] sm:$0xff]  ;;  %v2269_v0 = vld [vmem:[%s2439_s13 + $0x18] sm:$0x3] }
  0x51   : > { %1183 = vmatpush.msra.mxu1 %v2201_v2  ;;  %1212 = vmatpush.msra.mxu2 %v2206_v3  ;;  %v2282_v63 = vld [vmem:[%s2426_s10 + $0x188] sm:$0xff]  ;;  %v2270_v1 = vld [vmem:[%s2445_s16 + $0x18] sm:$0x3]  ;;  %v2290_v2 = vld [vmem:[%s2414_s28 + $0x1a0] sm:$0xff] }
  0x52   : > { %1252 = vmatpush.msra.mxu3 %v2214_v6  ;;  %1156 = vmatpush.msra.mxu0 %v2195_v7  ;;  %v2271_v3 = vld [vmem:[%s2414_s28 + $0x180] sm:$0xff]  ;;  %v1573_v6 = vadd.f32 %v2270_v1, %v2269_v0  ;;  %v2288_v7 = vld [vmem:[%s2439_s13 + $0x1a] sm:$0x3] }
  0x53   : > { %1184 = vmatpush.msra.mxu1 %v2200_v8  ;;  %1213 = vmatpush.msra.mxu2 %v2205_v9  ;;  %v2317_v8 = vld [vmem:[%s2419_s7 + $0x1d8] sm:$0xff] }
  0x54   : > { %2199 = vmatmul.msk.f32.vlgmr.msra.gmra.mxu0 %vm372_vm0, %v2193_v4  ;;  %2204 = vmatmul.msk.f32.vlgmr.msra.gmra.mxu1 %vm372_vm0, %v2194_v5  ;;  %v2276_v4 = vld [vmem:[%s2419_s7 + $0x180] sm:$0xff]  ;;  %v2298_v9 = vld [vmem:[%s2419_s7 + $0x1b8] sm:$0xff] }
  0x55   : > { %2209 = vmatmul.msk.f32.vlgmr.msra.gmra.mxu2 %vm372_vm0, %v1189_v10  ;;  %2218 = vmatmul.msk.f32.vlgmr.msra.gmra.mxu3 %vm372_vm0, %v2212_v11  ;;  %v2281_v5 = vld [vmem:[%s2426_s10 + $0x180] sm:$0xff]  ;;  %v2303_v10 = vld [vmem:[%s2426_s10 + $0x1b8] sm:$0xff] }
  0x56   : > { %1373 = vmatpush.msrb.mxu3 %v2241_v12  ;;  %1277 = vmatpush.msrb.mxu0 %v2222_v13  ;;  %v2312_v11 = vld [vmem:[%s2414_s28 + $0x1d8] sm:$0xff]  ;;  %v2316_v12 = vld [vmem:[%s2419_s7 + $0x1d0] sm:$0xff] }
  0x57   : > { %1306 = vmatpush.msrb.mxu1 %v2227_v14  ;;  %1345 = vmatpush.msrb.mxu2 %v2236_v15  ;;  %v2297_v13 = vld [vmem:[%s2419_s7 + $0x1b0] sm:$0xff] }
  0x58   : > { %1374 = vmatpush.msrb.mxu3 %v2240_v16  ;;  %1278 = vmatpush.msrb.mxu0 %v2221_v17  ;;  %v2302_v14 = vld [vmem:[%s2426_s10 + $0x1b0] sm:$0xff]  ;;  %v2315_v16 = vld [vmem:[%s2419_s7 + $0x1c8] sm:$0xff] }
  0x59   : > { %1307 = vmatpush.msrb.mxu1 %v2226_v18  ;;  %1346 = vmatpush.msrb.mxu2 %v2235_v19  ;;  %v2311_v15 = vld [vmem:[%s2414_s28 + $0x1d0] sm:$0xff]  ;;  %v2296_v17 = vld [vmem:[%s2419_s7 + $0x1a8] sm:$0xff]  ;;  %v2289_v18 = vld [vmem:[%s2445_s16 + $0x1a] sm:$0x3] }
  0x5a   : > { %1375 = vmatpush.msrb.mxu3 %v2239_v20  ;;  %1279 = vmatpush.msrb.mxu0 %v2220_v21  ;;  %v2301_v19 = vld [vmem:[%s2426_s10 + $0x1a8] sm:$0xff]  ;;  %v2314_v21 = vld [vmem:[%s2419_s7 + $0x1c0] sm:$0xff] }
  0x5b   : > { %1308 = vmatpush.msrb.mxu1 %v2225_v23  ;;  %1347 = vmatpush.msrb.mxu2 %v2234_v24  ;;  %v2310_v20 = vld [vmem:[%s2414_s28 + $0x1c8] sm:$0xff]  ;;  %v2300_v23 = vld [vmem:[%s2426_s10 + $0x1a0] sm:$0xff] }
  0x5c   : > { %1376 = vmatpush.msrb.mxu3 %v2238_v25  ;;  %1280 = vmatpush.msrb.mxu0 %v2219_v26  ;;  %v2309_v24 = vld [vmem:[%s2414_s28 + $0x1c0] sm:$0xff]  ;;  %v1669_v25 = vadd.f32 %v2289_v18, %v2288_v7  ;;  %v2307_v26 = vld [vmem:[%s2439_s13 + $0x1c] sm:$0x3] }
  0x5d   : > { %1309 = vmatpush.msrb.mxu1 %v2224_v27  ;;  %1348 = vmatpush.msrb.mxu2 %v2233_v28  ;;  %v2308_v27 = vld [vmem:[%s2445_s16 + $0x1c] sm:$0x3] }
  0x5e   : > { %2223 = vmatmul.msk.f32.vlgmr.msrb.gmra.mxu0 %vm372_vm0, %v2213_v22  ;;  %2228 = vmatmul.msk.f32.vlgmr.msrb.gmra.mxu1 %vm372_vm0, %v1285_v29  ;;  %v2295_v22 = vld [vmem:[%s2419_s7 + $0x1a0] sm:$0xff]  ;;  %v2341_v28 = vld [vmem:[%s2426_s10 + $0x1f8] sm:$0xff] }
  0x5f   : > { %2237 = vmatmul.msk.f32.vlgmr.msrb.gmra.mxu2 %vm372_vm0, %v2231_v30  ;;  %2242 = vmatmul.msk.f32.vlgmr.msrb.gmra.mxu3 %vm372_vm0, %v2232_v31  ;;  %v2322_v29 = vld [vmem:[%s2426_s10 + $0x1d8] sm:$0xff] }
  0x60   : > { %1498 = vmatpush.msra.mxu3 %v2265_v32  ;;  %1402 = vmatpush.msra.mxu0 %v2246_v33  ;;  %v2336_v30 = vld [vmem:[%s2419_s7 + $0x1f8] sm:$0xff]  ;;  %v2340_v32 = vld [vmem:[%s2426_s10 + $0x1f0] sm:$0xff] }
  0x61   : > { %1441 = vmatpush.msra.mxu1 %v2255_v34  ;;  %1469 = vmatpush.msra.mxu2 %v2260_v35  ;;  %v2331_v31 = vld [vmem:[%s2414_s28 + $0x1f8] sm:$0xff]  ;;  %v2321_v33 = vld [vmem:[%s2426_s10 + $0x1d0] sm:$0xff]  ;;  %v2339_v35 = vld [vmem:[%s2426_s10 + $0x1e8] sm:$0xff] }
  0x62   : > { %1499 = vmatpush.msra.mxu3 %v2264_v36  ;;  %1403 = vmatpush.msra.mxu0 %v2245_v37  ;;  %v2335_v34 = vld [vmem:[%s2419_s7 + $0x1f0] sm:$0xff]  ;;  %v2320_v37 = vld [vmem:[%s2426_s10 + $0x1c8] sm:$0xff] }
  0x63   : > { %1442 = vmatpush.msra.mxu1 %v2254_v38  ;;  %1470 = vmatpush.msra.mxu2 %v2259_v39  ;;  %v2330_v36 = vld [vmem:[%s2414_s28 + $0x1f0] sm:$0xff]  ;;  %v2326_v38 = vld [vmem:[%s2439_s13 + $0x1e] sm:$0x3] }
  0x64   : > { %1500 = vmatpush.msra.mxu3 %v2263_v40  ;;  %1404 = vmatpush.msra.mxu0 %v2244_v41  ;;  %v2327_v39 = vld [vmem:[%s2445_s16 + $0x1e] sm:$0x3]  ;;  %v2334_v40 = vld [vmem:[%s2419_s7 + $0x1e8] sm:$0xff] }
  0x65   : > { %1443 = vmatpush.msra.mxu1 %v2253_v42  ;;  %1471 = vmatpush.msra.mxu2 %v2258_v43  ;;  %v2329_v41 = vld [vmem:[%s2414_s28 + $0x1e8] sm:$0xff]  ;;  %v1765_v42 = vadd.f32 %v2308_v27, %v2307_v26  ;;  %v2338_v43 = vld [vmem:[%s2426_s10 + $0x1e0] sm:$0xff] }
  0x66   : > { %1501 = vmatpush.msra.mxu3 %v2262_v46  ;;  %1405 = vmatpush.msra.mxu0 %v2243_v47  ;;  %v1861_v46 = vadd.f32 %v2327_v39, %v2326_v38  ;;  %v2328_v47 = vld [vmem:[%s2414_s28 + $0x1e0] sm:$0xff] }
  0x67   : > { %1444 = vmatpush.msra.mxu1 %v2252_v49  ;;  %1472 = vmatpush.msra.mxu2 %v2257_v50 }
  0x68   : > { %2247 = vmatmul.msk.f32.vlgmr.msra.gmra.mxu0 %vm372_vm0, %v1381_v48  ;;  %2256 = vmatmul.msk.f32.vlgmr.msra.gmra.mxu1 %vm372_vm0, %v2250_v44  ;;  %v2319_v44 = vld [vmem:[%s2426_s10 + $0x1c0] sm:$0xff] }
  0x69   : > { %2261 = vmatmul.msk.f32.vlgmr.msra.gmra.mxu2 %vm372_vm0, %v2251_v45  ;;  %2266 = vmatmul.msk.f32.vlgmr.msra.gmra.mxu3 %vm372_vm0, %v1477_v51  ;;  %v2333_v45 = vld [vmem:[%s2419_s7 + $0x1e0] sm:$0xff] }
  0x6a   : > { %1633 = vmatpush.msrb.mxu3 %v2293_v52  ;;  %1537 = vmatpush.msrb.mxu0 %v2274_v53 }
  0x6b   : > { %1565 = vmatpush.msrb.mxu1 %v2279_v54  ;;  %1594 = vmatpush.msrb.mxu2 %v2284_v55 }
  0x6c   : > { %1634 = vmatpush.msrb.mxu3 %v2292_v56  ;;  %1538 = vmatpush.msrb.mxu0 %v2273_v57 }
  0x6d   : > { %1566 = vmatpush.msrb.mxu1 %v2278_v58  ;;  %1595 = vmatpush.msrb.mxu2 %v2283_v59 }
  0x6e   : > { %1635 = vmatpush.msrb.mxu3 %v2291_v60  ;;  %1539 = vmatpush.msrb.mxu0 %v2272_v61 }
  0x6f   : > { %1567 = vmatpush.msrb.mxu1 %v2277_v62  ;;  %1596 = vmatpush.msrb.mxu2 %v2282_v63 }
  0x70   : > { %1636 = vmatpush.msrb.mxu3 %v2290_v2  ;;  %1540 = vmatpush.msrb.mxu0 %v2271_v3 }
  0x71   : > { %1568 = vmatpush.msrb.mxu1 %v2276_v4  ;;  %1597 = vmatpush.msrb.mxu2 %v2281_v5 }
  0x72   : > { %2275 = vmatmul.msk.f32.vlgmr.msrb.gmra.mxu0 %vm372_vm0, %v2269_v0  ;;  %2280 = vmatmul.msk.f32.vlgmr.msrb.gmra.mxu1 %vm372_vm0, %v2270_v1 }
  0x73   : > { %2285 = vmatmul.msk.f32.vlgmr.msrb.gmra.mxu2 %vm372_vm0, %v1573_v6  ;;  %2294 = vmatmul.msk.f32.vlgmr.msrb.gmra.mxu3 %vm372_vm0, %v2288_v7 }
  0x74   : > { %1757 = vmatpush.msra.mxu3 %v2317_v8  ;;  %1661 = vmatpush.msra.mxu0 %v2298_v9 }
  0x75   : > { %1690 = vmatpush.msra.mxu1 %v2303_v10  ;;  %1729 = vmatpush.msra.mxu2 %v2312_v11 }
  0x76   : > { %1758 = vmatpush.msra.mxu3 %v2316_v12  ;;  %1662 = vmatpush.msra.mxu0 %v2297_v13 }
  0x77   : > { %1691 = vmatpush.msra.mxu1 %v2302_v14  ;;  %1730 = vmatpush.msra.mxu2 %v2311_v15 }
  0x78   : > { %1759 = vmatpush.msra.mxu3 %v2315_v16  ;;  %1663 = vmatpush.msra.mxu0 %v2296_v17 }
  0x79   : > { %1692 = vmatpush.msra.mxu1 %v2301_v19  ;;  %1731 = vmatpush.msra.mxu2 %v2310_v20 }
  0x7a   : > { %1760 = vmatpush.msra.mxu3 %v2314_v21  ;;  %1664 = vmatpush.msra.mxu0 %v2295_v22 }
  0x7b   : > { %1693 = vmatpush.msra.mxu1 %v2300_v23  ;;  %1732 = vmatpush.msra.mxu2 %v2309_v24 }
  0x7c   : > { %2299 = vmatmul.msk.f32.vlgmr.msra.gmra.mxu0 %vm372_vm0, %v2289_v18  ;;  %2304 = vmatmul.msk.f32.vlgmr.msra.gmra.mxu1 %vm372_vm0, %v1669_v25 }
  0x7d   : > { %2313 = vmatmul.msk.f32.vlgmr.msra.gmra.mxu2 %vm372_vm0, %v2307_v26  ;;  %2318 = vmatmul.msk.f32.vlgmr.msra.gmra.mxu3 %vm372_vm0, %v2308_v27 }
  0x7e   : > { %1882 = vmatpush.msrb.mxu3 %v2341_v28  ;;  %1786 = vmatpush.msrb.mxu0 %v2322_v29 }
  0x7f   : > { %1853 = vmatpush.msrb.mxu2 %v2336_v30  ;;  %1825 = vmatpush.msrb.mxu1 %v2331_v31 }
  0x80   : > { %1883 = vmatpush.msrb.mxu3 %v2340_v32  ;;  %1787 = vmatpush.msrb.mxu0 %v2321_v33 }
  0x81   : > { %1854 = vmatpush.msrb.mxu2 %v2335_v34  ;;  %1826 = vmatpush.msrb.mxu1 %v2330_v36 }
  0x82   : > { %1884 = vmatpush.msrb.mxu3 %v2339_v35  ;;  %1788 = vmatpush.msrb.mxu0 %v2320_v37 }
  0x83   : > { %1855 = vmatpush.msrb.mxu2 %v2334_v40  ;;  %1827 = vmatpush.msrb.mxu1 %v2329_v41 }
  0x84   : > { %1885 = vmatpush.msrb.mxu3 %v2338_v43  ;;  %1789 = vmatpush.msrb.mxu0 %v2319_v44 }
  0x85   : > { %1856 = vmatpush.msrb.mxu2 %v2333_v45  ;;  %2323 = vmatmul.msk.f32.vlgmr.msrb.gmra.mxu0 %vm372_vm0, %v1765_v42 }
  0x86   : > { %2337 = vmatmul.msk.f32.vlgmr.msrb.gmra.mxu2 %vm372_vm0, %v2327_v39  ;;  %2342 = vmatmul.msk.f32.vlgmr.msrb.gmra.mxu3 %vm372_vm0, %v1861_v46 }
  0x87   : > { %1828 = vmatpush.msrb.mxu1 %v2328_v47 }
  0x88   : > { %2332 = vmatmul.msk.f32.vlgmr.msrb.gmra.mxu1 %vm372_vm0, %v2326_v38 }
  0x94   : > { %v393_v48 = vpop.f32.mrf.mxu0 }
  0x95   : > { %v420_v49 = vpop.f32.mrf.mxu1 }
  0x96   : > { %v451_v50 = vsub.f32 %v393_v48, %v420_v49 }
  0x98   : > { %453 = vst.msk [vmem:[%s2714_s19] sm:$0x3] %vm452_vm1, %v451_v50 }
  0x9c   : > { %v486_v52 = vpop.f32.mrf.mxu3 }
  0x9d   : > { %v448_v51 = vpop.f32.mrf.mxu2 }
  0x9e   : > { %v454_v53 = vsub.f32 %v448_v51, %v393_v48 }
  0x9f   : > { %v514_v55 = vpop.f32.mrf.mxu0  ;;  %v543_v56 = vpop.f32.mrf.mxu1 }
  0xa0   : > { %v455_v54 = vsub.f32 %v454_v53, %v420_v49  ;;  %v546_v57 = vsub.f32 %v486_v52, %v514_v55  ;;  %v549_v58 = vsub.f32 %v543_v56, %v486_v52 }
  0xa2   : > { %456 = vst.msk [vmem:[%s2722_s23] sm:$0x3] %vm452_vm1, %v455_v54  ;;  %v550_v59 = vsub.f32 %v549_v58, %v514_v55 }
  0xa3   : > { %2077 = vst.msk [vmem:[%s2714_s19 + $0x2] sm:$0x3] %vm452_vm1, %v546_v57 }
  0xa4   : > { %2078 = vst.msk [vmem:[%s2722_s23 + $0x2] sm:$0x3] %vm452_vm1, %v550_v59 }
  0xa6   : > { %v582_v60 = vpop.f32.mrf.mxu2  ;;  %v610_v61 = vpop.f32.mrf.mxu3 }
  0xa7   : > { %v642_v62 = vsub.f32 %v582_v60, %v610_v61 }
  0xa9   : > { %2096 = vst.msk [vmem:[%s2714_s19 + $0x4] sm:$0x3] %vm452_vm1, %v642_v62  ;;  %v639_v63 = vpop.f32.mrf.mxu0  ;;  %v678_v0 = vpop.f32.mrf.mxu1 }
  0xaa   : > { %v645_v1 = vsub.f32 %v639_v63, %v582_v60 }
  0xac   : > { %v646_v2 = vsub.f32 %v645_v1, %v610_v61 }
  0xae   : > { %2097 = vst.msk [vmem:[%s2722_s23 + $0x4] sm:$0x3] %vm452_vm1, %v646_v2 }
  0xb0   : > { %v706_v3 = vpop.f32.mrf.mxu2  ;;  %v735_v4 = vpop.f32.mrf.mxu3 }
  0xb1   : > { %v738_v5 = vsub.f32 %v678_v0, %v706_v3  ;;  %v741_v6 = vsub.f32 %v735_v4, %v678_v0 }
  0xb3   : > { %2115 = vst.msk [vmem:[%s2714_s19 + $0x6] sm:$0x3] %vm452_vm1, %v738_v5  ;;  %v742_v7 = vsub.f32 %v741_v6, %v706_v3  ;;  %v774_v8 = vpop.f32.mrf.mxu0  ;;  %v802_v9 = vpop.f32.mrf.mxu1 }
  0xb4   : > { %v834_v10 = vsub.f32 %v774_v8, %v802_v9 }
  0xb5   : > { %2116 = vst.msk [vmem:[%s2722_s23 + $0x6] sm:$0x3] %vm452_vm1, %v742_v7 }
  0xb6   : > { %2134 = vst.msk [vmem:[%s2714_s19 + $0x8] sm:$0x3] %vm452_vm1, %v834_v10 }
  0xba   : > { %v831_v11 = vpop.f32.mrf.mxu2  ;;  %v870_v12 = vpop.f32.mrf.mxu3 }
  0xbb   : > { %v837_v13 = vsub.f32 %v831_v11, %v774_v8 }
  0xbd   : > { %v838_v14 = vsub.f32 %v837_v13, %v802_v9  ;;  %v898_v15 = vpop.f32.mrf.mxu0  ;;  %v927_v16 = vpop.f32.mrf.mxu1 }
  0xbe   : > { %v930_v17 = vsub.f32 %v870_v12, %v898_v15  ;;  %v933_v18 = vsub.f32 %v927_v16, %v870_v12 }
  0xbf   : > { %2135 = vst.msk [vmem:[%s2722_s23 + $0x8] sm:$0x3] %vm452_vm1, %v838_v14 }
  0xc0   : > { %2153 = vst.msk [vmem:[%s2714_s19 + $0xa] sm:$0x3] %vm452_vm1, %v930_v17  ;;  %v934_v19 = vsub.f32 %v933_v18, %v898_v15 }
  0xc2   : > { %2154 = vst.msk [vmem:[%s2722_s23 + $0xa] sm:$0x3] %vm452_vm1, %v934_v19 }
  0xc4   : > { %v966_v20 = vpop.f32.mrf.mxu2  ;;  %v994_v21 = vpop.f32.mrf.mxu3 }
  0xc5   : > { %v1026_v22 = vsub.f32 %v966_v20, %v994_v21 }
  0xc7   : > { %2172 = vst.msk [vmem:[%s2714_s19 + $0xc] sm:$0x3] %vm452_vm1, %v1026_v22  ;;  %v1023_v23 = vpop.f32.mrf.mxu0  ;;  %v1062_v24 = vpop.f32.mrf.mxu1 }
  0xc8   : > { %v1029_v25 = vsub.f32 %v1023_v23, %v966_v20 }
  0xca   : > { %v1030_v26 = vsub.f32 %v1029_v25, %v994_v21 }
  0xcc   : > { %2173 = vst.msk [vmem:[%s2722_s23 + $0xc] sm:$0x3] %vm452_vm1, %v1030_v26 }
  0xce   : > { %v1090_v27 = vpop.f32.mrf.mxu2  ;;  %v1119_v28 = vpop.f32.mrf.mxu3 }
  0xcf   : > { %v1122_v29 = vsub.f32 %v1062_v24, %v1090_v27  ;;  %v1125_v30 = vsub.f32 %v1119_v28, %v1062_v24 }
  0xd1   : > { %2191 = vst.msk [vmem:[%s2714_s19 + $0xe] sm:$0x3] %vm452_vm1, %v1122_v29  ;;  %v1126_v31 = vsub.f32 %v1125_v30, %v1090_v27  ;;  %v1158_v32 = vpop.f32.mrf.mxu0  ;;  %v1186_v33 = vpop.f32.mrf.mxu1 }
  0xd2   : > { %v1218_v34 = vsub.f32 %v1158_v32, %v1186_v33 }
  0xd3   : > { %2192 = vst.msk [vmem:[%s2722_s23 + $0xe] sm:$0x3] %vm452_vm1, %v1126_v31 }
  0xd4   : > { %2210 = vst.msk [vmem:[%s2714_s19 + $0x10] sm:$0x3] %vm452_vm1, %v1218_v34 }
  0xd8   : > { %v1215_v35 = vpop.f32.mrf.mxu2  ;;  %v1254_v36 = vpop.f32.mrf.mxu3 }
  0xd9   : > { %v1221_v37 = vsub.f32 %v1215_v35, %v1158_v32 }
  0xdb   : > { %v1222_v38 = vsub.f32 %v1221_v37, %v1186_v33  ;;  %v1282_v39 = vpop.f32.mrf.mxu0  ;;  %v1311_v40 = vpop.f32.mrf.mxu1 }
  0xdc   : > { %v1314_v41 = vsub.f32 %v1254_v36, %v1282_v39  ;;  %v1317_v42 = vsub.f32 %v1311_v40, %v1254_v36 }
  0xdd   : > { %2211 = vst.msk [vmem:[%s2722_s23 + $0x10] sm:$0x3] %vm452_vm1, %v1222_v38 }
  0xde   : > { %2229 = vst.msk [vmem:[%s2714_s19 + $0x12] sm:$0x3] %vm452_vm1, %v1314_v41  ;;  %v1318_v43 = vsub.f32 %v1317_v42, %v1282_v39 }
  0xe0   : > { %2230 = vst.msk [vmem:[%s2722_s23 + $0x12] sm:$0x3] %vm452_vm1, %v1318_v43 }
  0xe2   : > { %v1350_v44 = vpop.f32.mrf.mxu2  ;;  %v1378_v45 = vpop.f32.mrf.mxu3 }
  0xe3   : > { %v1410_v46 = vsub.f32 %v1350_v44, %v1378_v45 }
  0xe5   : > { %2248 = vst.msk [vmem:[%s2714_s19 + $0x14] sm:$0x3] %vm452_vm1, %v1410_v46  ;;  %v1407_v47 = vpop.f32.mrf.mxu0  ;;  %v1446_v48 = vpop.f32.mrf.mxu1 }
  0xe6   : > { %v1413_v49 = vsub.f32 %v1407_v47, %v1350_v44 }
  0xe8   : > { %v1414_v50 = vsub.f32 %v1413_v49, %v1378_v45 }
  0xea   : > { %2249 = vst.msk [vmem:[%s2722_s23 + $0x14] sm:$0x3] %vm452_vm1, %v1414_v50 }
  0xec   : > { %v1474_v51 = vpop.f32.mrf.mxu2  ;;  %v1503_v52 = vpop.f32.mrf.mxu3 }
  0xed   : > { %v1506_v53 = vsub.f32 %v1446_v48, %v1474_v51  ;;  %v1509_v54 = vsub.f32 %v1503_v52, %v1446_v48 }
  0xef   : > { %2267 = vst.msk [vmem:[%s2714_s19 + $0x16] sm:$0x3] %vm452_vm1, %v1506_v53  ;;  %v1510_v55 = vsub.f32 %v1509_v54, %v1474_v51  ;;  %v1542_v56 = vpop.f32.mrf.mxu0  ;;  %v1570_v57 = vpop.f32.mrf.mxu1 }
  0xf0   : > { %v1602_v58 = vsub.f32 %v1542_v56, %v1570_v57 }
  0xf1   : > { %2268 = vst.msk [vmem:[%s2722_s23 + $0x16] sm:$0x3] %vm452_vm1, %v1510_v55 }
  0xf2   : > { %2286 = vst.msk [vmem:[%s2714_s19 + $0x18] sm:$0x3] %vm452_vm1, %v1602_v58 }
  0xf6   : > { %v1599_v59 = vpop.f32.mrf.mxu2  ;;  %v1638_v60 = vpop.f32.mrf.mxu3 }
  0xf7   : > { %v1605_v61 = vsub.f32 %v1599_v59, %v1542_v56 }
  0xf9   : > { %v1606_v62 = vsub.f32 %v1605_v61, %v1570_v57  ;;  %v1666_v63 = vpop.f32.mrf.mxu0  ;;  %v1695_v0 = vpop.f32.mrf.mxu1 }
  0xfa   : > { %v1698_v1 = vsub.f32 %v1638_v60, %v1666_v63  ;;  %v1701_v2 = vsub.f32 %v1695_v0, %v1638_v60 }
  0xfb   : > { %2287 = vst.msk [vmem:[%s2722_s23 + $0x18] sm:$0x3] %vm452_vm1, %v1606_v62 }
  0xfc   : > { %2305 = vst.msk [vmem:[%s2714_s19 + $0x1a] sm:$0x3] %vm452_vm1, %v1698_v1  ;;  %v1702_v3 = vsub.f32 %v1701_v2, %v1666_v63 }
  0xfe   : > { %2306 = vst.msk [vmem:[%s2722_s23 + $0x1a] sm:$0x3] %vm452_vm1, %v1702_v3 }
 0x100   : > { %v1734_v4 = vpop.f32.mrf.mxu2  ;;  %v1762_v5 = vpop.f32.mrf.mxu3 }
 0x101   : > { %v1794_v6 = vsub.f32 %v1734_v4, %v1762_v5 }
 0x102   : > { %v1791_v7 = vpop.f32.mrf.mxu0 }
 0x103   : > { %2324 = vst.msk [vmem:[%s2714_s19 + $0x1c] sm:$0x3] %vm452_vm1, %v1794_v6  ;;  %v1797_v8 = vsub.f32 %v1791_v7, %v1734_v4 }
 0x105   : > { %v1798_v9 = vsub.f32 %v1797_v8, %v1762_v5  ;;  %v1830_v10 = vpop.f32.mrf.mxu1 }
 0x107   : > { %2325 = vst.msk [vmem:[%s2722_s23 + $0x1c] sm:$0x3] %vm452_vm1, %v1798_v9 }
 0x109   : > { %v1858_v11 = vpop.f32.mrf.mxu2  ;;  %v1887_v12 = vpop.f32.mrf.mxu3 }
 0x10a   : > { %v1890_v13 = vsub.f32 %v1830_v10, %v1858_v11  ;;  %v1893_v14 = vsub.f32 %v1887_v12, %v1830_v10 }
 0x10c   : > { %2343 = vst.msk [vmem:[%s2714_s19 + $0x1e] sm:$0x3] %vm452_vm1, %v1890_v13  ;;  %v1894_v15 = vsub.f32 %v1893_v14, %v1858_v11 }
 0x10e   : > { %2344 = vst.msk [vmem:[%s2722_s23 + $0x1e] sm:$0x3] %vm452_vm1, %v1894_v15 }
 0x10f PF: > { %s17_s21 = sadd.s32 1, %s2364_s21  }
 0x110   : > { %p14_p4 = scmp.ge.s32.totalorder %s17_s21, 4  }
 0x112   :  { %16 = sbr.rel (!%p14_p4) target bundleno = 1 (0x1), region = 199 }

// kernel: fno2d_forward.12
= control target key start
LH: loop header
LB: loop body
LE: loop exit
PB: predicated region body
PF: predicated region fallthrough
CT: control target
= control target key end

     0   :  { %s1699_s15 = smov 0   ;;  %s2629_s0 = inlined_call_operand.vmem [shape: f32[512,32], index: 0, kind: input, shape index: {}]   ;;  %s2630_s1 = inlined_call_operand.vmem [shape: f32[512,32], index: 1, kind: input, shape index: {}]   ;;  %s2631_s2 = inlined_call_operand.vmem [shape: f32[32,32], index: 2, kind: input, shape index: {}]   ;;  %s2632_s3 = inlined_call_operand.vmem [shape: f32[1,32], index: 3, kind: input, shape index: {}]   ;;  %s2633_s4 = inlined_call_operand.vmem [shape: f32[512,32], index: 4, kind: output, shape index: {}]  }
   0x1 LB: > { %s1469_s16 = sadd.s32 4294967295, %s1671_s15   ;;  %p1473_p0 = scmp.ge.s32.totalorder %s1671_s15, 1  ;;  %s1671_s15 = sphi %s1699_s15, %s14_s15  }
   0x2   : > { %p174_p1 = scmp.lt.s32.totalorder %s1671_s15, 3 }
   0x4   : > { %p175_p2 = pnand %p1473_p0, %p174_p1 }
   0x5   : > { %s1474_s21 = sshll.u32 (!%p175_p2), %s1469_s16, 5 }
   0x6   : > { %178 = sbr.rel (%p175_p2) target bundleno = 393 (0x189), region = 36  ;;  %p206_p3 = scmp.lt.s32.totalorder (!%p175_p2), %s1474_s21, 63 }
   0xb   : > { %v258_v0 = vld [vmem:[%s2631_s2 + $0x18] sm:$0xff]  ;;  %v257_v1 = vld [vmem:[%s2631_s2 + $0x10] sm:$0xff]  ;;  %v256_v2 = vld [vmem:[%s2631_s2 + $0x8] sm:$0xff]  ;;  %s2635_s21 = smov (!%p206_p3, %s1474_s21), 63  ;;  %vm263_vm0 = vcmask 261120  }
   0xc   : > { %372 = vmatpush.msra.mxu0 %v258_v0  ;;  %1514 = vmatpush.msra.mxu1 %v258_v0  ;;  %v255_v3 = vld [vmem:[%s2631_s2] sm:$0xff]  ;;  %s1719_s26 = sshll.u32 %s2635_s21, 3 }
   0xd   : > { %1515 = vmatpush.msra.mxu2 %v258_v0  ;;  %1516 = vmatpush.msra.mxu3 %v258_v0  ;;  %s1725_s29 = scalar_lea.vmem %s2629_s0, %s1719_s26  ;;  %s1795_s6 = scalar_lea.vmem %s2630_s1, %s1719_s26  ;;  %v1800_v36 = vld [vmem:[%s2632_s3] ss:$0 sm:$0xff] }
   0xe   : > { %373 = vmatpush.msra.mxu0 %v257_v1  ;;  %1517 = vmatpush.msra.mxu1 %v257_v1  ;;  %v223_v4 = vld [vmem:[%s1725_s29] sm:$0xff]  ;;  %v224_v8 = vld [vmem:[%s1725_s29 + $0x8] sm:$0xff]  ;;  %v225_v12 = vld [vmem:[%s1725_s29 + $0x10] sm:$0xff]  ;;  %s1913_s11 = scalar_lea.vmem %s2633_s4, %s1719_s26 }
   0xf   : > { %1518 = vmatpush.msra.mxu2 %v257_v1  ;;  %1519 = vmatpush.msra.mxu3 %v257_v1  ;;  %v231_v5 = vld [vmem:[%s1725_s29 + $0x40] sm:$0xff]  ;;  %v232_v9 = vld [vmem:[%s1725_s29 + $0x48] sm:$0xff]  ;;  %v233_v13 = vld [vmem:[%s1725_s29 + $0x50] sm:$0xff] }
  0x10   : > { %374 = vmatpush.msra.mxu0 %v256_v2  ;;  %1520 = vmatpush.msra.mxu1 %v256_v2  ;;  %v239_v6 = vld [vmem:[%s1725_s29 + $0x80] sm:$0xff]  ;;  %v240_v10 = vld [vmem:[%s1725_s29 + $0x88] sm:$0xff]  ;;  %v241_v14 = vld [vmem:[%s1725_s29 + $0x90] sm:$0xff] }
  0x11   : > { %1521 = vmatpush.msra.mxu2 %v256_v2  ;;  %1522 = vmatpush.msra.mxu3 %v256_v2  ;;  %v247_v7 = vld [vmem:[%s1725_s29 + $0xc0] sm:$0xff]  ;;  %v248_v11 = vld [vmem:[%s1725_s29 + $0xc8] sm:$0xff]  ;;  %v249_v15 = vld [vmem:[%s1725_s29 + $0xd0] sm:$0xff] }
  0x12   : > { %375 = vmatpush.msra.mxu0 %v255_v3  ;;  %1523 = vmatpush.msra.mxu1 %v255_v3  ;;  %v226_v16 = vld [vmem:[%s1725_s29 + $0x18] sm:$0xff]  ;;  %v227_v20 = vld [vmem:[%s1725_s29 + $0x20] sm:$0xff]  ;;  %v228_v24 = vld [vmem:[%s1725_s29 + $0x28] sm:$0xff] }
  0x13   : > { %1524 = vmatpush.msra.mxu2 %v255_v3  ;;  %1525 = vmatpush.msra.mxu3 %v255_v3  ;;  %v234_v17 = vld [vmem:[%s1725_s29 + $0x58] sm:$0xff]  ;;  %v235_v21 = vld [vmem:[%s1725_s29 + $0x60] sm:$0xff]  ;;  %v236_v25 = vld [vmem:[%s1725_s29 + $0x68] sm:$0xff] }
  0x14   : > { %1480 = vmatmul.msk.f32.vlgmr.msra.gmra.mxu0 %vm263_vm0, %v223_v4  ;;  %1488 = vmatmul.msk.f32.vlgmr.msra.gmra.mxu1 %vm263_vm0, %v231_v5  ;;  %v242_v18 = vld [vmem:[%s1725_s29 + $0x98] sm:$0xff]  ;;  %v243_v22 = vld [vmem:[%s1725_s29 + $0xa0] sm:$0xff]  ;;  %v244_v26 = vld [vmem:[%s1725_s29 + $0xa8] sm:$0xff] }
  0x15   : > { %1496 = vmatmul.msk.f32.vlgmr.msra.gmra.mxu2 %vm263_vm0, %v239_v6  ;;  %1504 = vmatmul.msk.f32.vlgmr.msra.gmra.mxu3 %vm263_vm0, %v247_v7  ;;  %v250_v19 = vld [vmem:[%s1725_s29 + $0xd8] sm:$0xff]  ;;  %v251_v23 = vld [vmem:[%s1725_s29 + $0xe0] sm:$0xff]  ;;  %v252_v27 = vld [vmem:[%s1725_s29 + $0xe8] sm:$0xff] }
  0x16   : > { %v229_v28 = vld [vmem:[%s1725_s29 + $0x30] sm:$0xff]  ;;  %v230_v32 = vld [vmem:[%s1725_s29 + $0x38] sm:$0xff]  ;;  %v473_v38 = vld [vmem:[%s1795_s6] sm:$0xff] }
  0x17   : > { %v237_v29 = vld [vmem:[%s1725_s29 + $0x70] sm:$0xff]  ;;  %v238_v33 = vld [vmem:[%s1725_s29 + $0x78] sm:$0xff]  ;;  %v481_v40 = vld [vmem:[%s1795_s6 + $0x40] sm:$0xff] }
  0x18   : > { %v245_v30 = vld [vmem:[%s1725_s29 + $0xb0] sm:$0xff]  ;;  %v246_v34 = vld [vmem:[%s1725_s29 + $0xb8] sm:$0xff]  ;;  %v489_v50 = vld [vmem:[%s1795_s6 + $0x80] sm:$0xff] }
  0x19   : > { %v253_v31 = vld [vmem:[%s1725_s29 + $0xf0] sm:$0xff]  ;;  %v254_v35 = vld [vmem:[%s1725_s29 + $0xf8] sm:$0xff]  ;;  %v497_v52 = vld [vmem:[%s1795_s6 + $0xc0] sm:$0xff] }
  0x1a   : > { %v474_v61 = vld [vmem:[%s1795_s6 + $0x8] sm:$0xff] }
  0x1c   : > { %1481 = vmatmul.msk.f32.gmra.mxu0 %vm263_vm0, %v224_v8  ;;  %1489 = vmatmul.msk.f32.gmra.mxu1 %vm263_vm0, %v232_v9 }
  0x1d   : > { %1497 = vmatmul.msk.f32.gmra.mxu2 %vm263_vm0, %v240_v10  ;;  %1505 = vmatmul.msk.f32.gmra.mxu3 %vm263_vm0, %v248_v11 }
  0x24   : > { %1482 = vmatmul.msk.f32.gmra.mxu0 %vm263_vm0, %v225_v12  ;;  %1490 = vmatmul.msk.f32.gmra.mxu1 %vm263_vm0, %v233_v13  ;;  %v482_v12 = vld [vmem:[%s1795_s6 + $0x48] sm:$0xff]  ;;  %v1673_v13 = vmov 1.0  }
  0x25   : > { %1498 = vmatmul.msk.f32.gmra.mxu2 %vm263_vm0, %v241_v14  ;;  %1506 = vmatmul.msk.f32.gmra.mxu3 %vm263_vm0, %v249_v15 }
  0x2c   : > { %1483 = vmatmul.msk.f32.gmra.mxu0 %vm263_vm0, %v226_v16  ;;  %1491 = vmatmul.msk.f32.gmra.mxu1 %vm263_vm0, %v234_v17 }
  0x2d   : > { %1499 = vmatmul.msk.f32.gmra.mxu2 %vm263_vm0, %v242_v18  ;;  %1507 = vmatmul.msk.f32.gmra.mxu3 %vm263_vm0, %v250_v19 }
  0x34   : > { %1484 = vmatmul.msk.f32.gmra.mxu0 %vm263_vm0, %v227_v20  ;;  %1492 = vmatmul.msk.f32.gmra.mxu1 %vm263_vm0, %v235_v21 }
  0x35   : > { %1500 = vmatmul.msk.f32.gmra.mxu2 %vm263_vm0, %v243_v22  ;;  %1508 = vmatmul.msk.f32.gmra.mxu3 %vm263_vm0, %v251_v23 }
  0x3c   : > { %1485 = vmatmul.msk.f32.gmra.mxu0 %vm263_vm0, %v228_v24  ;;  %1493 = vmatmul.msk.f32.gmra.mxu1 %vm263_vm0, %v236_v25 }
  0x3d   : > { %1501 = vmatmul.msk.f32.gmra.mxu2 %vm263_vm0, %v244_v26  ;;  %1509 = vmatmul.msk.f32.gmra.mxu3 %vm263_vm0, %v252_v27 }
  0x44   : > { %1486 = vmatmul.msk.f32.gmra.mxu0 %vm263_vm0, %v229_v28  ;;  %1494 = vmatmul.msk.f32.gmra.mxu1 %vm263_vm0, %v237_v29 }
  0x45   : > { %1502 = vmatmul.msk.f32.gmra.mxu2 %vm263_vm0, %v245_v30  ;;  %1510 = vmatmul.msk.f32.gmra.mxu3 %vm263_vm0, %v253_v31 }
  0x4c   : > { %1487 = vmatmul.msk.f32.gmra.mxu0 %vm263_vm0, %v230_v32  ;;  %1495 = vmatmul.msk.f32.gmra.mxu1 %vm263_vm0, %v238_v33 }
  0x4d   : > { %1503 = vmatmul.msk.f32.gmra.mxu2 %vm263_vm0, %v246_v34  ;;  %1511 = vmatmul.msk.f32.gmra.mxu3 %vm263_vm0, %v254_v35 }
  0x91   : > { %v377_v37 = vpop.f32.mrf.mxu0  ;;  %v401_v39 = vpop.f32.mrf.mxu1 }
  0x92   : > { %v378_v41 = vadd.f32 %v1800_v36, %v377_v37  ;;  %v402_v42 = vadd.f32 %v1800_v36, %v401_v39  ;;  %v490_v39 = vld [vmem:[%s1795_s6 + $0x88] sm:$0xff] }
  0x94   : > { %v505_v43 = vadd.f32 %v473_v38, %v378_v41  ;;  %v513_v44 = vadd.f32 %v481_v40, %v402_v42 }
  0x96   : > { %v569_v45 = vmul.f32 0.70710677, %v505_v43  ;;  %v577_v46 = vmul.f32 0.70710677, %v513_v44  ;;  %v1815_v9 = vmul.f32 0.5, %v505_v43  ;;  %v1817_v10 = vmul.f32 0.5, %v513_v44 }
  0x98   : > { %v665_v47 = vand.u32 2147483647, %v569_v45  ;;  %v673_v48 = vand.u32 2147483647, %v577_v46  ;;  %v425_v49 = vpop.f32.mrf.mxu2  ;;  %v449_v51 = vpop.f32.mrf.mxu3  ;;  %vm601_vm1 = vcmp.lt.f32.partialorder %v569_v45, 0.0  ;;  %vm609_vm2 = vcmp.lt.f32.partialorder %v577_v46, 0.0 }
  0x99   : > { %v426_v53 = vadd.f32 %v1800_v36, %v425_v49  ;;  %v450_v54 = vadd.f32 %v1800_v36, %v449_v51  ;;  %v380_v55 = vpop.f32.mrf.mxu0  ;;  %v404_v2 = vpop.f32.mrf.mxu1  ;;  %v1821_v14 = vsel %vm601_vm1, -1.0, %v1673_v13  ;;  %v1824_v15 = vsel %vm609_vm2, -1.0, %v1673_v13 }
  0x9a   : > { %v697_v56 = vmul.f32 0.3275911, %v665_v47  ;;  %v705_v57 = vmul.f32 0.3275911, %v673_v48  ;;  %v381_v60 = vadd.f32 %v1800_v36, %v380_v55  ;;  %v1081_v4 = vsub.f32 0.0, %v665_v47 }
  0x9b   : > { %v521_v58 = vadd.f32 %v489_v50, %v426_v53  ;;  %v529_v59 = vadd.f32 %v497_v52, %v450_v54  ;;  %v1089_v5 = vsub.f32 0.0, %v673_v48  ;;  %v405_v8 = vadd.f32 %v1800_v36, %v404_v2 }
  0x9c   : > { %v729_v62 = vadd.f32 1.0, %v697_v56  ;;  %v737_v63 = vadd.f32 1.0, %v705_v57  ;;  %v1812_v3 = vadd.f32 %v474_v61, %v381_v60  ;;  %v1113_v18 = vmul.f32 %v1081_v4, %v665_v47 }
  0x9d   : > { %v585_v0 = vmul.f32 0.70710677, %v521_v58  ;;  %v593_v1 = vmul.f32 0.70710677, %v529_v59  ;;  %v1121_v19 = vmul.f32 %v1089_v5, %v673_v48  ;;  %v1831_v24 = vmul.f32 0.5, %v521_v58 }
  0x9e   : > { %1536 = vrcp.f32 %v729_v62  ;;  %v1827_v17 = vmul.f32 0.70710677, %v1812_v3  ;;  %v1834_v27 = vadd.f32 %v482_v12, %v405_v8  ;;  %v1145_v35 = vmul.f32 1.442695, %v1113_v18 }
  0x9f   : > { %1538 = vrcp.f32 %v737_v63  ;;  %v681_v6 = vand.u32 2147483647, %v585_v0  ;;  %v689_v7 = vand.u32 2147483647, %v593_v1  ;;  %vm617_vm3 = vcmp.lt.f32.partialorder %v585_v0, 0.0 }
  0xa0   : > { %v428_v22 = vpop.f32.mrf.mxu2  ;;  %v666_v26 = vand.u32 2147483647, %v1827_v17  ;;  %v1841_v38 = vmul.f32 0.5, %v529_v59  ;;  %vm625_vm4 = vcmp.lt.f32.partialorder %v593_v1, 0.0  ;;  %v1845_v42 = vmul.f32 0.70710677, %v1834_v27  ;;  %v452_v59 = vpop.f32.mrf.mxu3 }
  0xa1   : > { %v713_v11 = vmul.f32 0.3275911, %v681_v6  ;;  %v721_v16 = vmul.f32 0.3275911, %v689_v7  ;;  %v1097_v21 = vsub.f32 0.0, %v681_v6  ;;  %v1105_v30 = vsub.f32 0.0, %v689_v7 }
  0xa2   : > { %v698_v32 = vmul.f32 0.3275911, %v666_v26  ;;  %v429_v33 = vadd.f32 %v1800_v36, %v428_v22  ;;  %v1161_v44 = vmul.f32 1.442695, %v1121_v19  ;;  %v1850_v45 = vsel %vm617_vm3, -1.0, %v1673_v13 }
  0xa3   : > { %v745_v20 = vadd.f32 1.0, %v713_v11  ;;  %v753_v25 = vadd.f32 1.0, %v721_v16  ;;  %v1129_v37 = vmul.f32 %v1097_v21, %v681_v6  ;;  %v1137_v46 = vmul.f32 %v1105_v30, %v689_v7  ;;  %v498_v16 = vld [vmem:[%s1795_s6 + $0xc8] sm:$0xff] }
  0xa4   : > { %v1829_v23 = vpop.eup %1536  ;;  %v730_v41 = vadd.f32 1.0, %v698_v32  ;;  %v674_v48 = vand.u32 2147483647, %v1845_v42  ;;  %v1854_v49 = vadd.f32 %v490_v39, %v429_v33  ;;  %v1859_v53 = vsel %vm625_vm4, -1.0, %v1673_v13 }
  0xa5   : > { %v1836_v28 = vpop.eup %1538  ;;  %v793_v29 = vmul.f32 1.0614054, %v1829_v23  ;;  %1540 = vrcp.f32 %v745_v20  ;;  %v1177_v52 = vmul.f32 1.442695, %v1129_v37  ;;  %v1082_v54 = vsub.f32 0.0, %v666_v26 }
  0xa6   : > { %v801_v31 = vmul.f32 1.0614054, %v1836_v28  ;;  %1542 = vrcp.f32 %v753_v25  ;;  %v706_v58 = vmul.f32 0.3275911, %v674_v48  ;;  %v1193_v62 = vmul.f32 1.442695, %v1137_v46 }
  0xa7   : > { %v825_v34 = vadd.f32 -1.4531521, %v793_v29  ;;  %1544 = vrcp.f32 %v730_v41  ;;  %v1868_v2 = vmul.f32 0.70710677, %v1854_v49  ;;  %v453_v6 = vadd.f32 %v1800_v36, %v452_v59 }
  0xa8   : > { %v833_v40 = vadd.f32 -1.4531521, %v801_v31  ;;  %1546 = vpow2.f32 %v1145_v35  ;;  %v738_v1 = vadd.f32 1.0, %v706_v58  ;;  %v1114_v12 = vmul.f32 %v1082_v54, %v666_v26  ;;  %v383_v31 = vpop.f32.mrf.mxu0 }
  0xa9   : > { %v857_v43 = vmul.f32 %v1829_v23, %v825_v34  ;;  %1548 = vpow2.f32 %v1161_v44  ;;  %v1090_v29 = vsub.f32 0.0, %v674_v48  ;;  %v682_v30 = vand.u32 2147483647, %v1868_v2 }
  0xaa   : > { %v865_v47 = vmul.f32 %v1836_v28, %v833_v40  ;;  %1550 = vpow2.f32 %v1177_v52  ;;  %v1880_v35 = vadd.f32 %v498_v16, %v453_v6  ;;  %v1147_v40 = vmul.f32 1.442695, %v1114_v12 }
  0xab   : > { %v1856_v50 = vpop.eup %1540  ;;  %v889_v51 = vadd.f32 1.4214138, %v857_v43  ;;  %1552 = vrcp.f32 %v738_v1  ;;  %v714_v41 = vmul.f32 0.3275911, %v682_v30  ;;  %vm602_vm5 = vcmp.lt.f32.partialorder %v1827_v17, 0.0 }
  0xac   : > { %v1861_v55 = vpop.eup %1542  ;;  %v897_v56 = vadd.f32 1.4214138, %v865_v47  ;;  %v809_v57 = vmul.f32 1.0614054, %v1856_v50  ;;  %1554 = vpow2.f32 %v1193_v62  ;;  %v1893_v1 = vmul.f32 0.70710677, %v1880_v35 }
  0xad   : > { %v921_v60 = vmul.f32 %v1829_v23, %v889_v51  ;;  %v817_v61 = vmul.f32 1.0614054, %v1861_v55  ;;  %v1871_v7 = vpop.eup %1544  ;;  %v384_v51 = vadd.f32 %v1800_v36, %v383_v31  ;;  %v746_v58 = vadd.f32 1.0, %v714_v41  ;;  %v475_v41 = vld [vmem:[%s1795_s6 + $0x10] sm:$0xff] }
  0xae   : > { %v929_v63 = vmul.f32 %v1836_v28, %v897_v56  ;;  %v841_v0 = vadd.f32 -1.4531521, %v809_v57  ;;  %v794_v20 = vmul.f32 1.0614054, %v1871_v7  ;;  %v1547_v21 = vpop.eup %1546  ;;  %v1122_v57 = vmul.f32 %v1090_v29, %v674_v48 }
  0xaf   : > { %v953_v4 = vadd.f32 -0.28449672, %v921_v60  ;;  %v849_v5 = vadd.f32 -1.4531521, %v817_v61  ;;  %v1549_v32 = vpop.eup %1548  ;;  %1556 = vrcp.f32 %v746_v58  ;;  %vm610_vm6 = vcmp.lt.f32.partialorder %v1845_v42, 0.0 }
  0xb0   : > { %v961_v8 = vadd.f32 -0.28449672, %v929_v63  ;;  %v873_v11 = vmul.f32 %v1856_v50, %v841_v0  ;;  %v826_v34 = vadd.f32 -1.4531521, %v794_v20  ;;  %v1551_v43 = vpop.eup %1550  ;;  %1558 = vpow2.f32 %v1147_v40 }
  0xb1   : > { %v985_v18 = vmul.f32 %v1829_v23, %v953_v4  ;;  %v881_v19 = vmul.f32 %v1861_v55, %v849_v5  ;;  %v1887_v52 = vpop.eup %1552  ;;  %vm618_vm7 = vcmp.lt.f32.partialorder %v1868_v2, 0.0  ;;  %vm626_vm8 = vcmp.lt.f32.partialorder %v1893_v1, 0.0 }
  0xb2   : > { %v993_v22 = vmul.f32 %v1836_v28, %v961_v8  ;;  %v905_v25 = vadd.f32 1.4214138, %v873_v11  ;;  %v858_v47 = vmul.f32 %v1871_v7, %v826_v34  ;;  %v1555_v59 = vpop.eup %1554  ;;  %v802_v63 = vmul.f32 1.0614054, %v1887_v52 }
  0xb3   : > { %v1017_v33 = vadd.f32 0.2548296, %v985_v18  ;;  %v913_v26 = vadd.f32 1.4214138, %v881_v19  ;;  %v1098_v11 = vsub.f32 0.0, %v682_v30 }
  0xb4   : > { %v1025_v37 = vadd.f32 0.2548296, %v993_v22  ;;  %v937_v39 = vmul.f32 %v1856_v50, %v905_v25  ;;  %v890_v62 = vadd.f32 1.4214138, %v858_v47  ;;  %v834_v48 = vadd.f32 -1.4531521, %v802_v63 }
  0xb5   : > { %v1049_v44 = vmul.f32 %v1829_v23, %v1017_v33  ;;  %v945_v46 = vmul.f32 %v1861_v55, %v913_v26  ;;  %v1163_v22 = vmul.f32 1.442695, %v1122_v57  ;;  %v1903_v25 = vand.u32 2147483647, %v1893_v1 }
  0xb6   : > { %v1057_v54 = vmul.f32 %v1836_v28, %v1025_v37  ;;  %v969_v56 = vadd.f32 -0.28449672, %v937_v39  ;;  %v922_v28 = vmul.f32 %v1871_v7, %v890_v62  ;;  %v866_v19 = vmul.f32 %v1887_v52, %v834_v48 }
  0xb7   : > { %v1209_v60 = vmul.f32 %v1547_v21, %v1049_v44  ;;  %v977_v61 = vadd.f32 -0.28449672, %v945_v46  ;;  %v1130_v26 = vmul.f32 %v1098_v11, %v682_v30  ;;  %v722_v34 = vmul.f32 0.3275911, %v1903_v25 }
  0xb8   : > { %v1217_v23 = vmul.f32 %v1549_v32, %v1057_v54  ;;  %v1001_v0 = vmul.f32 %v1856_v50, %v969_v56  ;;  %v954_v18 = vadd.f32 -0.28449672, %v922_v28  ;;  %v898_v33 = vadd.f32 1.4214138, %v866_v19 }
  0xb9   : > { %v1241_v4 = vsub.f32 1.0, %v1209_v60  ;;  %v1009_v5 = vmul.f32 %v1861_v55, %v977_v61  ;;  %v754_v56 = vadd.f32 1.0, %v722_v34  ;;  %1560 = vpow2.f32 %v1163_v22  ;;  %v491_v22 = vld [vmem:[%s1795_s6 + $0x90] sm:$0xff] }
  0xba   : > { %v1249_v6 = vsub.f32 1.0, %v1217_v23  ;;  %v1033_v8 = vadd.f32 0.2548296, %v1001_v0  ;;  %v986_v32 = vmul.f32 %v1871_v7, %v954_v18  ;;  %v930_v40 = vmul.f32 %v1887_v52, %v898_v33  ;;  %v483_v18 = vld [vmem:[%s1795_s6 + $0x50] sm:$0xff] }
  0xbb   : > { %v1273_v12 = vmul.f32 %v1241_v4, %v1821_v14  ;;  %v1041_v16 = vadd.f32 0.2548296, %v1009_v5  ;;  %v1907_v14 = vpop.eup %1556  ;;  %1562 = vrcp.f32 %v754_v56  ;;  %v538_v60 = vmul.f32 0.5, %v1812_v3  ;;  %v407_v3 = vpop.f32.mrf.mxu1 }
  0xbc   : > { %v1281_v20 = vmul.f32 %v1249_v6, %v1824_v15  ;;  %v1065_v21 = vmul.f32 %v1856_v50, %v1033_v8  ;;  %v1018_v39 = vadd.f32 0.2548296, %v986_v32  ;;  %v1559_v44 = vpop.eup %1558  ;;  %v810_v54 = vmul.f32 1.0614054, %v1907_v14  ;;  %v431_v8 = vpop.f32.mrf.mxu2 }
  0xbd   : > { %v1305_v29 = vadd.f32 1.0, %v1273_v12  ;;  %v1073_v31 = vmul.f32 %v1861_v55, %v1041_v16  ;;  %v962_v57 = vadd.f32 -0.28449672, %v930_v40  ;;  %v1179_v23 = vmul.f32 1.442695, %v1130_v26 }
  0xbe   : > { %v1313_v15 = vadd.f32 1.0, %v1281_v20  ;;  %v1225_v50 = vmul.f32 %v1551_v43, %v1065_v21  ;;  %v1050_v43 = vmul.f32 %v1871_v7, %v1018_v39  ;;  %v842_v58 = vadd.f32 -1.4531521, %v810_v54 }
  0xbf   : > { %v1337_v37 = vmul.f32 %v1305_v29, %v1815_v9  ;;  %v1233_v55 = vmul.f32 %v1555_v59, %v1073_v31  ;;  %v1927_v59 = vadd.f32 %v475_v41, %v384_v51  ;;  %v994_v62 = vmul.f32 %v1887_v52, %v962_v57  ;;  %v1561_v11 = vpop.eup %1560 }
  0xc0   : > { %v1345_v46 = vmul.f32 %v1313_v15, %v1817_v10  ;;  %v1257_v47 = vsub.f32 1.0, %v1225_v50  ;;  %v1210_v61 = vmul.f32 %v1559_v44, %v1050_v43  ;;  %v874_v7 = vmul.f32 %v1907_v14, %v842_v58 }
  0xc1   : > { %1369 = vst.msk [vmem:[%s1913_s11] sm:$0xff] %vm263_vm0, %v1337_v37  ;;  %v1265_v30 = vsub.f32 1.0, %v1233_v55  ;;  %v1934_v0 = vmul.f32 0.70710677, %v1927_v59  ;;  %v634_v51 = vsel %vm602_vm5, -1.0, %v1673_v13  ;;  %v1106_v48 = vsub.f32 0.0, %v1903_v25  ;;  %v1948_v19 = vpop.eup %1562 }
  0xc2   : > { %1377 = vst.msk [vmem:[%s1913_s11 + $0x40] sm:$0xff] %vm263_vm0, %v1345_v46  ;;  %v1289_v9 = vmul.f32 %v1257_v47, %v1850_v45  ;;  %v1026_v4 = vadd.f32 0.2548296, %v994_v62  ;;  %v906_v28 = vadd.f32 1.4214138, %v874_v7  ;;  %1564 = vpow2.f32 %v1179_v23  ;;  %v455_v47 = vpop.f32.mrf.mxu3  ;;  %v499_v7 = vld [vmem:[%s1795_s6 + $0xd0] sm:$0xff] }
  0xc3   : > { %v1297_v10 = vmul.f32 %v1265_v30, %v1859_v53  ;;  %v1242_v53 = vsub.f32 1.0, %v1210_v61  ;;  %v1942_v6 = vand.u32 2147483647, %v1934_v0  ;;  %v408_v21 = vadd.f32 %v1800_v36, %v407_v3 }
  0xc4   : > { %v1321_v63 = vadd.f32 1.0, %v1289_v9  ;;  %v1058_v16 = vmul.f32 %v1887_v52, %v1026_v4  ;;  %v818_v52 = vmul.f32 1.0614054, %v1948_v19  ;;  %v432_v31 = vadd.f32 %v1800_v36, %v431_v8 }
  0xc5   : > { %v1329_v45 = vadd.f32 1.0, %v1297_v10  ;;  %v1274_v17 = vmul.f32 %v1242_v53, %v634_v51  ;;  %v699_v20 = vmul.f32 0.3275911, %v1942_v6  ;;  %v1138_v33 = vmul.f32 %v1106_v48, %v1903_v25 }
  0xc6   : > { %v1353_v5 = vmul.f32 %v1321_v63, %v1831_v24  ;;  %v938_v24 = vmul.f32 %v1907_v14, %v906_v28  ;;  %v1218_v29 = vmul.f32 %v1561_v11, %v1058_v16  ;;  %v1961_v50 = vadd.f32 %v483_v18, %v408_v21 }
  0xc7   : > { %v1361_v12 = vmul.f32 %v1329_v45, %v1841_v38  ;;  %v1306_v38 = vadd.f32 1.0, %v1274_v17  ;;  %v731_v15 = vadd.f32 1.0, %v699_v20  ;;  %v850_v37 = vadd.f32 -1.4531521, %v818_v52 }
  0xc8   : > { %1385 = vst.msk [vmem:[%s1913_s11 + $0x80] sm:$0xff] %vm263_vm0, %v1353_v5  ;;  %v970_v32 = vadd.f32 -0.28449672, %v938_v24  ;;  %v1250_v34 = vsub.f32 1.0, %v1218_v29  ;;  %v1963_v55 = vadd.f32 %v491_v22, %v432_v31  ;;  %v642_v39 = vsel %vm610_vm6, -1.0, %v1673_v13  ;;  %v1565_v54 = vpop.eup %1564 }
  0xc9   : > { %1393 = vst.msk [vmem:[%s1913_s11 + $0xc0] sm:$0xff] %vm263_vm0, %v1361_v12  ;;  %v1338_v26 = vmul.f32 %v1306_v38, %v538_v60  ;;  %1566 = vrcp.f32 %v731_v15  ;;  %v546_v41 = vmul.f32 0.5, %v1834_v27  ;;  %v882_v44 = vmul.f32 %v1948_v19, %v850_v37  ;;  %v386_v12 = vpop.f32.mrf.mxu0 }
  0xca   : > { %v1002_v40 = vmul.f32 %v1907_v14, %v970_v32  ;;  %v1282_v25 = vmul.f32 %v1250_v34, %v642_v39  ;;  %v1974_v46 = vmul.f32 0.70710677, %v1961_v50  ;;  %v1195_v30 = vmul.f32 1.442695, %v1138_v33  ;;  %v410_v33 = vpop.f32.mrf.mxu1 }
  0xcb   : > { %1370 = vst.msk [vmem:[%s1913_s11 + $0x8] sm:$0xff] %vm263_vm0, %v1338_v26  ;;  %v1977_v42 = vmul.f32 0.70710677, %v1963_v55  ;;  %v914_v57 = vadd.f32 1.4214138, %v882_v44  ;;  %v1083_v58 = vsub.f32 0.0, %v1942_v6  ;;  %v456_v60 = vadd.f32 %v1800_v36, %v455_v47 }
  0xcc   : > { %v1034_v56 = vadd.f32 0.2548296, %v1002_v40  ;;  %v1314_v43 = vadd.f32 1.0, %v1282_v25  ;;  %v1981_v27 = vand.u32 2147483647, %v1974_v46  ;;  %v554_v62 = vmul.f32 0.5, %v1854_v49 }
  0xcd   : > { %v1986_v10 = vand.u32 2147483647, %v1977_v42  ;;  %v946_v63 = vmul.f32 %v1948_v19, %v914_v57  ;;  %v650_v45 = vsel %vm618_vm7, -1.0, %v1673_v13  ;;  %1568 = vpow2.f32 %v1195_v30 }
  0xce   : > { %v1066_v9 = vmul.f32 %v1907_v14, %v1034_v56  ;;  %v1346_v61 = vmul.f32 %v1314_v43, %v546_v41  ;;  %v707_v2 = vmul.f32 0.3275911, %v1981_v27  ;;  %v1115_v5 = vmul.f32 %v1083_v58, %v1942_v6  ;;  %v484_v56 = vld [vmem:[%s1795_s6 + $0x58] sm:$0xff] }
  0xcf   : > { %v1993_v23 = vpop.eup %1566  ;;  %v715_v51 = vmul.f32 0.3275911, %v1986_v10  ;;  %v978_v53 = vadd.f32 -0.28449672, %v946_v63  ;;  %v2002_v48 = vadd.f32 %v499_v7, %v456_v60  ;;  %vm603_vm9 = vcmp.lt.f32.partialorder %v1934_v0, 0.0  ;;  %v476_v0 = vld [vmem:[%s1795_s6 + $0x18] sm:$0xff]  ;;  %v434_v7 = vpop.f32.mrf.mxu2 }
  0xd0   : > { %v1226_v14 = vmul.f32 %v1565_v54, %v1066_v9  ;;  %1378 = vst.msk [vmem:[%s1913_s11 + $0x48] sm:$0xff] %vm263_vm0, %v1346_v61  ;;  %v795_v49 = vmul.f32 1.0614054, %v1993_v23  ;;  %v739_v4 = vadd.f32 1.0, %v707_v2  ;;  %v562_v16 = vmul.f32 0.5, %v1880_v35 }
  0xd1   : > { %v747_v28 = vadd.f32 1.0, %v715_v51  ;;  %v1010_v8 = vmul.f32 %v1948_v19, %v978_v53  ;;  %v658_v18 = vsel %vm626_vm8, -1.0, %v1673_v13  ;;  %v2011_v24 = vmul.f32 0.5, %v1927_v59 }
  0xd2   : > { %v1258_v3 = vsub.f32 1.0, %v1226_v14  ;;  %v827_v11 = vadd.f32 -1.4531521, %v795_v49  ;;  %1570 = vrcp.f32 %v739_v4  ;;  %v2015_v21 = vmul.f32 0.70710677, %v2002_v48 }
  0xd3   : > { %1572 = vrcp.f32 %v747_v28  ;;  %v1042_v6 = vadd.f32 0.2548296, %v1010_v8  ;;  %v2019_v38 = vsel %vm603_vm9, -1.0, %v1673_v13  ;;  %v1149_v35 = vmul.f32 1.442695, %v1115_v5  ;;  %v1569_v1 = vpop.eup %1568 }
  0xd4   : > { %v1290_v17 = vmul.f32 %v1258_v3, %v650_v45  ;;  %v859_v20 = vmul.f32 %v1993_v23, %v827_v11  ;;  %v387_v29 = vadd.f32 %v1800_v36, %v386_v12  ;;  %v2024_v59 = vmul.f32 0.5, %v1961_v50 }
  0xd5   : > { %v1074_v52 = vmul.f32 %v1948_v19, %v1042_v6  ;;  %v2027_v32 = vand.u32 2147483647, %v2015_v21  ;;  %v1091_v26 = vsub.f32 0.0, %v1981_v27  ;;  %v1099_v34 = vsub.f32 0.0, %v1986_v10 }
  0xd6   : > { %v1322_v22 = vadd.f32 1.0, %v1290_v17  ;;  %v891_v31 = vadd.f32 1.4214138, %v859_v20  ;;  %v2031_v37 = vadd.f32 %v476_v0, %v387_v29  ;;  %v2037_v50 = vmul.f32 0.5, %v1963_v55  ;;  %v458_v29 = vpop.f32.mrf.mxu3 }
  0xd7   : > { %v1234_v40 = vmul.f32 %v1569_v1, %v1074_v52  ;;  %v723_v41 = vmul.f32 0.3275911, %v2027_v32  ;;  %1574 = vpow2.f32 %v1149_v35  ;;  %v411_v54 = vadd.f32 %v1800_v36, %v410_v33 }
  0xd8   : > { %v1354_v15 = vmul.f32 %v1322_v22, %v554_v62  ;;  %v2033_v39 = vpop.eup %1570  ;;  %v923_v19 = vmul.f32 %v1993_v23, %v891_v31  ;;  %v2046_v47 = vmul.f32 0.70710677, %v2031_v37  ;;  %v1123_v58 = vmul.f32 %v1091_v26, %v1981_v27 }
  0xd9   : > { %v2040_v25 = vpop.eup %1572  ;;  %v803_v44 = vmul.f32 1.0614054, %v2033_v39  ;;  %v1266_v30 = vsub.f32 1.0, %v1234_v40  ;;  %v755_v57 = vadd.f32 1.0, %v723_v41  ;;  %v1131_v60 = vmul.f32 %v1099_v34, %v1986_v10 }
  0xda   : > { %1386 = vst.msk [vmem:[%s1913_s11 + $0x88] sm:$0xff] %vm263_vm0, %v1354_v15  ;;  %v955_v43 = vadd.f32 -0.28449672, %v923_v19  ;;  %v811_v55 = vmul.f32 1.0614054, %v2040_v25  ;;  %vm611_vm10 = vcmp.lt.f32.partialorder %v1974_v46, 0.0  ;;  %v2060_v51 = vadd.f32 %v484_v56, %v411_v54 }
  0xdb   : > { %v835_v9 = vadd.f32 -1.4531521, %v803_v44  ;;  %v2054_v61 = vand.u32 2147483647, %v2046_v47  ;;  %v1298_v62 = vmul.f32 %v1266_v30, %v658_v18  ;;  %1576 = vrcp.f32 %v755_v57  ;;  %v492_v18 = vld [vmem:[%s1795_s6 + $0x98] sm:$0xff] }
  0xdc   : > { %v987_v63 = vmul.f32 %v1993_v23, %v955_v43  ;;  %v843_v2 = vadd.f32 -1.4531521, %v811_v55  ;;  %vm619_vm11 = vcmp.lt.f32.partialorder %v1977_v42, 0.0  ;;  %v1165_v3 = vmul.f32 1.442695, %v1123_v58  ;;  %v500_v30 = vld [vmem:[%s1795_s6 + $0xd8] sm:$0xff] }
  0xdd   : > { %v867_v45 = vmul.f32 %v2033_v39, %v835_v9  ;;  %v700_v14 = vmul.f32 0.3275911, %v2054_v61  ;;  %v1330_v27 = vadd.f32 1.0, %v1298_v62  ;;  %v1575_v49 = vpop.eup %1574  ;;  %v435_v28 = vadd.f32 %v1800_v36, %v434_v7 }
  0xde   : > { %v1019_v10 = vadd.f32 0.2548296, %v987_v63  ;;  %v875_v53 = vmul.f32 %v2040_v25, %v843_v2  ;;  %v1181_v17 = vmul.f32 1.442695, %v1131_v60  ;;  %v2070_v6 = vsel %vm611_vm10, -1.0, %v1673_v13 }
  0xdf   : > { %v899_v4 = vadd.f32 1.4214138, %v867_v45  ;;  %v732_v5 = vadd.f32 1.0, %v700_v14  ;;  %v1362_v8 = vmul.f32 %v1330_v27, %v562_v16  ;;  %v2074_v0 = vmul.f32 0.70710677, %v2060_v51 }
  0xe0   : > { %v1051_v11 = vmul.f32 %v1993_v23, %v1019_v10  ;;  %v907_v12 = vadd.f32 1.4214138, %v875_v53  ;;  %v651_v23 = vsel %vm619_vm11, -1.0, %v1673_v13  ;;  %v1107_v46 = vsub.f32 0.0, %v2027_v32 }
  0xe1   : > { %v931_v20 = vmul.f32 %v2033_v39, %v899_v4  ;;  %1578 = vrcp.f32 %v732_v5  ;;  %v2076_v22 = vpop.eup %1576  ;;  %1394 = vst.msk [vmem:[%s1913_s11 + $0xc8] sm:$0xff] %vm263_vm0, %v1362_v8  ;;  %v2086_v31 = vadd.f32 %v492_v18, %v435_v28  ;;  %v2089_v26 = vmul.f32 0.5, %v2002_v48 }
  0xe2   : > { %v1211_v16 = vmul.f32 %v1575_v49, %v1051_v11  ;;  %v939_v35 = vmul.f32 %v2040_v25, %v907_v12  ;;  %1580 = vpow2.f32 %v1165_v3  ;;  %v819_v52 = vmul.f32 1.0614054, %v2076_v22 }
  0xe3   : > { %v963_v1 = vadd.f32 -0.28449672, %v931_v20  ;;  %1582 = vpow2.f32 %v1181_v17  ;;  %v676_v40 = vand.u32 2147483647, %v2074_v0  ;;  %v459_v19 = vadd.f32 %v1800_v36, %v458_v29 }
  0xe4   : > { %v1243_v33 = vsub.f32 1.0, %v1211_v16  ;;  %v971_v15 = vadd.f32 -0.28449672, %v939_v35  ;;  %v851_v34 = vadd.f32 -1.4531521, %v819_v52  ;;  %v1139_v54 = vmul.f32 %v1107_v46, %v2027_v32 }
  0xe5   : > { %v995_v42 = vmul.f32 %v2033_v39, %v963_v1  ;;  %v1084_v56 = vsub.f32 0.0, %v2054_v61  ;;  %v708_v57 = vmul.f32 0.3275911, %v676_v40  ;;  %v2103_v9 = vmul.f32 0.70710677, %v2086_v31 }
  0xe6   : > { %v1275_v41 = vmul.f32 %v1243_v33, %v2019_v38  ;;  %v1003_v44 = vmul.f32 %v2040_v25, %v971_v15  ;;  %v883_v55 = vmul.f32 %v2076_v22, %v851_v34  ;;  %vm627_vm12 = vcmp.lt.f32.partialorder %v2015_v21, 0.0 }
  0xe7   : > { %v2099_v43 = vpop.eup %1578  ;;  %v1027_v48 = vadd.f32 0.2548296, %v995_v42  ;;  %v740_v2 = vadd.f32 1.0, %v708_v57  ;;  %v2108_v7 = vadd.f32 %v500_v30, %v459_v19  ;;  %v1197_v10 = vmul.f32 1.442695, %v1139_v54 }
  0xe8   : > { %v1307_v58 = vadd.f32 1.0, %v1275_v41  ;;  %v1035_v60 = vadd.f32 0.2548296, %v1003_v44  ;;  %v796_v38 = vmul.f32 1.0614054, %v2099_v43  ;;  %v1581_v32 = vpop.eup %1580  ;;  %v1116_v3 = vmul.f32 %v1084_v56, %v2054_v61  ;;  %v389_v61 = vpop.f32.mrf.mxu0  ;;  %v477_v56 = vld [vmem:[%s1795_s6 + $0x20] sm:$0xff] }
  0xe9   : > { %v1059_v62 = vmul.f32 %v2033_v39, %v1027_v48  ;;  %v915_v63 = vadd.f32 1.4214138, %v883_v55  ;;  %v1583_v45 = vpop.eup %1582  ;;  %1584 = vrcp.f32 %v740_v2  ;;  %v659_v5 = vsel %vm627_vm12, -1.0, %v1673_v13 }
  0xea   : > { %v1339_v14 = vmul.f32 %v1307_v58, %v2011_v24  ;;  %v1067_v27 = vmul.f32 %v2040_v25, %v1035_v60  ;;  %v828_v53 = vadd.f32 -1.4531521, %v796_v38  ;;  %v2121_v24 = vand.u32 2147483647, %v2103_v9 }
  0xeb   : > { %v1219_v49 = vmul.f32 %v1581_v32, %v1059_v62  ;;  %v947_v4 = vmul.f32 %v2076_v22, %v915_v63  ;;  %v1092_v11 = vsub.f32 0.0, %v676_v40  ;;  %v2124_v12 = vmul.f32 0.70710677, %v2108_v7 }
  0xec   : > { %1371 = vst.msk [vmem:[%s1913_s11 + $0x10] sm:$0xff] %vm263_vm0, %v1339_v14  ;;  %v1227_v39 = vmul.f32 %v1583_v45, %v1067_v27  ;;  %v860_v28 = vmul.f32 %v2099_v43, %v828_v53  ;;  %1586 = vpow2.f32 %v1197_v10  ;;  %v716_v20 = vmul.f32 0.3275911, %v2121_v24 }
  0xed   : > { %v1251_v25 = vsub.f32 1.0, %v1219_v49  ;;  %v979_v8 = vadd.f32 -0.28449672, %v947_v4  ;;  %v1151_v35 = vmul.f32 1.442695, %v1116_v3  ;;  %v390_v33 = vadd.f32 %v1800_v36, %v389_v61 }
  0xee   : > { %v1259_v17 = vsub.f32 1.0, %v1227_v39  ;;  %v892_v18 = vadd.f32 1.4214138, %v860_v28  ;;  %v2130_v46 = vand.u32 2147483647, %v2124_v12  ;;  %v748_v52 = vadd.f32 1.0, %v716_v20 }
  0xef   : > { %v1283_v21 = vmul.f32 %v1251_v25, %v2070_v6  ;;  %v1011_v16 = vmul.f32 %v2076_v22, %v979_v8  ;;  %v2134_v15 = vpop.eup %1584  ;;  %v1124_v19 = vmul.f32 %v1092_v11, %v676_v40  ;;  %vm604_vm13 = vcmp.lt.f32.partialorder %v2046_v47, 0.0  ;;  %v437_v8 = vpop.f32.mrf.mxu2 }
  0xf0   : > { %v1291_v29 = vmul.f32 %v1259_v17, %v651_v23  ;;  %v924_v1 = vmul.f32 %v2099_v43, %v892_v18  ;;  %v724_v6 = vmul.f32 0.3275911, %v2130_v46  ;;  %v804_v54 = vmul.f32 1.0614054, %v2134_v15  ;;  %v413_v23 = vpop.f32.mrf.mxu1 }
  0xf1   : > { %v1315_v42 = vadd.f32 1.0, %v1283_v21  ;;  %v1043_v34 = vadd.f32 0.2548296, %v1011_v16  ;;  %1588 = vrcp.f32 %v748_v52  ;;  %v540_v32 = vmul.f32 0.5, %v2031_v37 }
  0xf2   : > { %v1323_v41 = vadd.f32 1.0, %v1291_v29  ;;  %v956_v44 = vadd.f32 -0.28449672, %v924_v1  ;;  %1590 = vpow2.f32 %v1151_v35  ;;  %v756_v55 = vadd.f32 1.0, %v724_v6  ;;  %v1587_v57 = vpop.eup %1586 }
  0xf3   : > { %v1347_v30 = vmul.f32 %v1315_v42, %v2024_v59  ;;  %v1075_v48 = vmul.f32 %v2076_v22, %v1043_v34  ;;  %v836_v60 = vadd.f32 -1.4531521, %v804_v54  ;;  %v2147_v62 = vadd.f32 %v477_v56, %v390_v33  ;;  %v485_v22 = vld [vmem:[%s1795_s6 + $0x60] sm:$0xff] }
  0xf4   : > { %v1355_v40 = vmul.f32 %v1323_v41, %v2037_v50  ;;  %v988_v58 = vmul.f32 %v2099_v43, %v956_v44  ;;  %v414_v59 = vadd.f32 %v1800_v36, %v413_v23  ;;  %v1167_v2 = vmul.f32 1.442695, %v1124_v19  ;;  %v461_v44 = vpop.f32.mrf.mxu3 }
  0xf5   : > { %1379 = vst.msk [vmem:[%s1913_s11 + $0x50] sm:$0xff] %vm263_vm0, %v1347_v30  ;;  %v1235_v38 = vmul.f32 %v1587_v57, %v1075_v48  ;;  %v868_v50 = vmul.f32 %v2134_v15, %v836_v60  ;;  %1592 = vrcp.f32 %v756_v55  ;;  %v636_v45 = vsel %vm604_vm13, -1.0, %v1673_v13 }
  0xf6   : > { %1387 = vst.msk [vmem:[%s1913_s11 + $0x90] sm:$0xff] %vm263_vm0, %v1355_v40  ;;  %v1020_v63 = vadd.f32 0.2548296, %v988_v58  ;;  %v1100_v14 = vsub.f32 0.0, %v2121_v24  ;;  %v2157_v27 = vmul.f32 0.70710677, %v2147_v62  ;;  %v2165_v4 = vadd.f32 %v485_v22, %v414_v59 }
  0xf7   : > { %v1267_v47 = vsub.f32 1.0, %v1235_v38  ;;  %v2159_v37 = vpop.eup %1588  ;;  %v2163_v53 = vmul.f32 0.5, %v2060_v51  ;;  %v900_v49 = vadd.f32 1.4214138, %v868_v50  ;;  %vm612_vm14 = vcmp.lt.f32.partialorder %v2074_v0, 0.0  ;;  %v501_v59 = vld [vmem:[%s1795_s6 + $0xe0] sm:$0xff] }
  0xf8   : > { %v1052_v10 = vmul.f32 %v2099_v43, %v1020_v63  ;;  %v1591_v3 = vpop.eup %1590  ;;  %v812_v28 = vmul.f32 1.0614054, %v2159_v37  ;;  %v2170_v25 = vand.u32 2147483647, %v2157_v27  ;;  %1594 = vpow2.f32 %v1167_v2 }
  0xf9   : > { %v1299_v39 = vmul.f32 %v1267_v47, %v659_v5  ;;  %v932_v61 = vmul.f32 %v2134_v15, %v900_v49  ;;  %v1108_v51 = vsub.f32 0.0, %v2130_v46  ;;  %v1132_v18 = vmul.f32 %v1100_v14, %v2121_v24  ;;  %v493_v24 = vld [vmem:[%s1795_s6 + $0xa0] sm:$0xff] }
  0xfa   : > { %v1212_v11 = vmul.f32 %v1591_v3, %v1052_v10  ;;  %v844_v17 = vadd.f32 -1.4531521, %v812_v28  ;;  %v701_v5 = vmul.f32 0.3275911, %v2170_v25  ;;  %v2179_v35 = vmul.f32 0.70710677, %v2165_v4 }
  0xfb   : > { %v1331_v43 = vadd.f32 1.0, %v1299_v39  ;;  %v2176_v20 = vpop.eup %1592  ;;  %v964_v16 = vadd.f32 -0.28449672, %v932_v61  ;;  %v438_v29 = vadd.f32 %v1800_v36, %v437_v8  ;;  %v2188_v6 = vmul.f32 0.5, %v2086_v31 }
  0xfc   : > { %v1244_v21 = vsub.f32 1.0, %v1212_v11  ;;  %v876_v52 = vmul.f32 %v2159_v37, %v844_v17  ;;  %v820_v33 = vmul.f32 1.0614054, %v2176_v20  ;;  %v733_v42 = vadd.f32 1.0, %v701_v5  ;;  %v392_v11 = vpop.f32.mrf.mxu0 }
  0xfd   : > { %v1363_v1 = vmul.f32 %v1331_v43, %v2089_v26  ;;  %v996_v19 = vmul.f32 %v2134_v15, %v964_v16  ;;  %v1140_v41 = vmul.f32 %v1108_v51, %v2130_v46  ;;  %v644_v26 = vsel %vm612_vm14, -1.0, %v1673_v13 }
  0xfe   : > { %v1276_v34 = vmul.f32 %v1244_v21, %v636_v45  ;;  %v908_v54 = vadd.f32 1.4214138, %v876_v52  ;;  %v852_v56 = vadd.f32 -1.4531521, %v820_v33  ;;  %1596 = vrcp.f32 %v733_v42  ;;  %v1595_v23 = vpop.eup %1594  ;;  %v2242_v52 = vld [vmem:[%s2632_s3] ss:$0 sm:$0xff] }
  0xff   : > { %1395 = vst.msk [vmem:[%s1913_s11 + $0xd0] sm:$0xff] %vm263_vm0, %v1363_v1  ;;  %v1028_v48 = vadd.f32 0.2548296, %v996_v19  ;;  %v1183_v55 = vmul.f32 1.442695, %v1132_v18  ;;  %v2196_v31 = vadd.f32 %v493_v24, %v438_v29  ;;  %v462_v0 = vadd.f32 %v1800_v36, %v461_v44 }
 0x100   : > { %v1308_v30 = vadd.f32 1.0, %v1276_v34  ;;  %v940_v46 = vmul.f32 %v2159_v37, %v908_v54  ;;  %v884_v57 = vmul.f32 %v2176_v20, %v852_v56  ;;  %v2201_v40 = vand.u32 2147483647, %v2179_v35  ;;  %v478_v34 = vld [vmem:[%s1795_s6 + $0x28] sm:$0xff] }
 0x101   : > { %v1060_v60 = vmul.f32 %v2134_v15, %v1028_v48  ;;  %vm620_vm15 = vcmp.lt.f32.partialorder %v2103_v9, 0.0  ;;  %v1199_v38 = vmul.f32 1.442695, %v1140_v41  ;;  %1598 = vpow2.f32 %v1183_v55 }
 0x102   : > { %v1340_v58 = vmul.f32 %v1308_v30, %v540_v32  ;;  %v972_v22 = vadd.f32 -0.28449672, %v940_v46  ;;  %v916_v63 = vadd.f32 1.4214138, %v884_v57  ;;  %v709_v50 = vmul.f32 0.3275911, %v2201_v40 }
 0x103   : > { %v1220_v2 = vmul.f32 %v1595_v23, %v1060_v60  ;;  %v1085_v47 = vsub.f32 0.0, %v2170_v25  ;;  %v2212_v45 = vmul.f32 0.70710677, %v2196_v31  ;;  %v2218_v10 = vadd.f32 %v501_v59, %v462_v0  ;;  %v486_v59 = vld [vmem:[%s1795_s6 + $0x68] sm:$0xff] }
 0x104   : > { %1372 = vst.msk [vmem:[%s1913_s11 + $0x18] sm:$0xff] %vm263_vm0, %v1340_v58  ;;  %v2214_v36 = vpop.eup %1596  ;;  %v1004_v15 = vmul.f32 %v2159_v37, %v972_v22  ;;  %v948_v32 = vmul.f32 %v2176_v20, %v916_v63  ;;  %v741_v14 = vadd.f32 1.0, %v709_v50  ;;  %v652_v3 = vsel %vm620_vm15, -1.0, %v1673_v13 }
 0x105   : > { %v1252_v49 = vsub.f32 1.0, %v1220_v2  ;;  %1600 = vpow2.f32 %v1199_v38  ;;  %v797_v39 = vmul.f32 1.0614054, %v2214_v36  ;;  %vm628_vm1 = vcmp.lt.f32.partialorder %v2124_v12, 0.0 }
 0x106   : > { %v1036_v28 = vadd.f32 0.2548296, %v1004_v15  ;;  %v980_v8 = vadd.f32 -0.28449672, %v948_v32  ;;  %1602 = vrcp.f32 %v741_v14  ;;  %v1117_v43 = vmul.f32 %v1085_v47, %v2170_v25 }
 0x107   : > { %v1284_v61 = vmul.f32 %v1252_v49, %v644_v26  ;;  %v829_v51 = vadd.f32 -1.4531521, %v797_v39  ;;  %v2227_v17 = vand.u32 2147483647, %v2212_v45  ;;  %v2231_v18 = vmul.f32 0.5, %v2108_v7  ;;  %v1599_v16 = vpop.eup %1598 }
 0x108   : > { %v1068_v9 = vmul.f32 %v2159_v37, %v1036_v28  ;;  %v1012_v5 = vmul.f32 %v2176_v20, %v980_v8  ;;  %v2235_v21 = vmul.f32 0.70710677, %v2218_v10  ;;  %v393_v37 = vadd.f32 %v2242_v52, %v392_v11  ;;  %v440_v28 = vpop.f32.mrf.mxu2 }
 0x109   : > { %v1316_v29 = vadd.f32 1.0, %v1284_v61  ;;  %v861_v1 = vmul.f32 %v2214_v36, %v829_v51  ;;  %v717_v25 = vmul.f32 0.3275911, %v2227_v17  ;;  %v660_v33 = vsel %vm628_vm1, -1.0, %v1673_v13 }
 0x10a   : > { %v1228_v7 = vmul.f32 %v1599_v16, %v1068_v9  ;;  %v1044_v42 = vadd.f32 0.2548296, %v1012_v5  ;;  %v2249_v24 = vmul.f32 0.5, %v2147_v62  ;;  %v1153_v26 = vmul.f32 1.442695, %v1117_v43  ;;  %v416_v62 = vpop.f32.mrf.mxu1 }
 0x10b   : > { %v1601_v19 = vpop.eup %1600  ;;  %v1348_v41 = vmul.f32 %v1316_v29, %v2163_v53  ;;  %v893_v44 = vadd.f32 1.4214138, %v861_v1  ;;  %v749_v54 = vadd.f32 1.0, %v717_v25  ;;  %v1093_v12 = vsub.f32 0.0, %v2201_v40 }
 0x10c   : > { %v2253_v56 = vpop.eup %1602  ;;  %v1260_v23 = vsub.f32 1.0, %v1228_v7  ;;  %v1076_v30 = vmul.f32 %v2176_v20, %v1044_v42  ;;  %v2258_v48 = vand.u32 2147483647, %v2235_v21  ;;  %v2264_v46 = vadd.f32 %v478_v34, %v393_v37 }
 0x10d   : > { %1380 = vst.msk [vmem:[%s1913_s11 + $0x58] sm:$0xff] %vm263_vm0, %v1348_v41  ;;  %v925_v55 = vmul.f32 %v2214_v36, %v893_v44  ;;  %v805_v53 = vmul.f32 1.0614054, %v2253_v56  ;;  %1604 = vrcp.f32 %v749_v54  ;;  %vm605_vm2 = vcmp.lt.f32.partialorder %v2157_v27, 0.0 }
 0x10e   : > { %v1292_v57 = vmul.f32 %v1260_v23, %v652_v3  ;;  %v1236_v0 = vmul.f32 %v1601_v19, %v1076_v30  ;;  %v725_v20 = vmul.f32 0.3275911, %v2258_v48  ;;  %1606 = vpow2.f32 %v1153_v26  ;;  %v494_v19 = vld [vmem:[%s1795_s6 + $0xa8] sm:$0xff] }
 0x10f   : > { %v957_v58 = vadd.f32 -0.28449672, %v925_v55  ;;  %v837_v60 = vadd.f32 -1.4531521, %v805_v53  ;;  %v417_v38 = vadd.f32 %v2242_v52, %v416_v62  ;;  %v1125_v50 = vmul.f32 %v1093_v12, %v2201_v40 }
 0x110   : > { %v1324_v22 = vadd.f32 1.0, %v1292_v57  ;;  %v1268_v63 = vsub.f32 1.0, %v1236_v0  ;;  %v757_v2 = vadd.f32 1.0, %v725_v20  ;;  %v1101_v32 = vsub.f32 0.0, %v2227_v17  ;;  %v464_v20 = vpop.f32.mrf.mxu3 }
 0x111   : > { %v989_v47 = vmul.f32 %v2214_v36, %v957_v58  ;;  %v869_v15 = vmul.f32 %v2253_v56, %v837_v60  ;;  %v2275_v14 = vmul.f32 0.70710677, %v2264_v46  ;;  %v2278_v39 = vadd.f32 %v486_v59, %v417_v38 }
 0x112   : > { %v1356_v49 = vmul.f32 %v1324_v22, %v2188_v6  ;;  %v1300_v3 = vmul.f32 %v1268_v63, %v660_v33  ;;  %1608 = vrcp.f32 %v757_v2  ;;  %v637_v40 = vsel %vm605_vm2, -1.0, %v1673_v13 }
 0x113   : > { %v2280_v8 = vpop.eup %1604  ;;  %v1021_v11 = vadd.f32 0.2548296, %v989_v47  ;;  %vm613_vm3 = vcmp.lt.f32.partialorder %v2179_v35, 0.0  ;;  %v901_v61 = vadd.f32 1.4214138, %v869_v15  ;;  %v1133_v27 = vmul.f32 %v1101_v32, %v2227_v17 }
 0x114   : > { %1388 = vst.msk [vmem:[%s1913_s11 + $0x98] sm:$0xff] %vm263_vm0, %v1356_v49  ;;  %v1332_v51 = vadd.f32 1.0, %v1300_v3  ;;  %v1169_v6 = vmul.f32 1.442695, %v1125_v50  ;;  %v813_v43 = vmul.f32 1.0614054, %v2280_v8  ;;  %v1607_v9 = vpop.eup %1606  ;;  %v441_v29 = vadd.f32 %v2242_v52, %v440_v28 }
 0x115   : > { %v1053_v5 = vmul.f32 %v2214_v36, %v1021_v11  ;;  %v933_v16 = vmul.f32 %v2253_v56, %v901_v61  ;;  %v2295_v37 = vand.u32 2147483647, %v2275_v14  ;;  %v2298_v7 = vmul.f32 0.70710677, %v2278_v39  ;;  %v502_v28 = vld [vmem:[%s1795_s6 + $0xe8] sm:$0xff] }
 0x116   : > { %v1364_v1 = vmul.f32 %v1332_v51, %v2231_v18  ;;  %v845_v25 = vadd.f32 -1.4531521, %v813_v43  ;;  %v2301_v42 = vmul.f32 0.5, %v2165_v4  ;;  %v1109_v34 = vsub.f32 0.0, %v2258_v48 }
 0x117   : > { %v1213_v33 = vmul.f32 %v1607_v9, %v1053_v5  ;;  %v965_v36 = vadd.f32 -0.28449672, %v933_v16  ;;  %v645_v18 = vsel %vm613_vm3, -1.0, %v1673_v13  ;;  %1610 = vpow2.f32 %v1169_v6 }
 0x118   : > { %v2305_v17 = vpop.eup %1608  ;;  %1396 = vst.msk [vmem:[%s1913_s11 + $0xd8] sm:$0xff] %vm263_vm0, %v1364_v1  ;;  %v877_v41 = vmul.f32 %v2280_v8, %v845_v25  ;;  %v702_v44 = vmul.f32 0.3275911, %v2295_v37  ;;  %v1185_v54 = vmul.f32 1.442695, %v1133_v27  ;;  %v2319_v55 = vadd.f32 %v494_v19, %v441_v29 }
 0x119   : > { %v1245_v26 = vsub.f32 1.0, %v1213_v33  ;;  %v997_v4 = vmul.f32 %v2253_v56, %v965_v36  ;;  %v821_v23 = vmul.f32 1.0614054, %v2305_v17  ;;  %v2317_v62 = vand.u32 2147483647, %v2298_v7 }
 0x11a   : > { %v909_v30 = vadd.f32 1.4214138, %v877_v41  ;;  %v734_v12 = vadd.f32 1.0, %v702_v44  ;;  %v1141_v0 = vmul.f32 %v1109_v34, %v2258_v48  ;;  %vm621_vm4 = vcmp.lt.f32.partialorder %v2212_v45, 0.0 }
 0x11b   : > { %v1277_v35 = vmul.f32 %v1245_v26, %v637_v40  ;;  %v1029_v53 = vadd.f32 0.2548296, %v997_v4  ;;  %v853_v57 = vadd.f32 -1.4531521, %v821_v23  ;;  %v710_v60 = vmul.f32 0.3275911, %v2317_v62 }
 0x11c   : > { %v941_v58 = vmul.f32 %v2280_v8, %v909_v30  ;;  %1612 = vrcp.f32 %v734_v12  ;;  %v2328_v48 = vmul.f32 0.70710677, %v2319_v55  ;;  %v465_v47 = vadd.f32 %v2242_v52, %v464_v20  ;;  %v479_v12 = vld [vmem:[%s1795_s6 + $0x30] sm:$0xff]  ;;  %v419_v20 = vpop.f32.mrf.mxu1 }
 0x11d   : > { %v1309_v38 = vadd.f32 1.0, %v1277_v35  ;;  %v1061_v59 = vmul.f32 %v2253_v56, %v1029_v53  ;;  %1614 = vpow2.f32 %v1185_v54  ;;  %v885_v22 = vmul.f32 %v2305_v17, %v853_v57  ;;  %v1611_v63 = vpop.eup %1610 }
 0x11e   : > { %v973_v50 = vadd.f32 -0.28449672, %v941_v58  ;;  %v742_v2 = vadd.f32 1.0, %v710_v60  ;;  %v1201_v3 = vmul.f32 1.442695, %v1141_v0  ;;  %v1086_v40 = vsub.f32 0.0, %v2295_v37 }
 0x11f   : > { %v1341_v15 = vmul.f32 %v1309_v38, %v2249_v24  ;;  %v1221_v32 = vmul.f32 %v1611_v63, %v1061_v59  ;;  %v917_v49 = vadd.f32 1.4214138, %v885_v22  ;;  %v2336_v11 = vand.u32 2147483647, %v2328_v48 }
 0x120   : > { %v1005_v56 = vmul.f32 %v2280_v8, %v973_v50  ;;  %1616 = vrcp.f32 %v742_v2  ;;  %v557_v51 = vmul.f32 0.5, %v2196_v31  ;;  %v2342_v6 = vmul.f32 0.5, %v2218_v10  ;;  %v395_v10 = vpop.f32.mrf.mxu0 }
 0x121   : > { %1373 = vst.msk [vmem:[%s1913_s11 + $0x20] sm:$0xff] %vm263_vm0, %v1341_v15  ;;  %v1253_v61 = vsub.f32 1.0, %v1221_v32  ;;  %v949_v24 = vmul.f32 %v2305_v17, %v917_v49  ;;  %v653_v9 = vsel %vm621_vm4, -1.0, %v1673_v13  ;;  %v718_v16 = vmul.f32 0.3275911, %v2336_v11  ;;  %v487_v32 = vld [vmem:[%s1795_s6 + $0x70] sm:$0xff] }
 0x122   : > { %v2345_v43 = vpop.eup %1612  ;;  %v1037_v5 = vadd.f32 0.2548296, %v1005_v56  ;;  %v2351_v27 = vadd.f32 %v502_v28, %v465_v47  ;;  %1618 = vpow2.f32 %v1201_v3  ;;  %v1118_v36 = vmul.f32 %v1086_v40, %v2295_v37 }
 0x123   : > { %v1615_v29 = vpop.eup %1614  ;;  %v1285_v1 = vmul.f32 %v1253_v61, %v645_v18  ;;  %v981_v25 = vadd.f32 -0.28449672, %v949_v24  ;;  %v798_v31 = vmul.f32 1.0614054, %v2345_v43  ;;  %v1094_v45 = vsub.f32 0.0, %v2317_v62 }
 0x124   : > { %v1069_v33 = vmul.f32 %v2280_v8, %v1037_v5  ;;  %v750_v34 = vadd.f32 1.0, %v718_v16  ;;  %v2359_v26 = vmul.f32 0.70710677, %v2351_v27  ;;  %vm629_vm5 = vcmp.lt.f32.partialorder %v2235_v21, 0.0 }
 0x125   : > { %v1317_v19 = vadd.f32 1.0, %v1285_v1  ;;  %v1013_v41 = vmul.f32 %v2305_v17, %v981_v25  ;;  %v830_v44 = vadd.f32 -1.4531521, %v798_v31  ;;  %v396_v8 = vadd.f32 %v2242_v52, %v395_v10 }
 0x126   : > { %v2361_v18 = vpop.eup %1616  ;;  %v1229_v4 = vmul.f32 %v1615_v29, %v1069_v33  ;;  %1620 = vrcp.f32 %v750_v34  ;;  %v1155_v53 = vmul.f32 1.442695, %v1118_v36  ;;  %v1126_v57 = vmul.f32 %v1094_v45, %v2317_v62  ;;  %v443_v34 = vpop.f32.mrf.mxu2 }
 0x127   : > { %v1349_v37 = vmul.f32 %v1317_v19, %v2301_v42  ;;  %v1045_v54 = vadd.f32 0.2548296, %v1013_v41  ;;  %v862_v23 = vmul.f32 %v2345_v43, %v830_v44  ;;  %v806_v30 = vmul.f32 1.0614054, %v2361_v18 }
 0x128   : > { %v1261_v35 = vsub.f32 1.0, %v1229_v4  ;;  %v2371_v0 = vand.u32 2147483647, %v2359_v26  ;;  %v1619_v58 = vpop.eup %1618  ;;  %v1102_v59 = vsub.f32 0.0, %v2336_v11  ;;  %v661_v63 = vsel %vm629_vm5, -1.0, %v1673_v13 }
 0x129   : > { %1381 = vst.msk [vmem:[%s1913_s11 + $0x60] sm:$0xff] %vm263_vm0, %v1349_v37  ;;  %v1077_v42 = vmul.f32 %v2305_v17, %v1045_v54  ;;  %v894_v60 = vadd.f32 1.4214138, %v862_v23  ;;  %v838_v38 = vadd.f32 -1.4531521, %v806_v30  ;;  %v2381_v50 = vadd.f32 %v479_v12, %v396_v8 }
 0x12a   : > { %v1293_v22 = vmul.f32 %v1261_v35, %v653_v9  ;;  %v726_v62 = vmul.f32 0.3275911, %v2371_v0  ;;  %v420_v17 = vadd.f32 %v2242_v52, %v419_v20  ;;  %1622 = vpow2.f32 %v1155_v53 }
 0x12b   : > { %v1237_v2 = vmul.f32 %v1619_v58, %v1077_v42  ;;  %v926_v47 = vmul.f32 %v2345_v43, %v894_v60  ;;  %v870_v15 = vmul.f32 %v2361_v18, %v838_v38  ;;  %v1171_v28 = vmul.f32 1.442695, %v1126_v57  ;;  %v495_v57 = vld [vmem:[%s1795_s6 + $0xb0] sm:$0xff]  ;;  %v467_v60 = vpop.f32.mrf.mxu3 }
 0x12c   : > { %v2387_v49 = vpop.eup %1620  ;;  %v1325_v3 = vadd.f32 1.0, %v1293_v22  ;;  %v758_v21 = vadd.f32 1.0, %v726_v62  ;;  %v1134_v24 = vmul.f32 %v1102_v59, %v2336_v11  ;;  %v2391_v16 = vadd.f32 %v487_v32, %v420_v17 }
 0x12d   : > { %v1269_v56 = vsub.f32 1.0, %v1237_v2  ;;  %v958_v40 = vadd.f32 -0.28449672, %v926_v47  ;;  %v902_v61 = vadd.f32 1.4214138, %v870_v15  ;;  %v542_v10 = vmul.f32 0.5, %v2264_v46 }
 0x12e   : > { %v1357_v9 = vmul.f32 %v1325_v3, %v557_v51  ;;  %v814_v5 = vmul.f32 1.0614054, %v2387_v49  ;;  %1624 = vrcp.f32 %v758_v21  ;;  %v2396_v31 = vmul.f32 0.70710677, %v2381_v50 }
 0x12f   : > { %v1301_v29 = vmul.f32 %v1269_v56, %v661_v63  ;;  %v990_v1 = vmul.f32 %v2345_v43, %v958_v40  ;;  %v934_v25 = vmul.f32 %v2361_v18, %v902_v61  ;;  %vm606_vm6 = vcmp.lt.f32.partialorder %v2275_v14, 0.0  ;;  %v503_v56 = vld [vmem:[%s1795_s6 + $0xf0] sm:$0xff] }
 0x130   : > { %1389 = vst.msk [vmem:[%s1913_s11 + $0xa0] sm:$0xff] %vm263_vm0, %v1357_v9  ;;  %v2403_v11 = vmul.f32 0.5, %v2278_v39  ;;  %v846_v51 = vadd.f32 -1.4531521, %v814_v5  ;;  %1626 = vpow2.f32 %v1171_v28  ;;  %v1623_v19 = vpop.eup %1622  ;;  %v1187_v44 = vmul.f32 1.442695, %v1134_v24 }
 0x131   : > { %v1333_v33 = vadd.f32 1.0, %v1301_v29  ;;  %v1022_v36 = vadd.f32 0.2548296, %v990_v1  ;;  %v966_v45 = vadd.f32 -0.28449672, %v934_v25  ;;  %v1110_v54 = vsub.f32 0.0, %v2371_v0 }
 0x132   : > { %v878_v41 = vmul.f32 %v2387_v49, %v846_v51  ;;  %v2407_v4 = vand.u32 2147483647, %v2396_v31  ;;  %v2410_v46 = vmul.f32 0.70710677, %v2391_v16  ;;  %v638_v30 = vsel %vm606_vm6, -1.0, %v1673_v13 }
 0x133   : > { %v1365_v39 = vmul.f32 %v1333_v33, %v2342_v6  ;;  %v1054_v8 = vmul.f32 %v2345_v43, %v1022_v36  ;;  %v998_v37 = vmul.f32 %v2361_v18, %v966_v45  ;;  %v444_v53 = vadd.f32 %v2242_v52, %v443_v34 }
 0x134   : > { %v2416_v23 = vpop.eup %1624  ;;  %v910_v12 = vadd.f32 1.4214138, %v878_v41  ;;  %v703_v35 = vmul.f32 0.3275911, %v2407_v4  ;;  %vm614_vm7 = vcmp.lt.f32.partialorder %v2298_v7, 0.0  ;;  %1628 = vpow2.f32 %v1187_v44 }
 0x135   : > { %1397 = vst.msk [vmem:[%s1913_s11 + $0xe0] sm:$0xff] %vm263_vm0, %v1365_v39  ;;  %v1214_v6 = vmul.f32 %v1623_v19, %v1054_v8  ;;  %v1030_v43 = vadd.f32 0.2548296, %v998_v37  ;;  %v822_v20 = vmul.f32 1.0614054, %v2416_v23  ;;  %v1142_v62 = vmul.f32 %v1110_v54, %v2371_v0  ;;  %v398_v37 = vpop.f32.mrf.mxu0 }
 0x136   : > { %v942_v58 = vmul.f32 %v2387_v49, %v910_v12  ;;  %v735_v42 = vadd.f32 1.0, %v703_v35  ;;  %v2430_v14 = vand.u32 2147483647, %v2410_v46  ;;  %v1627_v38 = vpop.eup %1626  ;;  %v2435_v15 = vadd.f32 %v495_v57, %v444_v53 }
 0x137   : > { %v1246_v59 = vsub.f32 1.0, %v1214_v6  ;;  %v1062_v22 = vmul.f32 %v2361_v18, %v1030_v43  ;;  %v854_v63 = vadd.f32 -1.4531521, %v822_v20  ;;  %v468_v28 = vadd.f32 %v2242_v52, %v467_v60 }
 0x138   : > { %v974_v2 = vadd.f32 -0.28449672, %v942_v58  ;;  %1630 = vrcp.f32 %v735_v42  ;;  %v711_v47 = vmul.f32 0.3275911, %v2430_v14  ;;  %v646_v21 = vsel %vm614_vm7, -1.0, %v1673_v13  ;;  %v480_v42 = vld [vmem:[%s1795_s6 + $0x38] sm:$0xff] }
 0x139   : > { %v1278_v17 = vmul.f32 %v1246_v59, %v638_v30  ;;  %v1222_v32 = vmul.f32 %v1627_v38, %v1062_v22  ;;  %v886_v3 = vmul.f32 %v2416_v23, %v854_v63  ;;  %vm622_vm8 = vcmp.lt.f32.partialorder %v2328_v48, 0.0 }
 0x13a   : > { %v1006_v18 = vmul.f32 %v2387_v49, %v974_v2  ;;  %v743_v0 = vadd.f32 1.0, %v711_v47  ;;  %v1203_v9 = vmul.f32 1.442695, %v1142_v62  ;;  %v1629_v5 = vpop.eup %1628  ;;  %v1087_v1 = vsub.f32 0.0, %v2407_v4  ;;  %v422_v2 = vpop.f32.mrf.mxu1 }
 0x13b   : > { %v1310_v40 = vadd.f32 1.0, %v1278_v17  ;;  %v1254_v61 = vsub.f32 1.0, %v1222_v32  ;;  %v918_v24 = vadd.f32 1.4214138, %v886_v3  ;;  %v2447_v25 = vmul.f32 0.70710677, %v2435_v15 }
 0x13c   : > { %v1038_v29 = vadd.f32 0.2548296, %v1006_v18  ;;  %1632 = vrcp.f32 %v743_v0  ;;  %v2450_v36 = vadd.f32 %v503_v56, %v468_v28  ;;  %v558_v34 = vmul.f32 0.5, %v2319_v55 }
 0x13d   : > { %v1342_v7 = vmul.f32 %v1310_v40, %v542_v10  ;;  %v1286_v51 = vmul.f32 %v1254_v61, %v646_v21  ;;  %v950_v33 = vmul.f32 %v2416_v23, %v918_v24  ;;  %v654_v19 = vsel %vm622_vm8, -1.0, %v1673_v13  ;;  %v488_v24 = vld [vmem:[%s1795_s6 + $0x78] sm:$0xff] }
 0x13e   : > { %v2452_v45 = vpop.eup %1630  ;;  %v1070_v41 = vmul.f32 %v2387_v49, %v1038_v29  ;;  %v2460_v44 = vand.u32 2147483647, %v2447_v25  ;;  %1634 = vpow2.f32 %v1203_v9  ;;  %v1119_v55 = vmul.f32 %v1087_v1, %v2407_v4 }
 0x13f   : > { %1374 = vst.msk [vmem:[%s1913_s11 + $0x28] sm:$0xff] %vm263_vm0, %v1342_v7  ;;  %v1318_v10 = vadd.f32 1.0, %v1286_v51  ;;  %v982_v39 = vadd.f32 -0.28449672, %v950_v33  ;;  %v799_v8 = vmul.f32 1.0614054, %v2452_v45  ;;  %v399_v20 = vadd.f32 %v2242_v52, %v398_v37 }
 0x140   : > { %v1230_v54 = vmul.f32 %v1629_v5, %v1070_v41  ;;  %v719_v48 = vmul.f32 0.3275911, %v2460_v44  ;;  %v2470_v35 = vmul.f32 0.70710677, %v2450_v36  ;;  %v1095_v6 = vsub.f32 0.0, %v2430_v14 }
 0x141   : > { %v1350_v49 = vmul.f32 %v1318_v10, %v2403_v11  ;;  %v1014_v30 = vmul.f32 %v2416_v23, %v982_v39  ;;  %v831_v12 = vadd.f32 -1.4531521, %v799_v8  ;;  %v566_v38 = vmul.f32 0.5, %v2351_v27 }
 0x142   : > { %v2472_v53 = vpop.eup %1632  ;;  %v1262_v57 = vsub.f32 1.0, %v1230_v54  ;;  %v751_v43 = vadd.f32 1.0, %v719_v48  ;;  %vm630_vm9 = vcmp.lt.f32.partialorder %v2359_v26, 0.0  ;;  %v2485_v62 = vand.u32 2147483647, %v2470_v35  ;;  %v446_v48 = vpop.f32.mrf.mxu2 }
 0x143   : > { %1382 = vst.msk [vmem:[%s1913_s11 + $0x68] sm:$0xff] %vm263_vm0, %v1350_v49  ;;  %v1046_v4 = vadd.f32 0.2548296, %v1014_v30  ;;  %v863_v58 = vmul.f32 %v2452_v45, %v831_v12  ;;  %v807_v11 = vmul.f32 1.0614054, %v2472_v53  ;;  %v1127_v3 = vmul.f32 %v1095_v6, %v2430_v14 }
 0x144   : > { %v1294_v60 = vmul.f32 %v1262_v57, %v654_v19  ;;  %1636 = vrcp.f32 %v751_v43  ;;  %v1635_v47 = vpop.eup %1634  ;;  %v1157_v32 = vmul.f32 1.442695, %v1119_v55  ;;  %v2488_v28 = vadd.f32 %v480_v42, %v399_v20  ;;  %v496_v20 = vld [vmem:[%s1795_s6 + $0xb8] sm:$0xff] }
 0x145   : > { %v1078_v59 = vmul.f32 %v2416_v23, %v1046_v4  ;;  %v895_v22 = vadd.f32 1.4214138, %v863_v58  ;;  %v839_v63 = vadd.f32 -1.4531521, %v807_v11  ;;  %v727_v18 = vmul.f32 0.3275911, %v2485_v62 }
 0x146   : > { %v1326_v17 = vadd.f32 1.0, %v1294_v60  ;;  %v1103_v56 = vsub.f32 0.0, %v2460_v44  ;;  %v2495_v40 = vmul.f32 0.70710677, %v2488_v28  ;;  %v423_v61 = vadd.f32 %v2242_v52, %v422_v2 }
 0x147   : > { %v1238_v27 = vmul.f32 %v1635_v47, %v1078_v59  ;;  %v927_v21 = vmul.f32 %v2452_v45, %v895_v22  ;;  %v871_v23 = vmul.f32 %v2472_v53, %v839_v63  ;;  %v759_v29 = vadd.f32 1.0, %v727_v18 }
 0x148   : > { %v1358_v0 = vmul.f32 %v1326_v17, %v558_v34  ;;  %v662_v7 = vsel %vm630_vm9, -1.0, %v1673_v13  ;;  %1638 = vpow2.f32 %v1157_v32  ;;  %v1173_v51 = vmul.f32 1.442695, %v1127_v3 }
 0x149   : > { %v1270_v14 = vsub.f32 1.0, %v1238_v27  ;;  %v959_v9 = vadd.f32 -0.28449672, %v927_v21  ;;  %v903_v5 = vadd.f32 1.4214138, %v871_v23  ;;  %vm607_vm10 = vcmp.lt.f32.partialorder %v2396_v31, 0.0  ;;  %v470_v27 = vpop.f32.mrf.mxu3 }
 0x14a   : > { %v2499_v1 = vpop.eup %1636  ;;  %1390 = vst.msk [vmem:[%s1913_s11 + $0xa8] sm:$0xff] %vm263_vm0, %v1358_v0  ;;  %v2507_v33 = vand.u32 2147483647, %v2495_v40  ;;  %1640 = vrcp.f32 %v759_v29  ;;  %v2514_v26 = vadd.f32 %v488_v24, %v423_v61  ;;  %v1135_v55 = vmul.f32 %v1103_v56, %v2460_v44 }
 0x14b   : > { %v1302_v34 = vmul.f32 %v1270_v14, %v662_v7  ;;  %v991_v19 = vmul.f32 %v2452_v45, %v959_v9  ;;  %v935_v41 = vmul.f32 %v2472_v53, %v903_v5  ;;  %v815_v10 = vmul.f32 1.0614054, %v2499_v1 }
 0x14c   : > { %v704_v39 = vmul.f32 0.3275911, %v2507_v33  ;;  %vm615_vm11 = vcmp.lt.f32.partialorder %v2410_v46, 0.0  ;;  %1642 = vpow2.f32 %v1173_v51  ;;  %v1111_v43 = vsub.f32 0.0, %v2485_v62 }
 0x14d   : > { %v1334_v8 = vadd.f32 1.0, %v1302_v34  ;;  %v1023_v37 = vadd.f32 0.2548296, %v991_v19  ;;  %v967_v54 = vadd.f32 -0.28449672, %v935_v41  ;;  %v447_v11 = vadd.f32 %v2242_v52, %v446_v48 }
 0x14e   : > { %v847_v49 = vadd.f32 -1.4531521, %v815_v10  ;;  %v736_v30 = vadd.f32 1.0, %v704_v39  ;;  %v1639_v4 = vpop.eup %1638  ;;  %v2524_v44 = vmul.f32 0.70710677, %v2514_v26  ;;  %v543_v42 = vmul.f32 0.5, %v2381_v50 }
 0x14f   : > { %v1366_v12 = vmul.f32 %v1334_v8, %v566_v38  ;;  %v1055_v57 = vmul.f32 %v2452_v45, %v1023_v37  ;;  %v999_v6 = vmul.f32 %v2472_v53, %v967_v54  ;;  %v1189_v38 = vmul.f32 1.442695, %v1135_v55  ;;  %v504_v10 = vld [vmem:[%s1795_s6 + $0xf8] sm:$0xff] }
 0x150   : > { %v879_v58 = vmul.f32 %v2499_v1, %v847_v49  ;;  %1644 = vrcp.f32 %v736_v30  ;;  %v2530_v59 = vpop.eup %1640  ;;  %v639_v22 = vsel %vm607_vm10, -1.0, %v1673_v13  ;;  %v2536_v2 = vand.u32 2147483647, %v2524_v44 }
 0x151   : > { %1398 = vst.msk [vmem:[%s1913_s11 + $0xe8] sm:$0xff] %vm263_vm0, %v1366_v12  ;;  %v1215_v60 = vmul.f32 %v1639_v4, %v1055_v57  ;;  %v1031_v45 = vadd.f32 0.2548296, %v999_v6  ;;  %v2538_v47 = vadd.f32 %v496_v20, %v447_v11  ;;  %v647_v50 = vsel %vm615_vm11, -1.0, %v1673_v13 }
 0x152   : > { %v911_v63 = vadd.f32 1.4214138, %v879_v58  ;;  %v823_v3 = vmul.f32 1.0614054, %v2530_v59  ;;  %v1643_v21 = vpop.eup %1642  ;;  %v1143_v23 = vmul.f32 %v1111_v43, %v2485_v62  ;;  %v1088_v18 = vsub.f32 0.0, %v2507_v33 }
 0x153   : > { %v1247_v17 = vsub.f32 1.0, %v1215_v60  ;;  %v1063_v32 = vmul.f32 %v2472_v53, %v1031_v45  ;;  %v712_v0 = vmul.f32 0.3275911, %v2536_v2  ;;  %1646 = vpow2.f32 %v1189_v38 }
 0x154   : > { %v943_v31 = vmul.f32 %v2499_v1, %v911_v63  ;;  %v855_v46 = vadd.f32 -1.4531521, %v823_v3  ;;  %v2552_v9 = vmul.f32 0.70710677, %v2538_v47  ;;  %v471_v5 = vadd.f32 %v2242_v52, %v470_v27 }
 0x155   : > { %v1279_v56 = vmul.f32 %v1247_v17, %v639_v22  ;;  %v1223_v61 = vmul.f32 %v1643_v21, %v1063_v32  ;;  %v744_v14 = vadd.f32 1.0, %v712_v0  ;;  %v1205_v19 = vmul.f32 1.442695, %v1143_v23 }
 0x156   : > { %v2549_v24 = vpop.eup %1644  ;;  %v975_v53 = vadd.f32 -0.28449672, %v943_v31  ;;  %v887_v7 = vmul.f32 %v2530_v59, %v855_v46  ;;  %v1120_v41 = vmul.f32 %v1088_v18, %v2507_v33  ;;  %v551_v52 = vmul.f32 0.5, %v2391_v16 }
 0x157   : > { %v1311_v29 = vadd.f32 1.0, %v1279_v56  ;;  %v1255_v62 = vsub.f32 1.0, %v1223_v61  ;;  %v800_v51 = vmul.f32 1.0614054, %v2549_v24  ;;  %1648 = vrcp.f32 %v744_v14 }
 0x158   : > { %v1007_v34 = vmul.f32 %v2499_v1, %v975_v53  ;;  %v919_v37 = vadd.f32 1.4214138, %v887_v7  ;;  %v2562_v48 = vand.u32 2147483647, %v2552_v9  ;;  %v2568_v57 = vadd.f32 %v504_v10, %v471_v5 }
 0x159   : > { %v1343_v39 = vmul.f32 %v1311_v29, %v543_v42  ;;  %v1287_v8 = vmul.f32 %v1255_v62, %v647_v50  ;;  %v832_v54 = vadd.f32 -1.4531521, %v800_v51  ;;  %v1647_v49 = vpop.eup %1646  ;;  %vm623_vm12 = vcmp.lt.f32.partialorder %v2447_v25, 0.0 }
 0x15a   : > { %v1039_v55 = vadd.f32 0.2548296, %v1007_v34  ;;  %v951_v12 = vmul.f32 %v2530_v59, %v919_v37  ;;  %1650 = vpow2.f32 %v1205_v19  ;;  %v720_v16 = vmul.f32 0.3275911, %v2562_v48 }
 0x15b   : > { %1375 = vst.msk [vmem:[%s1913_s11 + $0x30] sm:$0xff] %vm263_vm0, %v1343_v39  ;;  %v1319_v30 = vadd.f32 1.0, %v1287_v8  ;;  %v864_v33 = vmul.f32 %v2549_v24, %v832_v54  ;;  %v1159_v58 = vmul.f32 1.442695, %v1120_v41  ;;  %v1096_v60 = vsub.f32 0.0, %v2536_v2 }
 0x15c   : > { %v1071_v6 = vmul.f32 %v2499_v1, %v1039_v55  ;;  %v983_v20 = vadd.f32 -0.28449672, %v951_v12  ;;  %v752_v45 = vadd.f32 1.0, %v720_v16  ;;  %v2577_v38 = vmul.f32 0.70710677, %v2568_v57 }
 0x15d   : > { %v1351_v43 = vmul.f32 %v1319_v30, %v551_v52  ;;  %v896_v4 = vadd.f32 1.4214138, %v864_v33  ;;  %v2573_v11 = vpop.eup %1648  ;;  %v655_v17 = vsel %vm623_vm12, -1.0, %v1673_v13  ;;  %v1128_v23 = vmul.f32 %v1096_v60, %v2536_v2 }
 0x15e   : > { %v1231_v42 = vmul.f32 %v1647_v49, %v1071_v6  ;;  %v1015_v1 = vmul.f32 %v2530_v59, %v983_v20  ;;  %v808_v63 = vmul.f32 1.0614054, %v2573_v11  ;;  %1652 = vrcp.f32 %v752_v45 }
 0x15f   : > { %1383 = vst.msk [vmem:[%s1913_s11 + $0x70] sm:$0xff] %vm263_vm0, %v1351_v43  ;;  %v928_v22 = vmul.f32 %v2549_v24, %v896_v4  ;;  %1654 = vpow2.f32 %v1159_v58  ;;  %v696_v18 = vand.u32 2147483647, %v2577_v38  ;;  %v559_v25 = vmul.f32 0.5, %v2435_v15 }
 0x160   : > { %v1263_v50 = vsub.f32 1.0, %v1231_v42  ;;  %v1047_v32 = vadd.f32 0.2548296, %v1015_v1  ;;  %v840_v27 = vadd.f32 -1.4531521, %v808_v63  ;;  %v1651_v21 = vpop.eup %1650  ;;  %vm631_vm13 = vcmp.lt.f32.partialorder %v2470_v35, 0.0 }
 0x161   : > { %v960_v3 = vadd.f32 -0.28449672, %v928_v22  ;;  %v728_v53 = vmul.f32 0.3275911, %v696_v18  ;;  %v1175_v7 = vmul.f32 1.442695, %v1128_v23 }
 0x162   : > { %v1295_v31 = vmul.f32 %v1263_v50, %v655_v17  ;;  %v1079_v0 = vmul.f32 %v2530_v59, %v1047_v32  ;;  %v872_v61 = vmul.f32 %v2573_v11, %v840_v27  ;;  %v1104_v51 = vsub.f32 0.0, %v2562_v48 }
 0x163   : > { %v992_v56 = vmul.f32 %v2549_v24, %v960_v3  ;;  %v760_v59 = vadd.f32 1.0, %v728_v53  ;;  %v663_v35 = vsel %vm631_vm13, -1.0, %v1673_v13  ;;  %vm608_vm14 = vcmp.lt.f32.partialorder %v2495_v40, 0.0 }
 0x164   : > { %v1327_v46 = vadd.f32 1.0, %v1295_v31  ;;  %v1239_v14 = vmul.f32 %v1651_v21, %v1079_v0  ;;  %v904_v29 = vadd.f32 1.4214138, %v872_v61  ;;  %v1653_v62 = vpop.eup %1652  ;;  %v567_v52 = vmul.f32 0.5, %v2450_v36 }
 0x165   : > { %v1024_v5 = vadd.f32 0.2548296, %v992_v56  ;;  %v816_v15 = vmul.f32 1.0614054, %v1653_v62  ;;  %v1655_v10 = vpop.eup %1654  ;;  %1656 = vrcp.f32 %v760_v59  ;;  %v640_v33 = vsel %vm608_vm14, -1.0, %v1673_v13 }
 0x166   : > { %v1359_v2 = vmul.f32 %v1327_v46, %v559_v25  ;;  %v1271_v34 = vsub.f32 1.0, %v1239_v14  ;;  %v936_v41 = vmul.f32 %v2573_v11, %v904_v29  ;;  %1658 = vpow2.f32 %v1175_v7 }
 0x167   : > { %v1056_v19 = vmul.f32 %v2549_v24, %v1024_v5  ;;  %v848_v54 = vadd.f32 -1.4531521, %v816_v15  ;;  %v1136_v24 = vmul.f32 %v1104_v51, %v2562_v48  ;;  %v544_v4 = vmul.f32 0.5, %v2488_v28 }
 0x168   : > { %1391 = vst.msk [vmem:[%s1913_s11 + $0xb0] sm:$0xff] %vm263_vm0, %v1359_v2  ;;  %v1303_v39 = vmul.f32 %v1271_v34, %v663_v35  ;;  %v968_v37 = vadd.f32 -0.28449672, %v936_v41  ;;  %v1112_v58 = vsub.f32 0.0, %v696_v18  ;;  %vm616_vm15 = vcmp.lt.f32.partialorder %v2524_v44, 0.0 }
 0x169   : > { %v1216_v8 = vmul.f32 %v1655_v10, %v1056_v19  ;;  %v880_v12 = vmul.f32 %v1653_v62, %v848_v54  ;;  %v1191_v36 = vmul.f32 1.442695, %v1136_v24  ;;  %v648_v21 = vsel %vm616_vm15, -1.0, %v1673_v13 }
 0x16a   : > { %v1335_v55 = vadd.f32 1.0, %v1303_v39  ;;  %v1000_v30 = vmul.f32 %v2573_v11, %v968_v37  ;;  %v1144_v32 = vmul.f32 %v1112_v58, %v696_v18  ;;  %v552_v44 = vmul.f32 0.5, %v2514_v26 }
 0x16b   : > { %v1248_v49 = vsub.f32 1.0, %v1216_v8  ;;  %v912_v43 = vadd.f32 1.4214138, %v880_v12  ;;  %v1657_v20 = vpop.eup %1656  ;;  %1660 = vpow2.f32 %v1191_v36  ;;  %vm624_vm1 = vcmp.lt.f32.partialorder %v2552_v9, 0.0 }
 0x16c   : > { %v1367_v6 = vmul.f32 %v1335_v55, %v567_v52  ;;  %v1032_v16 = vadd.f32 0.2548296, %v1000_v30  ;;  %v824_v45 = vmul.f32 1.0614054, %v1657_v20  ;;  %v1659_v1 = vpop.eup %1658  ;;  %v1207_v0 = vmul.f32 1.442695, %v1144_v32 }
 0x16d   : > { %v1280_v40 = vmul.f32 %v1248_v49, %v640_v33  ;;  %v944_v60 = vmul.f32 %v1653_v62, %v912_v43  ;;  %v656_v2 = vsel %vm624_vm1, -1.0, %v1673_v13  ;;  %vm632_vm2 = vcmp.lt.f32.partialorder %v2577_v38, 0.0 }
 0x16e   : > { %1399 = vst.msk [vmem:[%s1913_s11 + $0xf0] sm:$0xff] %vm263_vm0, %v1367_v6  ;;  %v1064_v42 = vmul.f32 %v2573_v11, %v1032_v16  ;;  %v856_v50 = vadd.f32 -1.4531521, %v824_v45  ;;  %1662 = vpow2.f32 %v1207_v0  ;;  %v664_v15 = vsel %vm632_vm2, -1.0, %v1673_v13 }
 0x16f   : > { %v1312_v48 = vadd.f32 1.0, %v1280_v40  ;;  %v976_v17 = vadd.f32 -0.28449672, %v944_v60  ;;  %v568_v35 = vmul.f32 0.5, %v2568_v57 }
 0x170   : > { %v1224_v63 = vmul.f32 %v1659_v1, %v1064_v42  ;;  %v888_v27 = vmul.f32 %v1657_v20, %v856_v50 }
 0x171   : > { %v1344_v22 = vmul.f32 %v1312_v48, %v544_v4  ;;  %v1008_v3 = vmul.f32 %v1653_v62, %v976_v17  ;;  %v1661_v46 = vpop.eup %1660 }
 0x172   : > { %v1256_v28 = vsub.f32 1.0, %v1224_v63  ;;  %v920_v23 = vadd.f32 1.4214138, %v888_v27 }
 0x173   : > { %1376 = vst.msk [vmem:[%s1913_s11 + $0x38] sm:$0xff] %vm263_vm0, %v1344_v22  ;;  %v1040_v31 = vadd.f32 0.2548296, %v1008_v3 }
 0x174   : > { %v1288_v11 = vmul.f32 %v1256_v28, %v648_v21  ;;  %v952_v25 = vmul.f32 %v1657_v20, %v920_v23  ;;  %v1663_v34 = vpop.eup %1662 }
 0x175   : > { %v1072_v61 = vmul.f32 %v1653_v62, %v1040_v31  ;;  %v560_v62 = vmul.f32 0.5, %v2538_v47 }
 0x176   : > { %v1320_v56 = vadd.f32 1.0, %v1288_v11  ;;  %v984_v14 = vadd.f32 -0.28449672, %v952_v25 }
 0x177   : > { %v1232_v18 = vmul.f32 %v1661_v46, %v1072_v61 }
 0x178   : > { %v1352_v53 = vmul.f32 %v1320_v56, %v552_v44  ;;  %v1016_v29 = vmul.f32 %v1657_v20, %v984_v14 }
 0x179   : > { %v1264_v5 = vsub.f32 1.0, %v1232_v18 }
 0x17a   : > { %1384 = vst.msk [vmem:[%s1913_s11 + $0x78] sm:$0xff] %vm263_vm0, %v1352_v53  ;;  %v1048_v26 = vadd.f32 0.2548296, %v1016_v29 }
 0x17b   : > { %v1296_v7 = vmul.f32 %v1264_v5, %v656_v2 }
 0x17c   : > { %v1080_v59 = vmul.f32 %v1657_v20, %v1048_v26 }
 0x17d   : > { %v1328_v51 = vadd.f32 1.0, %v1296_v7 }
 0x17e   : > { %v1240_v9 = vmul.f32 %v1663_v34, %v1080_v59 }
 0x17f   : > { %v1360_v19 = vmul.f32 %v1328_v51, %v560_v62 }
 0x180   : > { %v1272_v41 = vsub.f32 1.0, %v1240_v9 }
 0x181   : > { %1392 = vst.msk [vmem:[%s1913_s11 + $0xb8] sm:$0xff] %vm263_vm0, %v1360_v19 }
 0x182   : > { %v1304_v10 = vmul.f32 %v1272_v41, %v664_v15 }
 0x184   : > { %v1336_v39 = vadd.f32 1.0, %v1304_v10 }
 0x186   : > { %v1368_v8 = vmul.f32 %v1336_v39, %v568_v35 }
 0x188   : > { %1400 = vst.msk [vmem:[%s1913_s11 + $0xf8] sm:$0xff] %vm263_vm0, %v1368_v8 }
 0x189 PF: > { %s14_s15 = sadd.s32 1, %s1671_s15  }
 0x18a   : > { %p11_p4 = scmp.ge.s32.totalorder %s14_s15, 4  }
 0x18c   :  { %13 = sbr.rel (!%p11_p4) target bundleno = 1 (0x1), region = 69 }

// kernel: fno2d_forward.19
= control target key start
LH: loop header
LB: loop body
LE: loop exit
PB: predicated region body
PF: predicated region fallthrough
CT: control target
= control target key end

     0   :  { %10 = vsyncpa [#allocation4], 0  ;;  %s5236_s0 = inlined_call_operand.vmem [shape: f32[512,32], index: 0, kind: input, shape index: {}]   ;;  %s5237_s1 = inlined_call_operand.vmem [shape: f32[32,256], index: 1, kind: input, shape index: {}]   ;;  %s5238_s2 = inlined_call_operand.vmem [shape: f32[1,256], index: 2, kind: input, shape index: {}]   ;;  %s5239_s3 = inlined_call_operand.vmem [shape: f32[256,128], index: 3, kind: input, shape index: {}]   ;;  %s5240_s4 = inlined_call_operand.vmem [shape: f32[1,128], index: 4, kind: input, shape index: {}]   ;;  %s5241_s5 = inlined_call_operand.hbm [shape: f32[512,128], index: 5, kind: output, shape index: {}]  }
   0x1   :  { %12 = vsyncpa [#allocation4 + $0x1], 0  ;;  %s3265_s18 = smov 0   ;;  %s3267_s19 = smov 0  }
   0x2   :  { %s3269_s20 = smov 0   ;;  %s3271_s21 = smov 0  }
   0x3 LB: > { %s3286_s22 = sadd.s32 4294967295, %s3230_s21   ;;  %s2759_s23 = sadd.s32 4294967294, %s3230_s21   ;;  %s3230_s21 = sphi %s3271_s21, %s5339_s21   ;;  %s3226_s20 = sphi %s3269_s20, %s5338_s20   ;;  %s3222_s19 = sphi %s3267_s19, %s5337_s19   ;;  %s3218_s18 = sphi %s3265_s18, %s5336_s18  }
   0x4   : > { %s3290_s24 = sadd.s32 1, %s3230_s21   ;;  %s135_s25 = sadd.s32 1, %s3226_s20 }
   0x5   : > { %s132_s26 = ssub.s32 %s3230_s21, %s3290_s24  ;;  %p145_p0 = scmp.ne.s32.totalorder %s3226_s20, %s3222_s19 }
   0x6   : > { %p133_p1 = scmp.eq.s32.totalorder %s132_s26, 0  ;;  %p146_p2 = scmp.eq.s32.totalorder %s3286_s22, 1 }
   0x7   : > { %p151_p3 = scmp.ne.s32.totalorder %s3222_s19, %s3218_s18  ;;  %p152_p4 = scmp.eq.s32.totalorder %s2759_s23, 1 }
   0x8   : > { %s3301_s27 = scalar_select %p133_p1, %s3226_s20, %s135_s25  }
   0x9   : > { %p3303_p5 = por %p146_p2, %p145_p0  ;;  %p3307_p6 = por %p152_p4, %p151_p3 }
   0xa   : > { %p2762_p7 = scmp.ge.s32.totalorder %s3230_s21, 1  ;;  %p191_p8 = scmp.lt.s32.totalorder %s3230_s21, 3 }
   0xc   : > { %p192_p9 = pnand %p2762_p7, %p191_p8 }
   0xe   : > { %195 = sbr.rel (%p192_p9) target bundleno = 755 (0x2f3), region = 40 }
  0x13   : > { %v264_v0 = vld [vmem:[%s5237_s1 + $0x30] sm:$0xff]  ;;  %v265_v1 = vld [vmem:[%s5237_s1 + $0x38] sm:$0xff]  ;;  %v262_v2 = vld [vmem:[%s5237_s1 + $0x20] sm:$0xff]  ;;  %s2764_s11 = sshll.u32 %s3286_s22, 5  ;;  %vm272_vm0 = vcmask 261120   ;;  %s3188_s17 = scalar_lea.hbm %s5241_s5, 512 }
  0x14   : > { %381 = vmatpush.msra.mxu0 %v264_v0  ;;  %494 = vmatpush.msra.mxu1 %v265_v1  ;;  %v263_v3 = vld [vmem:[%s5237_s1 + $0x28] sm:$0xff]  ;;  %p220_p10 = scmp.lt.s32.totalorder %s2764_s11, 63  ;;  %v260_v4 = vld [vmem:[%s5237_s1 + $0x10] sm:$0xff]  ;;  %v261_v5 = vld [vmem:[%s5237_s1 + $0x18] sm:$0xff] }
  0x15   : > { %v258_v6 = vld [vmem:[%s5237_s1] sm:$0xff]  ;;  %v259_v7 = vld [vmem:[%s5237_s1 + $0x8] sm:$0xff]  ;;  %v2402_v24 = vld [vmem:[%s5239_s3 + $0x78] sm:$0xff] }
  0x16   : > { %382 = vmatpush.msra.mxu0 %v262_v2  ;;  %495 = vmatpush.msra.mxu1 %v263_v3  ;;  %s5341_s11 = smov (!%p220_p10, %s2764_s11), 63  ;;  %v2418_v25 = vld [vmem:[%s5239_s3 + $0xf8] sm:$0xff]  ;;  %v266_v26 = vld [vmem:[%s5238_s2] sm:$0x3]  ;;  %v2401_v27 = vld [vmem:[%s5239_s3 + $0x70] sm:$0xff] }
  0x17   : > { %s2765_s6 = sshll.u32 %s5341_s11, 3  ;;  %2836 = vmatpush.msra.mxu2 %v2402_v24  ;;  %2852 = vmatpush.msra.mxu3 %v2418_v25  ;;  %v2417_v28 = vld [vmem:[%s5239_s3 + $0xf0] sm:$0xff]  ;;  %v2400_v29 = vld [vmem:[%s5239_s3 + $0x68] sm:$0xff]  ;;  %v3412_v31 = vperm.slane %v266_v26, 0  ;;  %v3414_v32 = vperm.slane %v266_v26, 1  ;;  %v2399_v33 = vld [vmem:[%s5239_s3 + $0x60] sm:$0xff] }
  0x18   : > { %383 = vmatpush.msra.mxu0 %v260_v4  ;;  %496 = vmatpush.msra.mxu1 %v261_v5  ;;  %s3341_s9 = scalar_lea.vmem %s5236_s0, %s2765_s6  ;;  %v2416_v30 = vld [vmem:[%s5239_s3 + $0xe8] sm:$0xff]  ;;  %v2415_v34 = vld [vmem:[%s5239_s3 + $0xe0] sm:$0xff]  ;;  %v2398_v38 = vld [vmem:[%s5239_s3 + $0x58] sm:$0xff]  ;;  %s2835_s6 = sshll.u32 %s3286_s22, 8 }
  0x19   : > { %v226_v8 = vld [vmem:[%s3341_s9] sm:$0xff]  ;;  %v227_v9 = vld [vmem:[%s3341_s9 + $0x8] sm:$0xff]  ;;  %v228_v10 = vld [vmem:[%s3341_s9 + $0x10] sm:$0xff]  ;;  %2837 = vmatpush.msra.mxu2 %v2401_v27  ;;  %2853 = vmatpush.msra.mxu3 %v2417_v28  ;;  %s2693_s10 = scalar_lea.hbm %s5241_s5, %s2835_s6 }
  0x1a   : > { %384 = vmatpush.msra.mxu0 %v258_v6  ;;  %497 = vmatpush.msra.mxu1 %v259_v7  ;;  %v229_v11 = vld [vmem:[%s3341_s9 + $0x18] sm:$0xff]  ;;  %v230_v12 = vld [vmem:[%s3341_s9 + $0x20] sm:$0xff]  ;;  %v231_v13 = vld [vmem:[%s3341_s9 + $0x28] sm:$0xff]  ;;  %s2696_s12 = sshll.u32 %s2693_s10, 4  ;;  %s2697_s12 = int_to_ptr.hbm [resolvable:$true] %s2696_s12 }
  0x1b   : > { %2766 = vmatmul.msk.f32.vlgmr.msra.gmra.mxu0 %vm272_vm0, %v226_v8  ;;  %2798 = vmatmul.msk.f32.vlgmr.msra.gmra.mxu1 %vm272_vm0, %v226_v8  ;;  %v232_v14 = vld [vmem:[%s3341_s9 + $0x30] sm:$0xff]  ;;  %v233_v15 = vld [vmem:[%s3341_s9 + $0x38] sm:$0xff]  ;;  %v234_v16 = vld [vmem:[%s3341_s9 + $0x40] sm:$0xff]  ;;  %s3182_s22 = sshra.s32 %s2697_s12, 4  ;;  %s3183_s22 = int_to_ptr.hbm [resolvable:$true] %s3182_s22 }
  0x1c   : > { %v235_v17 = vld [vmem:[%s3341_s9 + $0x48] sm:$0xff]  ;;  %v236_v18 = vld [vmem:[%s3341_s9 + $0x50] sm:$0xff]  ;;  %v237_v19 = vld [vmem:[%s3341_s9 + $0x58] sm:$0xff]  ;;  %2423 = vmatpush.msrb.mxu0 %v2402_v24  ;;  %2536 = vmatpush.msrb.mxu1 %v2418_v25  ;;  %s3184_s14 = scalar_lea.hbm %s3183_s22, 256  ;;  %p3189_p0 = scmp.lt.s32.totalorder %s3183_s22, %s5241_s5 }
  0x1d   : > { %v238_v20 = vld [vmem:[%s3341_s9 + $0x60] sm:$0xff]  ;;  %v239_v21 = vld [vmem:[%s3341_s9 + $0x68] sm:$0xff]  ;;  %v240_v22 = vld [vmem:[%s3341_s9 + $0x70] sm:$0xff]  ;;  %2838 = vmatpush.msra.mxu2 %v2400_v29  ;;  %2854 = vmatpush.msra.mxu3 %v2416_v30  ;;  %p3185_p11 = scmp.ne.s32.totalorder %s3183_s22, %s3184_s14  ;;  %p3190_p1 = scmp.lt.s32.totalorder %s3188_s17, %s3184_s14 }
  0x1e   : > { %v241_v23 = vld [vmem:[%s3341_s9 + $0x78] sm:$0xff]  ;;  %2424 = vmatpush.msrb.mxu0 %v2401_v27  ;;  %2537 = vmatpush.msrb.mxu1 %v2417_v28  ;;  %v242_v37 = vld [vmem:[%s3341_s9 + $0x80] sm:$0xff]  ;;  %v2397_v42 = vld [vmem:[%s5239_s3 + $0x50] sm:$0xff] }
  0x1f   : > { %2839 = vmatpush.msra.mxu2 %v2399_v33  ;;  %2855 = vmatpush.msra.mxu3 %v2415_v34  ;;  %v2414_v39 = vld [vmem:[%s5239_s3 + $0xd8] sm:$0xff]  ;;  %v2413_v43 = vld [vmem:[%s5239_s3 + $0xd0] sm:$0xff]  ;;  %v2396_v46 = vld [vmem:[%s5239_s3 + $0x48] sm:$0xff]  ;;  %p3186_p12 = pnand %p3185_p11, %p3303_p5  ;;  %p3191_p2 = por %p3190_p1, %p3189_p0 }
  0x20   : > { %2425 = vmatpush.msrb.mxu0 %v2400_v29  ;;  %2538 = vmatpush.msrb.mxu1 %v2416_v30  ;;  %v2412_v47 = vld [vmem:[%s5239_s3 + $0xc8] sm:$0xff]  ;;  %v2395_v50 = vld [vmem:[%s5239_s3 + $0x40] sm:$0xff]  ;;  %v2394_v56 = vld [vmem:[%s5239_s3 + $0x38] sm:$0xff] }
  0x21   : > { %2840 = vmatpush.msra.mxu2 %v2398_v38  ;;  %2856 = vmatpush.msra.mxu3 %v2414_v39  ;;  %v2411_v51 = vld [vmem:[%s5239_s3 + $0xc0] sm:$0xff]  ;;  %v243_v55 = vld [vmem:[%s3341_s9 + $0x88] sm:$0xff]  ;;  %v2410_v57 = vld [vmem:[%s5239_s3 + $0xb8] sm:$0xff]  ;;  %p3187_p13 = pneg %p3186_p12 }
  0x22   : > { %2426 = vmatpush.msrb.mxu0 %v2399_v33  ;;  %2539 = vmatpush.msrb.mxu1 %v2415_v34  ;;  %v2393_v62 = vld [vmem:[%s5239_s3 + $0x30] sm:$0xff]  ;;  %v2392_v0 = vld [vmem:[%s5239_s3 + $0x28] sm:$0xff]  ;;  %v2391_v4 = vld [vmem:[%s5239_s3 + $0x20] sm:$0xff] }
  0x23   : > { %2767 = vmatmul.msk.f32.gmra.mxu0 %vm272_vm0, %v227_v9  ;;  %2799 = vmatmul.msk.f32.gmra.mxu1 %vm272_vm0, %v227_v9  ;;  %v2409_v63 = vld [vmem:[%s5239_s3 + $0xb0] sm:$0xff]  ;;  %v2408_v2 = vld [vmem:[%s5239_s3 + $0xa8] sm:$0xff]  ;;  %v2407_v5 = vld [vmem:[%s5239_s3 + $0xa0] sm:$0xff]  ;;  %p3192_p3 = pnand %p3191_p2, %p3187_p13 }
  0x24   : > { %2841 = vmatpush.msra.mxu2 %v2397_v42  ;;  %2857 = vmatpush.msra.mxu3 %v2413_v43  ;;  %v244_v6 = vld [vmem:[%s3341_s9 + $0x90] sm:$0xff]  ;;  %v2390_v7 = vld [vmem:[%s5239_s3 + $0x18] sm:$0xff]  ;;  %v2387_v24 = vld [vmem:[%s5239_s3] sm:$0xff] }
  0x25   : > { %2427 = vmatpush.msrb.mxu0 %v2398_v38  ;;  %2540 = vmatpush.msrb.mxu1 %v2414_v39  ;;  %v2406_v8 = vld [vmem:[%s5239_s3 + $0x98] sm:$0xff]  ;;  %v2403_v26 = vld [vmem:[%s5239_s3 + $0x80] sm:$0xff] }
  0x26   : > { %2842 = vmatpush.msra.mxu2 %v2396_v46  ;;  %2858 = vmatpush.msra.mxu3 %v2412_v47  ;;  %v245_v28 = vld [vmem:[%s3341_s9 + $0x98] sm:$0xff] }
  0x27   : > { %2428 = vmatpush.msrb.mxu0 %v2397_v42  ;;  %2541 = vmatpush.msrb.mxu1 %v2413_v43 }
  0x28   : > { %2843 = vmatpush.msra.mxu2 %v2395_v50  ;;  %2859 = vmatpush.msra.mxu3 %v2411_v51 }
  0x29   : > { %2429 = vmatpush.msrb.mxu0 %v2396_v46  ;;  %2542 = vmatpush.msrb.mxu1 %v2412_v47 }
  0x2a   : > { %2844 = vmatpush.msra.mxu2 %v2394_v56  ;;  %2860 = vmatpush.msra.mxu3 %v2410_v57 }
  0x2b   : > { %2768 = vmatmul.msk.f32.gmra.mxu0 %vm272_vm0, %v228_v10  ;;  %2800 = vmatmul.msk.f32.gmra.mxu1 %vm272_vm0, %v228_v10 }
  0x2c   : > { %2845 = vmatpush.msra.mxu2 %v2393_v62  ;;  %2861 = vmatpush.msra.mxu3 %v2409_v63 }
  0x2d   : > { %2430 = vmatpush.msrb.mxu0 %v2395_v50  ;;  %2543 = vmatpush.msrb.mxu1 %v2411_v51  ;;  %v246_v50 = vld [vmem:[%s3341_s9 + $0xa0] sm:$0xff] }
  0x2e   : > { %2846 = vmatpush.msra.mxu2 %v2392_v0  ;;  %2862 = vmatpush.msra.mxu3 %v2408_v2 }
  0x2f   : > { %2431 = vmatpush.msrb.mxu0 %v2394_v56  ;;  %2544 = vmatpush.msrb.mxu1 %v2410_v57 }
  0x30   : > { %2847 = vmatpush.msra.mxu2 %v2391_v4  ;;  %2863 = vmatpush.msra.mxu3 %v2407_v5 }
  0x31   : > { %2432 = vmatpush.msrb.mxu0 %v2393_v62  ;;  %2545 = vmatpush.msrb.mxu1 %v2409_v63 }
  0x32   : > { %2848 = vmatpush.msra.mxu2 %v2390_v7  ;;  %2864 = vmatpush.msra.mxu3 %v2406_v8 }
  0x33   : > { %2769 = vmatmul.msk.f32.gmra.mxu0 %vm272_vm0, %v229_v11  ;;  %2801 = vmatmul.msk.f32.gmra.mxu1 %vm272_vm0, %v229_v11 }
  0x34   : > { %2433 = vmatpush.msrb.mxu0 %v2392_v0  ;;  %2546 = vmatpush.msrb.mxu1 %v2408_v2 }
  0x36   : > { %2434 = vmatpush.msrb.mxu0 %v2391_v4  ;;  %2547 = vmatpush.msrb.mxu1 %v2407_v5 }
  0x38   : > { %2435 = vmatpush.msrb.mxu0 %v2390_v7  ;;  %2548 = vmatpush.msrb.mxu1 %v2406_v8 }
  0x3b   : > { %2770 = vmatmul.msk.f32.gmra.mxu0 %vm272_vm0, %v230_v12  ;;  %2802 = vmatmul.msk.f32.gmra.mxu1 %vm272_vm0, %v230_v12 }
  0x43   : > { %2771 = vmatmul.msk.f32.gmra.mxu0 %vm272_vm0, %v231_v13  ;;  %2803 = vmatmul.msk.f32.gmra.mxu1 %vm272_vm0, %v231_v13 }
  0x4b   : > { %2772 = vmatmul.msk.f32.gmra.mxu0 %vm272_vm0, %v232_v14  ;;  %2804 = vmatmul.msk.f32.gmra.mxu1 %vm272_vm0, %v232_v14  ;;  %v2389_v14 = vld [vmem:[%s5239_s3 + $0x10] sm:$0xff] }
  0x4c   : > { %2849 = vmatpush.msra.mxu2 %v2389_v14  ;;  %2436 = vmatpush.msrb.mxu0 %v2389_v14 }
  0x53   : > { %2773 = vmatmul.msk.f32.gmra.mxu0 %vm272_vm0, %v233_v15  ;;  %2805 = vmatmul.msk.f32.gmra.mxu1 %vm272_vm0, %v233_v15  ;;  %v2405_v15 = vld [vmem:[%s5239_s3 + $0x90] sm:$0xff] }
  0x54   : > { %2865 = vmatpush.msra.mxu3 %v2405_v15  ;;  %2549 = vmatpush.msrb.mxu1 %v2405_v15 }
  0x5b   : > { %2774 = vmatmul.msk.f32.gmra.mxu0 %vm272_vm0, %v234_v16  ;;  %2806 = vmatmul.msk.f32.gmra.mxu1 %vm272_vm0, %v234_v16 }
  0x63   : > { %2775 = vmatmul.msk.f32.gmra.mxu0 %vm272_vm0, %v235_v17  ;;  %2807 = vmatmul.msk.f32.gmra.mxu1 %vm272_vm0, %v235_v17 }
  0x6b   : > { %2776 = vmatmul.msk.f32.gmra.mxu0 %vm272_vm0, %v236_v18  ;;  %2808 = vmatmul.msk.f32.gmra.mxu1 %vm272_vm0, %v236_v18 }
  0x73   : > { %2777 = vmatmul.msk.f32.gmra.mxu0 %vm272_vm0, %v237_v19  ;;  %2809 = vmatmul.msk.f32.gmra.mxu1 %vm272_vm0, %v237_v19 }
  0x7b   : > { %2778 = vmatmul.msk.f32.gmra.mxu0 %vm272_vm0, %v238_v20  ;;  %2810 = vmatmul.msk.f32.gmra.mxu1 %vm272_vm0, %v238_v20 }
  0x83   : > { %2779 = vmatmul.msk.f32.gmra.mxu0 %vm272_vm0, %v239_v21  ;;  %2811 = vmatmul.msk.f32.gmra.mxu1 %vm272_vm0, %v239_v21 }
  0x8b   : > { %2780 = vmatmul.msk.f32.gmra.mxu0 %vm272_vm0, %v240_v22  ;;  %2812 = vmatmul.msk.f32.gmra.mxu1 %vm272_vm0, %v240_v22  ;;  %v2388_v22 = vld [vmem:[%s5239_s3 + $0x8] sm:$0xff] }
  0x8c   : > { %2850 = vmatpush.msra.mxu2 %v2388_v22  ;;  %2437 = vmatpush.msrb.mxu0 %v2388_v22 }
  0x8e   : > { %2851 = vmatpush.msra.mxu2 %v2387_v24  ;;  %2438 = vmatpush.msrb.mxu0 %v2387_v24 }
  0x93   : > { %2781 = vmatmul.msk.f32.gmra.mxu0 %vm272_vm0, %v241_v23  ;;  %2813 = vmatmul.msk.f32.gmra.mxu1 %vm272_vm0, %v241_v23  ;;  %v2404_v23 = vld [vmem:[%s5239_s3 + $0x88] sm:$0xff] }
  0x94   : > { %2866 = vmatpush.msra.mxu3 %v2404_v23  ;;  %2550 = vmatpush.msrb.mxu1 %v2404_v23 }
  0x96   : > { %2867 = vmatpush.msra.mxu3 %v2403_v26  ;;  %2551 = vmatpush.msrb.mxu1 %v2403_v26 }
  0x98   : > { %v386_v35 = vpop.f32.mrf.mxu0  ;;  %v499_v36 = vpop.f32.mrf.mxu1 }
  0x99   : > { %v3430_v40 = vadd.f32 %v386_v35, %v3412_v31  ;;  %v3433_v41 = vadd.f32 %v499_v36, %v3414_v32 }
  0x9b   : > { %v3442_v44 = vmul.f32 0.70710677, %v3430_v40  ;;  %v3445_v45 = vmul.f32 0.70710677, %v3433_v41  ;;  %2782 = vmatmul.msk.f32.gmra.mxu0 %vm272_vm0, %v242_v37  ;;  %2814 = vmatmul.msk.f32.gmra.mxu1 %vm272_vm0, %v242_v37  ;;  %v3585_v0 = vmul.f32 0.5, %v3433_v41 }
  0x9d   : > { %v3456_v48 = vand.u32 2147483647, %v3442_v44  ;;  %v3459_v49 = vand.u32 2147483647, %v3445_v45  ;;  %vm723_vm1 = vcmp.lt.f32.partialorder %v3442_v44, 0.0  ;;  %vm724_vm2 = vcmp.lt.f32.partialorder %v3445_v45, 0.0 }
  0x9f   : > { %v915_v52 = vmul.f32 0.3275911, %v3456_v48  ;;  %v916_v53 = vmul.f32 0.3275911, %v3459_v49  ;;  %v1683_v37 = vsub.f32 0.0, %v3456_v48  ;;  %v1684_v47 = vsub.f32 0.0, %v3459_v49 }
  0xa0   : > { %v389_v54 = vpop.f32.mrf.mxu0  ;;  %v502_v61 = vpop.f32.mrf.mxu1 }
  0xa1   : > { %v979_v58 = vadd.f32 1.0, %v915_v52  ;;  %v980_v59 = vadd.f32 1.0, %v916_v53  ;;  %v3477_v60 = vadd.f32 %v389_v54, %v3412_v31  ;;  %v3491_v1 = vadd.f32 %v502_v61, %v3414_v32 }
  0xa2   : > { %v1747_v51 = vmul.f32 %v1683_v37, %v3456_v48  ;;  %v3580_v48 = vmul.f32 0.5, %v3430_v40  ;;  %v1748_v62 = vmul.f32 %v1684_v47, %v3459_v49 }
  0xa3   : > { %2911 = vrcp.f32 %v979_v58  ;;  %2783 = vmatmul.msk.f32.gmra.mxu0 %vm272_vm0, %v243_v55  ;;  %2815 = vmatmul.msk.f32.gmra.mxu1 %vm272_vm0, %v243_v55  ;;  %v3497_v3 = vmul.f32 0.70710677, %v3477_v60  ;;  %v3515_v10 = vmul.f32 0.70710677, %v3491_v1  ;;  %v3630_v37 = vmul.f32 0.5, %v3491_v1 }
  0xa4   : > { %2913 = vrcp.f32 %v980_v59  ;;  %v1811_v63 = vmul.f32 1.442695, %v1747_v51  ;;  %v1813_v14 = vmul.f32 1.442695, %v1748_v62 }
  0xa5   : > { %v3521_v13 = vand.u32 2147483647, %v3497_v3  ;;  %v3533_v19 = vand.u32 2147483647, %v3515_v10  ;;  %vm725_vm3 = vcmp.lt.f32.partialorder %v3497_v3, 0.0  ;;  %vm726_vm4 = vcmp.lt.f32.partialorder %v3515_v10, 0.0 }
  0xa7   : > { %v917_v20 = vmul.f32 0.3275911, %v3521_v13  ;;  %v918_v33 = vmul.f32 0.3275911, %v3533_v19  ;;  %v1685_v53 = vsub.f32 0.0, %v3521_v13  ;;  %v1686_v57 = vsub.f32 0.0, %v3533_v19 }
  0xa8   : > { %v392_v17 = vpop.f32.mrf.mxu0  ;;  %v505_v29 = vpop.f32.mrf.mxu1 }
  0xa9   : > { %v3512_v9 = vpop.eup %2911  ;;  %v3537_v21 = vadd.f32 %v392_v17, %v3412_v31  ;;  %v981_v30 = vadd.f32 1.0, %v917_v20  ;;  %v982_v38 = vadd.f32 1.0, %v918_v33  ;;  %v3563_v42 = vadd.f32 %v505_v29, %v3414_v32 }
  0xaa   : > { %v3517_v11 = vpop.eup %2913  ;;  %v1107_v12 = vmul.f32 1.0614054, %v3512_v9  ;;  %v1749_v4 = vmul.f32 %v1685_v53, %v3521_v13  ;;  %v1750_v7 = vmul.f32 %v1686_v57, %v3533_v19 }
  0xab   : > { %v1108_v16 = vmul.f32 1.0614054, %v3517_v11  ;;  %2784 = vmatmul.msk.f32.gmra.mxu0 %vm272_vm0, %v244_v6  ;;  %2816 = vmatmul.msk.f32.gmra.mxu1 %vm272_vm0, %v244_v6  ;;  %v3555_v34 = vmul.f32 0.70710677, %v3537_v21  ;;  %2915 = vrcp.f32 %v981_v30  ;;  %v3571_v55 = vmul.f32 0.70710677, %v3563_v42 }
  0xac   : > { %v1171_v18 = vadd.f32 -1.4531521, %v1107_v12  ;;  %2917 = vrcp.f32 %v982_v38  ;;  %v5243_v6 = vmov 1.0   ;;  %v1817_v23 = vmul.f32 1.442695, %v1750_v7 }
  0xad   : > { %v1172_v25 = vadd.f32 -1.4531521, %v1108_v16  ;;  %v855_v39 = vand.u32 2147483647, %v3555_v34  ;;  %v856_v40 = vand.u32 2147483647, %v3571_v55  ;;  %2919 = vpow2.f32 %v1811_v63 }
  0xae   : > { %v1235_v27 = vmul.f32 %v3512_v9, %v1171_v18  ;;  %v3597_v49 = vsel %vm723_vm1, -1.0, %v5243_v6  ;;  %v3605_v13 = vsel %vm724_vm2, -1.0, %v5243_v6  ;;  %v247_v16 = vld [vmem:[%s3341_s9 + $0xa8] sm:$0xff]  ;;  %v1815_v18 = vmul.f32 1.442695, %v1749_v4 }
  0xaf   : > { %v1236_v35 = vmul.f32 %v3517_v11, %v1172_v25  ;;  %v919_v54 = vmul.f32 0.3275911, %v855_v39  ;;  %v1687_v15 = vsub.f32 0.0, %v855_v39  ;;  %v1688_v19 = vsub.f32 0.0, %v856_v40 }
  0xb0   : > { %v1299_v36 = vadd.f32 1.4214138, %v1235_v27  ;;  %v395_v52 = vpop.f32.mrf.mxu0  ;;  %v508_v58 = vpop.f32.mrf.mxu1  ;;  %v920_v29 = vmul.f32 0.3275911, %v856_v40  ;;  %v3621_v30 = vmul.f32 0.5, %v3477_v60  ;;  %v3636_v60 = vsel %vm726_vm4, -1.0, %v5243_v6 }
  0xb1   : > { %v1300_v43 = vadd.f32 1.4214138, %v1236_v35  ;;  %v3577_v59 = vpop.eup %2915  ;;  %v3589_v2 = vadd.f32 %v395_v52, %v3412_v31  ;;  %v983_v5 = vadd.f32 1.0, %v919_v54  ;;  %v3594_v44 = vadd.f32 %v508_v58, %v3414_v32  ;;  %v248_v54 = vld [vmem:[%s3341_s9 + $0xb0] sm:$0xff] }
  0xb2   : > { %v1363_v46 = vmul.f32 %v3512_v9, %v1299_v36  ;;  %v1109_v45 = vmul.f32 1.0614054, %v3577_v59  ;;  %v3601_v8 = vpop.eup %2917  ;;  %v3627_v36 = vsel %vm725_vm3, -1.0, %v5243_v6  ;;  %v1752_v38 = vmul.f32 %v1688_v19, %v856_v40 }
  0xb3   : > { %2785 = vmatmul.msk.f32.gmra.mxu0 %vm272_vm0, %v245_v28  ;;  %2817 = vmatmul.msk.f32.gmra.mxu1 %vm272_vm0, %v245_v28  ;;  %v1364_v56 = vmul.f32 %v3517_v11, %v1300_v43  ;;  %v3611_v17 = vmul.f32 0.70710677, %v3589_v2  ;;  %2921 = vrcp.f32 %v983_v5  ;;  %v3614_v20 = vmul.f32 0.70710677, %v3594_v44  ;;  %v2920_v43 = vpop.eup %2919 }
  0xb4   : > { %v1427_v61 = vadd.f32 -0.28449672, %v1363_v46  ;;  %v1173_v25 = vadd.f32 -1.4531521, %v1109_v45  ;;  %v1110_v26 = vmul.f32 1.0614054, %v3601_v8  ;;  %v1751_v28 = vmul.f32 %v1687_v15, %v855_v39 }
  0xb5   : > { %v1428_v41 = vadd.f32 -0.28449672, %v1364_v56  ;;  %2923 = vpow2.f32 %v1813_v14  ;;  %v857_v33 = vand.u32 2147483647, %v3611_v17  ;;  %v858_v39 = vand.u32 2147483647, %v3614_v20 }
  0xb6   : > { %v1491_v12 = vmul.f32 %v3512_v9, %v1427_v61  ;;  %2925 = vpow2.f32 %v1815_v18  ;;  %v1237_v3 = vmul.f32 %v3577_v59, %v1173_v25  ;;  %v1174_v47 = vadd.f32 -1.4531521, %v1110_v26 }
  0xb7   : > { %v1492_v22 = vmul.f32 %v3517_v11, %v1428_v41  ;;  %2927 = vpow2.f32 %v1817_v23  ;;  %v1819_v51 = vmul.f32 1.442695, %v1751_v28  ;;  %v984_v52 = vadd.f32 1.0, %v920_v29 }
  0xb8   : > { %v398_v24 = vpop.f32.mrf.mxu0  ;;  %v1555_v27 = vadd.f32 0.2548296, %v1491_v12  ;;  %v511_v35 = vpop.f32.mrf.mxu1  ;;  %v921_v56 = vmul.f32 0.3275911, %v857_v33  ;;  %v1689_v10 = vsub.f32 0.0, %v857_v33  ;;  %v1238_v58 = vmul.f32 %v3601_v8, %v1174_v47 }
  0xb9   : > { %v1556_v46 = vadd.f32 0.2548296, %v1492_v22  ;;  %v3643_v53 = vadd.f32 %v398_v24, %v3412_v31  ;;  %v1301_v57 = vadd.f32 1.4214138, %v1237_v3  ;;  %v1821_v61 = vmul.f32 1.442695, %v1752_v38 }
  0xba   : > { %v1619_v1 = vmul.f32 %v3512_v9, %v1555_v27  ;;  %v922_v62 = vmul.f32 0.3275911, %v858_v39  ;;  %v1690_v63 = vsub.f32 0.0, %v858_v39  ;;  %v3648_v4 = vadd.f32 %v511_v35, %v3414_v32 }
  0xbb   : > { %2786 = vmatmul.msk.f32.gmra.mxu0 %vm272_vm0, %v246_v50  ;;  %2818 = vmatmul.msk.f32.gmra.mxu1 %vm272_vm0, %v246_v50  ;;  %v3639_v50 = vpop.eup %2921  ;;  %v1620_v9 = vmul.f32 %v3517_v11, %v1556_v46  ;;  %v1365_v40 = vmul.f32 %v3577_v59, %v1301_v57  ;;  %v1302_v41 = vadd.f32 1.4214138, %v1238_v58  ;;  %vm727_vm5 = vcmp.lt.f32.partialorder %v3555_v34, 0.0 }
  0xbc   : > { %v2924_v5 = vpop.eup %2923  ;;  %v1111_v7 = vmul.f32 1.0614054, %v3639_v50  ;;  %v1939_v12 = vmul.f32 %v2920_v43, %v1619_v1  ;;  %2929 = vrcp.f32 %v984_v52  ;;  %v3657_v14 = vmul.f32 0.70710677, %v3643_v53 }
  0xbd   : > { %v2926_v45 = vpop.eup %2925  ;;  %2931 = vpow2.f32 %v1819_v51  ;;  %v985_v11 = vadd.f32 1.0, %v921_v56  ;;  %v3660_v19 = vmul.f32 0.5, %v3537_v21  ;;  %v1754_v22 = vmul.f32 %v1690_v63, %v858_v39  ;;  %v249_v21 = vld [vmem:[%s3341_s9 + $0xb8] sm:$0xff] }
  0xbe   : > { %v2928_v15 = vpop.eup %2927  ;;  %2933 = vpow2.f32 %v1821_v61  ;;  %v1429_v23 = vadd.f32 -0.28449672, %v1365_v40  ;;  %v1366_v24 = vmul.f32 %v3601_v8, %v1302_v41  ;;  %v1940_v25 = vmul.f32 %v2924_v5, %v1620_v9 }
  0xbf   : > { %v986_v26 = vadd.f32 1.0, %v922_v62  ;;  %v3664_v27 = vmul.f32 0.70710677, %v3648_v4  ;;  %v1175_v29 = vadd.f32 -1.4531521, %v1111_v7  ;;  %v2003_v35 = vsub.f32 1.0, %v1939_v12 }
  0xc0   : > { %v401_v18 = vpop.f32.mrf.mxu0  ;;  %v514_v28 = vpop.f32.mrf.mxu1  ;;  %v1493_v38 = vmul.f32 %v3577_v59, %v1429_v23  ;;  %v1430_v43 = vadd.f32 -0.28449672, %v1366_v24  ;;  %2935 = vrcp.f32 %v985_v11  ;;  %v3675_v3 = vsel %vm727_vm5, -1.0, %v5243_v6 }
  0xc1   : > { %v3670_v39 = vadd.f32 %v401_v18, %v3412_v31  ;;  %v1825_v1 = vmul.f32 1.442695, %v1754_v22  ;;  %v3680_v51 = vadd.f32 %v514_v28, %v3414_v32  ;;  %2937 = vrcp.f32 %v986_v26  ;;  %v250_v28 = vld [vmem:[%s3341_s9 + $0xc0] sm:$0xff] }
  0xc2   : > { %v3677_v47 = vpop.eup %2929  ;;  %v1557_v52 = vadd.f32 0.2548296, %v1493_v38  ;;  %v860_v57 = vand.u32 2147483647, %v3664_v27  ;;  %v1239_v34 = vmul.f32 %v3639_v50, %v1175_v29  ;;  %v2067_v61 = vmul.f32 %v2003_v35, %v3597_v49 }
  0xc3   : > { %2787 = vmatmul.msk.f32.gmra.mxu0 %vm272_vm0, %v247_v16  ;;  %2819 = vmatmul.msk.f32.gmra.mxu1 %vm272_vm0, %v247_v16  ;;  %v1753_v16 = vmul.f32 %v1689_v10, %v857_v33  ;;  %v859_v33 = vand.u32 2147483647, %v3657_v14  ;;  %v3683_v56 = vpop.eup %2931  ;;  %v2004_v10 = vsub.f32 1.0, %v1940_v25  ;;  %v3694_v40 = vmul.f32 0.70710677, %v3670_v39 }
  0xc4   : > { %v3689_v58 = vpop.eup %2933  ;;  %v1621_v63 = vmul.f32 %v3577_v59, %v1557_v52  ;;  %v3697_v41 = vmul.f32 0.5, %v3563_v42  ;;  %v3700_v7 = vmul.f32 0.70710677, %v3680_v51  ;;  %v1692_v18 = vsub.f32 0.0, %v860_v57 }
  0xc5   : > { %v1823_v46 = vmul.f32 1.442695, %v1753_v16  ;;  %v923_v62 = vmul.f32 0.3275911, %v859_v33  ;;  %v1691_v9 = vsub.f32 0.0, %v859_v33  ;;  %v2068_v59 = vmul.f32 %v2004_v10, %v3605_v13 }
  0xc6   : > { %v1941_v12 = vmul.f32 %v2926_v45, %v1621_v63  ;;  %v3703_v11 = vpop.eup %2935  ;;  %v924_v16 = vmul.f32 0.3275911, %v860_v57  ;;  %v1303_v23 = vadd.f32 1.4214138, %v1239_v34  ;;  %v2131_v24 = vadd.f32 1.0, %v2067_v61 }
  0xc7   : > { %2939 = vpow2.f32 %v1823_v46  ;;  %v987_v25 = vadd.f32 1.0, %v923_v62  ;;  %v3707_v29 = vpop.eup %2937  ;;  %v1755_v35 = vmul.f32 %v1691_v9, %v859_v33  ;;  %v861_v45 = vand.u32 2147483647, %v3694_v40 }
  0xc8   : > { %2941 = vpow2.f32 %v1825_v1  ;;  %v404_v22 = vpop.f32.mrf.mxu0  ;;  %v2005_v26 = vsub.f32 1.0, %v1941_v12  ;;  %v517_v38 = vpop.f32.mrf.mxu1  ;;  %v862_v13 = vand.u32 2147483647, %v3700_v7  ;;  %v3719_v52 = vadd.f32 1.0, %v2068_v59 }
  0xc9   : > { %v1756_v33 = vmul.f32 %v1692_v18, %v860_v57  ;;  %v988_v61 = vadd.f32 1.0, %v924_v16  ;;  %v3726_v62 = vadd.f32 %v517_v38, %v3414_v32  ;;  %v1693_v9 = vsub.f32 0.0, %v861_v45 }
  0xca   : > { %v2069_v46 = vmul.f32 %v2005_v26, %v3627_v36  ;;  %2943 = vrcp.f32 %v987_v25  ;;  %vm728_vm6 = vcmp.lt.f32.partialorder %v3571_v55, 0.0  ;;  %vm729_vm7 = vcmp.lt.f32.partialorder %v3611_v17, 0.0 }
  0xcb   : > { %2788 = vmatmul.msk.f32.gmra.mxu0 %vm272_vm0, %v248_v54  ;;  %2820 = vmatmul.msk.f32.gmra.mxu1 %vm272_vm0, %v248_v54  ;;  %v1494_v54 = vmul.f32 %v3601_v8, %v1430_v43  ;;  %v1112_v43 = vmul.f32 1.0614054, %v3677_v47  ;;  %v1829_v16 = vmul.f32 1.442695, %v1756_v33  ;;  %2945 = vrcp.f32 %v988_v61 }
  0xcc   : > { %v2133_v63 = vadd.f32 1.0, %v2069_v46  ;;  %v1757_v38 = vmul.f32 %v1693_v9, %v861_v45  ;;  %v3745_v33 = vmul.f32 %v2131_v24, %v3580_v48  ;;  %vm730_vm8 = vcmp.lt.f32.partialorder %v3614_v20, 0.0 }
  0xcd   : > { %v1558_v5 = vadd.f32 0.2548296, %v1494_v54  ;;  %v1176_v10 = vadd.f32 -1.4531521, %v1112_v43  ;;  %vm731_vm9 = vcmp.lt.f32.partialorder %v3657_v14, 0.0  ;;  %vm732_vm10 = vcmp.lt.f32.partialorder %v3664_v27, 0.0 }
  0xce   : > { %v2197_v18 = vmul.f32 %v2133_v63, %v3621_v30  ;;  %v603_v14 = vmul.f32 0.5, %v3643_v53  ;;  %vm733_vm11 = vcmp.lt.f32.partialorder %v3694_v40, 0.0  ;;  %vm734_vm12 = vcmp.lt.f32.partialorder %v3700_v7, 0.0 }
  0xcf   : > { %v1622_v49 = vmul.f32 %v3601_v8, %v1558_v5  ;;  %v1367_v8 = vmul.f32 %v3639_v50, %v1303_v23  ;;  %v1827_v5 = vmul.f32 1.442695, %v1755_v35  ;;  %v1240_v57 = vmul.f32 %v3677_v47, %v1176_v10 }
  0xd0   : > { %2442 = vmatmul.f32.vlgmr.msra.gmra.mxu2 %v2197_v18  ;;  %v520_v63 = vpop.f32.mrf.mxu1  ;;  %v604_v27 = vmul.f32 0.5, %v3648_v4  ;;  %v606_v7 = vmul.f32 0.5, %v3680_v51 }
  0xd1   : > { %v1942_v42 = vmul.f32 %v2928_v15, %v1622_v49  ;;  %v3717_v15 = vpop.eup %2939  ;;  %v1431_v54 = vadd.f32 -0.28449672, %v1367_v8  ;;  %v1694_v49 = vsub.f32 0.0, %v862_v13  ;;  %v1304_v26 = vadd.f32 1.4214138, %v1240_v57  ;;  %v407_v8 = vpop.f32.mrf.mxu0 }
  0xd2   : > { %v3723_v34 = vpop.eup %2941  ;;  %2947 = vpow2.f32 %v1827_v5  ;;  %v1831_v5 = vmul.f32 1.442695, %v1757_v38  ;;  %v3755_v48 = vadd.f32 %v407_v8, %v3412_v31 }
  0xd3   : > { %2789 = vmatmul.msk.f32.gmra.mxu0 %vm272_vm0, %v249_v21  ;;  %2821 = vmatmul.msk.f32.gmra.mxu1 %vm272_vm0, %v249_v21  ;;  %v3714_v21 = vadd.f32 %v404_v22, %v3412_v31  ;;  %v2006_v1 = vsub.f32 1.0, %v1942_v42  ;;  %v1495_v12 = vmul.f32 %v3639_v50, %v1431_v54  ;;  %v925_v42 = vmul.f32 0.3275911, %v861_v45  ;;  %v251_v54 = vld [vmem:[%s3341_s9 + $0xc8] sm:$0xff] }
  0xd4   : > { %v1368_v30 = vmul.f32 %v3677_v47, %v1304_v26  ;;  %v1758_v25 = vmul.f32 %v1694_v49, %v862_v13  ;;  %2949 = vpow2.f32 %v1829_v16  ;;  %v1114_v49 = vmul.f32 1.0614054, %v3707_v29 }
  0xd5   : > { %v2070_v36 = vmul.f32 %v2006_v1, %v3636_v60  ;;  %v3732_v59 = vmul.f32 0.70710677, %v3714_v21  ;;  %v1559_v23 = vadd.f32 0.2548296, %v1495_v12  ;;  %v3736_v60 = vmul.f32 0.70710677, %v3726_v62 }
  0xd6   : > { %v1113_v1 = vmul.f32 1.0614054, %v3703_v11  ;;  %v1432_v45 = vadd.f32 -0.28449672, %v1368_v30  ;;  %v1833_v9 = vmul.f32 1.442695, %v1758_v25  ;;  %v3763_v16 = vadd.f32 %v520_v63, %v3414_v32 }
  0xd7   : > { %v2134_v22 = vadd.f32 1.0, %v2070_v36  ;;  %v1623_v43 = vmul.f32 %v3639_v50, %v1559_v23  ;;  %v863_v46 = vand.u32 2147483647, %v3732_v59  ;;  %v989_v50 = vadd.f32 1.0, %v925_v42 }
  0xd8   : > { %v864_v61 = vand.u32 2147483647, %v3736_v60  ;;  %v1177_v36 = vadd.f32 -1.4531521, %v1113_v1  ;;  %v1178_v38 = vadd.f32 -1.4531521, %v1114_v49 }
  0xd9   : > { %v2198_v35 = vmul.f32 %v2134_v22, %v3630_v37  ;;  %v1943_v37 = vmul.f32 %v3683_v56, %v1623_v43  ;;  %v1496_v56 = vmul.f32 %v3677_v47, %v1432_v45  ;;  %v927_v12 = vmul.f32 0.3275911, %v863_v46  ;;  %v410_v63 = vpop.f32.mrf.mxu0 }
  0xda   : > { %v1241_v57 = vmul.f32 %v3703_v11, %v1177_v36  ;;  %v1695_v22 = vsub.f32 0.0, %v863_v46  ;;  %2951 = vrcp.f32 %v989_v50  ;;  %v3771_v43 = vmul.f32 0.70710677, %v3755_v48 }
  0xdb   : > { %2790 = vmatmul.msk.f32.gmra.mxu0 %vm272_vm0, %v250_v28  ;;  %2822 = vmatmul.msk.f32.gmra.mxu1 %vm272_vm0, %v250_v28  ;;  %v926_v28 = vmul.f32 0.3275911, %v862_v13  ;;  %v3752_v13 = vpop.eup %2943  ;;  %v2007_v24 = vsub.f32 1.0, %v1943_v37  ;;  %v1560_v26 = vadd.f32 0.2548296, %v1496_v56  ;;  %v1242_v37 = vmul.f32 %v3707_v29, %v1178_v38 }
  0xdc   : > { %2555 = vmatmul.f32.vlgmr.msra.gmra.mxu3 %v2198_v35  ;;  %v3760_v18 = vpop.eup %2945  ;;  %v1305_v35 = vadd.f32 1.4214138, %v1241_v57  ;;  %v928_v1 = vmul.f32 0.3275911, %v864_v61  ;;  %v1759_v45 = vmul.f32 %v1695_v22, %v863_v46  ;;  %v991_v36 = vadd.f32 1.0, %v927_v12 }
  0xdd   : > { %v990_v10 = vadd.f32 1.0, %v926_v28  ;;  %v2071_v23 = vmul.f32 %v2007_v24, %v3675_v3  ;;  %v3766_v42 = vpop.eup %2947  ;;  %v1696_v28 = vsub.f32 0.0, %v864_v61  ;;  %v1624_v25 = vmul.f32 %v3677_v47, %v1560_v26 }
  0xde   : > { %v3768_v8 = vpop.eup %2949  ;;  %v1369_v3 = vmul.f32 %v3703_v11, %v1305_v35  ;;  %v865_v56 = vand.u32 2147483647, %v3771_v43  ;;  %v792_v46 = vsel %vm728_vm6, -1.0, %v5243_v6  ;;  %v992_v26 = vadd.f32 1.0, %v928_v1 }
  0xdf   : > { %2953 = vrcp.f32 %v990_v10  ;;  %v2135_v30 = vadd.f32 1.0, %v2071_v23  ;;  %v1944_v10 = vmul.f32 %v3689_v58, %v1624_v25  ;;  %v1760_v24 = vmul.f32 %v1696_v28, %v864_v61  ;;  %v523_v58 = vpop.f32.mrf.mxu1 }
  0xe0   : > { %2955 = vpow2.f32 %v1831_v5  ;;  %v1433_v47 = vadd.f32 -0.28449672, %v1369_v3  ;;  %v1306_v5 = vadd.f32 1.4214138, %v1242_v37  ;;  %v3786_v49 = vpop.eup %2951  ;;  %v1835_v23 = vmul.f32 1.442695, %v1759_v45 }
  0xe1   : > { %v2199_v50 = vmul.f32 %v2135_v30, %v3660_v19  ;;  %2957 = vpow2.f32 %v1833_v9  ;;  %v2008_v57 = vsub.f32 1.0, %v1944_v10  ;;  %v3789_v19 = vadd.f32 %v410_v63, %v3412_v31 }
  0xe2   : > { %v1497_v12 = vmul.f32 %v3703_v11, %v1433_v47  ;;  %v1370_v61 = vmul.f32 %v3707_v29, %v1306_v5  ;;  %v1115_v9 = vmul.f32 1.0614054, %v3752_v13  ;;  %2959 = vrcp.f32 %v991_v36 }
  0xe3   : > { %2791 = vmatmul.msk.f32.gmra.mxu0 %vm272_vm0, %v251_v54  ;;  %2823 = vmatmul.msk.f32.gmra.mxu1 %vm272_vm0, %v251_v54  ;;  %v3777_v54 = vmul.f32 0.70710677, %v3763_v16  ;;  %v2072_v28 = vmul.f32 %v2008_v57, %v792_v46  ;;  %v1837_v38 = vmul.f32 1.442695, %v1760_v24  ;;  %v929_v3 = vmul.f32 0.3275911, %v865_v56 }
  0xe4   : > { %2445 = vmatmul.f32.gmra.mxu2 %v2199_v50  ;;  %v1561_v30 = vadd.f32 0.2548296, %v1497_v12  ;;  %v1434_v25 = vadd.f32 -0.28449672, %v1370_v61  ;;  %v3801_v50 = vadd.f32 %v523_v58, %v3414_v32  ;;  %v1179_v10 = vadd.f32 -1.4531521, %v1115_v9 }
  0xe5   : > { %v3794_v22 = vpop.eup %2953  ;;  %v866_v55 = vand.u32 2147483647, %v3777_v54  ;;  %v2136_v37 = vadd.f32 1.0, %v2072_v28  ;;  %v1697_v45 = vsub.f32 0.0, %v865_v56  ;;  %v3804_v1 = vmul.f32 0.70710677, %v3789_v19 }
  0xe6   : > { %v3797_v35 = vpop.eup %2955  ;;  %5265 = vst [vmem:[#allocation6_spill] sm:$0xff] %v3801_v50  ;;  %v1625_v63 = vmul.f32 %v3703_v11, %v1561_v30  ;;  %v1498_v47 = vmul.f32 %v3707_v29, %v1434_v25  ;;  %2961 = vrcp.f32 %v992_v26  ;;  %v1243_v46 = vmul.f32 %v3752_v13, %v1179_v10  ;;  %v252_v57 = vld [vmem:[%s3341_s9 + $0xd0] sm:$0xff] }
  0xe7   : > { %v3808_v5 = vpop.eup %2957  ;;  %v930_v36 = vmul.f32 0.3275911, %v866_v55  ;;  %v2200_v24 = vmul.f32 %v2136_v37, %v3697_v41  ;;  %2963 = vpow2.f32 %v1835_v23  ;;  %v1698_v58 = vsub.f32 0.0, %v866_v55 }
  0xe8   : > { %v1945_v12 = vmul.f32 %v3717_v15, %v1625_v63  ;;  %v1562_v61 = vadd.f32 0.2548296, %v1498_v47  ;;  %2965 = vpow2.f32 %v1837_v38  ;;  %v993_v11 = vadd.f32 1.0, %v929_v3  ;;  %v3819_v41 = vpop.eup %2959  ;;  %v413_v38 = vpop.f32.mrf.mxu0 }
  0xe9   : > { %2558 = vmatmul.f32.gmra.mxu3 %v2200_v24  ;;  %v3817_v9 = vmul.f32 0.70710677, %v3801_v50  ;;  %v1307_v26 = vadd.f32 1.4214138, %v1243_v46  ;;  %v1761_v28 = vmul.f32 %v1697_v45, %v865_v56  ;;  %v867_v23 = vand.u32 2147483647, %v3804_v1 }
  0xea   : > { %v2009_v30 = vsub.f32 1.0, %v1945_v12  ;;  %v1626_v15 = vmul.f32 %v3707_v29, %v1562_v61  ;;  %v994_v25 = vadd.f32 1.0, %v930_v36  ;;  %v793_v37 = vsel %vm729_vm7, -1.0, %v5243_v6 }
  0xeb   : > { %2792 = vmatmul.msk.f32.gmra.mxu0 %vm272_vm0, %v252_v57  ;;  %2824 = vmatmul.msk.f32.gmra.mxu1 %vm272_vm0, %v252_v57  ;;  %v1371_v3 = vmul.f32 %v3752_v13, %v1307_v26  ;;  %v1116_v10 = vmul.f32 1.0614054, %v3760_v18  ;;  %v1762_v63 = vmul.f32 %v1698_v58, %v866_v55  ;;  %v601_v47 = vmul.f32 0.5, %v3589_v2 }
  0xec   : > { %v2073_v24 = vmul.f32 %v2009_v30, %v793_v37  ;;  %v1946_v56 = vmul.f32 %v3723_v34, %v1626_v15  ;;  %v3830_v45 = vpop.eup %2961  ;;  %2967 = vrcp.f32 %v993_v11  ;;  %v868_v29 = vand.u32 2147483647, %v3817_v9 }
  0xed   : > { %v1435_v17 = vadd.f32 -0.28449672, %v1371_v3  ;;  %v1180_v36 = vadd.f32 -1.4531521, %v1116_v10  ;;  %v3834_v46 = vpop.eup %2963  ;;  %v1699_v57 = vsub.f32 0.0, %v867_v23  ;;  %v3837_v55 = vadd.f32 %v413_v38, %v3412_v31  ;;  %v526_v10 = vpop.f32.mrf.mxu1 }
  0xee   : > { %v2137_v12 = vadd.f32 1.0, %v2073_v24  ;;  %v2010_v61 = vsub.f32 1.0, %v1946_v56  ;;  %v3839_v2 = vpop.eup %2965  ;;  %v794_v34 = vsel %vm730_vm8, -1.0, %v5243_v6  ;;  %v1117_v26 = vmul.f32 1.0614054, %v3786_v49 }
  0xef   : > { %v1499_v58 = vmul.f32 %v3752_v13, %v1435_v17  ;;  %v1244_v11 = vmul.f32 %v3760_v18, %v1180_v36  ;;  %v1839_v30 = vmul.f32 1.442695, %v1761_v28  ;;  %v602_v37 = vmul.f32 0.5, %v3594_v44 }
  0xf0   : > { %v2201_v15 = vmul.f32 %v2137_v12, %v601_v47  ;;  %v2074_v3 = vmul.f32 %v2010_v61, %v794_v34  ;;  %2969 = vrcp.f32 %v994_v25  ;;  %v931_v38 = vmul.f32 0.3275911, %v867_v23  ;;  %v253_v25 = vld [vmem:[%s3341_s9 + $0xd8] sm:$0xff] }
  0xf1   : > { %v1563_v24 = vadd.f32 0.2548296, %v1499_v58  ;;  %v1308_v56 = vadd.f32 1.4214138, %v1244_v11  ;;  %v932_v50 = vmul.f32 0.3275911, %v868_v29  ;;  %v1763_v28 = vmul.f32 %v1699_v57, %v867_v23 }
  0xf2   : > { %v1700_v20 = vsub.f32 0.0, %v868_v29  ;;  %2448 = vmatmul.f32.gmra.mxu2 %v2201_v15  ;;  %v2138_v6 = vadd.f32 1.0, %v2074_v3  ;;  %v3849_v17 = vmul.f32 0.70710677, %v3837_v55  ;;  %v3851_v36 = vpop.eup %2967  ;;  %v1181_v12 = vadd.f32 -1.4531521, %v1117_v26 }
  0xf3   : > { %v1627_v47 = vmul.f32 %v3752_v13, %v1563_v24  ;;  %v1372_v44 = vmul.f32 %v3760_v18, %v1308_v56  ;;  %2971 = vpow2.f32 %v1839_v30  ;;  %v1841_v61 = vmul.f32 1.442695, %v1762_v63  ;;  %2793 = vmatmul.msk.f32.gmra.mxu0 %vm272_vm0, %v253_v25  ;;  %2825 = vmatmul.msk.f32.gmra.mxu1 %vm272_vm0, %v253_v25 }
  0xf4   : > { %v2202_v34 = vmul.f32 %v2138_v6, %v602_v37  ;;  %v3857_v58 = vadd.f32 %v526_v10, %v3414_v32  ;;  %v995_v11 = vadd.f32 1.0, %v931_v38  ;;  %v1245_v57 = vmul.f32 %v3786_v49, %v1181_v12  ;;  %v416_v12 = vpop.f32.mrf.mxu0 }
  0xf5   : > { %v1947_v23 = vmul.f32 %v3766_v42, %v1627_v47  ;;  %v1436_v13 = vadd.f32 -0.28449672, %v1372_v44  ;;  %v996_v26 = vadd.f32 1.0, %v932_v50  ;;  %v1764_v15 = vmul.f32 %v1700_v20, %v868_v29 }
  0xf6   : > { %2561 = vmatmul.f32.gmra.mxu3 %v2202_v34  ;;  %v869_v6 = vand.u32 2147483647, %v3849_v17  ;;  %v1118_v63 = vmul.f32 1.0614054, %v3794_v22  ;;  %v3866_v30 = vpop.eup %2969  ;;  %v1843_v37 = vmul.f32 1.442695, %v1763_v28  ;;  %2973 = vpow2.f32 %v1841_v61 }
  0xf7   : > { %v2011_v3 = vsub.f32 1.0, %v1947_v23  ;;  %v1500_v10 = vmul.f32 %v3760_v18, %v1436_v13  ;;  %v1309_v24 = vadd.f32 1.4214138, %v1245_v57  ;;  %v3870_v42 = vmul.f32 0.70710677, %v3857_v58 }
  0xf8   : > { %v5266_v38 = vmov 1.0   ;;  %v1182_v29 = vadd.f32 -1.4531521, %v1118_v63  ;;  %v3877_v56 = vmul.f32 %v3719_v52, %v3585_v0  ;;  %2975 = vrcp.f32 %v995_v11 }
  0xf9   : > { %v795_v50 = vsel %vm731_vm9, -1.0, %v5266_v38  ;;  %v1564_v28 = vadd.f32 0.2548296, %v1500_v10  ;;  %v3879_v47 = vpop.eup %2971  ;;  %2977 = vrcp.f32 %v996_v26  ;;  %v1701_v44 = vsub.f32 0.0, %v869_v6  ;;  %v529_v10 = vpop.f32.mrf.mxu1 }
  0xfa   : > { %v2075_v20 = vmul.f32 %v2011_v3, %v795_v50  ;;  %v1373_v25 = vmul.f32 %v3786_v49, %v1309_v24  ;;  %v1246_v61 = vmul.f32 %v3794_v22, %v1182_v29  ;;  %v1845_v34 = vmul.f32 1.442695, %v1764_v15 }
  0xfb   : > { %v1628_v13 = vmul.f32 %v3760_v18, %v1564_v28  ;;  %2979 = vpow2.f32 %v1843_v37  ;;  %v870_v0 = vand.u32 2147483647, %v3870_v42  ;;  %v933_v57 = vmul.f32 0.3275911, %v869_v6 }
  0xfc   : > { %v2139_v23 = vadd.f32 1.0, %v2075_v20  ;;  %v1437_v52 = vadd.f32 -0.28449672, %v1373_v25  ;;  %v1310_v11 = vadd.f32 1.4214138, %v1246_v61  ;;  %v3888_v3 = vadd.f32 %v416_v12, %v3412_v31  ;;  %v3890_v24 = vpop.eup %2973 }
  0xfd   : > { %v1948_v26 = vmul.f32 %v3768_v8, %v1628_v13  ;;  %v1765_v15 = vmul.f32 %v1701_v44, %v869_v6  ;;  %v1119_v37 = vmul.f32 1.0614054, %v3819_v41  ;;  %2981 = vpow2.f32 %v1845_v34 }
  0xfe   : > { %v2203_v63 = vmul.f32 %v2139_v23, %v603_v14  ;;  %v1501_v53 = vmul.f32 %v3786_v49, %v1437_v52  ;;  %v1374_v18 = vmul.f32 %v3794_v22, %v1310_v11  ;;  %v3895_v50 = vpop.eup %2975  ;;  %v3899_v8 = vmul.f32 0.5, %v3837_v55 }
  0xff   : > { %v2012_v29 = vsub.f32 1.0, %v1948_v26  ;;  %v3901_v20 = vpop.eup %2977  ;;  %v1702_v6 = vsub.f32 0.0, %v870_v0  ;;  %v796_v28 = vsel %vm732_vm10, -1.0, %v5266_v38  ;;  %v997_v25 = vadd.f32 1.0, %v933_v57 }
 0x100   : > { %2451 = vmatmul.f32.gmra.mxu2 %v2203_v63  ;;  %v1565_v44 = vadd.f32 0.2548296, %v1501_v53  ;;  %v1438_v12 = vadd.f32 -0.28449672, %v1374_v18  ;;  %v3908_v34 = vmul.f32 0.70710677, %v3888_v3  ;;  %v3916_v26 = vadd.f32 %v529_v10, %v3414_v32 }
 0x101   : > { %v2076_v61 = vmul.f32 %v2012_v29, %v796_v28  ;;  %v1183_v55 = vadd.f32 -1.4531521, %v1119_v37  ;;  %v3910_v14 = vpop.eup %2979  ;;  %v1847_v23 = vmul.f32 1.442695, %v1765_v15  ;;  %v934_v13 = vmul.f32 0.3275911, %v870_v0  ;;  %v419_v28 = vpop.f32.mrf.mxu0 }
 0x102   : > { %v1629_v52 = vmul.f32 %v3786_v49, %v1565_v44  ;;  %v1502_v11 = vmul.f32 %v3794_v22, %v1438_v12  ;;  %v254_v53 = vld [vmem:[%s3341_s9 + $0xe0] sm:$0xff]  ;;  %v3921_v18 = vmul.f32 0.5, %v3857_v58  ;;  %v1766_v37 = vmul.f32 %v1702_v6, %v870_v0 }
 0x103   : > { %v2140_v63 = vadd.f32 1.0, %v2076_v61  ;;  %v1247_v57 = vmul.f32 %v3819_v41, %v1183_v55  ;;  %2794 = vmatmul.msk.f32.gmra.mxu0 %vm272_vm0, %v254_v53  ;;  %2826 = vmatmul.msk.f32.gmra.mxu1 %vm272_vm0, %v254_v53  ;;  %v3926_v49 = vpop.eup %2981  ;;  %2983 = vrcp.f32 %v997_v25  ;;  %v871_v10 = vand.u32 2147483647, %v3908_v34  ;;  %v532_v61 = vpop.f32.mrf.mxu1 }
 0x104   : > { %v1949_v15 = vmul.f32 %v3797_v35, %v1629_v52  ;;  %v1566_v29 = vadd.f32 0.2548296, %v1502_v11  ;;  %2985 = vpow2.f32 %v1847_v23  ;;  %v998_v12 = vadd.f32 1.0, %v934_v13 }
 0x105   : > { %v2204_v4 = vmul.f32 %v2140_v63, %v604_v27  ;;  %v1311_v44 = vadd.f32 1.4214138, %v1247_v57  ;;  %v3931_v35 = vmul.f32 0.70710677, %v3916_v26  ;;  %v797_v6 = vsel %vm733_vm11, -1.0, %v5266_v38 }
 0x106   : > { %v2013_v58 = vsub.f32 1.0, %v1949_v15  ;;  %v1630_v0 = vmul.f32 %v3794_v22, %v1566_v29  ;;  %v1120_v55 = vmul.f32 1.0614054, %v3830_v45  ;;  %v1849_v52 = vmul.f32 1.442695, %v1766_v37 }
 0x107   : > { %2564 = vmatmul.f32.gmra.mxu3 %v2204_v4  ;;  %v1375_v25 = vmul.f32 %v3819_v41, %v1311_v44  ;;  %v3940_v13 = vadd.f32 %v419_v28, %v3412_v31  ;;  %vm735_vm13 = vcmp.lt.f32.partialorder %v3732_v59, 0.0  ;;  %v1703_v22 = vsub.f32 0.0, %v871_v10 }
 0x108   : > { %v2077_v11 = vmul.f32 %v2013_v58, %v797_v6  ;;  %v1950_v23 = vmul.f32 %v3808_v5, %v1630_v0  ;;  %v605_v27 = vmul.f32 0.5, %v3670_v39  ;;  %v1184_v40 = vadd.f32 -1.4531521, %v1120_v55 }
 0x109   : > { %v1439_v63 = vadd.f32 -0.28449672, %v1375_v25  ;;  %v935_v57 = vmul.f32 0.3275911, %v871_v10  ;;  %v3945_v29 = vadd.f32 %v532_v61, %v3414_v32  ;;  %v3947_v37 = vpop.eup %2983  ;;  %v872_v5 = vand.u32 2147483647, %v3931_v35 }
 0x10a   : > { %v2141_v53 = vadd.f32 1.0, %v2077_v11  ;;  %v2014_v15 = vsub.f32 1.0, %v1950_v23  ;;  %v798_v4 = vsel %vm734_vm12, -1.0, %v5266_v38  ;;  %v1248_v39 = vmul.f32 %v3830_v45, %v1184_v40  ;;  %v3955_v44 = vpop.eup %2985 }
 0x10b   : > { %v1503_v28 = vmul.f32 %v3819_v41, %v1439_v63  ;;  %2987 = vrcp.f32 %v998_v12  ;;  %v3958_v6 = vmul.f32 0.70710677, %v3940_v13  ;;  %v1767_v61 = vmul.f32 %v1703_v22, %v871_v10 }
 0x10c   : > { %v2205_v58 = vmul.f32 %v2141_v53, %v605_v27  ;;  %v2078_v0 = vmul.f32 %v2014_v15, %v798_v4  ;;  %2989 = vpow2.f32 %v1849_v52  ;;  %v1312_v55 = vadd.f32 1.4214138, %v1248_v39  ;;  %v255_v15 = vld [vmem:[%s3341_s9 + $0xe8] sm:$0xff] }
 0x10d   : > { %v1567_v25 = vadd.f32 0.2548296, %v1503_v28  ;;  %v999_v11 = vadd.f32 1.0, %v935_v57  ;;  %v3962_v63 = vmul.f32 0.70710677, %v3945_v29  ;;  %v1704_v40 = vsub.f32 0.0, %v872_v5  ;;  %2795 = vmatmul.msk.f32.gmra.mxu0 %vm272_vm0, %v255_v15  ;;  %2827 = vmatmul.msk.f32.gmra.mxu1 %vm272_vm0, %v255_v15 }
 0x10e   : > { %2454 = vmatmul.f32.gmra.mxu2 %v2205_v58  ;;  %v2142_v23 = vadd.f32 1.0, %v2078_v0  ;;  %v1376_v27 = vmul.f32 %v3830_v45, %v1312_v55  ;;  %v1121_v53 = vmul.f32 1.0614054, %v3851_v36  ;;  %v3969_v10 = vmul.f32 0.5, %v3888_v3  ;;  %v422_v0 = vpop.f32.mrf.mxu0 }
 0x10f   : > { %v1631_v12 = vmul.f32 %v3819_v41, %v1567_v25  ;;  %v936_v52 = vmul.f32 0.3275911, %v872_v5  ;;  %v873_v57 = vand.u32 2147483647, %v3958_v6  ;;  %vm736_vm14 = vcmp.lt.f32.partialorder %v3736_v60, 0.0 }
 0x110   : > { %5267 = vst [vmem:[#allocation7_spill] sm:$0xff] %v3969_v10  ;;  %v2206_v22 = vmul.f32 %v2142_v23, %v606_v7  ;;  %v1851_v51 = vmul.f32 1.442695, %v1767_v61  ;;  %v1440_v4 = vadd.f32 -0.28449672, %v1376_v27  ;;  %2991 = vrcp.f32 %v999_v11 }
 0x111   : > { %v1951_v41 = vmul.f32 %v3834_v46, %v1631_v12  ;;  %v1185_v28 = vadd.f32 -1.4531521, %v1121_v53  ;;  %v3976_v39 = vpop.eup %2987  ;;  %v3979_v3 = vmul.f32 0.5, %v3916_v26  ;;  %v874_v58 = vand.u32 2147483647, %v3962_v63 }
 0x112   : > { %2567 = vmatmul.f32.gmra.mxu3 %v2206_v22  ;;  %v1122_v25 = vmul.f32 1.0614054, %v3866_v30  ;;  %v3983_v55 = vpop.eup %2989  ;;  %v1768_v7 = vmul.f32 %v1704_v40, %v872_v5  ;;  %v1504_v46 = vmul.f32 %v3830_v45, %v1440_v4  ;;  %v1000_v12 = vadd.f32 1.0, %v936_v52 }
 0x113   : > { %5268 = vst [vmem:[#allocation8_spill] sm:$0xff] %v3979_v3  ;;  %v2015_v61 = vsub.f32 1.0, %v1951_v41  ;;  %v1249_v23 = vmul.f32 %v3851_v36, %v1185_v28  ;;  %v1705_v27 = vsub.f32 0.0, %v873_v57  ;;  %v799_v26 = vsel %vm735_vm13, -1.0, %v5266_v38 }
 0x114   : > { %v1186_v11 = vadd.f32 -1.4531521, %v1122_v25  ;;  %2993 = vpow2.f32 %v1851_v51  ;;  %v1568_v15 = vadd.f32 0.2548296, %v1504_v46  ;;  %v3991_v22 = vadd.f32 %v422_v0, %v3412_v31  ;;  %v535_v25 = vpop.f32.mrf.mxu1 }
 0x115   : > { %v2079_v53 = vmul.f32 %v2015_v61, %v799_v26  ;;  %v937_v3 = vmul.f32 0.3275911, %v873_v57  ;;  %v1706_v5 = vsub.f32 0.0, %v874_v58  ;;  %v1313_v40 = vadd.f32 1.4214138, %v1249_v23 }
 0x116   : > { %v1250_v41 = vmul.f32 %v3866_v30, %v1186_v11  ;;  %v1853_v4 = vmul.f32 1.442695, %v1768_v7  ;;  %v607_v52 = vmul.f32 0.5, %v3714_v21  ;;  %v1632_v10 = vmul.f32 %v3830_v45, %v1568_v15  ;;  %v3996_v59 = vpop.eup %2991 }
 0x117   : > { %v2143_v28 = vadd.f32 1.0, %v2079_v53  ;;  %2995 = vrcp.f32 %v1000_v12  ;;  %v1769_v51 = vmul.f32 %v1705_v27, %v873_v57  ;;  %v1377_v61 = vmul.f32 %v3851_v36, %v1313_v40 }
 0x118   : > { %v1314_v0 = vadd.f32 1.4214138, %v1250_v41  ;;  %vm737_vm15 = vcmp.lt.f32.partialorder %v3771_v43, 0.0  ;;  %v938_v46 = vmul.f32 0.3275911, %v874_v58  ;;  %v1952_v26 = vmul.f32 %v3839_v2, %v1632_v10 }
 0x119   : > { %v2207_v23 = vmul.f32 %v2143_v28, %v607_v52  ;;  %v4002_v7 = vmul.f32 0.70710677, %v3991_v22  ;;  %v1001_v21 = vadd.f32 1.0, %v937_v3  ;;  %v1770_v11 = vmul.f32 %v1706_v5, %v874_v58 }
 0x11a   : > { %v1441_v45 = vadd.f32 -0.28449672, %v1377_v61  ;;  %v1378_v53 = vmul.f32 %v3866_v30, %v1314_v0  ;;  %v4005_v12 = vpop.eup %2993  ;;  %2997 = vpow2.f32 %v1853_v4  ;;  %v4008_v57 = vmul.f32 0.5, %v3940_v13 }
 0x11b   : > { %2457 = vmatmul.f32.gmra.mxu2 %v2207_v23  ;;  %v2016_v27 = vsub.f32 1.0, %v1952_v26  ;;  %v4011_v15 = vadd.f32 %v535_v25, %v3414_v32  ;;  %vm738_vm1 = vcmp.lt.f32.partialorder %v3777_v54, 0.0  ;;  %v1855_v2 = vmul.f32 1.442695, %v1769_v51  ;;  %v256_v25 = vld [vmem:[%s3341_s9 + $0xf0] sm:$0xff] }
 0x11c   : > { %v800_v10 = vsel %vm736_vm14, -1.0, %v5266_v38  ;;  %v1505_v3 = vmul.f32 %v3851_v36, %v1441_v45  ;;  %v1442_v58 = vadd.f32 -0.28449672, %v1378_v53  ;;  %v1002_v5 = vadd.f32 1.0, %v938_v46  ;;  %2796 = vmatmul.msk.f32.gmra.mxu0 %vm272_vm0, %v256_v25  ;;  %2828 = vmatmul.msk.f32.gmra.mxu1 %vm272_vm0, %v256_v25 }
 0x11d   : > { %v2080_v40 = vmul.f32 %v2016_v27, %v800_v10  ;;  %v875_v13 = vand.u32 2147483647, %v4002_v7  ;;  %v1123_v41 = vmul.f32 1.0614054, %v3895_v50  ;;  %v4020_v4 = vpop.eup %2995  ;;  %2999 = vrcp.f32 %v1001_v21 }
 0x11e   : > { %v1857_v52 = vmul.f32 1.442695, %v1770_v11  ;;  %v1569_v28 = vadd.f32 0.2548296, %v1505_v3  ;;  %v1506_v51 = vmul.f32 %v3866_v30, %v1442_v58  ;;  %v608_v60 = vmul.f32 0.5, %v3726_v62  ;;  %v425_v11 = vpop.f32.mrf.mxu0 }
 0x11f   : > { %v2144_v61 = vadd.f32 1.0, %v2080_v40  ;;  %v4026_v0 = vmul.f32 0.70710677, %v4011_v15  ;;  %v1187_v46 = vadd.f32 -1.4531521, %v1123_v41  ;;  %3001 = vpow2.f32 %v1855_v2  ;;  %v538_v2 = vpop.f32.mrf.mxu1 }
 0x120   : > { %v4031_v23 = vmul.f32 0.5, %v3945_v29  ;;  %v1633_v26 = vmul.f32 %v3851_v36, %v1569_v28  ;;  %v1570_v21 = vadd.f32 0.2548296, %v1506_v51  ;;  %v4034_v45 = vpop.eup %2997  ;;  %3003 = vrcp.f32 %v1002_v5 }
 0x121   : > { %v2208_v62 = vmul.f32 %v2144_v61, %v608_v60  ;;  %v1707_v53 = vsub.f32 0.0, %v875_v13  ;;  %v1251_v27 = vmul.f32 %v3895_v50, %v1187_v46  ;;  %3005 = vpow2.f32 %v1857_v52 }
 0x122   : > { %5269 = vst [vmem:[#allocation9_spill] sm:$0xff] %v4031_v23  ;;  %v1953_v10 = vmul.f32 %v3879_v47, %v1633_v26  ;;  %v1634_v3 = vmul.f32 %v3866_v30, %v1570_v21  ;;  %v1124_v29 = vmul.f32 1.0614054, %v3901_v20  ;;  %v876_v36 = vand.u32 2147483647, %v4026_v0 }
 0x123   : > { %2570 = vmatmul.f32.gmra.mxu3 %v2208_v62  ;;  %v609_v58 = vmul.f32 0.5, %v3755_v48  ;;  %v4043_v40 = vadd.f32 %v425_v11, %v3412_v31  ;;  %v1315_v5 = vadd.f32 1.4214138, %v1251_v27  ;;  %v4045_v41 = vpop.eup %2999  ;;  %v801_v47 = vsel %vm737_vm15, -1.0, %v5266_v38 }
 0x124   : > { %v2017_v52 = vsub.f32 1.0, %v1953_v10  ;;  %v1954_v30 = vmul.f32 %v3890_v24, %v1634_v3  ;;  %v1188_v28 = vadd.f32 -1.4531521, %v1124_v29  ;;  %v939_v51 = vmul.f32 0.3275911, %v875_v13 }
 0x125   : > { %v1771_v25 = vmul.f32 %v1707_v53, %v875_v13  ;;  %v4052_v60 = vadd.f32 %v538_v2, %v3414_v32  ;;  %v1379_v48 = vmul.f32 %v3895_v50, %v1315_v5  ;;  %v4055_v61 = vpop.eup %3001  ;;  %vm739_vm2 = vcmp.lt.f32.partialorder %v3804_v1, 0.0 }
 0x126   : > { %v2081_v46 = vmul.f32 %v2017_v52, %v801_v47  ;;  %v610_v26 = vmul.f32 0.5, %v3763_v16  ;;  %v2018_v43 = vsub.f32 1.0, %v1954_v30  ;;  %v1252_v21 = vmul.f32 %v3901_v20, %v1188_v28  ;;  %v4060_v11 = vpop.eup %3003 }
 0x127   : > { %v1708_v24 = vsub.f32 0.0, %v876_v36  ;;  %v802_v13 = vsel %vm738_vm1, -1.0, %v5266_v38  ;;  %v4066_v62 = vmul.f32 0.70710677, %v4043_v40  ;;  %v1443_v53 = vadd.f32 -0.28449672, %v1379_v48  ;;  %v4068_v27 = vpop.eup %3005 }
 0x128   : > { %v940_v10 = vmul.f32 0.3275911, %v876_v36  ;;  %v2145_v3 = vadd.f32 1.0, %v2081_v46  ;;  %v2082_v16 = vmul.f32 %v2018_v43, %v802_v13  ;;  %v1316_v2 = vadd.f32 1.4214138, %v1252_v21 }
 0x129   : > { %v1003_v29 = vadd.f32 1.0, %v939_v51  ;;  %v1859_v5 = vmul.f32 1.442695, %v1771_v25  ;;  %v4071_v47 = vmul.f32 0.70710677, %v4052_v60  ;;  %v1507_v52 = vmul.f32 %v3895_v50, %v1443_v53  ;;  %v428_v51 = vpop.f32.mrf.mxu0  ;;  %v257_v25 = vld [vmem:[%s3341_s9 + $0xf8] sm:$0xff] }
 0x12a   : > { %v2209_v54 = vmul.f32 %v2145_v3, %v609_v58  ;;  %v2146_v30 = vadd.f32 1.0, %v2082_v16  ;;  %v1380_v28 = vmul.f32 %v3901_v20, %v1316_v2  ;;  %v1125_v48 = vmul.f32 1.0614054, %v3947_v37  ;;  %2797 = vmatmul.msk.f32.gmra.mxu0 %vm272_vm0, %v257_v25  ;;  %2829 = vmatmul.msk.f32.gmra.mxu1 %vm272_vm0, %v257_v25  ;;  %s216_s9 = sand.u32 1, %s3222_s19  }
 0x12b   : > { %v4077_v23 = vmul.f32 0.5, %v3991_v22  ;;  %v1772_v46 = vmul.f32 %v1708_v24, %v876_v36  ;;  %v877_v43 = vand.u32 2147483647, %v4066_v62  ;;  %v1571_v21 = vadd.f32 0.2548296, %v1507_v52  ;;  %s2763_s23 = sshll.u32 %s216_s9, 8 }
 0x12c   : > { %vm740_vm3 = vcmp.lt.f32.partialorder %v3817_v9, 0.0  ;;  %v1004_v13 = vadd.f32 1.0, %v940_v10  ;;  %2460 = vmatmul.f32.gmra.mxu2 %v2209_v54  ;;  %v2210_v53 = vmul.f32 %v2146_v30, %v610_v26  ;;  %v1444_v58 = vadd.f32 -0.28449672, %v1380_v28  ;;  %s4557_s25 = scalar_lea.vmem [#allocation3], %s2763_s23  ;;  %s2682_s13 = scalar_lea.sflag [#allocation4], %s216_s9 }
 0x12d   : > { %v1189_v3 = vadd.f32 -1.4531521, %v1125_v48  ;;  %3007 = vrcp.f32 %v1003_v29  ;;  %v4084_v16 = vmul.f32 0.5, %v4011_v15  ;;  %v878_v22 = vand.u32 2147483647, %v4071_v47  ;;  %s2694_s11 = sshll.u32 %s4557_s25, 4  ;;  %s2695_s11 = int_to_ptr.vmem [resolvable:$true] %s2694_s11 }
 0x12e   : > { %v1635_v36 = vmul.f32 %v3895_v50, %v1571_v21  ;;  %2573 = vmatmul.f32.gmra.mxu3 %v2210_v53  ;;  %v1508_v24 = vmul.f32 %v3901_v20, %v1444_v58  ;;  %v4091_v10 = vadd.f32 %v428_v51, %v3412_v31  ;;  %v1126_v2 = vmul.f32 1.0614054, %v3976_v39  ;;  %v541_v51 = vpop.f32.mrf.mxu1 }
 0x12f   : > { %v1253_v26 = vmul.f32 %v3947_v37, %v1189_v3  ;;  %3009 = vpow2.f32 %v1859_v5  ;;  %v1861_v29 = vmul.f32 1.442695, %v1772_v46  ;;  %v1709_v15 = vsub.f32 0.0, %v877_v43 }
 0x130   : > { %v1955_v52 = vmul.f32 %v3910_v14, %v1635_v36  ;;  %3011 = vrcp.f32 %v1004_v13  ;;  %v941_v54 = vmul.f32 0.3275911, %v877_v43  ;;  %v1572_v50 = vadd.f32 0.2548296, %v1508_v24 }
 0x131   : > { %v1317_v30 = vadd.f32 1.4214138, %v1253_v26  ;;  %v4097_v28 = vmul.f32 0.5, %v4043_v40  ;;  %v803_v48 = vsel %vm739_vm2, -1.0, %v5266_v38  ;;  %v1190_v25 = vadd.f32 -1.4531521, %v1126_v2 }
 0x132   : > { %v2019_v21 = vsub.f32 1.0, %v1955_v52  ;;  %v1710_v53 = vsub.f32 0.0, %v878_v22  ;;  %v1636_v5 = vmul.f32 %v3901_v20, %v1572_v50  ;;  %v4104_v46 = vmul.f32 0.70710677, %v4091_v10  ;;  %2439 = vmatmul.f32.vlgmr.msrb.gmra.mxu0 %v3745_v33  ;;  %2552 = vmatmul.f32.vlgmr.msrb.gmra.mxu1 %v3877_v56 }
 0x133   : > { %v1381_v14 = vmul.f32 %v3947_v37, %v1317_v30  ;;  %v4107_v13 = vpop.eup %3007  ;;  %vm741_vm0 = vcmp.lt.f32.partialorder %v3849_v17, 0.0  ;;  %3013 = vpow2.f32 %v1861_v29  ;;  %v1773_v40 = vmul.f32 %v1709_v15, %v877_v43 }
 0x134   : > { %v2083_v58 = vmul.f32 %v2019_v21, %v803_v48  ;;  %v1254_v1 = vmul.f32 %v3976_v39, %v1190_v25  ;;  %v1005_v3 = vadd.f32 1.0, %v941_v54  ;;  %v1956_v36 = vmul.f32 %v3926_v49, %v1636_v5  ;;  %v5270_v5 = vld [vmem:[#allocation6_spill] sm:$0xff] }
 0x135   : > { %v4113_v24 = vadd.f32 %v541_v51, %v3414_v32  ;;  %v1445_v20 = vadd.f32 -0.28449672, %v1381_v14  ;;  %v4116_v26 = vpop.eup %3009  ;;  %v942_v2 = vmul.f32 0.3275911, %v878_v22  ;;  %v611_v52 = vmul.f32 0.5, %v3789_v19 }
 0x136   : > { %v2147_v50 = vadd.f32 1.0, %v2083_v58  ;;  %v1318_v29 = vadd.f32 1.4214138, %v1254_v1  ;;  %v4120_v43 = vpop.eup %3011  ;;  %v1774_v15 = vmul.f32 %v1710_v53, %v878_v22  ;;  %v2020_v54 = vsub.f32 1.0, %v1956_v36  ;;  %v431_v58 = vpop.f32.mrf.mxu0 }
 0x137   : > { %v879_v49 = vand.u32 2147483647, %v4104_v46  ;;  %v1509_v30 = vmul.f32 %v3947_v37, %v1445_v20  ;;  %vm742_vm4 = vcmp.lt.f32.partialorder %v3870_v42, 0.0  ;;  %v1863_v33 = vmul.f32 1.442695, %v1773_v40 }
 0x138   : > { %v2211_v48 = vmul.f32 %v2147_v50, %v611_v52  ;;  %v804_v19 = vsel %vm740_vm3, -1.0, %v5266_v38  ;;  %v1382_v21 = vmul.f32 %v3976_v39, %v1318_v29  ;;  %3015 = vrcp.f32 %v1005_v3 }
 0x139   : > { %v2084_v56 = vmul.f32 %v2020_v54, %v804_v19  ;;  %v4130_v51 = vmul.f32 0.70710677, %v4113_v24  ;;  %v1573_v22 = vadd.f32 0.2548296, %v1509_v30  ;;  %v4132_v25 = vpop.eup %3013  ;;  %v1006_v53 = vadd.f32 1.0, %v942_v2 }
 0x13a   : > { %2463 = vmatmul.f32.gmra.mxu2 %v2211_v48  ;;  %v612_v14 = vmul.f32 0.5, %v5270_v5  ;;  %v1446_v40 = vadd.f32 -0.28449672, %v1382_v21  ;;  %v1127_v1 = vmul.f32 1.0614054, %v3996_v59  ;;  %v1711_v20 = vsub.f32 0.0, %v879_v49 }
 0x13b   : > { %v1865_v9 = vmul.f32 1.442695, %v1774_v15  ;;  %v2148_v36 = vadd.f32 1.0, %v2084_v56  ;;  %v1637_v3 = vmul.f32 %v3947_v37, %v1573_v22  ;;  %3017 = vpow2.f32 %v1863_v33  ;;  %v544_v15 = vpop.f32.mrf.mxu1 }
 0x13c   : > { %v943_v52 = vmul.f32 0.3275911, %v879_v49  ;;  %v1510_v50 = vmul.f32 %v3976_v39, %v1446_v40  ;;  %v1191_v29 = vadd.f32 -1.4531521, %v1127_v1  ;;  %v880_v2 = vand.u32 2147483647, %v4130_v51 }
 0x13d   : > { %v2212_v54 = vmul.f32 %v2148_v36, %v612_v14  ;;  %v1957_v30 = vmul.f32 %v3955_v44, %v1637_v3  ;;  %v4141_v48 = vadd.f32 %v431_v58, %v3412_v31  ;;  %3019 = vrcp.f32 %v1006_v53 }
 0x13e   : > { %v1574_v19 = vadd.f32 0.2548296, %v1510_v50  ;;  %v1255_v21 = vmul.f32 %v3996_v59, %v1191_v29  ;;  %v1128_v37 = vmul.f32 1.0614054, %v4020_v4  ;;  %v4145_v33 = vpop.eup %3015  ;;  %3021 = vpow2.f32 %v1865_v9 }
 0x13f   : > { %2576 = vmatmul.f32.gmra.mxu3 %v2212_v54  ;;  %v1775_v56 = vmul.f32 %v1711_v20, %v879_v49  ;;  %v805_v22 = vsel %vm741_vm0, -1.0, %v5266_v38  ;;  %v2021_v44 = vsub.f32 1.0, %v1957_v30  ;;  %v1007_v5 = vadd.f32 1.0, %v943_v52 }
 0x140   : > { %v1638_v14 = vmul.f32 %v3976_v39, %v1574_v19  ;;  %v1319_v53 = vadd.f32 1.4214138, %v1255_v21  ;;  %v1192_v40 = vadd.f32 -1.4531521, %v1128_v37  ;;  %v944_v58 = vmul.f32 0.3275911, %v880_v2 }
 0x141   : > { %v2085_v1 = vmul.f32 %v2021_v44, %v805_v22  ;;  %v4152_v36 = vmul.f32 0.70710677, %v4141_v48  ;;  %v545_v3 = vadd.f32 %v544_v15, %v3414_v32  ;;  %v4155_v9 = vpop.eup %3017  ;;  %v1129_v52 = vmul.f32 1.0614054, %v4045_v41 }
 0x142   : > { %v1958_v49 = vmul.f32 %v3983_v55, %v1638_v14  ;;  %v1383_v17 = vmul.f32 %v3996_v59, %v1319_v53  ;;  %v1256_v20 = vmul.f32 %v4020_v4, %v1192_v40  ;;  %v1867_v39 = vmul.f32 1.442695, %v1775_v56 }
 0x143   : > { %v1712_v50 = vsub.f32 0.0, %v880_v2  ;;  %v2149_v29 = vadd.f32 1.0, %v2085_v1  ;;  %v806_v54 = vsel %vm742_vm4, -1.0, %v5266_v38  ;;  %v4164_v30 = vpop.eup %3019  ;;  %vm743_vm5 = vcmp.lt.f32.partialorder %v3908_v34, 0.0 }
 0x144   : > { %3023 = vrcp.f32 %v1007_v5  ;;  %v2022_v19 = vsub.f32 1.0, %v1958_v49  ;;  %v1447_v55 = vadd.f32 -0.28449672, %v1383_v17  ;;  %v1320_v15 = vadd.f32 1.4214138, %v1256_v20  ;;  %v4167_v21 = vpop.eup %3021  ;;  %v434_v20 = vpop.f32.mrf.mxu0 }
 0x145   : > { %v1008_v37 = vadd.f32 1.0, %v944_v58  ;;  %v2213_v22 = vmul.f32 %v2149_v29, %v3899_v8  ;;  %v881_v56 = vand.u32 2147483647, %v4152_v36  ;;  %v4171_v44 = vmul.f32 0.70710677, %v545_v3 }
 0x146   : > { %v2086_v14 = vmul.f32 %v2022_v19, %v806_v54  ;;  %v1511_v42 = vmul.f32 %v3996_v59, %v1447_v55  ;;  %v1384_v53 = vmul.f32 %v4020_v4, %v1320_v15  ;;  %v1193_v40 = vadd.f32 -1.4531521, %v1129_v52  ;;  %v547_v19 = vpop.f32.mrf.mxu1 }
 0x147   : > { %v4176_v5 = vmul.f32 0.5, %v4052_v60  ;;  %v4179_v1 = vmul.f32 0.5, %v4091_v10  ;;  %3025 = vpow2.f32 %v1867_v39  ;;  %v1776_v58 = vmul.f32 %v1712_v50, %v880_v2  ;;  %2466 = vmatmul.f32.gmra.mxu2 %v2213_v22 }
 0x148   : > { %vm744_vm6 = vcmp.lt.f32.partialorder %v3931_v35, 0.0  ;;  %v2150_v8 = vadd.f32 1.0, %v2086_v14  ;;  %v1575_v49 = vadd.f32 0.2548296, %v1511_v42  ;;  %v1448_v17 = vadd.f32 -0.28449672, %v1384_v53 }
 0x149   : > { %v1257_v29 = vmul.f32 %v4045_v41, %v1193_v40  ;;  %v4184_v54 = vmul.f32 0.5, %v4113_v24  ;;  %3027 = vrcp.f32 %v1008_v37  ;;  %v1713_v60 = vsub.f32 0.0, %v881_v56 }
 0x14a   : > { %v882_v52 = vand.u32 2147483647, %v4171_v44  ;;  %v4187_v10 = vpop.eup %3023  ;;  %v2214_v2 = vmul.f32 %v2150_v8, %v3921_v18  ;;  %v1639_v39 = vmul.f32 %v3996_v59, %v1575_v49  ;;  %v1512_v50 = vmul.f32 %v4020_v4, %v1448_v17 }
 0x14b   : > { %v1321_v55 = vadd.f32 1.4214138, %v1257_v29  ;;  %v1869_v15 = vmul.f32 1.442695, %v1776_v58  ;;  %v945_v22 = vmul.f32 0.3275911, %v881_v56  ;;  %v4193_v14 = vadd.f32 %v434_v20, %v3412_v31 }
 0x14c   : > { %v1130_v24 = vmul.f32 1.0614054, %v4060_v11  ;;  %2579 = vmatmul.f32.gmra.mxu3 %v2214_v2  ;;  %v4197_v37 = vmul.f32 0.5, %v4141_v48  ;;  %v1959_v42 = vmul.f32 %v4005_v12, %v1639_v39  ;;  %v1576_v18 = vadd.f32 0.2548296, %v1512_v50 }
 0x14d   : > { %v1385_v59 = vmul.f32 %v4045_v41, %v1321_v55  ;;  %v4201_v53 = vpop.eup %3025  ;;  %v1777_v40 = vmul.f32 %v1713_v60, %v881_v56  ;;  %v4203_v8 = vmul.f32 0.5, %v545_v3  ;;  %v4206_v58 = vadd.f32 %v547_v19, %v3414_v32 }
 0x14e   : > { %5271 = vst [vmem:[#allocation6_spill] sm:$0xff] %v4197_v37  ;;  %v1194_v49 = vadd.f32 -1.4531521, %v1130_v24  ;;  %vm745_vm7 = vcmp.lt.f32.partialorder %v3958_v6, 0.0  ;;  %v1714_v17 = vsub.f32 0.0, %v882_v52  ;;  %v2023_v20 = vsub.f32 1.0, %v1959_v42 }
 0x14f   : > { %5272 = vst [vmem:[#allocation10_spill] sm:$0xff] %v4203_v8  ;;  %v1640_v48 = vmul.f32 %v4020_v4, %v1576_v18  ;;  %v1449_v29 = vadd.f32 -0.28449672, %v1385_v59  ;;  %v4210_v12 = vpop.eup %3027  ;;  %v1009_v2 = vadd.f32 1.0, %v945_v22  ;;  %v807_v56 = vsel %vm743_vm5, -1.0, %v5266_v38 }
 0x150   : > { %v4216_v3 = vmul.f32 0.70710677, %v4193_v14  ;;  %v1258_v60 = vmul.f32 %v4060_v11, %v1194_v49  ;;  %v946_v39 = vmul.f32 0.3275911, %v882_v52  ;;  %v2087_v50 = vmul.f32 %v2023_v20, %v807_v56 }
 0x151   : > { %v1960_v19 = vmul.f32 %v4034_v45, %v1640_v48  ;;  %v1513_v55 = vmul.f32 %v4045_v41, %v1449_v29  ;;  %3029 = vpow2.f32 %v1869_v15  ;;  %v1871_v4 = vmul.f32 1.442695, %v1777_v40  ;;  %v5273_v15 = vld [vmem:[#allocation7_spill] sm:$0xff] }
 0x152   : > { %v4222_v24 = vmul.f32 0.70710677, %v4206_v58  ;;  %v1322_v22 = vadd.f32 1.4214138, %v1258_v60  ;;  %v1778_v42 = vmul.f32 %v1714_v17, %v882_v52  ;;  %v2151_v34 = vadd.f32 1.0, %v2087_v50  ;;  %v437_v17 = vpop.f32.mrf.mxu0 }
 0x153   : > { %v2024_v18 = vsub.f32 1.0, %v1960_v19  ;;  %v1577_v59 = vadd.f32 0.2548296, %v1513_v55  ;;  %v808_v49 = vsel %vm744_vm6, -1.0, %v5266_v38  ;;  %v883_v20 = vand.u32 2147483647, %v4216_v3  ;;  %v550_v55 = vpop.f32.mrf.mxu1 }
 0x154   : > { %v1386_v45 = vmul.f32 %v4060_v11, %v1322_v22  ;;  %v1131_v48 = vmul.f32 1.0614054, %v4107_v13  ;;  %vm746_vm8 = vcmp.lt.f32.partialorder %v3962_v63, 0.0  ;;  %3031 = vrcp.f32 %v1009_v2 }
 0x155   : > { %v2215_v40 = vmul.f32 %v2151_v34, %v5273_v15  ;;  %v2088_v29 = vmul.f32 %v2024_v18, %v808_v49  ;;  %v1641_v52 = vmul.f32 %v4045_v41, %v1577_v59  ;;  %3033 = vpow2.f32 %v1871_v4 }
 0x156   : > { %v1010_v56 = vadd.f32 1.0, %v946_v39  ;;  %v884_v35 = vand.u32 2147483647, %v4222_v24  ;;  %v1450_v60 = vadd.f32 -0.28449672, %v1386_v45  ;;  %v1715_v18 = vsub.f32 0.0, %v883_v20 }
 0x157   : > { %2469 = vmatmul.f32.gmra.mxu2 %v2215_v40  ;;  %v2152_v50 = vadd.f32 1.0, %v2088_v29  ;;  %v1961_v19 = vmul.f32 %v4055_v61, %v1641_v52  ;;  %v1195_v22 = vadd.f32 -1.4531521, %v1131_v48  ;;  %v1132_v8 = vmul.f32 1.0614054, %v4120_v43  ;;  %v4236_v2 = vpop.eup %3029  ;;  %v5274_v39 = vld [vmem:[#allocation8_spill] sm:$0xff] }
 0x158   : > { %v1873_v34 = vmul.f32 1.442695, %v1778_v42  ;;  %v1514_v41 = vmul.f32 %v4060_v11, %v1450_v60  ;;  %v4240_v4 = vadd.f32 %v437_v17, %v3412_v31  ;;  %v1716_v61 = vsub.f32 0.0, %v884_v35 }
 0x159   : > { %v2216_v59 = vmul.f32 %v2152_v50, %v5274_v39  ;;  %v2025_v49 = vsub.f32 1.0, %v1961_v19  ;;  %v1259_v45 = vmul.f32 %v4107_v13, %v1195_v22  ;;  %v1196_v15 = vadd.f32 -1.4531521, %v1132_v8 }
 0x15a   : > { %v809_v48 = vsel %vm745_vm7, -1.0, %v5266_v38  ;;  %v1578_v40 = vadd.f32 0.2548296, %v1514_v41  ;;  %v4248_v42 = vadd.f32 %v550_v55, %v3414_v32  ;;  %v4250_v29 = vpop.eup %3031  ;;  %v947_v52 = vmul.f32 0.3275911, %v883_v20 }
 0x15b   : > { %2582 = vmatmul.f32.gmra.mxu3 %v2216_v59  ;;  %v2089_v17 = vmul.f32 %v2025_v49, %v809_v48  ;;  %v1323_v60 = vadd.f32 1.4214138, %v1259_v45  ;;  %v1260_v50 = vmul.f32 %v4120_v43, %v1196_v15  ;;  %v4253_v19 = vpop.eup %3033  ;;  %3035 = vrcp.f32 %v1010_v56 }
 0x15c   : > { %v1779_v8 = vmul.f32 %v1715_v18, %v883_v20  ;;  %v1642_v22 = vmul.f32 %v4060_v11, %v1578_v40  ;;  %v4257_v6 = vmul.f32 0.70710677, %v4240_v4  ;;  %v948_v41 = vmul.f32 0.3275911, %v884_v35 }
 0x15d   : > { %v2153_v55 = vadd.f32 1.0, %v2089_v17  ;;  %v1387_v39 = vmul.f32 %v4107_v13, %v1323_v60  ;;  %v1324_v37 = vadd.f32 1.4214138, %v1260_v50  ;;  %vm747_vm9 = vcmp.lt.f32.partialorder %v4002_v7, 0.0  ;;  %v440_v17 = vpop.f32.mrf.mxu0 }
 0x15e   : > { %3037 = vpow2.f32 %v1873_v34  ;;  %v1780_v59 = vmul.f32 %v1716_v61, %v884_v35  ;;  %v1962_v49 = vmul.f32 %v4068_v27, %v1642_v22  ;;  %v4263_v45 = vmul.f32 0.70710677, %v4248_v42 }
 0x15f   : > { %vm748_vm10 = vcmp.lt.f32.partialorder %v4026_v0, 0.0  ;;  %v1011_v11 = vadd.f32 1.0, %v947_v52  ;;  %v2217_v20 = vmul.f32 %v2153_v55, %v4008_v57  ;;  %v1451_v56 = vadd.f32 -0.28449672, %v1387_v39 }
 0x160   : > { %v1388_v18 = vmul.f32 %v4120_v43, %v1324_v37  ;;  %v1875_v15 = vmul.f32 1.442695, %v1779_v8  ;;  %v810_v48 = vsel %vm746_vm8, -1.0, %v5266_v38  ;;  %v2026_v34 = vsub.f32 1.0, %v1962_v49 }
 0x161   : > { %v885_v35 = vand.u32 2147483647, %v4257_v6  ;;  %v1012_v27 = vadd.f32 1.0, %v948_v41  ;;  %2472 = vmatmul.f32.gmra.mxu2 %v2217_v20  ;;  %v1515_v61 = vmul.f32 %v4107_v13, %v1451_v56  ;;  %v1133_v52 = vmul.f32 1.0614054, %v4145_v33  ;;  %v4274_v57 = vpop.eup %3035  ;;  %v553_v56 = vpop.f32.mrf.mxu1 }
 0x162   : > { %v1452_v40 = vadd.f32 -0.28449672, %v1388_v18  ;;  %v4277_v37 = vmul.f32 0.5, %v4193_v14  ;;  %v1877_v60 = vmul.f32 1.442695, %v1780_v59  ;;  %v2090_v50 = vmul.f32 %v2026_v34, %v810_v48  ;;  %v5275_v48 = vld [vmem:[#allocation9_spill] sm:$0xff] }
 0x163   : > { %v886_v63 = vand.u32 2147483647, %v4263_v45  ;;  %3039 = vrcp.f32 %v1011_v11  ;;  %v1579_v8 = vadd.f32 0.2548296, %v1515_v61  ;;  %v1197_v41 = vadd.f32 -1.4531521, %v1133_v52 }
 0x164   : > { %v1516_v22 = vmul.f32 %v4120_v43, %v1452_v40  ;;  %v4281_v55 = vpop.eup %3037  ;;  %3041 = vpow2.f32 %v1875_v15  ;;  %v2154_v39 = vadd.f32 1.0, %v2090_v50  ;;  %v1717_v49 = vsub.f32 0.0, %v885_v35 }
 0x165   : > { %v4284_v20 = vadd.f32 %v440_v17, %v3412_v31  ;;  %3043 = vrcp.f32 %v1012_v27  ;;  %v1643_v14 = vmul.f32 %v4107_v13, %v1579_v8  ;;  %v1261_v18 = vmul.f32 %v4145_v33, %v1197_v41 }
 0x166   : > { %v1580_v59 = vadd.f32 0.2548296, %v1516_v22  ;;  %v4289_v11 = vmul.f32 0.5, %v4206_v58  ;;  %3045 = vpow2.f32 %v1877_v60  ;;  %v2218_v34 = vmul.f32 %v2154_v39, %v5275_v48 }
 0x167   : > { %v1718_v61 = vsub.f32 0.0, %v886_v63  ;;  %v949_v15 = vmul.f32 0.3275911, %v885_v35  ;;  %v1963_v40 = vmul.f32 %v4116_v26, %v1643_v14  ;;  %v4295_v52 = vadd.f32 %v553_v56, %v3414_v32 }
 0x168   : > { %v1644_v17 = vmul.f32 %v4120_v43, %v1580_v59  ;;  %2585 = vmatmul.f32.gmra.mxu3 %v2218_v34  ;;  %v1781_v13 = vmul.f32 %v1717_v49, %v885_v35  ;;  %v4298_v27 = vmul.f32 0.70710677, %v4284_v20  ;;  %v1325_v50 = vadd.f32 1.4214138, %v1261_v18 }
 0x169   : > { %v1134_v58 = vmul.f32 1.0614054, %v4164_v30  ;;  %v4301_v60 = vpop.eup %3039  ;;  %v950_v8 = vmul.f32 0.3275911, %v886_v63  ;;  %v811_v26 = vsel %vm747_vm9, -1.0, %v5266_v38  ;;  %v2027_v22 = vsub.f32 1.0, %v1963_v40 }
 0x16a   : > { %v1964_v43 = vmul.f32 %v4132_v25, %v1644_v17  ;;  %v4307_v41 = vpop.eup %3041  ;;  %v1782_v39 = vmul.f32 %v1718_v61, %v886_v63  ;;  %v812_v35 = vsel %vm748_vm10, -1.0, %v5266_v38  ;;  %v1389_v49 = vmul.f32 %v4145_v33, %v1325_v50 }
 0x16b   : > { %v1198_v56 = vadd.f32 -1.4531521, %v1134_v58  ;;  %v4313_v14 = vpop.eup %3043  ;;  %vm749_vm11 = vcmp.lt.f32.partialorder %v4066_v62, 0.0  ;;  %v1013_v59 = vadd.f32 1.0, %v949_v15  ;;  %v2091_v7 = vmul.f32 %v2027_v22, %v811_v26  ;;  %v443_v15 = vpop.f32.mrf.mxu0 }
 0x16c   : > { %v2028_v18 = vsub.f32 1.0, %v1964_v43  ;;  %v4317_v48 = vmul.f32 0.70710677, %v4295_v52  ;;  %v4319_v25 = vpop.eup %3045  ;;  %v1879_v63 = vmul.f32 1.442695, %v1781_v13  ;;  %v4324_v40 = vmul.f32 0.5, %v4240_v4 }
 0x16d   : > { %v887_v34 = vand.u32 2147483647, %v4298_v27  ;;  %v1453_v0 = vadd.f32 -0.28449672, %v1389_v49  ;;  %v1262_v61 = vmul.f32 %v4164_v30, %v1198_v56  ;;  %v1014_v17 = vadd.f32 1.0, %v950_v8 }
 0x16e   : > { %v2155_v50 = vadd.f32 1.0, %v2091_v7  ;;  %v2092_v58 = vmul.f32 %v2028_v18, %v812_v35  ;;  %vm750_vm12 = vcmp.lt.f32.partialorder %v4071_v47, 0.0  ;;  %v4328_v26 = vmul.f32 0.5, %v4248_v42  ;;  %v556_v18 = vpop.f32.mrf.mxu1 }
 0x16f   : > { %v1881_v22 = vmul.f32 1.442695, %v1782_v39  ;;  %v1517_v13 = vmul.f32 %v4145_v33, %v1453_v0  ;;  %v1326_v43 = vadd.f32 1.4214138, %v1262_v61  ;;  %3047 = vrcp.f32 %v1013_v59 }
 0x170   : > { %5276 = vst [vmem:[#allocation7_spill] sm:$0xff] %v4328_v26  ;;  %v2219_v49 = vmul.f32 %v2155_v50, %v4077_v23  ;;  %v2156_v56 = vadd.f32 1.0, %v2092_v58  ;;  %v888_v4 = vand.u32 2147483647, %v4317_v48  ;;  %3049 = vpow2.f32 %v1879_v63 }
 0x171   : > { %v1719_v8 = vsub.f32 0.0, %v887_v34  ;;  %v1581_v7 = vadd.f32 0.2548296, %v1517_v13  ;;  %v1390_v35 = vmul.f32 %v4164_v30, %v1326_v43  ;;  %3051 = vrcp.f32 %v1014_v17 }
 0x172   : > { %2475 = vmatmul.f32.gmra.mxu2 %v2219_v49  ;;  %v2220_v42 = vmul.f32 %v2156_v56, %v4084_v16  ;;  %v951_v39 = vmul.f32 0.3275911, %v887_v34  ;;  %v4336_v0 = vadd.f32 %v443_v15, %v3412_v31  ;;  %3053 = vpow2.f32 %v1881_v22 }
 0x173   : > { %v4339_v23 = vmul.f32 0.5, %v4284_v20  ;;  %v1645_v59 = vmul.f32 %v4145_v33, %v1581_v7  ;;  %v1454_v63 = vadd.f32 -0.28449672, %v1390_v35  ;;  %v952_v61 = vmul.f32 0.3275911, %v888_v4 }
 0x174   : > { %2588 = vmatmul.f32.gmra.mxu3 %v2220_v42  ;;  %v1720_v50 = vsub.f32 0.0, %v888_v4  ;;  %v4343_v58 = vadd.f32 %v556_v18, %v3414_v32  ;;  %v1135_v17 = vmul.f32 1.0614054, %v4187_v10  ;;  %v1783_v16 = vmul.f32 %v1719_v8, %v887_v34 }
 0x175   : > { %5277 = vst [vmem:[#allocation8_spill] sm:$0xff] %v4339_v23  ;;  %v1965_v13 = vmul.f32 %v4155_v9, %v1645_v59  ;;  %v1518_v15 = vmul.f32 %v4164_v30, %v1454_v63  ;;  %v1136_v22 = vmul.f32 1.0614054, %v4210_v12  ;;  %v4349_v20 = vpop.eup %3047  ;;  %v1015_v43 = vadd.f32 1.0, %v951_v39  ;;  %v446_v63 = vpop.f32.mrf.mxu0 }
 0x176   : > { %v4352_v33 = vmul.f32 0.5, %v4295_v52  ;;  %v4355_v49 = vmul.f32 0.70710677, %v4336_v0  ;;  %v1199_v56 = vadd.f32 -1.4531521, %v1135_v17  ;;  %v4357_v7 = vpop.eup %3049  ;;  %v813_v9 = vsel %vm749_vm11, -1.0, %v5266_v38 }
 0x177   : > { %v2029_v34 = vsub.f32 1.0, %v1965_v13  ;;  %v1582_v8 = vadd.f32 0.2548296, %v1518_v15  ;;  %v1200_v35 = vadd.f32 -1.4531521, %v1136_v22  ;;  %v4362_v18 = vpop.eup %3051  ;;  %v1016_v42 = vadd.f32 1.0, %v952_v61 }
 0x178   : > { %5278 = vst [vmem:[#allocation9_spill] sm:$0xff] %v4352_v33  ;;  %v1784_v39 = vmul.f32 %v1720_v50, %v888_v4  ;;  %v4365_v52 = vmul.f32 0.70710677, %v4343_v58  ;;  %v1263_v59 = vmul.f32 %v4187_v10, %v1199_v56  ;;  %v4368_v17 = vpop.eup %3053  ;;  %v1883_v33 = vmul.f32 1.442695, %v1783_v16 }
 0x179   : > { %5279 = vst [vmem:[#allocation11_spill] sm:$0xff] %v4355_v49  ;;  %v2093_v23 = vmul.f32 %v2029_v34, %v813_v9  ;;  %v1646_v62 = vmul.f32 %v4164_v30, %v1582_v8  ;;  %v1264_v13 = vmul.f32 %v4210_v12, %v1200_v35  ;;  %3055 = vrcp.f32 %v1015_v43 }
 0x17a   : > { %5280 = vst [vmem:[#allocation12_spill] sm:$0xff] %v4365_v52  ;;  %v814_v61 = vsel %vm750_vm12, -1.0, %v5266_v38  ;;  %v889_v4 = vand.u32 2147483647, %v4355_v49  ;;  %v1327_v50 = vadd.f32 1.4214138, %v1263_v59  ;;  %v4379_v16 = vadd.f32 %v446_v63, %v3412_v31  ;;  %v559_v63 = vpop.f32.mrf.mxu1 }
 0x17b   : > { %vm751_vm13 = vcmp.lt.f32.partialorder %v4104_v46, 0.0  ;;  %v2157_v15 = vadd.f32 1.0, %v2093_v23  ;;  %v1966_v22 = vmul.f32 %v4167_v21, %v1646_v62  ;;  %v1328_v56 = vadd.f32 1.4214138, %v1264_v13 }
 0x17c   : > { %3057 = vrcp.f32 %v1016_v42  ;;  %v1885_v30 = vmul.f32 1.442695, %v1784_v39  ;;  %v890_v43 = vand.u32 2147483647, %v4365_v52  ;;  %v1391_v9 = vmul.f32 %v4187_v10, %v1327_v50 }
 0x17d   : > { %vm752_vm14 = vcmp.lt.f32.partialorder %v4130_v51, 0.0  ;;  %v2221_v47 = vmul.f32 %v2157_v15, %v4097_v28  ;;  %v2030_v34 = vsub.f32 1.0, %v1966_v22  ;;  %v1392_v8 = vmul.f32 %v4210_v12, %v1328_v56 }
 0x17e   : > { %v1137_v23 = vmul.f32 1.0614054, %v4250_v29  ;;  %3059 = vpow2.f32 %v1883_v33  ;;  %v953_v21 = vmul.f32 0.3275911, %v889_v4  ;;  %v1721_v35 = vsub.f32 0.0, %v889_v4 }
 0x17f   : > { %v1455_v59 = vadd.f32 -0.28449672, %v1391_v9  ;;  %2478 = vmatmul.f32.gmra.mxu2 %v2221_v47  ;;  %v2094_v42 = vmul.f32 %v2030_v34, %v814_v61  ;;  %v1456_v39 = vadd.f32 -0.28449672, %v1392_v8  ;;  %v4388_v62 = vmul.f32 0.70710677, %v4379_v16  ;;  %v4390_v50 = vpop.eup %3055 }
 0x180   : > { %v1201_v13 = vadd.f32 -1.4531521, %v1137_v23  ;;  %3061 = vpow2.f32 %v1885_v30  ;;  %v954_v28 = vmul.f32 0.3275911, %v890_v43  ;;  %v1722_v15 = vsub.f32 0.0, %v890_v43 }
 0x181   : > { %v1519_v22 = vmul.f32 %v4187_v10, %v1455_v59  ;;  %v2158_v56 = vadd.f32 1.0, %v2094_v42  ;;  %v1520_v33 = vmul.f32 %v4210_v12, %v1456_v39  ;;  %v4395_v9 = vadd.f32 %v559_v63, %v3414_v32 }
 0x182   : > { %v1265_v61 = vmul.f32 %v4250_v29, %v1201_v13  ;;  %v4398_v47 = vpop.eup %3057  ;;  %v4401_v34 = vmul.f32 0.5, %v4336_v0  ;;  %v1017_v8 = vadd.f32 1.0, %v953_v21  ;;  %v1138_v30 = vmul.f32 1.0614054, %v4274_v57 }
 0x183   : > { %v1583_v23 = vadd.f32 0.2548296, %v1519_v22  ;;  %v2222_v52 = vmul.f32 %v2158_v56, %v4176_v5  ;;  %v1785_v59 = vmul.f32 %v1721_v35, %v889_v4  ;;  %v1584_v42 = vadd.f32 0.2548296, %v1520_v33 }
 0x184   : > { %5281 = vst [vmem:[#allocation13_spill] sm:$0xff] %v4401_v34  ;;  %v891_v39 = vand.u32 2147483647, %v4388_v62  ;;  %v4406_v49 = vpop.eup %3059  ;;  %v4409_v63 = vmul.f32 0.5, %v4343_v58  ;;  %v1329_v26 = vadd.f32 1.4214138, %v1265_v61  ;;  %v1786_v22 = vmul.f32 %v1722_v15, %v890_v43 }
 0x185   : > { %v1647_v13 = vmul.f32 %v4187_v10, %v1583_v23  ;;  %v1202_v0 = vadd.f32 -1.4531521, %v1138_v30  ;;  %2591 = vmatmul.f32.gmra.mxu3 %v2222_v52  ;;  %v1018_v21 = vadd.f32 1.0, %v954_v28  ;;  %v1648_v34 = vmul.f32 %v4210_v12, %v1584_v42  ;;  %v449_v52 = vpop.f32.mrf.mxu0 }
 0x186   : > { %v4414_v5 = vmul.f32 0.70710677, %v4395_v9  ;;  %v4416_v4 = vpop.eup %3061  ;;  %v815_v35 = vsel %vm751_vm13, -1.0, %v5266_v38  ;;  %v1393_v10 = vmul.f32 %v4250_v29, %v1329_v26  ;;  %3063 = vrcp.f32 %v1017_v8 }
 0x187   : > { %v1967_v58 = vmul.f32 %v4201_v53, %v1647_v13  ;;  %v1266_v56 = vmul.f32 %v4274_v57, %v1202_v0  ;;  %v1887_v43 = vmul.f32 1.442695, %v1785_v59  ;;  %v1968_v12 = vmul.f32 %v4236_v2, %v1648_v34 }
 0x188   : > { %v1723_v28 = vsub.f32 0.0, %v891_v39  ;;  %vm753_vm15 = vcmp.lt.f32.partialorder %v4152_v36, 0.0  ;;  %v816_v46 = vsel %vm752_vm14, -1.0, %v5266_v38  ;;  %v1457_v33 = vadd.f32 -0.28449672, %v1393_v10 }
 0x189   : > { %v2031_v15 = vsub.f32 1.0, %v1967_v58  ;;  %v1330_v61 = vadd.f32 1.4214138, %v1266_v56  ;;  %v2032_v53 = vsub.f32 1.0, %v1968_v12  ;;  %v955_v23 = vmul.f32 0.3275911, %v891_v39 }
 0x18a   : > { %v892_v26 = vand.u32 2147483647, %v4414_v5  ;;  %v4431_v30 = vadd.f32 %v449_v52, %v3412_v31  ;;  %v1521_v2 = vmul.f32 %v4250_v29, %v1457_v33  ;;  %v1139_v59 = vmul.f32 1.0614054, %v4301_v60 }
 0x18b   : > { %v2095_v8 = vmul.f32 %v2031_v15, %v815_v35  ;;  %v1394_v34 = vmul.f32 %v4274_v57, %v1330_v61  ;;  %3065 = vrcp.f32 %v1018_v21  ;;  %v1889_v42 = vmul.f32 1.442695, %v1786_v22  ;;  %v562_v22 = vpop.f32.mrf.mxu1 }
 0x18c   : > { %v2096_v51 = vmul.f32 %v2032_v53, %v816_v46  ;;  %v1787_v13 = vmul.f32 %v1723_v28, %v891_v39  ;;  %vm754_vm1 = vcmp.lt.f32.partialorder %v4171_v44, 0.0  ;;  %3067 = vpow2.f32 %v1887_v43  ;;  %v4437_v56 = vpop.eup %3063 }
 0x18d   : > { %v2159_v0 = vadd.f32 1.0, %v2095_v8  ;;  %v1585_v58 = vadd.f32 0.2548296, %v1521_v2  ;;  %v1458_v10 = vadd.f32 -0.28449672, %v1394_v34  ;;  %v1019_v35 = vadd.f32 1.0, %v955_v23 }
 0x18e   : > { %v2160_v52 = vadd.f32 1.0, %v2096_v51  ;;  %v1724_v12 = vsub.f32 0.0, %v892_v26  ;;  %v4440_v15 = vmul.f32 0.70710677, %v4431_v30  ;;  %v1203_v28 = vadd.f32 -1.4531521, %v1139_v59 }
 0x18f   : > { %v2223_v33 = vmul.f32 %v2159_v0, %v4179_v1  ;;  %v1649_v21 = vmul.f32 %v4250_v29, %v1585_v58  ;;  %v1522_v39 = vmul.f32 %v4274_v57, %v1458_v10  ;;  %3069 = vpow2.f32 %v1889_v42  ;;  %v452_v0 = vpop.f32.mrf.mxu0 }
 0x190   : > { %v2224_v43 = vmul.f32 %v2160_v52, %v4184_v54  ;;  %v1891_v46 = vmul.f32 1.442695, %v1787_v13  ;;  %v956_v61 = vmul.f32 0.3275911, %v892_v26  ;;  %vm755_vm2 = vcmp.lt.f32.partialorder %v4216_v3, 0.0 }
 0x191   : > { %2481 = vmatmul.f32.gmra.mxu2 %v2223_v33  ;;  %v1969_v53 = vmul.f32 %v4253_v19, %v1649_v21  ;;  %v1586_v23 = vadd.f32 0.2548296, %v1522_v39  ;;  %v1267_v8 = vmul.f32 %v4301_v60, %v1203_v28  ;;  %v1140_v1 = vmul.f32 1.0614054, %v4313_v14  ;;  %v4450_v29 = vpop.eup %3065 }
 0x192   : > { %2594 = vmatmul.f32.gmra.mxu3 %v2224_v43  ;;  %3071 = vrcp.f32 %v1019_v35  ;;  %v1788_v2 = vmul.f32 %v1724_v12, %v892_v26  ;;  %v893_v34 = vand.u32 2147483647, %v4440_v15  ;;  %v563_v54 = vadd.f32 %v562_v22, %v3414_v32  ;;  %v4454_v59 = vpop.eup %3067 }
 0x193   : > { %vm756_vm3 = vcmp.lt.f32.partialorder %v4222_v24, 0.0  ;;  %v2033_v42 = vsub.f32 1.0, %v1969_v53  ;;  %v1650_v19 = vmul.f32 %v4274_v57, %v1586_v23  ;;  %v1331_v51 = vadd.f32 1.4214138, %v1267_v8  ;;  %v5282_v8 = vld [vmem:[#allocation6_spill] sm:$0xff] }
 0x194   : > { %v1204_v13 = vadd.f32 -1.4531521, %v1140_v1  ;;  %v4459_v58 = vmul.f32 0.5, %v4379_v16  ;;  %3073 = vpow2.f32 %v1891_v46  ;;  %v1020_v10 = vadd.f32 1.0, %v956_v61 }
 0x195   : > { %v817_v26 = vsel %vm753_vm15, -1.0, %v5266_v38  ;;  %v1970_v35 = vmul.f32 %v4281_v55, %v1650_v19  ;;  %v1395_v12 = vmul.f32 %v4301_v60, %v1331_v51  ;;  %v4467_v57 = vpop.eup %3069  ;;  %v1893_v21 = vmul.f32 1.442695, %v1788_v2  ;;  %v565_v51 = vpop.f32.mrf.mxu1 }
 0x196   : > { %v2097_v52 = vmul.f32 %v2033_v42, %v817_v26  ;;  %v1268_v33 = vmul.f32 %v4313_v14, %v1204_v13  ;;  %v1725_v39 = vsub.f32 0.0, %v893_v34  ;;  %v4469_v22 = vmul.f32 0.70710677, %v563_v54 }
 0x197   : > { %v4472_v16 = vadd.f32 %v452_v0, %v3412_v31  ;;  %vm757_vm0 = vcmp.lt.f32.partialorder %v4257_v6, 0.0  ;;  %v2034_v28 = vsub.f32 1.0, %v1970_v35  ;;  %v1459_v43 = vadd.f32 -0.28449672, %v1395_v12 }
 0x198   : > { %v2161_v36 = vadd.f32 1.0, %v2097_v52  ;;  %v1332_v46 = vadd.f32 1.4214138, %v1268_v33  ;;  %v4475_v55 = vpop.eup %3071  ;;  %v4478_v61 = vmul.f32 0.5, %v4395_v9  ;;  %3075 = vrcp.f32 %v1020_v10 }
 0x199   : > { %v818_v53 = vsel %vm754_vm1, -1.0, %v5266_v38  ;;  %v957_v23 = vmul.f32 0.3275911, %v893_v34  ;;  %v1523_v42 = vmul.f32 %v4301_v60, %v1459_v43  ;;  %v4489_v0 = vmul.f32 0.5, %v4431_v30 }
 0x19a   : > { %v2225_v1 = vmul.f32 %v2161_v36, %v5282_v8  ;;  %v2098_v2 = vmul.f32 %v2034_v28, %v818_v53  ;;  %v1396_v19 = vmul.f32 %v4313_v14, %v1332_v46  ;;  %v4486_v13 = vpop.eup %3073  ;;  %v1789_v9 = vmul.f32 %v1725_v39, %v893_v34  ;;  %v5285_v39 = vld [vmem:[#allocation10_spill] sm:$0xff] }
 0x19b   : > { %5283 = vst [vmem:[#allocation6_spill] sm:$0xff] %v4489_v0  ;;  %v894_v10 = vand.u32 2147483647, %v4469_v22  ;;  %v4493_v44 = vmul.f32 0.70710677, %v4472_v16  ;;  %3077 = vpow2.f32 %v1893_v21  ;;  %v1021_v12 = vadd.f32 1.0, %v957_v23 }
 0x19c   : > { %2484 = vmatmul.f32.gmra.mxu2 %v2225_v1  ;;  %v2162_v26 = vadd.f32 1.0, %v2098_v2  ;;  %v1587_v52 = vadd.f32 0.2548296, %v1523_v42  ;;  %v1460_v35 = vadd.f32 -0.28449672, %v1396_v19  ;;  %v4495_v33 = vmul.f32 0.5, %v563_v54 }
 0x19d   : > { %v819_v30 = vsel %vm755_vm2, -1.0, %v5266_v38  ;;  %v4501_v34 = vadd.f32 %v565_v51, %v3414_v32  ;;  %v1141_v43 = vmul.f32 1.0614054, %v4349_v20  ;;  %v1895_v54 = vmul.f32 1.442695, %v1789_v9 }
 0x19e   : > { %5284 = vst [vmem:[#allocation14_spill] sm:$0xff] %v4495_v33  ;;  %v2226_v36 = vmul.f32 %v2162_v26, %v5285_v39  ;;  %v1651_v28 = vmul.f32 %v4301_v60, %v1587_v52  ;;  %v1524_v21 = vmul.f32 %v4313_v14, %v1460_v35  ;;  %v4508_v46 = vpop.eup %3075  ;;  %v1726_v53 = vsub.f32 0.0, %v894_v10  ;;  %v4519_v51 = vld [vmem:[%s5240_s4] ss:$0 sm:$0xff]  ;;  %v455_v35 = vpop.f32.mrf.mxu0 }
 0x19f   : > { %v820_v3 = vsel %vm756_vm3, -1.0, %v5266_v38  ;;  %v1142_v23 = vmul.f32 1.0614054, %v4362_v18  ;;  %v895_v60 = vand.u32 2147483647, %v4493_v44  ;;  %3079 = vrcp.f32 %v1021_v12  ;;  %v2443_v12 = vpop.f32.mrf.mxu2 }
 0x1a0   : > { %2597 = vmatmul.f32.gmra.mxu3 %v2226_v36  ;;  %v1971_v8 = vmul.f32 %v4307_v41, %v1651_v28  ;;  %v1588_v1 = vadd.f32 0.2548296, %v1524_v21  ;;  %v1205_v2 = vadd.f32 -1.4531521, %v1141_v43  ;;  %v958_v42 = vmul.f32 0.3275911, %v894_v10 }
 0x1a1   : > { %v1206_v19 = vadd.f32 -1.4531521, %v1142_v23  ;;  %v4521_v9 = vpop.eup %3077  ;;  %v4525_v41 = vmul.f32 0.70710677, %v4501_v34  ;;  %3081 = vpow2.f32 %v1895_v54  ;;  %v1790_v39 = vmul.f32 %v1726_v53, %v894_v10 }
 0x1a2   : > { %v2035_v24 = vsub.f32 1.0, %v1971_v8  ;;  %v1652_v26 = vmul.f32 %v4313_v14, %v1588_v1  ;;  %v1269_v52 = vmul.f32 %v4349_v20, %v1205_v2  ;;  %v4531_v36 = vsel %vm757_vm0, -1.0, %v5266_v38 }
 0x1a3   : > { %5286 = vst [vmem:[#allocation10_spill] sm:$0xff] %v4525_v41  ;;  %v1270_v28 = vmul.f32 %v4362_v18, %v1206_v19  ;;  %vm758_vm4 = vcmp.lt.f32.partialorder %v4263_v45, 0.0  ;;  %v1727_v43 = vsub.f32 0.0, %v895_v60  ;;  %v1022_v8 = vadd.f32 1.0, %v958_v42  ;;  %v568_v42 = vpop.f32.mrf.mxu1 }
 0x1a4   : > { %v2099_v21 = vmul.f32 %v2035_v24, %v819_v30  ;;  %v1972_v14 = vmul.f32 %v4319_v25, %v1652_v26  ;;  %v1333_v23 = vadd.f32 1.4214138, %v1269_v52  ;;  %v4539_v10 = vadd.f32 %v455_v35, %v3412_v31  ;;  %v2556_v30 = vpop.f32.mrf.mxu3 }
 0x1a5   : > { %v1334_v1 = vadd.f32 1.4214138, %v1270_v28  ;;  %v2444_v6 = vadd.f32 %v4519_v51, %v2443_v12  ;;  %v896_v2 = vand.u32 2147483647, %v4525_v41  ;;  %v4544_v24 = vpop.eup %3079  ;;  %v1897_v25 = vmul.f32 1.442695, %v1790_v39 }
 0x1a6   : > { %v2163_v54 = vadd.f32 1.0, %v2099_v21  ;;  %v2036_v53 = vsub.f32 1.0, %v1972_v14  ;;  %v1397_v19 = vmul.f32 %v4349_v20, %v1333_v23  ;;  %v959_v26 = vmul.f32 0.3275911, %v895_v60 }
 0x1a7   : > { %v1398_v52 = vmul.f32 %v4362_v18, %v1334_v1  ;;  %v2557_v28 = vadd.f32 %v2556_v30, %v2444_v6  ;;  %v1791_v0 = vmul.f32 %v1727_v43, %v895_v60  ;;  %v4548_v21 = vpop.eup %3081  ;;  %3083 = vrcp.f32 %v1022_v8 }
 0x1a8   : > { %v2227_v35 = vmul.f32 %v2163_v54, %v4277_v37  ;;  %v2100_v33 = vmul.f32 %v2036_v53, %v820_v3  ;;  %v1461_v12 = vadd.f32 -0.28449672, %v1397_v19  ;;  %v4551_v14 = vmul.f32 0.5, %v4472_v16 }
 0x1a9   : > { %v1462_v23 = vadd.f32 -0.28449672, %v1398_v52  ;;  %v4554_v41 = vmul.f32 0.70710677, %v4539_v10  ;;  %v1728_v1 = vsub.f32 0.0, %v896_v2  ;;  %2650 = vst [vmem:[%s4557_s25 + $0x8] sm:$0xff] %v2557_v28  ;;  %3085 = vpow2.f32 %v1897_v25  ;;  %v458_v28 = vpop.f32.mrf.mxu0 }
 0x1aa   : > { %2487 = vmatmul.f32.gmra.mxu2 %v2227_v35  ;;  %v2164_v39 = vadd.f32 1.0, %v2100_v33  ;;  %v1525_v6 = vmul.f32 %v4349_v20, %v1461_v12  ;;  %v1143_v37 = vmul.f32 1.0614054, %v4390_v50  ;;  %v1023_v3 = vadd.f32 1.0, %v959_v26 }
 0x1ab   : > { %v4562_v16 = vmul.f32 0.5, %v4501_v34  ;;  %v1526_v60 = vmul.f32 %v4362_v18, %v1462_v23  ;;  %v1899_v8 = vmul.f32 1.442695, %v1791_v0  ;;  %v897_v19 = vand.u32 2147483647, %v4554_v41 }
 0x1ac   : > { %v2228_v43 = vmul.f32 %v2164_v39, %v4289_v11  ;;  %v1589_v33 = vadd.f32 0.2548296, %v1525_v6  ;;  %v1207_v54 = vadd.f32 -1.4531521, %v1143_v37  ;;  %v569_v30 = vadd.f32 %v568_v42, %v3414_v32 }
 0x1ad   : > { %5287 = vst [vmem:[#allocation15_spill] sm:$0xff] %v4562_v16  ;;  %v1590_v53 = vadd.f32 0.2548296, %v1526_v60  ;;  %v1144_v52 = vmul.f32 1.0614054, %v4398_v47  ;;  %v1792_v26 = vmul.f32 %v1728_v1, %v896_v2  ;;  %v4571_v12 = vpop.eup %3083  ;;  %3087 = vrcp.f32 %v1023_v3 }
 0x1ae   : > { %2600 = vmatmul.f32.gmra.mxu3 %v2228_v43  ;;  %v960_v25 = vmul.f32 0.3275911, %v896_v2  ;;  %v1653_v34 = vmul.f32 %v4349_v20, %v1589_v33  ;;  %v1271_v35 = vmul.f32 %v4390_v50, %v1207_v54  ;;  %v822_v11 = vsel %vm758_vm4, -1.0, %v5266_v38 }
 0x1af   : > { %v1654_v0 = vmul.f32 %v4362_v18, %v1590_v53  ;;  %v1208_v42 = vadd.f32 -1.4531521, %v1144_v52  ;;  %vm759_vm5 = vcmp.lt.f32.partialorder %v4298_v27, 0.0  ;;  %3089 = vpow2.f32 %v1899_v8  ;;  %v4582_v39 = vpop.eup %3085  ;;  %v571_v18 = vpop.f32.mrf.mxu1 }
 0x1b0   : > { %v1973_v23 = vmul.f32 %v4357_v7, %v1653_v34  ;;  %v1335_v2 = vadd.f32 1.4214138, %v1271_v35  ;;  %v4580_v20 = vadd.f32 %v458_v28, %v3412_v31  ;;  %v1729_v6 = vsub.f32 0.0, %v897_v19 }
 0x1b1   : > { %v1974_v1 = vmul.f32 %v4368_v17, %v1654_v0  ;;  %v4585_v37 = vmul.f32 0.70710677, %v569_v30  ;;  %v1272_v45 = vmul.f32 %v4398_v47, %v1208_v42  ;;  %v1024_v3 = vadd.f32 1.0, %v960_v25  ;;  %v2446_v17 = vpop.f32.mrf.mxu2 }
 0x1b2   : > { %v1901_v60 = vmul.f32 1.442695, %v1792_v26  ;;  %v2037_v43 = vsub.f32 1.0, %v1973_v23  ;;  %v1399_v8 = vmul.f32 %v4390_v50, %v1335_v2  ;;  %vm760_vm6 = vcmp.lt.f32.partialorder %v4317_v48, 0.0 }
 0x1b3   : > { %v2038_v7 = vsub.f32 1.0, %v1974_v1  ;;  %v4591_v33 = vmul.f32 0.5, %v4539_v10  ;;  %v961_v54 = vmul.f32 0.3275911, %v897_v19  ;;  %v1336_v53 = vadd.f32 1.4214138, %v1272_v45  ;;  %v4600_v26 = vpop.eup %3087 }
 0x1b4   : > { %v2101_v52 = vmul.f32 %v2037_v43, %v4531_v36  ;;  %v1463_v28 = vadd.f32 -0.28449672, %v1399_v8  ;;  %v4595_v34 = vmul.f32 0.70710677, %v4580_v20  ;;  %v4598_v25 = vadd.f32 %v571_v18, %v3414_v32 }
 0x1b5   : > { %5288 = vst [vmem:[#allocation16_spill] sm:$0xff] %v4591_v33  ;;  %v2102_v35 = vmul.f32 %v2038_v7, %v822_v11  ;;  %v1793_v0 = vmul.f32 %v1729_v6, %v897_v19  ;;  %v898_v42 = vand.u32 2147483647, %v4585_v37  ;;  %v1400_v10 = vmul.f32 %v4398_v47, %v1336_v53  ;;  %v4604_v23 = vpop.eup %3089  ;;  %v5291_v7 = vld [vmem:[#allocation7_spill] sm:$0xff] }
 0x1b6   : > { %5289 = vst [vmem:[#allocation17_spill] sm:$0xff] %v4595_v34  ;;  %3091 = vrcp.f32 %v1024_v3  ;;  %v2165_v2 = vadd.f32 1.0, %v2101_v52  ;;  %v1527_v36 = vmul.f32 %v4390_v50, %v1463_v28  ;;  %v2447_v1 = vadd.f32 %v4519_v51, %v2446_v17  ;;  %v2559_v17 = vpop.f32.mrf.mxu3 }
 0x1b7   : > { %3093 = vpow2.f32 %v1901_v60  ;;  %v2166_v45 = vadd.f32 1.0, %v2102_v35  ;;  %v1025_v18 = vadd.f32 1.0, %v961_v54  ;;  %v1464_v43 = vadd.f32 -0.28449672, %v1400_v10 }
 0x1b8   : > { %v2229_v8 = vmul.f32 %v2165_v2, %v4324_v40  ;;  %v1591_v11 = vadd.f32 0.2548296, %v1527_v36  ;;  %v899_v19 = vand.u32 2147483647, %v4595_v34  ;;  %v4611_v6 = vmul.f32 0.70710677, %v4598_v25 }
 0x1b9   : > { %v2230_v53 = vmul.f32 %v2166_v45, %v5291_v7  ;;  %v1903_v3 = vmul.f32 1.442695, %v1793_v0  ;;  %v1730_v52 = vsub.f32 0.0, %v898_v42  ;;  %v1528_v28 = vmul.f32 %v4398_v47, %v1464_v43 }
 0x1ba   : > { %5290 = vst [vmem:[#allocation18_spill] sm:$0xff] %v4611_v6  ;;  %2490 = vmatmul.f32.gmra.mxu2 %v2229_v8  ;;  %v4615_v60 = vmul.f32 0.5, %v569_v30  ;;  %v962_v54 = vmul.f32 0.3275911, %v898_v42  ;;  %v1655_v40 = vmul.f32 %v4390_v50, %v1591_v11  ;;  %v2560_v35 = vadd.f32 %v2559_v17, %v2447_v1  ;;  %v461_v1 = vpop.f32.mrf.mxu0  ;;  %v574_v17 = vpop.f32.mrf.mxu1 }
 0x1bb   : > { %2603 = vmatmul.f32.gmra.mxu3 %v2230_v53  ;;  %3095 = vrcp.f32 %v1025_v18  ;;  %v823_v10 = vsel %vm759_vm5, -1.0, %v5266_v38  ;;  %v1592_v2 = vadd.f32 0.2548296, %v1528_v28  ;;  %v1145_v0 = vmul.f32 1.0614054, %v4437_v56 }
 0x1bc   : > { %5292 = vst [vmem:[#allocation7_spill] sm:$0xff] %v4615_v60  ;;  %v4622_v36 = vpop.eup %3091  ;;  %v1975_v45 = vmul.f32 %v4406_v49, %v1655_v40  ;;  %v1731_v43 = vsub.f32 0.0, %v899_v19  ;;  %v900_v30 = vand.u32 2147483647, %v4611_v6  ;;  %v1146_v50 = vmul.f32 1.0614054, %v4450_v29 }
 0x1bd   : > { %2651 = vst [vmem:[%s4557_s25 + $0x10] sm:$0xff] %v2560_v35  ;;  %v4628_v8 = vpop.eup %3093  ;;  %3097 = vpow2.f32 %v1903_v3  ;;  %v1794_v18 = vmul.f32 %v1730_v52, %v898_v42  ;;  %v1656_v27 = vmul.f32 %v4398_v47, %v1592_v2  ;;  %v1209_v11 = vadd.f32 -1.4531521, %v1145_v0  ;;  %v5293_v40 = vld [vmem:[#allocation11_spill] sm:$0xff]  ;;  %v5294_v47 = vld [vmem:[#allocation12_spill] sm:$0xff] }
 0x1be   : > { %v1026_v7 = vadd.f32 1.0, %v962_v54  ;;  %v2039_v53 = vsub.f32 1.0, %v1975_v45  ;;  %v824_v49 = vsel %vm760_vm6, -1.0, %v5266_v38  ;;  %v1210_v28 = vadd.f32 -1.4531521, %v1146_v50 }
 0x1bf   : > { %vm761_vm7 = vcmp.lt.f32.partialorder %v5293_v40, 0.0  ;;  %v1976_v35 = vmul.f32 %v4416_v4, %v1656_v27  ;;  %v963_v60 = vmul.f32 0.3275911, %v899_v19  ;;  %v1273_v33 = vmul.f32 %v4437_v56, %v1209_v11 }
 0x1c0   : > { %v4638_v42 = vadd.f32 %v461_v1, %v3412_v31  ;;  %vm762_vm8 = vcmp.lt.f32.partialorder %v5294_v47, 0.0  ;;  %v2103_v3 = vmul.f32 %v2039_v53, %v823_v10  ;;  %v1795_v52 = vmul.f32 %v1731_v43, %v899_v19  ;;  %v2449_v43 = vpop.f32.mrf.mxu2  ;;  %v5296_v53 = vld [vmem:[#allocation8_spill] sm:$0xff] }
 0x1c1   : > { %v1732_v54 = vsub.f32 0.0, %v900_v30  ;;  %v1274_v48 = vmul.f32 %v4450_v29, %v1210_v28  ;;  %v4642_v2 = vpop.eup %3095  ;;  %v1905_v0 = vmul.f32 1.442695, %v1794_v18  ;;  %v2040_v45 = vsub.f32 1.0, %v1976_v35 }
 0x1c2   : > { %v1337_v50 = vadd.f32 1.4214138, %v1273_v33  ;;  %v575_v4 = vadd.f32 %v574_v17, %v3414_v32  ;;  %3099 = vrcp.f32 %v1026_v7  ;;  %v2167_v27 = vadd.f32 1.0, %v2103_v3 }
 0x1c3   : > { %v964_v11 = vmul.f32 0.3275911, %v900_v30  ;;  %v1338_v6 = vadd.f32 1.4214138, %v1274_v48  ;;  %v4645_v1 = vpop.eup %3097  ;;  %v2104_v34 = vmul.f32 %v2040_v45, %v824_v49  ;;  %v1027_v16 = vadd.f32 1.0, %v963_v60 }
 0x1c4   : > { %5295 = vst [vmem:[#allocation11_spill] sm:$0xff] %v4645_v1  ;;  %v1401_v19 = vmul.f32 %v4437_v56, %v1337_v50  ;;  %v4649_v10 = vmul.f32 0.70710677, %v4638_v42  ;;  %v2231_v18 = vmul.f32 %v2167_v27, %v5296_v53  ;;  %v1907_v28 = vmul.f32 1.442695, %v1795_v52  ;;  %v5297_v50 = vld [vmem:[#allocation9_spill] sm:$0xff] }
 0x1c5   : > { %v1796_v33 = vmul.f32 %v1732_v54, %v900_v30  ;;  %v1402_v17 = vmul.f32 %v4450_v29, %v1338_v6  ;;  %v2168_v7 = vadd.f32 1.0, %v2104_v34  ;;  %v4654_v35 = vmul.f32 0.5, %v4580_v20  ;;  %v2562_v20 = vpop.f32.mrf.mxu3 }
 0x1c6   : > { %v1465_v3 = vadd.f32 -0.28449672, %v1401_v19  ;;  %v4656_v48 = vmul.f32 0.70710677, %v575_v4  ;;  %3101 = vpow2.f32 %v1905_v0  ;;  %2493 = vmatmul.f32.gmra.mxu2 %v2231_v18  ;;  %v1028_v60 = vadd.f32 1.0, %v964_v11 }
 0x1c7   : > { %v1466_v49 = vadd.f32 -0.28449672, %v1402_v17  ;;  %v2450_v45 = vadd.f32 %v4519_v51, %v2449_v43  ;;  %v2232_v1 = vmul.f32 %v2168_v7, %v5297_v50  ;;  %v4661_v52 = vmul.f32 0.5, %v4598_v25  ;;  %v464_v43 = vpop.f32.mrf.mxu0 }
 0x1c8   : > { %v1529_v6 = vmul.f32 %v4437_v56, %v1465_v3  ;;  %v901_v34 = vand.u32 2147483647, %v4649_v10  ;;  %v4665_v30 = vpop.eup %3099  ;;  %3103 = vrcp.f32 %v1027_v16  ;;  %v1909_v54 = vmul.f32 1.442695, %v1796_v33 }
 0x1c9   : > { %v1530_v0 = vmul.f32 %v4450_v29, %v1466_v49  ;;  %v2563_v27 = vadd.f32 %v2562_v20, %v2450_v45  ;;  %2606 = vmatmul.f32.gmra.mxu3 %v2232_v1  ;;  %3105 = vpow2.f32 %v1907_v28  ;;  %v902_v19 = vand.u32 2147483647, %v4656_v48 }
 0x1ca   : > { %v1593_v11 = vadd.f32 0.2548296, %v1529_v6  ;;  %v1147_v25 = vmul.f32 1.0614054, %v4475_v55  ;;  %3107 = vrcp.f32 %v1028_v60  ;;  %v825_v53 = vsel %vm761_vm7, -1.0, %v5266_v38 }
 0x1cb   : > { %v1594_v18 = vadd.f32 0.2548296, %v1530_v0  ;;  %2652 = vst [vmem:[%s4557_s25 + $0x18] sm:$0xff] %v2563_v27  ;;  %v1148_v16 = vmul.f32 1.0614054, %v4508_v46  ;;  %v826_v1 = vsel %vm762_vm8, -1.0, %v5266_v38  ;;  %v4684_v49 = vadd.f32 %v464_v43, %v3412_v31  ;;  %v577_v27 = vpop.f32.mrf.mxu1 }
 0x1cc   : > { %v1657_v33 = vmul.f32 %v4437_v56, %v1593_v11  ;;  %v1733_v28 = vsub.f32 0.0, %v901_v34  ;;  %v1211_v17 = vadd.f32 -1.4531521, %v1147_v25  ;;  %v4679_v7 = vpop.eup %3101  ;;  %vm763_vm9 = vcmp.lt.f32.partialorder %v4388_v62, 0.0 }
 0x1cd   : > { %v1658_v3 = vmul.f32 %v4450_v29, %v1594_v18  ;;  %v965_v40 = vmul.f32 0.3275911, %v901_v34  ;;  %v1212_v60 = vadd.f32 -1.4531521, %v1148_v16  ;;  %3109 = vpow2.f32 %v1909_v54 }
 0x1ce   : > { %v1977_v56 = vmul.f32 %v4454_v59, %v1657_v33  ;;  %v4688_v45 = vmul.f32 0.5, %v4638_v42  ;;  %v1275_v47 = vmul.f32 %v4475_v55, %v1211_v17  ;;  %v4691_v50 = vpop.eup %3103  ;;  %v4694_v20 = vmul.f32 0.5, %v575_v4 }
 0x1cf   : > { %v1978_v6 = vmul.f32 %v4467_v57, %v1658_v3  ;;  %v1734_v29 = vsub.f32 0.0, %v902_v19  ;;  %v1276_v0 = vmul.f32 %v4508_v46, %v1212_v60  ;;  %v4697_v11 = vpop.eup %3105  ;;  %vm764_vm10 = vcmp.lt.f32.partialorder %v4414_v5, 0.0 }
 0x1d0   : > { %5298 = vst [vmem:[#allocation12_spill] sm:$0xff] %v4688_v45  ;;  %v2041_v59 = vsub.f32 1.0, %v1977_v56  ;;  %vm773_vm11 = vcmp.lt.f32.partialorder %v4649_v10, 0.0  ;;  %v1797_v42 = vmul.f32 %v1733_v28, %v901_v34  ;;  %v1339_v54 = vadd.f32 1.4214138, %v1275_v47  ;;  %v4701_v25 = vpop.eup %3107 }
 0x1d1   : > { %5299 = vst [vmem:[#allocation8_spill] sm:$0xff] %v4694_v20  ;;  %v2042_v43 = vsub.f32 1.0, %v1978_v6  ;;  %v1029_v18 = vadd.f32 1.0, %v965_v40  ;;  %v1340_v57 = vadd.f32 1.4214138, %v1276_v0  ;;  %v4708_v3 = vadd.f32 %v577_v27, %v3414_v32  ;;  %v2452_v6 = vpop.f32.mrf.mxu2 }
 0x1d2   : > { %v4704_v4 = vmul.f32 0.70710677, %v4684_v49  ;;  %v2105_v16 = vmul.f32 %v2041_v59, %v825_v53  ;;  %v966_v33 = vmul.f32 0.3275911, %v902_v19  ;;  %v1403_v17 = vmul.f32 %v4475_v55, %v1339_v54 }
 0x1d3   : > { %v2106_v60 = vmul.f32 %v2042_v43, %v826_v1  ;;  %v4711_v10 = vsel %vm773_vm11, -1.0, %v5266_v38  ;;  %v1798_v34 = vmul.f32 %v1734_v29, %v902_v19  ;;  %v1404_v28 = vmul.f32 %v4508_v46, %v1340_v57  ;;  %v4714_v56 = vpop.eup %3109  ;;  %v5300_v1 = vld [vmem:[#allocation13_spill] sm:$0xff] }
 0x1d4   : > { %v2169_v40 = vadd.f32 1.0, %v2105_v16  ;;  %v1911_v47 = vmul.f32 1.442695, %v1797_v42  ;;  %vm774_vm12 = vcmp.lt.f32.partialorder %v4656_v48, 0.0  ;;  %v1467_v53 = vadd.f32 -0.28449672, %v1403_v17 }
 0x1d5   : > { %v2170_v0 = vadd.f32 1.0, %v2106_v60  ;;  %3111 = vrcp.f32 %v1029_v18  ;;  %v1468_v59 = vadd.f32 -0.28449672, %v1404_v28  ;;  %v903_v27 = vand.u32 2147483647, %v4704_v4  ;;  %v2565_v28 = vpop.f32.mrf.mxu3 }
 0x1d6   : > { %v2233_v54 = vmul.f32 %v2169_v40, %v5300_v1  ;;  %v1030_v43 = vadd.f32 1.0, %v966_v33  ;;  %v1531_v19 = vmul.f32 %v4475_v55, %v1467_v53  ;;  %v4721_v29 = vmul.f32 0.70710677, %v4708_v3 }
 0x1d7   : > { %v2234_v57 = vmul.f32 %v2170_v0, %v4409_v63  ;;  %v1913_v42 = vmul.f32 1.442695, %v1798_v34  ;;  %v1532_v16 = vmul.f32 %v4508_v46, %v1468_v59  ;;  %v2453_v17 = vadd.f32 %v4519_v51, %v2452_v6  ;;  %v467_v0 = vpop.f32.mrf.mxu0 }
 0x1d8   : > { %2496 = vmatmul.f32.gmra.mxu2 %v2233_v54  ;;  %3113 = vpow2.f32 %v1911_v47  ;;  %v4729_v18 = vsel %vm774_vm12, -1.0, %v5266_v38  ;;  %v827_v33 = vsel %vm763_vm9, -1.0, %v5266_v38  ;;  %v1595_v60 = vadd.f32 0.2548296, %v1531_v19 }
 0x1d9   : > { %2609 = vmatmul.f32.gmra.mxu3 %v2234_v57  ;;  %v1596_v63 = vadd.f32 0.2548296, %v1532_v16  ;;  %v1735_v34 = vsub.f32 0.0, %v903_v27  ;;  %v2566_v40 = vadd.f32 %v2565_v28, %v2453_v17  ;;  %v1149_v53 = vmul.f32 1.0614054, %v4544_v24  ;;  %v580_v16 = vpop.f32.mrf.mxu1 }
 0x1da   : > { %3115 = vrcp.f32 %v1030_v43  ;;  %v1659_v47 = vmul.f32 %v4475_v55, %v1595_v60  ;;  %v904_v48 = vand.u32 2147483647, %v4721_v29  ;;  %v1150_v6 = vmul.f32 1.0614054, %v4571_v12 }
 0x1db   : > { %v4738_v59 = vpop.eup %3111  ;;  %3117 = vpow2.f32 %v1913_v42  ;;  %v828_v62 = vsel %vm764_vm10, -1.0, %v5266_v38  ;;  %v1660_v1 = vmul.f32 %v4508_v46, %v1596_v63  ;;  %2653 = vst [vmem:[%s4557_s25 + $0x20] sm:$0xff] %v2566_v40  ;;  %v1213_v54 = vadd.f32 -1.4531521, %v1149_v53 }
 0x1dc   : > { %v1979_v43 = vmul.f32 %v4486_v13, %v1659_v47  ;;  %v4747_v55 = vmul.f32 0.5, %v4684_v49  ;;  %v967_v19 = vmul.f32 0.3275911, %v903_v27  ;;  %v1214_v57 = vadd.f32 -1.4531521, %v1150_v6 }
 0x1dd   : > { %vm765_vm13 = vcmp.lt.f32.partialorder %v4440_v15, 0.0  ;;  %v1980_v42 = vmul.f32 %v4521_v9, %v1660_v1  ;;  %v1799_v17 = vmul.f32 %v1735_v34, %v903_v27  ;;  %v1277_v5 = vmul.f32 %v4544_v24, %v1213_v54  ;;  %v2455_v34 = vpop.f32.mrf.mxu2 }
 0x1de   : > { %5301 = vst [vmem:[#allocation9_spill] sm:$0xff] %v4747_v55  ;;  %v4753_v60 = vadd.f32 %v467_v0, %v3412_v31  ;;  %v4755_v46 = vpop.eup %3113  ;;  %vm766_vm14 = vcmp.lt.f32.partialorder %v4469_v22, 0.0  ;;  %v2043_v13 = vsub.f32 1.0, %v1979_v43  ;;  %vm775_vm15 = vcmp.lt.f32.partialorder %v4704_v4, 0.0  ;;  %v5302_v22 = vld [vmem:[#allocation10_spill] sm:$0xff] }
 0x1df   : > { %v1736_v49 = vsub.f32 0.0, %v904_v48  ;;  %v1278_v28 = vmul.f32 %v4571_v12, %v1214_v57  ;;  %v2044_v63 = vsub.f32 1.0, %v1980_v42  ;;  %vm776_vm1 = vcmp.lt.f32.partialorder %v4721_v29, 0.0 }
 0x1e0   : > { %v1341_v9 = vadd.f32 1.4214138, %v1277_v5  ;;  %v581_v27 = vadd.f32 %v580_v16, %v3414_v32  ;;  %v4762_v40 = vpop.eup %3115  ;;  %v2107_v53 = vmul.f32 %v2043_v13, %v827_v33  ;;  %v1031_v47 = vadd.f32 1.0, %v967_v19 }
 0x1e1   : > { %v968_v6 = vmul.f32 0.3275911, %v904_v48  ;;  %v1342_v0 = vadd.f32 1.4214138, %v1278_v28  ;;  %v4764_v1 = vpop.eup %3117  ;;  %v2108_v54 = vmul.f32 %v2044_v63, %v828_v62  ;;  %v1915_v43 = vmul.f32 1.442695, %v1799_v17 }
 0x1e2   : > { %v1405_v55 = vmul.f32 %v4544_v24, %v1341_v9  ;;  %v4768_v57 = vmul.f32 0.70710677, %v4753_v60  ;;  %v2171_v42 = vadd.f32 1.0, %v2107_v53  ;;  %v1800_v5 = vmul.f32 %v1736_v49, %v904_v48 }
 0x1e3   : > { %v1406_v16 = vmul.f32 %v4571_v12, %v1342_v0  ;;  %v2456_v20 = vadd.f32 %v4519_v51, %v2455_v34  ;;  %v2172_v45 = vadd.f32 1.0, %v2108_v54  ;;  %v4773_v33 = vmul.f32 0.5, %v4708_v3  ;;  %v470_v0 = vpop.f32.mrf.mxu0 }
 0x1e4   : > { %v1469_v19 = vadd.f32 -0.28449672, %v1405_v55  ;;  %v4775_v13 = vmul.f32 0.70710677, %v581_v27  ;;  %v2235_v62 = vmul.f32 %v2171_v42, %v4459_v58  ;;  %v4781_v17 = vsel %vm775_vm15, -1.0, %v5266_v38  ;;  %v2568_v58 = vpop.f32.mrf.mxu3 }
 0x1e5   : > { %v1032_v28 = vadd.f32 1.0, %v968_v6  ;;  %v1470_v48 = vadd.f32 -0.28449672, %v1406_v16  ;;  %v2236_v49 = vmul.f32 %v2172_v45, %v4478_v61  ;;  %v4787_v63 = vsel %vm776_vm1, -1.0, %v5266_v38 }
 0x1e6   : > { %v1533_v3 = vmul.f32 %v4544_v24, %v1469_v19  ;;  %v905_v55 = vand.u32 2147483647, %v4768_v57  ;;  %2499 = vmatmul.f32.gmra.mxu2 %v2235_v62  ;;  %3119 = vrcp.f32 %v1031_v47  ;;  %v1917_v4 = vmul.f32 1.442695, %v1800_v5 }
 0x1e7   : > { %v1534_v9 = vmul.f32 %v4571_v12, %v1470_v48  ;;  %v2569_v34 = vadd.f32 %v2568_v58, %v2456_v20  ;;  %2612 = vmatmul.f32.gmra.mxu3 %v2236_v49  ;;  %3121 = vpow2.f32 %v1915_v43  ;;  %v906_v45 = vand.u32 2147483647, %v4775_v13 }
 0x1e8   : > { %v1597_v61 = vadd.f32 0.2548296, %v1533_v3  ;;  %v1151_v29 = vmul.f32 1.0614054, %v4600_v26  ;;  %3123 = vrcp.f32 %v1032_v28  ;;  %v829_v53 = vsel %vm765_vm13, -1.0, %v5266_v38 }
 0x1e9   : > { %v1598_v6 = vadd.f32 0.2548296, %v1534_v9  ;;  %2654 = vst [vmem:[%s4557_s25 + $0x28] sm:$0xff] %v2569_v34  ;;  %v1152_v47 = vmul.f32 1.0614054, %v4622_v36  ;;  %v830_v20 = vsel %vm766_vm14, -1.0, %v5266_v38  ;;  %3125 = vpow2.f32 %v1917_v4 }
 0x1ea   : > { %v1661_v54 = vmul.f32 %v4544_v24, %v1597_v61  ;;  %v1737_v43 = vsub.f32 0.0, %v905_v55  ;;  %v1215_v42 = vadd.f32 -1.4531521, %v1151_v29  ;;  %vm767_vm2 = vcmp.lt.f32.partialorder %v4493_v44, 0.0  ;;  %v583_v61 = vpop.f32.mrf.mxu1 }
 0x1eb   : > { %v1662_v5 = vmul.f32 %v4571_v12, %v1598_v6  ;;  %v969_v15 = vmul.f32 0.3275911, %v905_v55  ;;  %v1216_v16 = vadd.f32 -1.4531521, %v1152_v47  ;;  %v1738_v62 = vsub.f32 0.0, %v906_v45 }
 0x1ec   : > { %v1981_v19 = vmul.f32 %v4548_v21, %v1661_v54  ;;  %v1279_v28 = vmul.f32 %v4600_v26, %v1215_v42  ;;  %v4808_v24 = vadd.f32 %v470_v0, %v3412_v31  ;;  %v4810_v48 = vpop.eup %3119  ;;  %vm768_vm3 = vcmp.lt.f32.partialorder %v5302_v22, 0.0 }
 0x1ed   : > { %v1982_v49 = vmul.f32 %v4582_v39, %v1662_v5  ;;  %v4815_v3 = vmul.f32 0.5, %v4753_v60  ;;  %v4817_v12 = vmul.f32 0.5, %v581_v27  ;;  %v1280_v58 = vmul.f32 %v4622_v36, %v1216_v16  ;;  %v4820_v21 = vpop.eup %3121 }
 0x1ee   : > { %v2045_v4 = vsub.f32 1.0, %v1981_v19  ;;  %vm777_vm0 = vcmp.lt.f32.partialorder %v4768_v57, 0.0  ;;  %v1801_v9 = vmul.f32 %v1737_v43, %v905_v55  ;;  %v1343_v34 = vadd.f32 1.4214138, %v1279_v28  ;;  %v4823_v29 = vpop.eup %3123 }
 0x1ef   : > { %5303 = vst [vmem:[#allocation13_spill] sm:$0xff] %v4817_v12  ;;  %v2046_v6 = vsub.f32 1.0, %v1982_v49  ;;  %v1033_v47 = vadd.f32 1.0, %v969_v15  ;;  %v970_v39 = vmul.f32 0.3275911, %v906_v45  ;;  %v1802_v54 = vmul.f32 %v1738_v62, %v906_v45  ;;  %v4829_v5 = vpop.eup %3125 }
 0x1f0   : > { %v1344_v0 = vadd.f32 1.4214138, %v1280_v58  ;;  %v2109_v60 = vmul.f32 %v2045_v4, %v829_v53  ;;  %v1407_v27 = vmul.f32 %v4600_v26, %v1343_v34  ;;  %v4827_v42 = vmul.f32 0.70710677, %v4808_v24  ;;  %v2458_v53 = vpop.f32.mrf.mxu2  ;;  %v5304_v58 = vld [vmem:[#allocation6_spill] sm:$0xff] }
 0x1f1   : > { %v2110_v16 = vmul.f32 %v2046_v6, %v830_v20  ;;  %v4832_v57 = vsel %vm777_vm0, -1.0, %v5266_v38  ;;  %v584_v43 = vadd.f32 %v583_v61, %v3414_v32  ;;  %v1919_v19 = vmul.f32 1.442695, %v1801_v9 }
 0x1f2   : > { %v1408_v55 = vmul.f32 %v4622_v36, %v1344_v0  ;;  %v2173_v15 = vadd.f32 1.0, %v2109_v60  ;;  %vm778_vm4 = vcmp.lt.f32.partialorder %v4775_v13, 0.0  ;;  %v1471_v45 = vadd.f32 -0.28449672, %v1407_v27  ;;  %v5305_v0 = vld [vmem:[#allocation14_spill] sm:$0xff]  ;;  %v2571_v27 = vpop.f32.mrf.mxu3 }
 0x1f3   : > { %v2174_v62 = vadd.f32 1.0, %v2110_v16  ;;  %3127 = vrcp.f32 %v1033_v47  ;;  %v1034_v28 = vadd.f32 1.0, %v970_v39  ;;  %v1921_v20 = vmul.f32 1.442695, %v1802_v54 }
 0x1f4   : > { %v1472_v49 = vadd.f32 -0.28449672, %v1408_v55  ;;  %v2237_v4 = vmul.f32 %v2173_v15, %v5304_v58  ;;  %v1535_v34 = vmul.f32 %v4600_v26, %v1471_v45  ;;  %v907_v6 = vand.u32 2147483647, %v4827_v42  ;;  %v473_v45 = vpop.f32.mrf.mxu0 }
 0x1f5   : > { %v2238_v12 = vmul.f32 %v2174_v62, %v5305_v0  ;;  %v4842_v9 = vmul.f32 0.70710677, %v584_v43  ;;  %v2459_v60 = vadd.f32 %v4519_v51, %v2458_v53  ;;  %3129 = vpow2.f32 %v1919_v19 }
 0x1f6   : > { %v1536_v61 = vmul.f32 %v4622_v36, %v1472_v49  ;;  %2502 = vmatmul.f32.gmra.mxu2 %v2237_v4  ;;  %v4848_v47 = vsel %vm778_vm4, -1.0, %v5266_v38  ;;  %v831_v39 = vsel %vm767_vm2, -1.0, %v5266_v38  ;;  %v1599_v54 = vadd.f32 0.2548296, %v1535_v34  ;;  %v586_v34 = vpop.f32.mrf.mxu1 }
 0x1f7   : > { %2615 = vmatmul.f32.gmra.mxu3 %v2238_v12  ;;  %3131 = vrcp.f32 %v1034_v28  ;;  %v2572_v55 = vadd.f32 %v2571_v27, %v2459_v60  ;;  %v1153_v15 = vmul.f32 1.0614054, %v4642_v2  ;;  %v832_v13 = vsel %vm768_vm3, -1.0, %v5266_v38 }
 0x1f8   : > { %v1600_v16 = vadd.f32 0.2548296, %v1536_v61  ;;  %v1663_v19 = vmul.f32 %v4600_v26, %v1599_v54  ;;  %v1739_v53 = vsub.f32 0.0, %v907_v6  ;;  %v1154_v44 = vmul.f32 1.0614054, %v4665_v30 }
 0x1f9   : > { %v4859_v62 = vpop.eup %3127  ;;  %3133 = vpow2.f32 %v1921_v20  ;;  %v908_v28 = vand.u32 2147483647, %v4842_v9  ;;  %2655 = vst [vmem:[%s4557_s25 + $0x30] sm:$0xff] %v2572_v55  ;;  %v1217_v49 = vadd.f32 -1.4531521, %v1153_v15  ;;  %v4866_v26 = vmul.f32 0.5, %v4808_v24  ;;  %v2461_v15 = vpop.f32.mrf.mxu2 }
 0x1fa   : > { %v1664_v12 = vmul.f32 %v4622_v36, %v1600_v16  ;;  %v1983_v58 = vmul.f32 %v4604_v23, %v1663_v19  ;;  %v1218_v4 = vadd.f32 -1.4531521, %v1154_v44  ;;  %v4869_v22 = vadd.f32 %v473_v45, %v3412_v31 }
 0x1fb   : > { %5306 = vst [vmem:[#allocation10_spill] sm:$0xff] %v4866_v26  ;;  %v971_v61 = vmul.f32 0.3275911, %v907_v6  ;;  %v4872_v20 = vmul.f32 0.5, %v584_v43  ;;  %v1281_v36 = vmul.f32 %v4642_v2, %v1217_v49  ;;  %v4875_v60 = vpop.eup %3129  ;;  %vm779_vm5 = vcmp.lt.f32.partialorder %v4827_v42, 0.0 }
 0x1fc   : > { %5307 = vst [vmem:[#allocation6_spill] sm:$0xff] %v4869_v22  ;;  %v1984_v0 = vmul.f32 %v4628_v8, %v1664_v12  ;;  %v2047_v54 = vsub.f32 1.0, %v1983_v58  ;;  %v1803_v23 = vmul.f32 %v1739_v53, %v907_v6  ;;  %v1282_v24 = vmul.f32 %v4665_v30, %v1218_v4 }
 0x1fd   : > { %5308 = vst [vmem:[#allocation14_spill] sm:$0xff] %v4872_v20  ;;  %v4879_v27 = vpop.eup %3131  ;;  %vm769_vm6 = vcmp.lt.f32.partialorder %v4554_v41, 0.0  ;;  %vm770_vm7 = vcmp.lt.f32.partialorder %v4585_v37, 0.0  ;;  %v972_v16 = vmul.f32 0.3275911, %v908_v28  ;;  %v4884_v55 = vadd.f32 %v586_v34, %v3414_v32 }
 0x1fe   : > { %v2048_v8 = vsub.f32 1.0, %v1984_v0  ;;  %v1345_v43 = vadd.f32 1.4214138, %v1281_v36  ;;  %v2111_v45 = vmul.f32 %v2047_v54, %v831_v39  ;;  %vm780_vm8 = vcmp.lt.f32.partialorder %v4842_v9, 0.0 }
 0x1ff   : > { %5309 = vst [vmem:[#allocation19_spill] sm:$0xff] %v4884_v55  ;;  %v1346_v19 = vadd.f32 1.4214138, %v1282_v24  ;;  %v4888_v6 = vmul.f32 0.70710677, %v4869_v22  ;;  %v4890_v53 = vpop.eup %3133  ;;  %v1035_v12 = vadd.f32 1.0, %v971_v61  ;;  %v2462_v36 = vadd.f32 %v4519_v51, %v2461_v15  ;;  %v2574_v22 = vpop.f32.mrf.mxu3 }
 0x200   : > { %v2112_v44 = vmul.f32 %v2048_v8, %v832_v13  ;;  %v1740_v49 = vsub.f32 0.0, %v908_v28  ;;  %v1409_v58 = vmul.f32 %v4642_v2, %v1345_v43  ;;  %v2175_v4 = vadd.f32 1.0, %v2111_v45  ;;  %v5310_v8 = vld [vmem:[#allocation15_spill] sm:$0xff]  ;;  %v476_v15 = vpop.f32.mrf.mxu0 }
 0x201   : > { %v1923_v0 = vmul.f32 1.442695, %v1803_v23  ;;  %v1410_v34 = vmul.f32 %v4665_v30, %v1346_v19  ;;  %v1036_v54 = vadd.f32 1.0, %v972_v16  ;;  %v4896_v24 = vmul.f32 0.70710677, %v4884_v55  ;;  %v5311_v19 = vld [vmem:[#allocation17_spill] sm:$0xff] }
 0x202   : > { %v2176_v39 = vadd.f32 1.0, %v2112_v44  ;;  %v1473_v20 = vadd.f32 -0.28449672, %v1409_v58  ;;  %v2239_v26 = vmul.f32 %v2175_v4, %v4551_v14  ;;  %v4902_v13 = vsel %vm779_vm5, -1.0, %v5266_v38 }
 0x203   : > { %v1474_v61 = vadd.f32 -0.28449672, %v1410_v34  ;;  %v909_v23 = vand.u32 2147483647, %v4888_v6  ;;  %3135 = vrcp.f32 %v1035_v12  ;;  %v1804_v51 = vmul.f32 %v1740_v49, %v908_v28 }
 0x204   : > { %v2240_v43 = vmul.f32 %v2176_v39, %v5310_v8  ;;  %v1537_v16 = vmul.f32 %v4642_v2, %v1473_v20  ;;  %2505 = vmatmul.f32.gmra.mxu2 %v2239_v26  ;;  %3137 = vpow2.f32 %v1923_v0  ;;  %v4910_v14 = vsel %vm780_vm8, -1.0, %v5266_v38 }
 0x205   : > { %v1538_v42 = vmul.f32 %v4665_v30, %v1474_v61  ;;  %v2575_v45 = vadd.f32 %v2574_v22, %v2462_v36  ;;  %vm771_vm9 = vcmp.lt.f32.partialorder %v5311_v19, 0.0  ;;  %3139 = vrcp.f32 %v1036_v54  ;;  %v589_v61 = vpop.f32.mrf.mxu1  ;;  %v4971_v19 = vld [vmem:[%s5240_s4] ss:$0 sm:$0xff] }
 0x206   : > { %2618 = vmatmul.f32.gmra.mxu3 %v2240_v43  ;;  %v1601_v44 = vadd.f32 0.2548296, %v1537_v16  ;;  %v910_v28 = vand.u32 2147483647, %v4896_v24  ;;  %v1155_v20 = vmul.f32 1.0614054, %v4691_v50  ;;  %v4919_v9 = vadd.f32 %v476_v15, %v3412_v31 }
 0x207   : > { %v1602_v12 = vadd.f32 0.2548296, %v1538_v42  ;;  %v1741_v26 = vsub.f32 0.0, %v909_v23  ;;  %2656 = vst [vmem:[%s4557_s25 + $0x38] sm:$0xff] %v2575_v45  ;;  %v1156_v49 = vmul.f32 1.0614054, %v4701_v25 }
 0x208   : > { %5312 = vst [vmem:[#allocation15_spill] sm:$0xff] %v4919_v9  ;;  %v1925_v58 = vmul.f32 1.442695, %v1804_v51  ;;  %v1665_v22 = vmul.f32 %v4642_v2, %v1601_v44  ;;  %v973_v4 = vmul.f32 0.3275911, %v909_v23  ;;  %v833_v34 = vsel %vm769_vm6, -1.0, %v5266_v38 }
 0x209   : > { %v1219_v0 = vadd.f32 -1.4531521, %v1155_v20  ;;  %v834_v36 = vsel %vm770_vm7, -1.0, %v5266_v38  ;;  %v1666_v39 = vmul.f32 %v4665_v30, %v1602_v12  ;;  %v1220_v54 = vadd.f32 -1.4531521, %v1156_v49  ;;  %v4929_v8 = vpop.eup %3135  ;;  %v5313_v43 = vld [vmem:[#allocation11_spill] sm:$0xff] }
 0x20a   : > { %v1985_v51 = vmul.f32 %v5313_v43, %v1665_v22  ;;  %v1742_v16 = vsub.f32 0.0, %v910_v28  ;;  %v4934_v15 = vmul.f32 0.70710677, %v4919_v9  ;;  %v4936_v41 = vpop.eup %3137  ;;  %vm781_vm10 = vcmp.lt.f32.partialorder %v4888_v6, 0.0  ;;  %v2464_v22 = vpop.f32.mrf.mxu2 }
 0x20b   : > { %v1283_v2 = vmul.f32 %v4691_v50, %v1219_v0  ;;  %v1986_v42 = vmul.f32 %v4679_v7, %v1666_v39  ;;  %v1805_v37 = vmul.f32 %v1741_v26, %v909_v23  ;;  %v1284_v30 = vmul.f32 %v4701_v25, %v1220_v54  ;;  %v4941_v45 = vpop.eup %3139  ;;  %v2577_v0 = vpop.f32.mrf.mxu3  ;;  %v5316_v7 = vld [vmem:[#allocation18_spill] sm:$0xff] }
 0x20c   : > { %5314 = vst [vmem:[#allocation17_spill] sm:$0xff] %v4934_v15  ;;  %v2049_v44 = vsub.f32 1.0, %v1985_v51  ;;  %v1037_v20 = vadd.f32 1.0, %v973_v4  ;;  %v4944_v49 = vadd.f32 %v589_v61, %v3414_v32  ;;  %3141 = vpow2.f32 %v1925_v58 }
 0x20d   : > { %v1347_v12 = vadd.f32 1.4214138, %v1283_v2  ;;  %v2050_v43 = vsub.f32 1.0, %v1986_v42  ;;  %v974_v9 = vmul.f32 0.3275911, %v910_v28  ;;  %vm772_vm11 = vcmp.lt.f32.partialorder %v5316_v7, 0.0 }
 0x20e   : > { %5315 = vst [vmem:[#allocation11_spill] sm:$0xff] %v4944_v49  ;;  %v1348_v55 = vadd.f32 1.4214138, %v1284_v30  ;;  %v2113_v39 = vmul.f32 %v2049_v44, %v833_v34  ;;  %v1806_v23 = vmul.f32 %v1742_v16, %v910_v28  ;;  %v911_v54 = vand.u32 2147483647, %v4934_v15  ;;  %v5319_v44 = vld [vmem:[#allocation16_spill] sm:$0xff] }
 0x20f   : > { %v1411_v26 = vmul.f32 %v4691_v50, %v1347_v12  ;;  %v2114_v51 = vmul.f32 %v2050_v43, %v834_v36  ;;  %v4952_v4 = vsel %vm781_vm10, -1.0, %v5266_v38  ;;  %v1927_v61 = vmul.f32 1.442695, %v1805_v37 }
 0x210   : > { %5317 = vst [vmem:[#allocation18_spill] sm:$0xff] %v4952_v4  ;;  %v1412_v58 = vmul.f32 %v4701_v25, %v1348_v55  ;;  %v2177_v2 = vadd.f32 1.0, %v2113_v39  ;;  %3143 = vrcp.f32 %v1037_v20  ;;  %v4956_v30 = vmul.f32 0.70710677, %v4944_v49  ;;  %v479_v20 = vpop.f32.mrf.mxu0  ;;  %v5320_v39 = vld [vmem:[#allocation7_spill] sm:$0xff] }
 0x211   : > { %v1475_v42 = vadd.f32 -0.28449672, %v1411_v26  ;;  %v2178_v28 = vadd.f32 1.0, %v2114_v51  ;;  %v1038_v34 = vadd.f32 1.0, %v974_v9  ;;  %v835_v36 = vsel %vm771_vm9, -1.0, %v5266_v38 }
 0x212   : > { %5318 = vst [vmem:[#allocation20_spill] sm:$0xff] %v4956_v30  ;;  %v1476_v16 = vadd.f32 -0.28449672, %v1412_v58  ;;  %v2241_v6 = vmul.f32 %v2177_v2, %v5319_v44  ;;  %vm782_vm12 = vcmp.lt.f32.partialorder %v4896_v24, 0.0  ;;  %v1929_v37 = vmul.f32 1.442695, %v1806_v23  ;;  %v4964_v43 = vpop.eup %3141  ;;  %v592_v2 = vpop.f32.mrf.mxu1 }
 0x213   : > { %v1539_v55 = vmul.f32 %v4691_v50, %v1475_v42  ;;  %v1743_v12 = vsub.f32 0.0, %v911_v54  ;;  %v2242_v26 = vmul.f32 %v2178_v28, %v5320_v39  ;;  %v975_v51 = vmul.f32 0.3275911, %v911_v54  ;;  %v2580_v4 = vpop.f32.mrf.mxu3 }
 0x214   : > { %v1540_v9 = vmul.f32 %v4701_v25, %v1476_v16  ;;  %v2465_v58 = vadd.f32 %v4971_v19, %v2464_v22  ;;  %2508 = vmatmul.f32.gmra.mxu2 %v2241_v6  ;;  %3145 = vpow2.f32 %v1927_v61  ;;  %v912_v42 = vand.u32 2147483647, %v4956_v30  ;;  %v2467_v30 = vpop.f32.mrf.mxu2 }
 0x215   : > { %v1603_v23 = vadd.f32 0.2548296, %v1539_v55  ;;  %v1157_v44 = vmul.f32 1.0614054, %v4738_v59  ;;  %2621 = vmatmul.f32.gmra.mxu3 %v2242_v26  ;;  %v1158_v39 = vmul.f32 1.0614054, %v4762_v40  ;;  %v4978_v49 = vadd.f32 %v479_v20, %v3412_v31 }
 0x216   : > { %v1604_v28 = vadd.f32 0.2548296, %v1540_v9  ;;  %v2578_v16 = vadd.f32 %v2577_v0, %v2465_v58  ;;  %v4980_v15 = vpop.eup %3143  ;;  %v1807_v6 = vmul.f32 %v1743_v12, %v911_v54  ;;  %v4984_v55 = vadd.f32 %v592_v2, %v3414_v32 }
 0x217   : > { %v1667_v22 = vmul.f32 %v4691_v50, %v1603_v23  ;;  %v1221_v61 = vadd.f32 -1.4531521, %v1157_v44  ;;  %3147 = vrcp.f32 %v1038_v34  ;;  %v1222_v0 = vadd.f32 -1.4531521, %v1158_v39 }
 0x218   : > { %5321 = vst [vmem:[#allocation16_spill] sm:$0xff] %v4984_v55  ;;  %v1668_v26 = vmul.f32 %v4701_v25, %v1604_v28  ;;  %v4989_v9 = vmul.f32 0.70710677, %v4978_v49  ;;  %v976_v20 = vmul.f32 0.3275911, %v912_v42  ;;  %v836_v32 = vsel %vm772_vm11, -1.0, %v5266_v38 }
 0x219   : > { %2657 = vst [vmem:[%s4557_s25 + $0x40] sm:$0xff] %v2578_v16  ;;  %v1987_v31 = vmul.f32 %v4697_v11, %v1667_v22  ;;  %v1285_v50 = vmul.f32 %v4738_v59, %v1221_v61  ;;  %v4994_v54 = vmul.f32 0.70710677, %v4984_v55  ;;  %v1286_v25 = vmul.f32 %v4762_v40, %v1222_v0 }
 0x21a   : > { %v1988_v34 = vmul.f32 %v4714_v56, %v1668_v26  ;;  %v5002_v12 = vand.u32 2147483647, %v4989_v9  ;;  %v5004_v58 = vpop.eup %3145  ;;  %v1039_v2 = vadd.f32 1.0, %v975_v51  ;;  %v1931_v23 = vmul.f32 1.442695, %v1807_v6 }
 0x21b   : > { %v2051_v11 = vsub.f32 1.0, %v1987_v31  ;;  %v1349_v44 = vadd.f32 1.4214138, %v1285_v50  ;;  %v1744_v16 = vsub.f32 0.0, %v912_v42  ;;  %v1350_v39 = vadd.f32 1.4214138, %v1286_v25 }
 0x21c   : > { %v2052_v28 = vsub.f32 1.0, %v1988_v34  ;;  %v977_v22 = vmul.f32 0.3275911, %v5002_v12  ;;  %v1040_v61 = vadd.f32 1.0, %v976_v20  ;;  %v5009_v26 = vand.u32 2147483647, %v4994_v54 }
 0x21d   : > { %v2115_v7 = vmul.f32 %v2051_v11, %v835_v36  ;;  %v1413_v56 = vmul.f32 %v4738_v59, %v1349_v44  ;;  %v5011_v0 = vpop.eup %3147  ;;  %v5016_v51 = vsel %vm782_vm12, -1.0, %v5266_v38  ;;  %3149 = vpow2.f32 %v1929_v37  ;;  %v2440_v44 = vpop.f32.mrf.mxu0 }
 0x21e   : > { %v2116_v6 = vmul.f32 %v2052_v28, %v836_v32  ;;  %v1414_v31 = vmul.f32 %v4762_v40, %v1350_v39  ;;  %3151 = vrcp.f32 %v1039_v2  ;;  %v1041_v20 = vadd.f32 1.0, %v977_v22  ;;  %v2470_v32 = vpop.f32.mrf.mxu2  ;;  %v2583_v28 = vpop.f32.mrf.mxu3 }
 0x21f   : > { %v2179_v50 = vadd.f32 1.0, %v2115_v7  ;;  %v1477_v36 = vadd.f32 -0.28449672, %v1413_v56  ;;  %3153 = vpow2.f32 %v1931_v23  ;;  %v5019_v25 = vmul.f32 %v1744_v16, %v912_v42 }
 0x220   : > { %v2180_v34 = vadd.f32 1.0, %v2116_v6  ;;  %v1478_v11 = vadd.f32 -0.28449672, %v1414_v31  ;;  %3155 = vrcp.f32 %v1040_v61  ;;  %v978_v37 = vmul.f32 0.3275911, %v5009_v26 }
 0x221   : > { %v2243_v55 = vmul.f32 %v2179_v50, %v4654_v35  ;;  %v1541_v24 = vmul.f32 %v4738_v59, %v1477_v36  ;;  %v1745_v22 = vsub.f32 0.0, %v5002_v12  ;;  %v2468_v42 = vadd.f32 %v4971_v19, %v2467_v30  ;;  %v2553_v36 = vpop.f32.mrf.mxu1 }
 0x222   : > { %v2244_v39 = vmul.f32 %v2180_v34, %v4661_v52  ;;  %v1542_v2 = vmul.f32 %v4762_v40, %v1478_v11  ;;  %3157 = vrcp.f32 %v1041_v20  ;;  %v1746_v35 = vsub.f32 0.0, %v5009_v26 }
 0x223   : > { %2511 = vmatmul.f32.gmra.mxu2 %v2243_v55  ;;  %v1605_v23 = vadd.f32 0.2548296, %v1541_v24  ;;  %v1159_v16 = vmul.f32 1.0614054, %v4810_v48  ;;  %v5030_v7 = vpop.eup %3149  ;;  %v2581_v56 = vadd.f32 %v2580_v4, %v2468_v42  ;;  %v1160_v52 = vmul.f32 1.0614054, %v4823_v29 }
 0x224   : > { %2624 = vmatmul.f32.gmra.mxu3 %v2244_v39  ;;  %v1606_v61 = vadd.f32 0.2548296, %v1542_v2  ;;  %v2441_v6 = vadd.f32 %v4971_v19, %v2440_v44  ;;  %v5034_v31 = vpop.eup %3151  ;;  %v1042_v55 = vadd.f32 1.0, %v978_v37  ;;  %v2471_v20 = vadd.f32 %v4971_v19, %v2470_v32 }
 0x225   : > { %v1669_v30 = vmul.f32 %v4738_v59, %v1605_v23  ;;  %v1223_v50 = vadd.f32 -1.4531521, %v1159_v16  ;;  %v5038_v34 = vpop.eup %3153  ;;  %2658 = vst [vmem:[%s4557_s25 + $0x48] sm:$0xff] %v2581_v56  ;;  %v1224_v4 = vadd.f32 -1.4531521, %v1160_v52  ;;  %vm785_vm15 = vcmp.lt.f32.partialorder %v4989_v9, 0.0 }
 0x226   : > { %v1670_v11 = vmul.f32 %v4762_v40, %v1606_v61  ;;  %v2554_v24 = vadd.f32 %v2553_v36, %v2441_v6  ;;  %v1161_v44 = vmul.f32 1.0614054, %v4859_v62  ;;  %v5043_v39 = vpop.eup %3155  ;;  %v2584_v2 = vadd.f32 %v2583_v28, %v2471_v20  ;;  %v2473_v6 = vpop.f32.mrf.mxu2 }
 0x227   : > { %v1989_v59 = vmul.f32 %v4755_v46, %v1669_v30  ;;  %v1287_v37 = vmul.f32 %v4810_v48, %v1223_v50  ;;  %v1162_v42 = vmul.f32 1.0614054, %v4879_v27  ;;  %v1288_v23 = vmul.f32 %v4823_v29, %v1224_v4  ;;  %v2586_v30 = vpop.f32.mrf.mxu3 }
 0x228   : > { %v1990_v32 = vmul.f32 %v4764_v1, %v1670_v11  ;;  %2649 = vst [vmem:[%s4557_s25] sm:$0xff] %v2554_v24  ;;  %v1225_v40 = vadd.f32 -1.4531521, %v1161_v44  ;;  %v1163_v16 = vmul.f32 1.0614054, %v4929_v8  ;;  %v5052_v61 = vpop.eup %3157  ;;  %3159 = vrcp.f32 %v1042_v55 }
 0x229   : > { %v2053_v56 = vsub.f32 1.0, %v1989_v59  ;;  %v1351_v52 = vadd.f32 1.4214138, %v1287_v37  ;;  %2659 = vst [vmem:[%s4557_s25 + $0x50] sm:$0xff] %v2584_v2  ;;  %v1226_v46 = vadd.f32 -1.4531521, %v1162_v42  ;;  %v2474_v1 = vadd.f32 %v4971_v19, %v2473_v6 }
 0x22a   : > { %v2054_v28 = vsub.f32 1.0, %v1990_v32  ;;  %v1352_v50 = vadd.f32 1.4214138, %v1288_v23  ;;  %v1289_v36 = vmul.f32 %v4859_v62, %v1225_v40  ;;  %v1227_v24 = vadd.f32 -1.4531521, %v1163_v16  ;;  %v5322_v16 = vld [vmem:[#allocation12_spill] sm:$0xff] }
 0x22b   : > { %v2117_v20 = vmul.f32 %v2053_v56, %v4711_v10  ;;  %v1415_v11 = vmul.f32 %v4810_v48, %v1351_v52  ;;  %v1290_v4 = vmul.f32 %v4879_v27, %v1226_v46  ;;  %v2587_v37 = vadd.f32 %v2586_v30, %v2474_v1 }
 0x22c   : > { %v2118_v55 = vmul.f32 %v2054_v28, %v4729_v18  ;;  %v1416_v44 = vmul.f32 %v4823_v29, %v1352_v50  ;;  %v1353_v59 = vadd.f32 1.4214138, %v1289_v36  ;;  %v1291_v23 = vmul.f32 %v4929_v8, %v1227_v24  ;;  %v5323_v50 = vld [vmem:[#allocation8_spill] sm:$0xff] }
 0x22d   : > { %v2181_v2 = vadd.f32 1.0, %v2117_v20  ;;  %v1479_v42 = vadd.f32 -0.28449672, %v1415_v11  ;;  %v1354_v32 = vadd.f32 1.4214138, %v1290_v4  ;;  %2660 = vst [vmem:[%s4557_s25 + $0x58] sm:$0xff] %v2587_v37 }
 0x22e   : > { %v2182_v40 = vadd.f32 1.0, %v2118_v55  ;;  %v1480_v6 = vadd.f32 -0.28449672, %v1416_v44  ;;  %v1417_v10 = vmul.f32 %v4859_v62, %v1353_v59  ;;  %v1164_v56 = vmul.f32 1.0614054, %v4941_v45  ;;  %v5066_v52 = vpop.eup %3159  ;;  %v2476_v44 = vpop.f32.mrf.mxu2 }
 0x22f   : > { %v2245_v18 = vmul.f32 %v2181_v2, %v5322_v16  ;;  %v1543_v46 = vmul.f32 %v4810_v48, %v1479_v42  ;;  %v1418_v30 = vmul.f32 %v4879_v27, %v1354_v32  ;;  %v1355_v28 = vadd.f32 1.4214138, %v1291_v23  ;;  %v2589_v59 = vpop.f32.mrf.mxu3 }
 0x230   : > { %v2246_v36 = vmul.f32 %v2182_v40, %v5323_v50  ;;  %v1544_v1 = vmul.f32 %v4823_v29, %v1480_v6  ;;  %v1481_v20 = vadd.f32 -0.28449672, %v1417_v10  ;;  %v1228_v11 = vadd.f32 -1.4531521, %v1164_v56 }
 0x231   : > { %2514 = vmatmul.f32.gmra.mxu2 %v2245_v18  ;;  %v1607_v4 = vadd.f32 0.2548296, %v1543_v46  ;;  %v1482_v24 = vadd.f32 -0.28449672, %v1418_v30  ;;  %v1419_v55 = vmul.f32 %v4929_v8, %v1355_v28  ;;  %v1165_v37 = vmul.f32 1.0614054, %v4980_v15 }
 0x232   : > { %2627 = vmatmul.f32.gmra.mxu3 %v2246_v36  ;;  %v1608_v2 = vadd.f32 0.2548296, %v1544_v1  ;;  %v1545_v42 = vmul.f32 %v4859_v62, %v1481_v20  ;;  %v1292_v32 = vmul.f32 %v4941_v45, %v1228_v11  ;;  %v2477_v23 = vadd.f32 %v4971_v19, %v2476_v44 }
 0x233   : > { %v1671_v40 = vmul.f32 %v4810_v48, %v1607_v4  ;;  %v1546_v6 = vmul.f32 %v4879_v27, %v1482_v24  ;;  %v1483_v10 = vadd.f32 -0.28449672, %v1419_v55  ;;  %v1229_v56 = vadd.f32 -1.4531521, %v1165_v37 }
 0x234   : > { %v1672_v16 = vmul.f32 %v4823_v29, %v1608_v2  ;;  %v1609_v18 = vadd.f32 0.2548296, %v1545_v42  ;;  %v1356_v46 = vadd.f32 1.4214138, %v1292_v32  ;;  %v2590_v30 = vadd.f32 %v2589_v59, %v2477_v23 }
 0x235   : > { %v1991_v28 = vmul.f32 %v4820_v21, %v1671_v40  ;;  %v1610_v50 = vadd.f32 0.2548296, %v1546_v6  ;;  %v1547_v36 = vmul.f32 %v4929_v8, %v1483_v10  ;;  %v1293_v1 = vmul.f32 %v4980_v15, %v1229_v56 }
 0x236   : > { %v1992_v20 = vmul.f32 %v4829_v5, %v1672_v16  ;;  %v1673_v48 = vmul.f32 %v4859_v62, %v1609_v18  ;;  %v1420_v11 = vmul.f32 %v4941_v45, %v1356_v46  ;;  %2661 = vst [vmem:[%s4557_s25 + $0x60] sm:$0xff] %v2590_v30  ;;  %v1166_v4 = vmul.f32 1.0614054, %v5011_v0  ;;  %v2479_v23 = vpop.f32.mrf.mxu2 }
 0x237   : > { %v2055_v29 = vsub.f32 1.0, %v1991_v28  ;;  %v1674_v24 = vmul.f32 %v4879_v27, %v1610_v50  ;;  %v1611_v55 = vadd.f32 0.2548296, %v1547_v36  ;;  %v1357_v44 = vadd.f32 1.4214138, %v1293_v1  ;;  %v2592_v40 = vpop.f32.mrf.mxu3  ;;  %v5324_v28 = vld [vmem:[#allocation9_spill] sm:$0xff] }
 0x238   : > { %v2056_v21 = vsub.f32 1.0, %v1992_v20  ;;  %v1993_v59 = vmul.f32 %v4875_v60, %v1673_v48  ;;  %v1484_v37 = vadd.f32 -0.28449672, %v1420_v11  ;;  %v1230_v2 = vadd.f32 -1.4531521, %v1166_v4 }
 0x239   : > { %v2119_v42 = vmul.f32 %v2055_v29, %v4781_v17  ;;  %v1994_v5 = vmul.f32 %v4890_v53, %v1674_v24  ;;  %v1675_v62 = vmul.f32 %v4929_v8, %v1611_v55  ;;  %v1421_v32 = vmul.f32 %v4980_v15, %v1357_v44 }
 0x23a   : > { %v2120_v6 = vmul.f32 %v2056_v21, %v4787_v63  ;;  %v2057_v27 = vsub.f32 1.0, %v1993_v59  ;;  %v1548_v10 = vmul.f32 %v4941_v45, %v1484_v37  ;;  %v1294_v56 = vmul.f32 %v5011_v0, %v1230_v2 }
 0x23b   : > { %v2183_v60 = vadd.f32 1.0, %v2119_v42  ;;  %v2058_v16 = vsub.f32 1.0, %v1994_v5  ;;  %v1995_v18 = vmul.f32 %v4936_v41, %v1675_v62  ;;  %v1485_v17 = vadd.f32 -0.28449672, %v1421_v32  ;;  %v5325_v5 = vld [vmem:[#allocation13_spill] sm:$0xff] }
 0x23c   : > { %v2184_v46 = vadd.f32 1.0, %v2120_v6  ;;  %v2121_v53 = vmul.f32 %v2057_v27, %v4832_v57  ;;  %v1612_v8 = vadd.f32 0.2548296, %v1548_v10  ;;  %v1358_v30 = vadd.f32 1.4214138, %v1294_v56 }
 0x23d   : > { %v2247_v50 = vmul.f32 %v2183_v60, %v5324_v28  ;;  %v2122_v36 = vmul.f32 %v2058_v16, %v4848_v47  ;;  %v2059_v63 = vsub.f32 1.0, %v1995_v18  ;;  %v1549_v1 = vmul.f32 %v4980_v15, %v1485_v17 }
 0x23e   : > { %v2248_v20 = vmul.f32 %v2184_v46, %v4773_v33  ;;  %v2185_v48 = vadd.f32 1.0, %v2121_v53  ;;  %v1676_v11 = vmul.f32 %v4941_v45, %v1612_v8  ;;  %v1422_v41 = vmul.f32 %v5011_v0, %v1358_v30  ;;  %v2482_v59 = vpop.f32.mrf.mxu2 }
 0x23f   : > { %v1809_v57 = vmul.f32 %v1745_v22, %v5002_v12  ;;  %2517 = vmatmul.f32.gmra.mxu2 %v2247_v50  ;;  %v2186_v4 = vadd.f32 1.0, %v2122_v36  ;;  %v1613_v29 = vadd.f32 0.2548296, %v1549_v1  ;;  %v2480_v24 = vadd.f32 %v4971_v19, %v2479_v23  ;;  %v2595_v37 = vpop.f32.mrf.mxu3  ;;  %v5326_v36 = vld [vmem:[#allocation10_spill] sm:$0xff] }
 0x240   : > { %v1810_v47 = vmul.f32 %v1746_v35, %v5009_v26  ;;  %2630 = vmatmul.f32.gmra.mxu3 %v2248_v20  ;;  %v1996_v33 = vmul.f32 %v4964_v43, %v1676_v11  ;;  %v1486_v45 = vadd.f32 -0.28449672, %v1422_v41  ;;  %v1167_v55 = vmul.f32 1.0614054, %v5034_v31 }
 0x241   : > { %v2249_v44 = vmul.f32 %v2185_v48, %v4815_v3  ;;  %v2123_v12 = vmul.f32 %v2059_v63, %v4902_v13  ;;  %v1677_v22 = vmul.f32 %v4980_v15, %v1613_v29  ;;  %v2593_v21 = vadd.f32 %v2592_v40, %v2480_v24  ;;  %v5327_v29 = vld [vmem:[#allocation14_spill] sm:$0xff] }
 0x242   : > { %v2060_v2 = vsub.f32 1.0, %v1996_v33  ;;  %v1550_v42 = vmul.f32 %v5011_v0, %v1486_v45  ;;  %v1231_v26 = vadd.f32 -1.4531521, %v1167_v55  ;;  %v1168_v35 = vmul.f32 1.0614054, %v5043_v39  ;;  %v5328_v24 = vld [vmem:[#allocation18_spill] sm:$0xff] }
 0x243   : > { %v2250_v43 = vmul.f32 %v2186_v4, %v5325_v5  ;;  %v1997_v62 = vmul.f32 %v5004_v58, %v1677_v22  ;;  %2662 = vst [vmem:[%s4557_s25 + $0x68] sm:$0xff] %v2593_v21  ;;  %v2483_v3 = vadd.f32 %v4971_v19, %v2482_v59  ;;  %v1169_v13 = vmul.f32 1.0614054, %v5052_v61 }
 0x244   : > { %v2124_v15 = vmul.f32 %v2060_v2, %v4910_v14  ;;  %v1614_v32 = vadd.f32 0.2548296, %v1550_v42  ;;  %v1295_v23 = vmul.f32 %v5034_v31, %v1231_v26  ;;  %v1232_v40 = vadd.f32 -1.4531521, %v1168_v35 }
 0x245   : > { %v2187_v6 = vadd.f32 1.0, %v2123_v12  ;;  %v2596_v27 = vadd.f32 %v2595_v37, %v2483_v3  ;;  %v1233_v10 = vadd.f32 -1.4531521, %v1169_v13  ;;  %v1170_v56 = vmul.f32 1.0614054, %v5066_v52  ;;  %v5330_v13 = vld [vmem:[#allocation19_spill] sm:$0xff] }
 0x246   : > { %v1933_v60 = vmul.f32 1.442695, %v5019_v25  ;;  %v1678_v58 = vmul.f32 %v5011_v0, %v1614_v32  ;;  %v1359_v16 = vadd.f32 1.4214138, %v1295_v23  ;;  %v1296_v18 = vmul.f32 %v5043_v39, %v1232_v40  ;;  %v2485_v20 = vpop.f32.mrf.mxu2 }
 0x247   : > { %2520 = vmatmul.f32.gmra.mxu2 %v2249_v44  ;;  %v2188_v17 = vadd.f32 1.0, %v2124_v15  ;;  %v2061_v46 = vsub.f32 1.0, %v1997_v62  ;;  %2663 = vst [vmem:[%s4557_s25 + $0x70] sm:$0xff] %v2596_v27  ;;  %v1297_v14 = vmul.f32 %v5052_v61, %v1233_v10  ;;  %v1234_v53 = vadd.f32 -1.4531521, %v1170_v56  ;;  %v2598_v48 = vpop.f32.mrf.mxu3  ;;  %v5329_v62 = vld [vmem:[#allocation6_spill] sm:$0xff] }
 0x248   : > { %v1935_v8 = vmul.f32 1.442695, %v1809_v57  ;;  %2633 = vmatmul.f32.gmra.mxu3 %v2250_v43  ;;  %v1998_v30 = vmul.f32 %v5030_v7, %v1678_v58  ;;  %v1423_v28 = vmul.f32 %v5034_v31, %v1359_v16  ;;  %v1360_v50 = vadd.f32 1.4214138, %v1296_v18  ;;  %v5331_v27 = vld [vmem:[#allocation17_spill] sm:$0xff] }
 0x249   : > { %v1937_v25 = vmul.f32 1.442695, %v1810_v47  ;;  %v2251_v0 = vmul.f32 %v2187_v6, %v5326_v36  ;;  %v1361_v63 = vadd.f32 1.4214138, %v1297_v14  ;;  %v1298_v1 = vmul.f32 %v5066_v52, %v1234_v53 }
 0x24a   : > { %v2062_v11 = vsub.f32 1.0, %v1998_v30  ;;  %v1487_v41 = vadd.f32 -0.28449672, %v1423_v28  ;;  %v1424_v4 = vmul.f32 %v5043_v39, %v1360_v50  ;;  %v2486_v57 = vadd.f32 %v4971_v19, %v2485_v20 }
 0x24b   : > { %v2252_v7 = vmul.f32 %v2188_v17, %v5327_v29  ;;  %v2125_v33 = vmul.f32 %v2061_v46, %v5328_v24  ;;  %v1425_v47 = vmul.f32 %v5052_v61, %v1361_v63  ;;  %v1362_v45 = vadd.f32 1.4214138, %v1298_v1 }
 0x24c   : > { %v2126_v55 = vmul.f32 %v2062_v11, %v5016_v51  ;;  %v1551_v44 = vmul.f32 %v5034_v31, %v1487_v41  ;;  %v1488_v12 = vadd.f32 -0.28449672, %v1424_v4  ;;  %v2599_v22 = vadd.f32 %v2598_v48, %v2486_v57  ;;  %v5334_v57 = vld [vmem:[#allocation11_spill] sm:$0xff] }
 0x24d   : > { %3161 = vpow2.f32 %v1933_v60  ;;  %v1489_v21 = vadd.f32 -0.28449672, %v1425_v47  ;;  %v1426_v59 = vmul.f32 %v5066_v52, %v1362_v45  ;;  %v2189_v42 = vadd.f32 1.0, %v2125_v33 }
 0x24e   : > { %3163 = vpow2.f32 %v1935_v8  ;;  %v1615_v37 = vadd.f32 0.2548296, %v1551_v44  ;;  %v1552_v2 = vmul.f32 %v5043_v39, %v1488_v12  ;;  %2664 = vst [vmem:[%s4557_s25 + $0x78] sm:$0xff] %v2599_v22  ;;  %v2190_v51 = vadd.f32 1.0, %v2126_v55  ;;  %v2488_v40 = vpop.f32.mrf.mxu2 }
 0x24f   : > { %2523 = vmatmul.f32.gmra.mxu2 %v2251_v0  ;;  %v1553_v26 = vmul.f32 %v5052_v61, %v1489_v21  ;;  %v1490_v35 = vadd.f32 -0.28449672, %v1426_v59  ;;  %3165 = vpow2.f32 %v1937_v25  ;;  %v653_v3 = vmul.f32 0.5, %v5329_v62  ;;  %v2601_v6 = vpop.f32.mrf.mxu3 }
 0x250   : > { %2636 = vmatmul.f32.gmra.mxu3 %v2252_v7  ;;  %v1679_v5 = vmul.f32 %v5034_v31, %v1615_v37  ;;  %v1616_v43 = vadd.f32 0.2548296, %v1552_v2  ;;  %v654_v15 = vmul.f32 0.5, %v5330_v13  ;;  %vm783_vm13 = vcmp.lt.f32.partialorder %v5331_v27, 0.0  ;;  %v5332_v31 = vld [vmem:[#allocation20_spill] sm:$0xff] }
 0x251   : > { %v1617_v32 = vadd.f32 0.2548296, %v1553_v26  ;;  %v1554_v23 = vmul.f32 %v5066_v52, %v1490_v35  ;;  %v2489_v60 = vadd.f32 %v4971_v19, %v2488_v40  ;;  %vm784_vm14 = vcmp.lt.f32.partialorder %v5332_v31, 0.0  ;;  %v5335_v2 = vld [vmem:[#allocation16_spill] sm:$0xff] }
 0x252   : > { %v1999_v10 = vmul.f32 %v5038_v34, %v1679_v5  ;;  %v1680_v56 = vmul.f32 %v5043_v39, %v1616_v43  ;;  %v2253_v16 = vmul.f32 %v2189_v42, %v653_v3  ;;  %v2254_v14 = vmul.f32 %v2190_v51, %v654_v15 }
 0x253   : > { %v3162_v58 = vpop.eup %3161  ;;  %v1681_v18 = vmul.f32 %v5052_v61, %v1617_v32  ;;  %v1618_v17 = vadd.f32 0.2548296, %v1554_v23  ;;  %v2602_v30 = vadd.f32 %v2601_v6, %v2489_v60  ;;  %v847_v28 = vsel %vm783_vm13, -1.0, %v5266_v38 }
 0x254   : > { %v3164_v46 = vpop.eup %3163  ;;  %v2063_v53 = vsub.f32 1.0, %v1999_v10  ;;  %v2000_v8 = vmul.f32 %v3162_v58, %v1680_v56  ;;  %v848_v0 = vsel %vm784_vm14, -1.0, %v5266_v38  ;;  %vm786_vm1 = vcmp.lt.f32.partialorder %v4994_v54, 0.0 }
 0x255   : > { %v2001_v34 = vmul.f32 %v3164_v46, %v1681_v18  ;;  %v1682_v39 = vmul.f32 %v5066_v52, %v1618_v17  ;;  %v3166_v50 = vpop.eup %3165  ;;  %2665 = vst [vmem:[%s4557_s25 + $0x80] sm:$0xff] %v2602_v30  ;;  %v5333_v52 = vld [vmem:[#allocation15_spill] sm:$0xff]  ;;  %v656_v29 = vmul.f32 0.5, %v5334_v57  ;;  %v849_v7 = vsel %vm785_vm15, -1.0, %v5266_v38 }
 0x256   : > { %v2127_v25 = vmul.f32 %v2063_v53, %v847_v28  ;;  %v2064_v36 = vsub.f32 1.0, %v2000_v8  ;;  %v655_v48 = vmul.f32 0.5, %v5333_v52  ;;  %v2491_v41 = vpop.f32.mrf.mxu2  ;;  %v850_v33 = vsel %vm786_vm1, -1.0, %v5266_v38 }
 0x257   : > { %2526 = vmatmul.f32.gmra.mxu2 %v2253_v16  ;;  %v2065_v61 = vsub.f32 1.0, %v2001_v34  ;;  %v2002_v63 = vmul.f32 %v3166_v50, %v1682_v39  ;;  %v2604_v4 = vpop.f32.mrf.mxu3  ;;  %v2492_v9 = vadd.f32 %v4971_v19, %v2491_v41  ;;  %v657_v21 = vmul.f32 0.5, %v4978_v49 }
 0x258   : > { %2639 = vmatmul.f32.gmra.mxu3 %v2254_v14  ;;  %v2191_v1 = vadd.f32 1.0, %v2127_v25  ;;  %v2128_v20 = vmul.f32 %v2064_v36, %v848_v0  ;;  %v658_v42 = vmul.f32 0.5, %v5335_v2 }
 0x259   : > { %v2066_v11 = vsub.f32 1.0, %v2002_v63  ;;  %v2129_v54 = vmul.f32 %v2065_v61, %v849_v7  ;;  %v2605_v44 = vadd.f32 %v2604_v4, %v2492_v9 }
 0x25a   : > { %v2192_v24 = vadd.f32 1.0, %v2128_v20  ;;  %v2255_v47 = vmul.f32 %v2191_v1, %v655_v48 }
 0x25b   : > { %v2130_v55 = vmul.f32 %v2066_v11, %v850_v33  ;;  %2666 = vst [vmem:[%s4557_s25 + $0x88] sm:$0xff] %v2605_v44  ;;  %v2193_v12 = vadd.f32 1.0, %v2129_v54 }
 0x25c   : > { %v2256_v45 = vmul.f32 %v2192_v24, %v656_v29 }
 0x25d   : > { %v2194_v22 = vadd.f32 1.0, %v2130_v55  ;;  %v2257_v26 = vmul.f32 %v2193_v12, %v657_v21 }
 0x25e   : > { %v2494_v59 = vpop.f32.mrf.mxu2 }
 0x25f   : > { %2529 = vmatmul.f32.gmra.mxu2 %v2255_v47  ;;  %v2607_v37 = vpop.f32.mrf.mxu3  ;;  %v2495_v38 = vadd.f32 %v4971_v19, %v2494_v59  ;;  %v2258_v35 = vmul.f32 %v2194_v22, %v658_v42 }
 0x260   : > { %2642 = vmatmul.f32.gmra.mxu3 %v2256_v45 }
 0x261   : > { %v2608_v51 = vadd.f32 %v2607_v37, %v2495_v38 }
 0x263   : > { %2667 = vst [vmem:[%s4557_s25 + $0x90] sm:$0xff] %v2608_v51 }
 0x266   : > { %v2497_v5 = vpop.f32.mrf.mxu2 }
 0x267   : > { %2532 = vmatmul.f32.gmra.mxu2 %v2257_v26  ;;  %v2610_v43 = vpop.f32.mrf.mxu3  ;;  %v2498_v62 = vadd.f32 %v4971_v19, %v2497_v5 }
 0x268   : > { %2645 = vmatmul.f32.gmra.mxu3 %v2258_v35 }
 0x269   : > { %v2611_v3 = vadd.f32 %v2610_v43, %v2498_v62 }
 0x26b   : > { %2668 = vst [vmem:[%s4557_s25 + $0x98] sm:$0xff] %v2611_v3 }
 0x26e   : > { %v2500_v49 = vpop.f32.mrf.mxu2 }
 0x26f   : > { %v2501_v13 = vadd.f32 %v4971_v19, %v2500_v49  ;;  %v2613_v15 = vpop.f32.mrf.mxu3 }
 0x271   : > { %v2614_v32 = vadd.f32 %v2613_v15, %v2501_v13 }
 0x273   : > { %2669 = vst [vmem:[%s4557_s25 + $0xa0] sm:$0xff] %v2614_v32 }
 0x279   : > { %v2503_v23 = vpop.f32.mrf.mxu2 }
 0x27a   : > { %v2504_v40 = vadd.f32 %v4971_v19, %v2503_v23  ;;  %v2616_v6 = vpop.f32.mrf.mxu3 }
 0x27c   : > { %v2617_v27 = vadd.f32 %v2616_v6, %v2504_v40 }
 0x27e   : > { %2670 = vst [vmem:[%s4557_s25 + $0xa8] sm:$0xff] %v2617_v27 }
 0x287   : > { %v2506_v10 = vpop.f32.mrf.mxu2 }
 0x288   : > { %v2507_v56 = vadd.f32 %v4971_v19, %v2506_v10 }
 0x289   : > { %v2619_v60 = vpop.f32.mrf.mxu3 }
 0x28a   : > { %v2620_v58 = vadd.f32 %v2619_v60, %v2507_v56 }
 0x28c   : > { %2671 = vst [vmem:[%s4557_s25 + $0xb0] sm:$0xff] %v2620_v58 }
 0x297   : > { %v2509_v31 = vpop.f32.mrf.mxu2 }
 0x298   : > { %v2510_v16 = vadd.f32 %v4971_v19, %v2509_v31  ;;  %v2622_v18 = vpop.f32.mrf.mxu3 }
 0x29a   : > { %v2623_v17 = vadd.f32 %v2622_v18, %v2510_v16 }
 0x29c   : > { %2672 = vst [vmem:[%s4557_s25 + $0xb8] sm:$0xff] %v2623_v17 }
 0x2a6   : > { %v2512_v46 = vpop.f32.mrf.mxu2 }
 0x2a7   : > { %v2513_v14 = vadd.f32 %v4971_v19, %v2512_v46  ;;  %v2625_v53 = vpop.f32.mrf.mxu3 }
 0x2a9   : > { %v2626_v8 = vadd.f32 %v2625_v53, %v2513_v14 }
 0x2ab   : > { %2673 = vst [vmem:[%s4557_s25 + $0xc0] sm:$0xff] %v2626_v8 }
 0x2b4   : > { %v2515_v30 = vpop.f32.mrf.mxu2 }
 0x2b5   : > { %v2516_v28 = vadd.f32 %v4971_v19, %v2515_v30  ;;  %v2628_v34 = vpop.f32.mrf.mxu3 }
 0x2b7   : > { %v2629_v39 = vadd.f32 %v2628_v34, %v2516_v28 }
 0x2b9   : > { %2674 = vst [vmem:[%s4557_s25 + $0xc8] sm:$0xff] %v2629_v39 }
 0x2c2   : > { %v2518_v50 = vpop.f32.mrf.mxu2 }
 0x2c3   : > { %v2519_v25 = vadd.f32 %v4971_v19, %v2518_v50  ;;  %v2631_v36 = vpop.f32.mrf.mxu3 }
 0x2c5   : > { %v2632_v0 = vadd.f32 %v2631_v36, %v2519_v25 }
 0x2c7   : > { %2675 = vst [vmem:[%s4557_s25 + $0xd0] sm:$0xff] %v2632_v0 }
 0x2ca   : > { %v2521_v61 = vpop.f32.mrf.mxu2 }
 0x2cb   : > { %v2522_v63 = vadd.f32 %v4971_v19, %v2521_v61  ;;  %v2634_v1 = vpop.f32.mrf.mxu3 }
 0x2cd   : > { %v2635_v20 = vadd.f32 %v2634_v1, %v2522_v63 }
 0x2cf   : > { %2676 = vst [vmem:[%s4557_s25 + $0xd8] sm:$0xff] %v2635_v20 }
 0x2d2   : > { %v2524_v52 = vpop.f32.mrf.mxu2 }
 0x2d3   : > { %v2525_v48 = vadd.f32 %v4971_v19, %v2524_v52  ;;  %v2637_v11 = vpop.f32.mrf.mxu3 }
 0x2d5   : > { %v2638_v41 = vadd.f32 %v2637_v11, %v2525_v48 }
 0x2d7   : > { %2677 = vst [vmem:[%s4557_s25 + $0xe0] sm:$0xff] %v2638_v41 }
 0x2da   : > { %v2527_v4 = vpop.f32.mrf.mxu2 }
 0x2db   : > { %v2528_v57 = vadd.f32 %v4971_v19, %v2527_v4  ;;  %v2640_v29 = vpop.f32.mrf.mxu3 }
 0x2dd   : > { %v2641_v7 = vadd.f32 %v2640_v29, %v2528_v57 }
 0x2df   : > { %2678 = vst [vmem:[%s4557_s25 + $0xe8] sm:$0xff] %v2641_v7 }
 0x2e2   : > { %v2530_v24 = vpop.f32.mrf.mxu2 }
 0x2e3   : > { %v2531_v9 = vadd.f32 %v4971_v19, %v2530_v24  ;;  %v2643_v33 = vpop.f32.mrf.mxu3 }
 0x2e5   : > { %v2644_v47 = vadd.f32 %v2643_v33, %v2531_v9 }
 0x2e7   : > { %2679 = vst [vmem:[%s4557_s25 + $0xf0] sm:$0xff] %v2644_v47 }
 0x2ea   : > { %v2533_v54 = vpop.f32.mrf.mxu2 }
 0x2eb   : > { %v2534_v45 = vadd.f32 %v4971_v19, %v2533_v54  ;;  %v2646_v55 = vpop.f32.mrf.mxu3 }
 0x2ed   : > { %v2647_v44 = vadd.f32 %v2646_v55, %v2534_v45 }
 0x2ef   : > { %2680 = vst [vmem:[%s4557_s25 + $0xf8] sm:$0xff] %v2647_v44 }
 0x2f0   : > { %3195 = shalt.err (!%p3192_p3)
}
 0x2f1   : > { %s3233_s9 = smov 128   ;;  %s3234_s25 = smov 8  }
 0x2f2   : > { %2868 = dma.vmem_to_hbm [thread:$0]  (%p3303_p5), %s2695_s11, 4096, %s2697_s12, %s2682_s13, %s3233_s9, %s3233_s9, %s3234_s25  }
 0x2f3 PF: > { %p2874_p4 = scmp.ge.s32.totalorder %s3230_s21, 2  ;;  %s2711_s30 = sand.u32 1, %s3218_s18  }
 0x2f4   : > { %s2712_s6 = scalar_lea.sflag [#allocation4], %s2711_s30 }
 0x2f5   : > { %p2871_p7 = pnand %p2874_p4, %p3307_p6 }
 0x2f7   : > { %p2872_p8 = pneg %p2871_p7 }
 0x2f9   : > { %3213 = dma.done.wait (%p2872_p8), %s2712_s6, 4096  }
 0x2fa   : > { %3215 = vsyncadd (%p2872_p8), %s2712_s6, 4294963200  ;;  %p15_p9 = scmp.ge.s32.totalorder %s3290_s24, 4   ;;  %s5336_s18 = smov %s3222_s19 }
 0x2fb   : > { %s5337_s19 = smov %s3226_s20  ;;  %s5338_s20 = smov %s3301_s27 }
 0x2fc   : > { %s5339_s21 = smov %s3290_s24  ;;  %17 = sbr.rel (!%p15_p9) target bundleno = 3 (0x3), region = 75 }
 0x301   :  { %2718 = vsyncpa [#allocation4], 1 }
 0x302   :  { %2720 = vsyncpa [#allocation4 + $0x1], 1 }

</bundles_post_ra>
